<compile_context>
chip_gen: v7x
topology: tpu7x:2x2x1
jax: 0.10.0
libtpu: 0.0.40
codegen_flags: <defaults>
</compile_context>

<pallas_src>
import functools

import jax
import jax.numpy as jnp
from jax.experimental import pallas as pl
from jax.experimental.pallas import tpu as pltpu


# ----------------------------------------------------------------------------
# Pallas kernel: fused  conv3x3(pad=1) -> ReLU -> conv1x1  + residual add
# One image per grid step; in-kernel im2col; single merged K=9*Ctot matmul.
# ----------------------------------------------------------------------------
def _make_fused_conv_kernel(tr, W, Ctot, Cout, res_off):
    n = tr * W

    def kernel(x_ref, w1_ref, b1_ref, w2_ref, b2_ref, out_ref):
        # x_ref  : (Ctot, H+2, W+2) f32  — full zero-padded image (one batch elem)
        # w1_ref : (Chid_p, 9*Ctot) bf16   b1_ref : (Chid_p, 1) f32
        # w2_ref : (Cout, Chid_p)  bf16    b2_ref : (Cout, 1)  f32
        # out_ref: (Cout, tr*W) f32        — lane-dense output strip
        r0 = pl.program_id(1) * tr
        if tr % 8 == 0:
            r0 = pl.multiple_of(r0, 8)

        taps = []
        res = None
        for dy in range(3):
            rows = x_ref[:, pl.ds(r0 + dy, tr), :]          # (Ctot, tr, W+2) f32
            if dy == 1:
                # residual = the state component itself (exact f32, no extra DMA)
                res = rows[res_off:res_off + Cout, :, 1:1 + W]
            rows_bf = rows.astype(jnp.bfloat16)
            for dx in range(3):
                taps.append(rows_bf[:, :, dx:dx + W])        # (Ctot, tr, W)

        # one merged im2col operand -> single K = 9*Ctot MXU matmul
        rhs = jnp.concatenate(taps, axis=0).reshape(9 * Ctot, n)
        hid = jnp.dot(w1_ref[...], rhs, preferred_element_type=jnp.float32)
        hid = jnp.maximum(hid + b1_ref[...], 0.0).astype(jnp.bfloat16)
        out = jnp.dot(w2_ref[...], hid, preferred_element_type=jnp.float32)

        out_ref[...] = res.reshape(Cout, n) + out + b2_ref[...]

    return kernel


# ----------------------------------------------------------------------------
# Generation-aware VMEM budgeting / row-block selection
# ----------------------------------------------------------------------------
def _vmem_budget():
    """(vmem_limit_bytes, working-set budget) derived from the chip's VMEM."""
    try:
        cap = int(pltpu.get_tpu_info().vmem_capacity_bytes)
    except Exception:
        cap = 64 * 1024 * 1024                      # conservative (v7x-sized)
    limit = min(int(cap * 0.75), 96 * 1024 * 1024)  # ~96 MiB v5e/v6e, ~48 MiB v7x
    return limit, int(limit * 0.6)


def _pick_rows(H, W, Ctot, Chid, Cout, budget):
    """Largest output row-block tr with tr | H and lane-dense (tr*W % 128 == 0
    or tr == H) whose working set fits the budget."""
    cands = sorted({H} | {r for r in range(8, H, 8)
                          if H % r == 0 and (r * W) % 128 == 0}, reverse=True)
    fixed = 2 * Ctot * (H + 2) * (W + 2) * 4            # double-buffered input slab
    per_row = W * (9 * Ctot * 3 + Chid * 8 + Cout * 20)  # rhs/taps/hid/res/out (+slack)
    for tr in cands:
        if fixed + tr * per_row <= budget:
            return tr
    return cands[-1]


# ----------------------------------------------------------------------------
# Wrapper: res + conv1x1(relu(conv3x3(x_cat)))  in one pallas_call
# ----------------------------------------------------------------------------
def fused_conv_block(x_cat, w1, b1, w2, b2, *, res_offset, cout):
    """x_cat: (BC, Ctot, H, W) f32 — already channel-concatenated input.
    w1: (Chid, 9*Ctot) im2col-layout 3x3 weight; b1: (Chid, 1);
    w2: (cout, Chid); b2: (cout, 1).  The residual is channels
    [res_offset, res_offset + cout) of x_cat."""
    BC, Ctot, H, W = x_cat.shape
    Chid = w1.shape[0]
    assert w1.shape == (Chid, 9 * Ctot)
    assert 0 <= res_offset and res_offset + cout <= Ctot

    # pad hidden dim to a multiple of 8 — exact (padded rows hit zero w2 cols)
    chid_p = -(-Chid // 8) * 8
    if chid_p != Chid:
        w1 = jnp.pad(w1, ((0, chid_p - Chid), (0, 0)))
        b1 = jnp.pad(b1, ((0, chid_p - Chid), (0, 0)))
        w2 = jnp.pad(w2, ((0, 0), (0, chid_p - Chid)))
    w1b = w1.astype(jnp.bfloat16)
    w2b = w2.astype(jnp.bfloat16)

    # zero pad=1 once per layer (single cheap XLA pass; conv reads it 1x)
    xp = jnp.pad(x_cat, ((0, 0), (0, 0), (1, 1), (1, 1)))

    vmem_limit, budget = _vmem_budget()
    tr = _pick_rows(H, W, Ctot, chid_p, cout, budget)
    n_rows = H // tr

    out = pl.pallas_call(
        _make_fused_conv_kernel(tr, W, Ctot, cout, res_offset),
        out_shape=jax.ShapeDtypeStruct((BC, cout, H * W), jnp.float32),
        grid=(BC, n_rows),
        in_specs=[
            # full padded image per batch element; constant over the row axis,
            # so Pallas fetches it once per image.
            pl.BlockSpec((None, Ctot, H + 2, W + 2), lambda b, j: (b, 0, 0, 0)),
            pl.BlockSpec(w1b.shape, lambda b, j: (0, 0)),
            pl.BlockSpec(b1.shape, lambda b, j: (0, 0)),
            pl.BlockSpec(w2b.shape, lambda b, j: (0, 0)),
            pl.BlockSpec(b2.shape, lambda b, j: (0, 0)),
        ],
        out_specs=pl.BlockSpec((None, cout, tr * W), lambda b, j: (b, 0, j)),
        compiler_params=pltpu.CompilerParams(
            dimension_semantics=("parallel", "arbitrary"),
            vmem_limit_bytes=vmem_limit),
    )(xp, w1b, b1, w2b, b2)

    return out.reshape(BC, cout, H, W)      # contiguous reshape (free)


# ----------------------------------------------------------------------------
# Plain-JAX glue: color pack/unpack and the FFT lensless camera model
# ----------------------------------------------------------------------------
def color_pack(x):
    b, c, k, h, w = x.shape
    assert c == 3
    return x.reshape((b * c, k, h, w))


def color_unpack(x):
    c = 3
    bc, k, h, w = x.shape
    return x.reshape((bc // c, c, k, h, w))


def make_camera(psfs, h, w):
    """Standard FFT-based lensless camera (forward / adjoint / crop)."""
    ph0, ph1 = h // 2, h - h // 2
    pw0, pw1 = w // 2, w - w // 2
    full = (2 * h, 2 * w)

    psf_pad = jnp.pad(psfs, ((0, 0), (0, 0), (0, 0), (ph0, ph1), (pw0, pw1)))
    Hf = jnp.fft.rfft2(jnp.fft.ifftshift(psf_pad, axes=(-2, -1)))
    Hf_conj = jnp.conj(Hf)

    def crop(x):
        return x[..., ph0:ph0 + h, pw0:pw0 + w]

    def pad(x):
        cfg = [(0, 0)] * (x.ndim - 2) + [(ph0, ph1), (pw0, pw1)]
        return jnp.pad(x, cfg)

    def forward(x):          # (b, 3, k, 2h, 2w) -> (b, 3, k, h, w)
        y = jnp.fft.irfft2(jnp.fft.rfft2(x) * Hf, s=full)
        return crop(y)

    def adjoint(y):          # (b, 3, k, h, w) -> (b, 3, k, 2h, 2w)
        return jnp.fft.irfft2(jnp.fft.rfft2(pad(y)) * Hf_conj, s=full)

    return forward, adjoint, crop


# ----------------------------------------------------------------------------
# ImageOptimizer forward (PrimalDualBlock stack, denoise=False path)
# ----------------------------------------------------------------------------
def image_optimizer_forward(params, image, *, width, depth, kernel=0):
    b, c, h, w = image.shape
    v = width
    cam_fwd, cam_adj, cam_crop = make_camera(params["psfs"], h, w)

    image_k = image.reshape(b * c, 1, h, w)
    dual = jnp.zeros((b * c, v, h, w), jnp.float32)
    primal = jnp.zeros((b * c, v, 2 * h, 2 * w), jnp.float32)

    for i in range(depth):
        lp = params["layers"][i]
        # ---- dual update: dual += conv(cat([camera.fwd(primal), dual, image]))
        dual_fwd = color_pack(cam_fwd(color_unpack(primal)))
        dual_cat = jnp.concatenate([dual_fwd, dual, image_k], axis=1)
        dual = fused_conv_block(dual_cat, lp["w1d"], lp["b1d"], lp["w2d"],
                                lp["b2d"], res_offset=v, cout=v)
        # ---- primal update: primal += conv(cat([camera.adj(dual), primal]))
        primal_adj = color_pack(cam_adj(color_unpack(dual)))
        primal_cat = jnp.concatenate([primal_adj, primal], axis=1)
        primal = fused_conv_block(primal_cat, lp["w1p"], lp["b1p"], lp["w2p"],
                                  lp["b2p"], res_offset=v, cout=v)

    output = cam_crop(primal)                # (b*c, width, h, w)
    # TODO(synk): UNet denoise branch omitted (denoise=False semantics).
    output = output[:, kernel:kernel + 1]    # (b*c, 1, h, w)
    output = output.reshape(b, c, h, w)
    return jax.nn.sigmoid(output)


# ----------------------------------------------------------------------------
# Deterministic synthetic parameters.  3x3 weights are stored pre-merged in
# the im2col layout: torch (Chid, Ctot, 3, 3) -> permute(0,2,3,1) -> (Chid, 9*Ctot).
# ----------------------------------------------------------------------------
def init_params(key, width, depth, psf, learned_models=1):
    v = width
    cd = 2 * v + 1            # dual_conv concat channels
    cp = 2 * v                # primal_conv concat channels
    hd = 2 * cd               # dual hidden
    hp = 2 * cp               # primal hidden
    psfs = jnp.tile(psf[None, :, None, :, :], (1, 1, learned_models, 1, 1))

    def nrm(k, s):
        return 0.1 * jax.random.normal(k, s, jnp.float32)

    layers = []
    for i in range(depth):
        ks = jax.random.split(jax.random.fold_in(key, i), 4)
        layers.append(dict(
            w1d=nrm(ks[0], (hd, 9 * cd)), b1d=jnp.zeros((hd, 1), jnp.float32),
            w2d=nrm(ks[1], (v, hd)),      b2d=jnp.zeros((v, 1), jnp.float32),
            w1p=nrm(ks[2], (hp, 9 * cp)), b1p=jnp.zeros((hp, 1), jnp.float32),
            w2p=nrm(ks[3], (v, hp)),      b2p=jnp.zeros((v, 1), jnp.float32),
        ))
    return dict(psfs=psfs, layers=layers)


# ----------------------------------------------------------------------------
if __name__ == "__main__":
    key = jax.random.PRNGKey(0)
    b, c, h, w = 2, 3, 16, 16          # c must be 3 (color_pack)
    width, depth = 4, 2

    k_img, k_psf, k_par = jax.random.split(key, 3)
    image = jax.random.uniform(k_img, (b, c, h, w), jnp.float32)
    psf = jax.random.uniform(k_psf, (c, h, w), jnp.float32)
    psf = psf / jnp.sum(psf, axis=(-2, -1), keepdims=True)

    params = init_params(k_par, width, depth, psf)

    fwd = jax.jit(functools.partial(image_optimizer_forward,
                                    width=width, depth=depth, kernel=0))
    out = jax.block_until_ready(fwd(params, image))

    assert out.shape == (b, c, h, w), out.shape
    assert bool(jnp.all(jnp.isfinite(out)))
    print("KERNEL_OK")
</pallas_src>

<mosaic_0001>
module attributes {stable_mosaic.version = 11 : i64} {
  func.func @kernel(%arg0: i32, %arg1: i32, %arg2: memref<1x9x18x18xf32, #tpu.memory_space<vmem>>, %arg3: memref<24x81xbf16, #tpu.memory_space<vmem>>, %arg4: memref<24x1xf32, #tpu.memory_space<vmem>>, %arg5: memref<4x24xbf16, #tpu.memory_space<vmem>>, %arg6: memref<4x1xf32, #tpu.memory_space<vmem>>, %arg7: memref<1x4x256xf32, #tpu.memory_space<vmem>>) attributes {dimension_semantics = [#tpu.dimension_semantics<parallel>, #tpu.dimension_semantics<arbitrary>], iteration_bounds = array<i64: 6, 1>, scalar_prefetch = 0 : i64, scratch_operands = 0 : i64, tpu.core_type = #tpu.core_type<tc>, window_params = [{transform_indices = @transform_0, window_bounds = array<i64: 1, 9, 18, 18>}, {pipeline_mode = #tpu.pipeline_mode<synchronous>, transform_indices = @transform_1, window_bounds = array<i64: 24, 81>}, {pipeline_mode = #tpu.pipeline_mode<synchronous>, transform_indices = @transform_2, window_bounds = array<i64: 24, 1>}, {pipeline_mode = #tpu.pipeline_mode<synchronous>, transform_indices = @transform_3, window_bounds = array<i64: 4, 24>}, {pipeline_mode = #tpu.pipeline_mode<synchronous>, transform_indices = @transform_4, window_bounds = array<i64: 4, 1>}, {transform_indices = @transform_5, window_bounds = array<i64: 1, 4, 256>}]} {
    %c16_i32 = arith.constant 16 : i32
    %0 = arith.muli %arg1, %c16_i32 : i32
    %1 = tpu.assume_multiple %0, 8 : i32
    %c0_i32 = arith.constant 0 : i32
    %2 = arith.addi %1, %c0_i32 : i32
    %c0 = arith.constant 0 : index
    %c0_0 = arith.constant 0 : index
    %3 = arith.index_cast %2 : i32 to index
    %c0_1 = arith.constant 0 : index
    %4 = vector.load %arg2[%c0, %c0_0, %3, %c0_1] : memref<1x9x18x18xf32, #tpu.memory_space<vmem>>, vector<1x9x16x18xf32>
    %5 = vector.shape_cast %4 : vector<1x9x16x18xf32> to vector<9x16x18xf32>
    %6 = arith.truncf %5 : vector<9x16x18xf32> to vector<9x16x18xbf16>
    %7 = vector.extract_strided_slice %6 {offsets = [0, 0, 0], sizes = [9, 16, 16], strides = [1, 1, 1]} : vector<9x16x18xbf16> to vector<9x16x16xbf16>
    %8 = vector.extract_strided_slice %6 {offsets = [0, 0, 1], sizes = [9, 16, 16], strides = [1, 1, 1]} : vector<9x16x18xbf16> to vector<9x16x16xbf16>
    %9 = vector.extract_strided_slice %6 {offsets = [0, 0, 2], sizes = [9, 16, 16], strides = [1, 1, 1]} : vector<9x16x18xbf16> to vector<9x16x16xbf16>
    %c1_i32 = arith.constant 1 : i32
    %10 = arith.addi %1, %c1_i32 : i32
    %c0_2 = arith.constant 0 : index
    %c0_3 = arith.constant 0 : index
    %11 = arith.index_cast %10 : i32 to index
    %c0_4 = arith.constant 0 : index
    %12 = vector.load %arg2[%c0_2, %c0_3, %11, %c0_4] : memref<1x9x18x18xf32, #tpu.memory_space<vmem>>, vector<1x9x16x18xf32>
    %13 = vector.shape_cast %12 : vector<1x9x16x18xf32> to vector<9x16x18xf32>
    %14 = vector.extract_strided_slice %13 {offsets = [4, 0, 1], sizes = [4, 16, 16], strides = [1, 1, 1]} : vector<9x16x18xf32> to vector<4x16x16xf32>
    %15 = arith.truncf %13 : vector<9x16x18xf32> to vector<9x16x18xbf16>
    %16 = vector.extract_strided_slice %15 {offsets = [0, 0, 0], sizes = [9, 16, 16], strides = [1, 1, 1]} : vector<9x16x18xbf16> to vector<9x16x16xbf16>
    %17 = vector.extract_strided_slice %15 {offsets = [0, 0, 1], sizes = [9, 16, 16], strides = [1, 1, 1]} : vector<9x16x18xbf16> to vector<9x16x16xbf16>
    %18 = vector.extract_strided_slice %15 {offsets = [0, 0, 2], sizes = [9, 16, 16], strides = [1, 1, 1]} : vector<9x16x18xbf16> to vector<9x16x16xbf16>
    %c2_i32 = arith.constant 2 : i32
    %19 = arith.addi %1, %c2_i32 : i32
    %c0_5 = arith.constant 0 : index
    %c0_6 = arith.constant 0 : index
    %20 = arith.index_cast %19 : i32 to index
    %c0_7 = arith.constant 0 : index
    %21 = vector.load %arg2[%c0_5, %c0_6, %20, %c0_7] : memref<1x9x18x18xf32, #tpu.memory_space<vmem>>, vector<1x9x16x18xf32>
    %22 = vector.shape_cast %21 : vector<1x9x16x18xf32> to vector<9x16x18xf32>
    %23 = arith.truncf %22 : vector<9x16x18xf32> to vector<9x16x18xbf16>
    %24 = vector.extract_strided_slice %23 {offsets = [0, 0, 0], sizes = [9, 16, 16], strides = [1, 1, 1]} : vector<9x16x18xbf16> to vector<9x16x16xbf16>
    %25 = vector.extract_strided_slice %23 {offsets = [0, 0, 1], sizes = [9, 16, 16], strides = [1, 1, 1]} : vector<9x16x18xbf16> to vector<9x16x16xbf16>
    %26 = vector.extract_strided_slice %23 {offsets = [0, 0, 2], sizes = [9, 16, 16], strides = [1, 1, 1]} : vector<9x16x18xbf16> to vector<9x16x16xbf16>
    %27 = tpu.concatenate %7, %8, %9, %16, %17, %18, %24, %25, %26 in 0 : vector<9x16x16xbf16>, vector<9x16x16xbf16>, vector<9x16x16xbf16>, vector<9x16x16xbf16>, vector<9x16x16xbf16>, vector<9x16x16xbf16>, vector<9x16x16xbf16>, vector<9x16x16xbf16>, vector<9x16x16xbf16> -> vector<81x16x16xbf16>
    %28 = vector.shape_cast %27 : vector<81x16x16xbf16> to vector<81x256xbf16>
    %c0_8 = arith.constant 0 : index
    %c0_9 = arith.constant 0 : index
    %29 = vector.load %arg3[%c0_8, %c0_9] : memref<24x81xbf16, #tpu.memory_space<vmem>>, vector<24x81xbf16>
    %cst = arith.constant dense<0.000000e+00> : vector<24x256xf32>
    %30 = tpu.matmul %29, %28, %cst {dimension_numbers = #tpu.dot_dimension_numbers<[1], [0], [0], [1], [0, 0, 1, 1], [], []>} : vector<24x81xbf16>, vector<81x256xbf16>, vector<24x256xf32> -> vector<24x256xf32>
    %c0_10 = arith.constant 0 : index
    %c0_11 = arith.constant 0 : index
    %31 = vector.load %arg4[%c0_10, %c0_11] : memref<24x1xf32, #tpu.memory_space<vmem>>, vector<24x1xf32>
    %32 = vector.broadcast %31 : vector<24x1xf32> to vector<24x256xf32>
    %33 = arith.addf %30, %32 : vector<24x256xf32>
    %cst_12 = arith.constant 0.000000e+00 : f32
    %34 = vector.broadcast %cst_12 : f32 to vector<24x256xf32>
    %35 = arith.maximumf %33, %34 : vector<24x256xf32>
    %36 = arith.truncf %35 : vector<24x256xf32> to vector<24x256xbf16>
    %c0_13 = arith.constant 0 : index
    %c0_14 = arith.constant 0 : index
    %37 = vector.load %arg5[%c0_13, %c0_14] : memref<4x24xbf16, #tpu.memory_space<vmem>>, vector<4x24xbf16>
    %cst_15 = arith.constant dense<0.000000e+00> : vector<4x256xf32>
    %38 = tpu.matmul %37, %36, %cst_15 {dimension_numbers = #tpu.dot_dimension_numbers<[1], [0], [0], [1], [0, 0, 1, 1], [], []>} : vector<4x24xbf16>, vector<24x256xbf16>, vector<4x256xf32> -> vector<4x256xf32>
    %39 = vector.shape_cast %14 : vector<4x16x16xf32> to vector<4x256xf32>
    %40 = arith.addf %39, %38 : vector<4x256xf32>
    %c0_16 = arith.constant 0 : index
    %c0_17 = arith.constant 0 : index
    %41 = vector.load %arg6[%c0_16, %c0_17] : memref<4x1xf32, #tpu.memory_space<vmem>>, vector<4x1xf32>
    %42 = vector.broadcast %41 : vector<4x1xf32> to vector<4x256xf32>
    %43 = arith.addf %40, %42 : vector<4x256xf32>
    %c0_18 = arith.constant 0 : index
    %c0_19 = arith.constant 0 : index
    %c0_20 = arith.constant 0 : index
    %44 = vector.load %arg7[%c0_18, %c0_19, %c0_20] : memref<1x4x256xf32, #tpu.memory_space<vmem>>, vector<1x4x256xf32>
    %45 = vector.shape_cast %44 : vector<1x4x256xf32> to vector<4x256xf32>
    %46 = vector.shape_cast %43 : vector<4x256xf32> to vector<1x4x256xf32>
    tpu.vector_store %arg7[%c0_18, %c0_19, %c0_20], %46 {strides = array<i32>} : memref<1x4x256xf32, #tpu.memory_space<vmem>>, vector<1x4x256xf32>,
    return
  }
  func.func @transform_0(%arg0: i32, %arg1: i32) -> (i32, i32, i32, i32) {
    %c0_i32 = arith.constant 0 : i32
    %c0_i32_0 = arith.constant 0 : i32
    %c0_i32_1 = arith.constant 0 : i32
    %c0_i32_2 = arith.constant 0 : i32
    return %arg0, %c0_i32, %c0_i32_0, %c0_i32_1 : i32, i32, i32, i32
  }
  func.func @transform_1(%arg0: i32, %arg1: i32) -> (i32, i32) {
    %c0_i32 = arith.constant 0 : i32
    %c0_i32_0 = arith.constant 0 : i32
    %c0_i32_1 = arith.constant 0 : i32
    return %c0_i32, %c0_i32_0 : i32, i32
  }
  func.func @transform_2(%arg0: i32, %arg1: i32) -> (i32, i32) {
    %c0_i32 = arith.constant 0 : i32
    %c0_i32_0 = arith.constant 0 : i32
    %c0_i32_1 = arith.constant 0 : i32
    return %c0_i32, %c0_i32_0 : i32, i32
  }
  func.func @transform_3(%arg0: i32, %arg1: i32) -> (i32, i32) {
    %c0_i32 = arith.constant 0 : i32
    %c0_i32_0 = arith.constant 0 : i32
    %c0_i32_1 = arith.constant 0 : i32
    return %c0_i32, %c0_i32_0 : i32, i32
  }
  func.func @transform_4(%arg0: i32, %arg1: i32) -> (i32, i32) {
    %c0_i32 = arith.constant 0 : i32
    %c0_i32_0 = arith.constant 0 : i32
    %c0_i32_1 = arith.constant 0 : i32
    return %c0_i32, %c0_i32_0 : i32, i32
  }
  func.func @transform_5(%arg0: i32, %arg1: i32) -> (i32, i32, i32) {
    %c0_i32 = arith.constant 0 : i32
    %c0_i32_0 = arith.constant 0 : i32
    return %arg0, %c0_i32, %arg1 : i32, i32, i32
  }
}

module attributes {stable_mosaic.version = 11 : i64} {
  func.func @kernel(%arg0: i32, %arg1: i32, %arg2: memref<1x8x34x34xf32, #tpu.memory_space<vmem>>, %arg3: memref<16x72xbf16, #tpu.memory_space<vmem>>, %arg4: memref<16x1xf32, #tpu.memory_space<vmem>>, %arg5: memref<4x16xbf16, #tpu.memory_space<vmem>>, %arg6: memref<4x1xf32, #tpu.memory_space<vmem>>, %arg7: memref<1x4x1024xf32, #tpu.memory_space<vmem>>) attributes {dimension_semantics = [#tpu.dimension_semantics<parallel>, #tpu.dimension_semantics<arbitrary>], iteration_bounds = array<i64: 6, 1>, scalar_prefetch = 0 : i64, scratch_operands = 0 : i64, tpu.core_type = #tpu.core_type<tc>, window_params = [{transform_indices = @transform_0, window_bounds = array<i64: 1, 8, 34, 34>}, {pipeline_mode = #tpu.pipeline_mode<synchronous>, transform_indices = @transform_1, window_bounds = array<i64: 16, 72>}, {pipeline_mode = #tpu.pipeline_mode<synchronous>, transform_indices = @transform_2, window_bounds = array<i64: 16, 1>}, {pipeline_mode = #tpu.pipeline_mode<synchronous>, transform_indices = @transform_3, window_bounds = array<i64: 4, 16>}, {pipeline_mode = #tpu.pipeline_mode<synchronous>, transform_indices = @transform_4, window_bounds = array<i64: 4, 1>}, {transform_indices = @transform_5, window_bounds = array<i64: 1, 4, 1024>}]} {
    %c32_i32 = arith.constant 32 : i32
    %0 = arith.muli %arg1, %c32_i32 : i32
    %1 = tpu.assume_multiple %0, 8 : i32
    %c0_i32 = arith.constant 0 : i32
    %2 = arith.addi %1, %c0_i32 : i32
    %c0 = arith.constant 0 : index
    %c0_0 = arith.constant 0 : index
    %3 = arith.index_cast %2 : i32 to index
    %c0_1 = arith.constant 0 : index
    %4 = vector.load %arg2[%c0, %c0_0, %3, %c0_1] : memref<1x8x34x34xf32, #tpu.memory_space<vmem>>, vector<1x8x32x34xf32>
    %5 = vector.shape_cast %4 : vector<1x8x32x34xf32> to vector<8x32x34xf32>
    %6 = arith.truncf %5 : vector<8x32x34xf32> to vector<8x32x34xbf16>
    %7 = vector.extract_strided_slice %6 {offsets = [0, 0, 0], sizes = [8, 32, 32], strides = [1, 1, 1]} : vector<8x32x34xbf16> to vector<8x32x32xbf16>
    %8 = vector.extract_strided_slice %6 {offsets = [0, 0, 1], sizes = [8, 32, 32], strides = [1, 1, 1]} : vector<8x32x34xbf16> to vector<8x32x32xbf16>
    %9 = vector.extract_strided_slice %6 {offsets = [0, 0, 2], sizes = [8, 32, 32], strides = [1, 1, 1]} : vector<8x32x34xbf16> to vector<8x32x32xbf16>
    %c1_i32 = arith.constant 1 : i32
    %10 = arith.addi %1, %c1_i32 : i32
    %c0_2 = arith.constant 0 : index
    %c0_3 = arith.constant 0 : index
    %11 = arith.index_cast %10 : i32 to index
    %c0_4 = arith.constant 0 : index
    %12 = vector.load %arg2[%c0_2, %c0_3, %11, %c0_4] : memref<1x8x34x34xf32, #tpu.memory_space<vmem>>, vector<1x8x32x34xf32>
    %13 = vector.shape_cast %12 : vector<1x8x32x34xf32> to vector<8x32x34xf32>
    %14 = vector.extract_strided_slice %13 {offsets = [4, 0, 1], sizes = [4, 32, 32], strides = [1, 1, 1]} : vector<8x32x34xf32> to vector<4x32x32xf32>
    %15 = arith.truncf %13 : vector<8x32x34xf32> to vector<8x32x34xbf16>
    %16 = vector.extract_strided_slice %15 {offsets = [0, 0, 0], sizes = [8, 32, 32], strides = [1, 1, 1]} : vector<8x32x34xbf16> to vector<8x32x32xbf16>
    %17 = vector.extract_strided_slice %15 {offsets = [0, 0, 1], sizes = [8, 32, 32], strides = [1, 1, 1]} : vector<8x32x34xbf16> to vector<8x32x32xbf16>
    %18 = vector.extract_strided_slice %15 {offsets = [0, 0, 2], sizes = [8, 32, 32], strides = [1, 1, 1]} : vector<8x32x34xbf16> to vector<8x32x32xbf16>
    %c2_i32 = arith.constant 2 : i32
    %19 = arith.addi %1, %c2_i32 : i32
    %c0_5 = arith.constant 0 : index
    %c0_6 = arith.constant 0 : index
    %20 = arith.index_cast %19 : i32 to index
    %c0_7 = arith.constant 0 : index
    %21 = vector.load %arg2[%c0_5, %c0_6, %20, %c0_7] : memref<1x8x34x34xf32, #tpu.memory_space<vmem>>, vector<1x8x32x34xf32>
    %22 = vector.shape_cast %21 : vector<1x8x32x34xf32> to vector<8x32x34xf32>
    %23 = arith.truncf %22 : vector<8x32x34xf32> to vector<8x32x34xbf16>
    %24 = vector.extract_strided_slice %23 {offsets = [0, 0, 0], sizes = [8, 32, 32], strides = [1, 1, 1]} : vector<8x32x34xbf16> to vector<8x32x32xbf16>
    %25 = vector.extract_strided_slice %23 {offsets = [0, 0, 1], sizes = [8, 32, 32], strides = [1, 1, 1]} : vector<8x32x34xbf16> to vector<8x32x32xbf16>
    %26 = vector.extract_strided_slice %23 {offsets = [0, 0, 2], sizes = [8, 32, 32], strides = [1, 1, 1]} : vector<8x32x34xbf16> to vector<8x32x32xbf16>
    %27 = tpu.concatenate %7, %8, %9, %16, %17, %18, %24, %25, %26 in 0 : vector<8x32x32xbf16>, vector<8x32x32xbf16>, vector<8x32x32xbf16>, vector<8x32x32xbf16>, vector<8x32x32xbf16>, vector<8x32x32xbf16>, vector<8x32x32xbf16>, vector<8x32x32xbf16>, vector<8x32x32xbf16> -> vector<72x32x32xbf16>
    %28 = vector.shape_cast %27 : vector<72x32x32xbf16> to vector<72x1024xbf16>
    %c0_8 = arith.constant 0 : index
    %c0_9 = arith.constant 0 : index
    %29 = vector.load %arg3[%c0_8, %c0_9] : memref<16x72xbf16, #tpu.memory_space<vmem>>, vector<16x72xbf16>
    %cst = arith.constant dense<0.000000e+00> : vector<16x1024xf32>
    %30 = tpu.matmul %29, %28, %cst {dimension_numbers = #tpu.dot_dimension_numbers<[1], [0], [0], [1], [0, 0, 1, 1], [], []>} : vector<16x72xbf16>, vector<72x1024xbf16>, vector<16x1024xf32> -> vector<16x1024xf32>
    %c0_10 = arith.constant 0 : index
    %c0_11 = arith.constant 0 : index
    %31 = vector.load %arg4[%c0_10, %c0_11] : memref<16x1xf32, #tpu.memory_space<vmem>>, vector<16x1xf32>
    %32 = vector.broadcast %31 : vector<16x1xf32> to vector<16x1024xf32>
    %33 = arith.addf %30, %32 : vector<16x1024xf32>
    %cst_12 = arith.constant 0.000000e+00 : f32
    %34 = vector.broadcast %cst_12 : f32 to vector<16x1024xf32>
    %35 = arith.maximumf %33, %34 : vector<16x1024xf32>
    %36 = arith.truncf %35 : vector<16x1024xf32> to vector<16x1024xbf16>
    %c0_13 = arith.constant 0 : index
    %c0_14 = arith.constant 0 : index
    %37 = vector.load %arg5[%c0_13, %c0_14] : memref<4x16xbf16, #tpu.memory_space<vmem>>, vector<4x16xbf16>
    %cst_15 = arith.constant dense<0.000000e+00> : vector<4x1024xf32>
    %38 = tpu.matmul %37, %36, %cst_15 {dimension_numbers = #tpu.dot_dimension_numbers<[1], [0], [0], [1], [0, 0, 1, 1], [], []>} : vector<4x16xbf16>, vector<16x1024xbf16>, vector<4x1024xf32> -> vector<4x1024xf32>
    %39 = vector.shape_cast %14 : vector<4x32x32xf32> to vector<4x1024xf32>
    %40 = arith.addf %39, %38 : vector<4x1024xf32>
    %c0_16 = arith.constant 0 : index
    %c0_17 = arith.constant 0 : index
    %41 = vector.load %arg6[%c0_16, %c0_17] : memref<4x1xf32, #tpu.memory_space<vmem>>, vector<4x1xf32>
    %42 = vector.broadcast %41 : vector<4x1xf32> to vector<4x1024xf32>
    %43 = arith.addf %40, %42 : vector<4x1024xf32>
    %c0_18 = arith.constant 0 : index
    %c0_19 = arith.constant 0 : index
    %c0_20 = arith.constant 0 : index
    %44 = vector.load %arg7[%c0_18, %c0_19, %c0_20] : memref<1x4x1024xf32, #tpu.memory_space<vmem>>, vector<1x4x1024xf32>
    %45 = vector.shape_cast %44 : vector<1x4x1024xf32> to vector<4x1024xf32>
    %46 = vector.shape_cast %43 : vector<4x1024xf32> to vector<1x4x1024xf32>
    tpu.vector_store %arg7[%c0_18, %c0_19, %c0_20], %46 {strides = array<i32>} : memref<1x4x1024xf32, #tpu.memory_space<vmem>>, vector<1x4x1024xf32>,
    return
  }
  func.func @transform_0(%arg0: i32, %arg1: i32) -> (i32, i32, i32, i32) {
    %c0_i32 = arith.constant 0 : i32
    %c0_i32_0 = arith.constant 0 : i32
    %c0_i32_1 = arith.constant 0 : i32
    %c0_i32_2 = arith.constant 0 : i32
    return %arg0, %c0_i32, %c0_i32_0, %c0_i32_1 : i32, i32, i32, i32
  }
  func.func @transform_1(%arg0: i32, %arg1: i32) -> (i32, i32) {
    %c0_i32 = arith.constant 0 : i32
    %c0_i32_0 = arith.constant 0 : i32
    %c0_i32_1 = arith.constant 0 : i32
    return %c0_i32, %c0_i32_0 : i32, i32
  }
  func.func @transform_2(%arg0: i32, %arg1: i32) -> (i32, i32) {
    %c0_i32 = arith.constant 0 : i32
    %c0_i32_0 = arith.constant 0 : i32
    %c0_i32_1 = arith.constant 0 : i32
    return %c0_i32, %c0_i32_0 : i32, i32
  }
  func.func @transform_3(%arg0: i32, %arg1: i32) -> (i32, i32) {
    %c0_i32 = arith.constant 0 : i32
    %c0_i32_0 = arith.constant 0 : i32
    %c0_i32_1 = arith.constant 0 : i32
    return %c0_i32, %c0_i32_0 : i32, i32
  }
  func.func @transform_4(%arg0: i32, %arg1: i32) -> (i32, i32) {
    %c0_i32 = arith.constant 0 : i32
    %c0_i32_0 = arith.constant 0 : i32
    %c0_i32_1 = arith.constant 0 : i32
    return %c0_i32, %c0_i32_0 : i32, i32
  }
  func.func @transform_5(%arg0: i32, %arg1: i32) -> (i32, i32, i32) {
    %c0_i32 = arith.constant 0 : i32
    %c0_i32_0 = arith.constant 0 : i32
    return %arg0, %c0_i32, %arg1 : i32, i32, i32
  }
}

</mosaic_0001>

<bundles_post_ra>
// kernel: reverse.9
= control target key start
LH: loop header
LB: loop body
LE: loop exit
PB: predicated region body
PF: predicated region fallthrough
CT: control target
= control target key end

     0   :  { %v232_v30 = vlaneseq  ;;  %v238_v52 = vld [vmem:[#allocation0 + $0x7] ss:$-1 sm:$0xff]  ;;  %v266_v62 = vld [vmem:[#allocation0 + $0x1f] ss:$-1 sm:$0xff]  ;;  %s1705_s0 = inlined_call_operand.vmem [shape: f32[2,3,4,32,15], index: 0, kind: input, shape index: {}]   ;;  %s1706_s1 = inlined_call_operand.vmem [shape: f32[2,3,4,32,15], index: 1, kind: output, shape index: {}]  }
   0x1   :  { %v124_v0 = vld [vmem:[%s1705_s0] sm:$0xff]  ;;  %v126_v1 = vld [vmem:[%s1705_s0 + $0x8] sm:$0xff]  ;;  %v128_v2 = vld [vmem:[%s1705_s0 + $0x10] sm:$0xff]  ;;  %v239_v55 = vrot.slane %v238_v52, 1 }
   0x2   :  { %125 = vst [vmem:[#allocation0 + $0x8] sm:$0xff] %v124_v0  ;;  %127 = vst [vmem:[#allocation0 + $0x10] sm:$0xff] %v126_v1  ;;  %v130_v3 = vld [vmem:[%s1705_s0 + $0x18] sm:$0xff]  ;;  %v132_v4 = vld [vmem:[%s1705_s0 + $0x20] sm:$0xff]  ;;  %v1444_v43 = vshrl.u32 %v232_v30, 7  ;;  %v267_v0 = vrot.slane %v266_v62, 1 }
   0x3   :  { %129 = vst [vmem:[#allocation0 + $0x20] sm:$0xff] %v128_v2  ;;  %v134_v5 = vld [vmem:[%s1705_s0 + $0x28] sm:$0xff]  ;;  %131 = vst [vmem:[#allocation0 + $0x28] sm:$0xff] %v130_v3  ;;  %v136_v6 = vld [vmem:[%s1705_s0 + $0x30] sm:$0xff] }
   0x4   :  { %133 = vst [vmem:[#allocation0 + $0x38] sm:$0xff] %v132_v4  ;;  %135 = vst [vmem:[#allocation0 + $0x40] sm:$0xff] %v134_v5  ;;  %v138_v7 = vld [vmem:[%s1705_s0 + $0x38] sm:$0xff]  ;;  %v140_v8 = vld [vmem:[%s1705_s0 + $0x40] sm:$0xff]  ;;  %vm234_vm0 = vcmp.lt.s32.totalorder %v1444_v43, 7 }
   0x5   :  { %137 = vst [vmem:[#allocation0 + $0x50] sm:$0xff] %v136_v6  ;;  %139 = vst [vmem:[#allocation0 + $0x58] sm:$0xff] %v138_v7  ;;  %v142_v9 = vld [vmem:[%s1705_s0 + $0x48] sm:$0xff]  ;;  %v144_v10 = vld [vmem:[%s1705_s0 + $0x50] sm:$0xff] }
   0x6   :  { %141 = vst [vmem:[#allocation0 + $0x68] sm:$0xff] %v140_v8  ;;  %v146_v11 = vld [vmem:[%s1705_s0 + $0x58] sm:$0xff]  ;;  %143 = vst [vmem:[#allocation0 + $0x70] sm:$0xff] %v142_v9  ;;  %v148_v12 = vld [vmem:[%s1705_s0 + $0x60] sm:$0xff] }
   0x7   :  { %145 = vst [vmem:[#allocation0 + $0x80] sm:$0xff] %v144_v10  ;;  %147 = vst [vmem:[#allocation0 + $0x88] sm:$0xff] %v146_v11  ;;  %v150_v13 = vld [vmem:[%s1705_s0 + $0x68] sm:$0xff]  ;;  %v152_v14 = vld [vmem:[%s1705_s0 + $0x70] sm:$0xff] }
   0x8   :  { %149 = vst [vmem:[#allocation0 + $0x98] sm:$0xff] %v148_v12  ;;  %151 = vst [vmem:[#allocation0 + $0xa0] sm:$0xff] %v150_v13  ;;  %v154_v15 = vld [vmem:[%s1705_s0 + $0x78] sm:$0xff]  ;;  %v156_v16 = vld [vmem:[%s1705_s0 + $0x80] sm:$0xff] }
   0x9   :  { %153 = vst [vmem:[#allocation0 + $0xb0] sm:$0xff] %v152_v14  ;;  %v158_v17 = vld [vmem:[%s1705_s0 + $0x88] sm:$0xff]  ;;  %155 = vst [vmem:[#allocation0 + $0xb8] sm:$0xff] %v154_v15  ;;  %v160_v18 = vld [vmem:[%s1705_s0 + $0x90] sm:$0xff] }
   0xa   :  { %157 = vst [vmem:[#allocation0 + $0xc8] sm:$0xff] %v156_v16  ;;  %159 = vst [vmem:[#allocation0 + $0xd0] sm:$0xff] %v158_v17  ;;  %v162_v19 = vld [vmem:[%s1705_s0 + $0x98] sm:$0xff]  ;;  %v164_v20 = vld [vmem:[%s1705_s0 + $0xa0] sm:$0xff] }
   0xb   :  { %161 = vst [vmem:[#allocation0 + $0xe0] sm:$0xff] %v160_v18  ;;  %163 = vst [vmem:[#allocation0 + $0xe8] sm:$0xff] %v162_v19  ;;  %v166_v21 = vld [vmem:[%s1705_s0 + $0xa8] sm:$0xff]  ;;  %v168_v22 = vld [vmem:[%s1705_s0 + $0xb0] sm:$0xff] }
   0xc   :  { %165 = vst [vmem:[#allocation0 + $0xf8] sm:$0xff] %v164_v20  ;;  %v170_v23 = vld [vmem:[%s1705_s0 + $0xb8] sm:$0xff]  ;;  %167 = vst [vmem:[#allocation0 + $0x100] sm:$0xff] %v166_v21  ;;  %v172_v24 = vld [vmem:[%s1705_s0 + $0xc0] sm:$0xff] }
   0xd   :  { %169 = vst [vmem:[#allocation0 + $0x110] sm:$0xff] %v168_v22  ;;  %171 = vst [vmem:[#allocation0 + $0x118] sm:$0xff] %v170_v23  ;;  %v174_v25 = vld [vmem:[%s1705_s0 + $0xc8] sm:$0xff]  ;;  %v176_v26 = vld [vmem:[%s1705_s0 + $0xd0] sm:$0xff] }
   0xe   :  { %173 = vst [vmem:[#allocation0 + $0x128] sm:$0xff] %v172_v24  ;;  %175 = vst [vmem:[#allocation0 + $0x130] sm:$0xff] %v174_v25  ;;  %v178_v27 = vld [vmem:[%s1705_s0 + $0xd8] sm:$0xff]  ;;  %v180_v28 = vld [vmem:[%s1705_s0 + $0xe0] sm:$0xff] }
   0xf   :  { %177 = vst [vmem:[#allocation0 + $0x140] sm:$0xff] %v176_v26  ;;  %v182_v29 = vld [vmem:[%s1705_s0 + $0xe8] sm:$0xff]  ;;  %179 = vst [vmem:[#allocation0 + $0x148] sm:$0xff] %v178_v27  ;;  %v184_v31 = vld [vmem:[%s1705_s0 + $0xf0] sm:$0xff] }
  0x10   :  { %181 = vst [vmem:[#allocation0 + $0x158] sm:$0xff] %v180_v28  ;;  %183 = vst [vmem:[#allocation0 + $0x160] sm:$0xff] %v182_v29  ;;  %v186_v32 = vld [vmem:[%s1705_s0 + $0xf8] sm:$0xff]  ;;  %v188_v33 = vld [vmem:[%s1705_s0 + $0x100] sm:$0xff] }
  0x11   :  { %185 = vst [vmem:[#allocation0 + $0x170] sm:$0xff] %v184_v31  ;;  %187 = vst [vmem:[#allocation0 + $0x178] sm:$0xff] %v186_v32  ;;  %v190_v34 = vld [vmem:[%s1705_s0 + $0x108] sm:$0xff]  ;;  %v192_v35 = vld [vmem:[%s1705_s0 + $0x110] sm:$0xff] }
  0x12   :  { %189 = vst [vmem:[#allocation0 + $0x188] sm:$0xff] %v188_v33  ;;  %v194_v36 = vld [vmem:[%s1705_s0 + $0x118] sm:$0xff]  ;;  %191 = vst [vmem:[#allocation0 + $0x190] sm:$0xff] %v190_v34  ;;  %v196_v37 = vld [vmem:[%s1705_s0 + $0x120] sm:$0xff] }
  0x13   :  { %193 = vst [vmem:[#allocation0 + $0x1a0] sm:$0xff] %v192_v35  ;;  %195 = vst [vmem:[#allocation0 + $0x1a8] sm:$0xff] %v194_v36  ;;  %v198_v38 = vld [vmem:[%s1705_s0 + $0x128] sm:$0xff]  ;;  %v200_v39 = vld [vmem:[%s1705_s0 + $0x130] sm:$0xff] }
  0x14   :  { %197 = vst [vmem:[#allocation0 + $0x1b8] sm:$0xff] %v196_v37  ;;  %199 = vst [vmem:[#allocation0 + $0x1c0] sm:$0xff] %v198_v38  ;;  %v202_v40 = vld [vmem:[%s1705_s0 + $0x138] sm:$0xff]  ;;  %v204_v41 = vld [vmem:[%s1705_s0 + $0x140] sm:$0xff] }
  0x15   :  { %201 = vst [vmem:[#allocation0 + $0x1d0] sm:$0xff] %v200_v39  ;;  %v206_v42 = vld [vmem:[%s1705_s0 + $0x148] sm:$0xff]  ;;  %203 = vst [vmem:[#allocation0 + $0x1d8] sm:$0xff] %v202_v40  ;;  %v208_v44 = vld [vmem:[%s1705_s0 + $0x150] sm:$0xff] }
  0x16   :  { %205 = vst [vmem:[#allocation0 + $0x1e8] sm:$0xff] %v204_v41  ;;  %207 = vst [vmem:[#allocation0 + $0x1f0] sm:$0xff] %v206_v42  ;;  %v210_v45 = vld [vmem:[%s1705_s0 + $0x158] sm:$0xff]  ;;  %v212_v46 = vld [vmem:[%s1705_s0 + $0x160] sm:$0xff] }
  0x17   :  { %209 = vst [vmem:[#allocation0 + $0x200] sm:$0xff] %v208_v44  ;;  %211 = vst [vmem:[#allocation0 + $0x208] sm:$0xff] %v210_v45  ;;  %v214_v47 = vld [vmem:[%s1705_s0 + $0x168] sm:$0xff]  ;;  %v216_v48 = vld [vmem:[%s1705_s0 + $0x170] sm:$0xff] }
  0x18   :  { %213 = vst [vmem:[#allocation0 + $0x218] sm:$0xff] %v212_v46  ;;  %v218_v49 = vld [vmem:[%s1705_s0 + $0x178] sm:$0xff]  ;;  %215 = vst [vmem:[#allocation0 + $0x220] sm:$0xff] %v214_v47  ;;  %v225_v50 = vld [vmem:[#allocation0 + $0xf] ss:$-1 sm:$0xff] }
  0x19   :  { %217 = vst [vmem:[#allocation0 + $0x230] sm:$0xff] %v216_v48  ;;  %219 = vst [vmem:[#allocation0 + $0x238] sm:$0xff] %v218_v49  ;;  %v230_v51 = vld [vmem:[#allocation0 + $0x17] ss:$-1 sm:$0xff]  ;;  %v226_v53 = vrot.slane %v225_v50, 1 }
  0x1a   :  { %v231_v54 = vrot.slane %v230_v51, 1  ;;  %v243_v56 = vld [vmem:[#allocation0 + $0xf] ss:$-1 sm:$0xff]  ;;  %v253_v58 = vld [vmem:[#allocation0 + $0x27] ss:$-1 sm:$0xff]  ;;  %240 = vst [vmem:[#allocation1 + $0x8] sm:$0xff] %v239_v55 }
  0x1b   :  { %v244_v57 = vrot.slane %v243_v56, 1  ;;  %v258_v59 = vld [vmem:[#allocation0 + $0x2f] ss:$-1 sm:$0xff]  ;;  %227 = vst [vmem:[#allocation1] sm:$0xff] %v226_v53  ;;  %v254_v60 = vrot.slane %v253_v58, 1  ;;  %268 = vst [vmem:[#allocation1 + $0x18] sm:$0xff] %v267_v0 }
  0x1c   :  { %v259_v61 = vrot.slane %v258_v59, 1  ;;  %v271_v63 = vld [vmem:[#allocation0 + $0x27] ss:$-1 sm:$0xff]  ;;  %235 = vst.msk [vmem:[#allocation1] sm:$0xff] %vm234_vm0, %v231_v54  ;;  %v281_v2 = vld [vmem:[#allocation0 + $0x3f] ss:$-1 sm:$0xff] }
  0x1d   :  { %248 = vst.msk [vmem:[#allocation1 + $0x8] sm:$0xff] %vm234_vm0, %v244_v57  ;;  %v272_v1 = vrot.slane %v271_v63, 1  ;;  %v286_v3 = vld [vmem:[#allocation0 + $0x47] ss:$-1 sm:$0xff]  ;;  %255 = vst [vmem:[#allocation1 + $0x10] sm:$0xff] %v254_v60  ;;  %v282_v4 = vrot.slane %v281_v2, 1 }
  0x1e   :  { %v287_v5 = vrot.slane %v286_v3, 1  ;;  %v294_v6 = vld [vmem:[#allocation0 + $0x37] ss:$-1 sm:$0xff]  ;;  %v299_v7 = vld [vmem:[#allocation0 + $0x3f] ss:$-1 sm:$0xff]  ;;  %263 = vst.msk [vmem:[#allocation1 + $0x10] sm:$0xff] %vm234_vm0, %v259_v61 }
  0x1f   :  { %v295_v8 = vrot.slane %v294_v6, 1  ;;  %v300_v9 = vrot.slane %v299_v7, 1  ;;  %v309_v10 = vld [vmem:[#allocation0 + $0x57] ss:$-1 sm:$0xff]  ;;  %v314_v11 = vld [vmem:[#allocation0 + $0x5f] ss:$-1 sm:$0xff] }
  0x20   :  { %276 = vst.msk [vmem:[#allocation1 + $0x18] sm:$0xff] %vm234_vm0, %v272_v1  ;;  %283 = vst [vmem:[#allocation1 + $0x20] sm:$0xff] %v282_v4  ;;  %v310_v12 = vrot.slane %v309_v10, 1  ;;  %v315_v13 = vrot.slane %v314_v11, 1  ;;  %v322_v14 = vld [vmem:[#allocation0 + $0x4f] ss:$-1 sm:$0xff] }
  0x21   :  { %v327_v15 = vld [vmem:[#allocation0 + $0x57] ss:$-1 sm:$0xff]  ;;  %291 = vst.msk [vmem:[#allocation1 + $0x20] sm:$0xff] %vm234_vm0, %v287_v5  ;;  %296 = vst [vmem:[#allocation1 + $0x28] sm:$0xff] %v295_v8  ;;  %v323_v16 = vrot.slane %v322_v14, 1 }
  0x22   :  { %v328_v17 = vrot.slane %v327_v15, 1  ;;  %v337_v18 = vld [vmem:[#allocation0 + $0x6f] ss:$-1 sm:$0xff]  ;;  %v342_v19 = vld [vmem:[#allocation0 + $0x77] ss:$-1 sm:$0xff]  ;;  %304 = vst.msk [vmem:[#allocation1 + $0x28] sm:$0xff] %vm234_vm0, %v300_v9 }
  0x23   :  { %311 = vst [vmem:[#allocation1 + $0x30] sm:$0xff] %v310_v12  ;;  %v338_v20 = vrot.slane %v337_v18, 1  ;;  %v343_v21 = vrot.slane %v342_v19, 1  ;;  %v350_v22 = vld [vmem:[#allocation0 + $0x67] ss:$-1 sm:$0xff]  ;;  %324 = vst [vmem:[#allocation1 + $0x38] sm:$0xff] %v323_v16 }
  0x24   :  { %v355_v23 = vld [vmem:[#allocation0 + $0x6f] ss:$-1 sm:$0xff]  ;;  %319 = vst.msk [vmem:[#allocation1 + $0x30] sm:$0xff] %vm234_vm0, %v315_v13  ;;  %v351_v24 = vrot.slane %v350_v22, 1  ;;  %v365_v26 = vld [vmem:[#allocation0 + $0x87] ss:$-1 sm:$0xff] }
  0x25   :  { %v356_v25 = vrot.slane %v355_v23, 1  ;;  %v370_v27 = vld [vmem:[#allocation0 + $0x8f] ss:$-1 sm:$0xff]  ;;  %332 = vst.msk [vmem:[#allocation1 + $0x38] sm:$0xff] %vm234_vm0, %v328_v17  ;;  %339 = vst [vmem:[#allocation1 + $0x40] sm:$0xff] %v338_v20  ;;  %v366_v28 = vrot.slane %v365_v26, 1 }
  0x26   :  { %v371_v29 = vrot.slane %v370_v27, 1  ;;  %v378_v30 = vld [vmem:[#allocation0 + $0x7f] ss:$-1 sm:$0xff]  ;;  %v383_v31 = vld [vmem:[#allocation0 + $0x87] ss:$-1 sm:$0xff]  ;;  %347 = vst.msk [vmem:[#allocation1 + $0x40] sm:$0xff] %vm234_vm0, %v343_v21 }
  0x27   :  { %352 = vst [vmem:[#allocation1 + $0x48] sm:$0xff] %v351_v24  ;;  %v379_v32 = vrot.slane %v378_v30, 1  ;;  %v384_v33 = vrot.slane %v383_v31, 1  ;;  %v393_v34 = vld [vmem:[#allocation0 + $0x9f] ss:$-1 sm:$0xff]  ;;  %367 = vst [vmem:[#allocation1 + $0x50] sm:$0xff] %v366_v28 }
  0x28   :  { %v398_v35 = vld [vmem:[#allocation0 + $0xa7] ss:$-1 sm:$0xff]  ;;  %360 = vst.msk [vmem:[#allocation1 + $0x48] sm:$0xff] %vm234_vm0, %v356_v25  ;;  %v394_v36 = vrot.slane %v393_v34, 1  ;;  %v406_v38 = vld [vmem:[#allocation0 + $0x97] ss:$-1 sm:$0xff] }
  0x29   :  { %v399_v37 = vrot.slane %v398_v35, 1  ;;  %v411_v39 = vld [vmem:[#allocation0 + $0x9f] ss:$-1 sm:$0xff]  ;;  %375 = vst.msk [vmem:[#allocation1 + $0x50] sm:$0xff] %vm234_vm0, %v371_v29  ;;  %380 = vst [vmem:[#allocation1 + $0x58] sm:$0xff] %v379_v32  ;;  %v407_v40 = vrot.slane %v406_v38, 1 }
  0x2a   :  { %v412_v41 = vrot.slane %v411_v39, 1  ;;  %v421_v42 = vld [vmem:[#allocation0 + $0xb7] ss:$-1 sm:$0xff]  ;;  %v426_v44 = vld [vmem:[#allocation0 + $0xbf] ss:$-1 sm:$0xff]  ;;  %388 = vst.msk [vmem:[#allocation1 + $0x58] sm:$0xff] %vm234_vm0, %v384_v33 }
  0x2b   :  { %395 = vst [vmem:[#allocation1 + $0x60] sm:$0xff] %v394_v36  ;;  %v422_v45 = vrot.slane %v421_v42, 1  ;;  %v427_v46 = vrot.slane %v426_v44, 1  ;;  %v434_v47 = vld [vmem:[#allocation0 + $0xaf] ss:$-1 sm:$0xff]  ;;  %408 = vst [vmem:[#allocation1 + $0x68] sm:$0xff] %v407_v40 }
  0x2c   :  { %v439_v48 = vld [vmem:[#allocation0 + $0xb7] ss:$-1 sm:$0xff]  ;;  %403 = vst.msk [vmem:[#allocation1 + $0x60] sm:$0xff] %vm234_vm0, %v399_v37  ;;  %v435_v49 = vrot.slane %v434_v47, 1  ;;  %v449_v51 = vld [vmem:[#allocation0 + $0xcf] ss:$-1 sm:$0xff] }
  0x2d   :  { %v440_v50 = vrot.slane %v439_v48, 1  ;;  %v454_v52 = vld [vmem:[#allocation0 + $0xd7] ss:$-1 sm:$0xff]  ;;  %416 = vst.msk [vmem:[#allocation1 + $0x68] sm:$0xff] %vm234_vm0, %v412_v41  ;;  %423 = vst [vmem:[#allocation1 + $0x70] sm:$0xff] %v422_v45  ;;  %v450_v53 = vrot.slane %v449_v51, 1 }
  0x2e   :  { %v455_v54 = vrot.slane %v454_v52, 1  ;;  %v462_v55 = vld [vmem:[#allocation0 + $0xc7] ss:$-1 sm:$0xff]  ;;  %v467_v56 = vld [vmem:[#allocation0 + $0xcf] ss:$-1 sm:$0xff]  ;;  %431 = vst.msk [vmem:[#allocation1 + $0x70] sm:$0xff] %vm234_vm0, %v427_v46 }
  0x2f   :  { %436 = vst [vmem:[#allocation1 + $0x78] sm:$0xff] %v435_v49  ;;  %v463_v57 = vrot.slane %v462_v55, 1  ;;  %v468_v58 = vrot.slane %v467_v56, 1  ;;  %v477_v59 = vld [vmem:[#allocation0 + $0xe7] ss:$-1 sm:$0xff]  ;;  %451 = vst [vmem:[#allocation1 + $0x80] sm:$0xff] %v450_v53 }
  0x30   :  { %v482_v60 = vld [vmem:[#allocation0 + $0xef] ss:$-1 sm:$0xff]  ;;  %444 = vst.msk [vmem:[#allocation1 + $0x78] sm:$0xff] %vm234_vm0, %v440_v50  ;;  %v478_v61 = vrot.slane %v477_v59, 1  ;;  %v490_v63 = vld [vmem:[#allocation0 + $0xdf] ss:$-1 sm:$0xff] }
  0x31   :  { %v483_v62 = vrot.slane %v482_v60, 1  ;;  %v495_v0 = vld [vmem:[#allocation0 + $0xe7] ss:$-1 sm:$0xff]  ;;  %459 = vst.msk [vmem:[#allocation1 + $0x80] sm:$0xff] %vm234_vm0, %v455_v54  ;;  %464 = vst [vmem:[#allocation1 + $0x88] sm:$0xff] %v463_v57  ;;  %v491_v1 = vrot.slane %v490_v63, 1 }
  0x32   :  { %v496_v2 = vrot.slane %v495_v0, 1  ;;  %v505_v3 = vld [vmem:[#allocation0 + $0xff] ss:$-1 sm:$0xff]  ;;  %v510_v4 = vld [vmem:[#allocation0 + $0x107] ss:$-1 sm:$0xff]  ;;  %472 = vst.msk [vmem:[#allocation1 + $0x88] sm:$0xff] %vm234_vm0, %v468_v58 }
  0x33   :  { %479 = vst [vmem:[#allocation1 + $0x90] sm:$0xff] %v478_v61  ;;  %v506_v5 = vrot.slane %v505_v3, 1  ;;  %v511_v6 = vrot.slane %v510_v4, 1  ;;  %v518_v7 = vld [vmem:[#allocation0 + $0xf7] ss:$-1 sm:$0xff]  ;;  %492 = vst [vmem:[#allocation1 + $0x98] sm:$0xff] %v491_v1 }
  0x34   :  { %v523_v8 = vld [vmem:[#allocation0 + $0xff] ss:$-1 sm:$0xff]  ;;  %487 = vst.msk [vmem:[#allocation1 + $0x90] sm:$0xff] %vm234_vm0, %v483_v62  ;;  %v519_v9 = vrot.slane %v518_v7, 1  ;;  %v533_v11 = vld [vmem:[#allocation0 + $0x117] ss:$-1 sm:$0xff] }
  0x35   :  { %v524_v10 = vrot.slane %v523_v8, 1  ;;  %v538_v12 = vld [vmem:[#allocation0 + $0x11f] ss:$-1 sm:$0xff]  ;;  %500 = vst.msk [vmem:[#allocation1 + $0x98] sm:$0xff] %vm234_vm0, %v496_v2  ;;  %507 = vst [vmem:[#allocation1 + $0xa0] sm:$0xff] %v506_v5  ;;  %v534_v13 = vrot.slane %v533_v11, 1 }
  0x36   :  { %v539_v14 = vrot.slane %v538_v12, 1  ;;  %v546_v15 = vld [vmem:[#allocation0 + $0x10f] ss:$-1 sm:$0xff]  ;;  %v551_v16 = vld [vmem:[#allocation0 + $0x117] ss:$-1 sm:$0xff]  ;;  %515 = vst.msk [vmem:[#allocation1 + $0xa0] sm:$0xff] %vm234_vm0, %v511_v6 }
  0x37   :  { %520 = vst [vmem:[#allocation1 + $0xa8] sm:$0xff] %v519_v9  ;;  %v547_v17 = vrot.slane %v546_v15, 1  ;;  %v552_v18 = vrot.slane %v551_v16, 1  ;;  %v561_v19 = vld [vmem:[#allocation0 + $0x12f] ss:$-1 sm:$0xff]  ;;  %535 = vst [vmem:[#allocation1 + $0xb0] sm:$0xff] %v534_v13 }
  0x38   :  { %v566_v20 = vld [vmem:[#allocation0 + $0x137] ss:$-1 sm:$0xff]  ;;  %528 = vst.msk [vmem:[#allocation1 + $0xa8] sm:$0xff] %vm234_vm0, %v524_v10  ;;  %v562_v21 = vrot.slane %v561_v19, 1  ;;  %v574_v23 = vld [vmem:[#allocation0 + $0x127] ss:$-1 sm:$0xff] }
  0x39   :  { %v567_v22 = vrot.slane %v566_v20, 1  ;;  %v579_v24 = vld [vmem:[#allocation0 + $0x12f] ss:$-1 sm:$0xff]  ;;  %543 = vst.msk [vmem:[#allocation1 + $0xb0] sm:$0xff] %vm234_vm0, %v539_v14  ;;  %548 = vst [vmem:[#allocation1 + $0xb8] sm:$0xff] %v547_v17  ;;  %v575_v25 = vrot.slane %v574_v23, 1 }
  0x3a   :  { %v580_v26 = vrot.slane %v579_v24, 1  ;;  %v589_v27 = vld [vmem:[#allocation0 + $0x147] ss:$-1 sm:$0xff]  ;;  %v594_v28 = vld [vmem:[#allocation0 + $0x14f] ss:$-1 sm:$0xff]  ;;  %556 = vst.msk [vmem:[#allocation1 + $0xb8] sm:$0xff] %vm234_vm0, %v552_v18 }
  0x3b   :  { %563 = vst [vmem:[#allocation1 + $0xc0] sm:$0xff] %v562_v21  ;;  %v590_v29 = vrot.slane %v589_v27, 1  ;;  %v595_v30 = vrot.slane %v594_v28, 1  ;;  %v602_v31 = vld [vmem:[#allocation0 + $0x13f] ss:$-1 sm:$0xff]  ;;  %576 = vst [vmem:[#allocation1 + $0xc8] sm:$0xff] %v575_v25 }
  0x3c   :  { %v607_v32 = vld [vmem:[#allocation0 + $0x147] ss:$-1 sm:$0xff]  ;;  %571 = vst.msk [vmem:[#allocation1 + $0xc0] sm:$0xff] %vm234_vm0, %v567_v22  ;;  %v603_v33 = vrot.slane %v602_v31, 1  ;;  %v617_v35 = vld [vmem:[#allocation0 + $0x15f] ss:$-1 sm:$0xff] }
  0x3d   :  { %v608_v34 = vrot.slane %v607_v32, 1  ;;  %v622_v36 = vld [vmem:[#allocation0 + $0x167] ss:$-1 sm:$0xff]  ;;  %584 = vst.msk [vmem:[#allocation1 + $0xc8] sm:$0xff] %vm234_vm0, %v580_v26  ;;  %591 = vst [vmem:[#allocation1 + $0xd0] sm:$0xff] %v590_v29  ;;  %v618_v37 = vrot.slane %v617_v35, 1 }
  0x3e   :  { %v623_v38 = vrot.slane %v622_v36, 1  ;;  %v630_v39 = vld [vmem:[#allocation0 + $0x157] ss:$-1 sm:$0xff]  ;;  %v635_v40 = vld [vmem:[#allocation0 + $0x15f] ss:$-1 sm:$0xff]  ;;  %599 = vst.msk [vmem:[#allocation1 + $0xd0] sm:$0xff] %vm234_vm0, %v595_v30 }
  0x3f   :  { %604 = vst [vmem:[#allocation1 + $0xd8] sm:$0xff] %v603_v33  ;;  %v631_v41 = vrot.slane %v630_v39, 1  ;;  %v636_v42 = vrot.slane %v635_v40, 1  ;;  %v645_v44 = vld [vmem:[#allocation0 + $0x177] ss:$-1 sm:$0xff]  ;;  %619 = vst [vmem:[#allocation1 + $0xe0] sm:$0xff] %v618_v37 }
  0x40   :  { %v650_v45 = vld [vmem:[#allocation0 + $0x17f] ss:$-1 sm:$0xff]  ;;  %612 = vst.msk [vmem:[#allocation1 + $0xd8] sm:$0xff] %vm234_vm0, %v608_v34  ;;  %v646_v46 = vrot.slane %v645_v44, 1  ;;  %v658_v48 = vld [vmem:[#allocation0 + $0x16f] ss:$-1 sm:$0xff] }
  0x41   :  { %v651_v47 = vrot.slane %v650_v45, 1  ;;  %v663_v49 = vld [vmem:[#allocation0 + $0x177] ss:$-1 sm:$0xff]  ;;  %627 = vst.msk [vmem:[#allocation1 + $0xe0] sm:$0xff] %vm234_vm0, %v623_v38  ;;  %632 = vst [vmem:[#allocation1 + $0xe8] sm:$0xff] %v631_v41  ;;  %v659_v50 = vrot.slane %v658_v48, 1 }
  0x42   :  { %v664_v51 = vrot.slane %v663_v49, 1  ;;  %v673_v52 = vld [vmem:[#allocation0 + $0x18f] ss:$-1 sm:$0xff]  ;;  %v678_v53 = vld [vmem:[#allocation0 + $0x197] ss:$-1 sm:$0xff]  ;;  %640 = vst.msk [vmem:[#allocation1 + $0xe8] sm:$0xff] %vm234_vm0, %v636_v42 }
  0x43   :  { %647 = vst [vmem:[#allocation1 + $0xf0] sm:$0xff] %v646_v46  ;;  %v674_v54 = vrot.slane %v673_v52, 1  ;;  %v679_v55 = vrot.slane %v678_v53, 1  ;;  %v686_v56 = vld [vmem:[#allocation0 + $0x187] ss:$-1 sm:$0xff]  ;;  %660 = vst [vmem:[#allocation1 + $0xf8] sm:$0xff] %v659_v50 }
  0x44   :  { %v691_v57 = vld [vmem:[#allocation0 + $0x18f] ss:$-1 sm:$0xff]  ;;  %655 = vst.msk [vmem:[#allocation1 + $0xf0] sm:$0xff] %vm234_vm0, %v651_v47  ;;  %v687_v58 = vrot.slane %v686_v56, 1  ;;  %v701_v60 = vld [vmem:[#allocation0 + $0x1a7] ss:$-1 sm:$0xff] }
  0x45   :  { %v692_v59 = vrot.slane %v691_v57, 1  ;;  %v706_v61 = vld [vmem:[#allocation0 + $0x1af] ss:$-1 sm:$0xff]  ;;  %668 = vst.msk [vmem:[#allocation1 + $0xf8] sm:$0xff] %vm234_vm0, %v664_v51  ;;  %675 = vst [vmem:[#allocation1 + $0x100] sm:$0xff] %v674_v54  ;;  %v702_v62 = vrot.slane %v701_v60, 1 }
  0x46   :  { %v707_v63 = vrot.slane %v706_v61, 1  ;;  %v714_v0 = vld [vmem:[#allocation0 + $0x19f] ss:$-1 sm:$0xff]  ;;  %v719_v1 = vld [vmem:[#allocation0 + $0x1a7] ss:$-1 sm:$0xff]  ;;  %683 = vst.msk [vmem:[#allocation1 + $0x100] sm:$0xff] %vm234_vm0, %v679_v55 }
  0x47   :  { %688 = vst [vmem:[#allocation1 + $0x108] sm:$0xff] %v687_v58  ;;  %v715_v2 = vrot.slane %v714_v0, 1  ;;  %v720_v3 = vrot.slane %v719_v1, 1  ;;  %v729_v4 = vld [vmem:[#allocation0 + $0x1bf] ss:$-1 sm:$0xff]  ;;  %703 = vst [vmem:[#allocation1 + $0x110] sm:$0xff] %v702_v62 }
  0x48   :  { %v734_v5 = vld [vmem:[#allocation0 + $0x1c7] ss:$-1 sm:$0xff]  ;;  %696 = vst.msk [vmem:[#allocation1 + $0x108] sm:$0xff] %vm234_vm0, %v692_v59  ;;  %v730_v6 = vrot.slane %v729_v4, 1  ;;  %v742_v8 = vld [vmem:[#allocation0 + $0x1b7] ss:$-1 sm:$0xff] }
  0x49   :  { %v735_v7 = vrot.slane %v734_v5, 1  ;;  %v747_v9 = vld [vmem:[#allocation0 + $0x1bf] ss:$-1 sm:$0xff]  ;;  %711 = vst.msk [vmem:[#allocation1 + $0x110] sm:$0xff] %vm234_vm0, %v707_v63  ;;  %716 = vst [vmem:[#allocation1 + $0x118] sm:$0xff] %v715_v2  ;;  %v743_v10 = vrot.slane %v742_v8, 1 }
  0x4a   :  { %v748_v11 = vrot.slane %v747_v9, 1  ;;  %v757_v12 = vld [vmem:[#allocation0 + $0x1d7] ss:$-1 sm:$0xff]  ;;  %v762_v13 = vld [vmem:[#allocation0 + $0x1df] ss:$-1 sm:$0xff]  ;;  %724 = vst.msk [vmem:[#allocation1 + $0x118] sm:$0xff] %vm234_vm0, %v720_v3 }
  0x4b   :  { %731 = vst [vmem:[#allocation1 + $0x120] sm:$0xff] %v730_v6  ;;  %v758_v14 = vrot.slane %v757_v12, 1  ;;  %v763_v15 = vrot.slane %v762_v13, 1  ;;  %v770_v16 = vld [vmem:[#allocation0 + $0x1cf] ss:$-1 sm:$0xff]  ;;  %744 = vst [vmem:[#allocation1 + $0x128] sm:$0xff] %v743_v10 }
  0x4c   :  { %v775_v17 = vld [vmem:[#allocation0 + $0x1d7] ss:$-1 sm:$0xff]  ;;  %739 = vst.msk [vmem:[#allocation1 + $0x120] sm:$0xff] %vm234_vm0, %v735_v7  ;;  %v771_v18 = vrot.slane %v770_v16, 1  ;;  %v785_v20 = vld [vmem:[#allocation0 + $0x1ef] ss:$-1 sm:$0xff] }
  0x4d   :  { %v776_v19 = vrot.slane %v775_v17, 1  ;;  %v790_v21 = vld [vmem:[#allocation0 + $0x1f7] ss:$-1 sm:$0xff]  ;;  %752 = vst.msk [vmem:[#allocation1 + $0x128] sm:$0xff] %vm234_vm0, %v748_v11  ;;  %759 = vst [vmem:[#allocation1 + $0x130] sm:$0xff] %v758_v14  ;;  %v786_v22 = vrot.slane %v785_v20, 1 }
  0x4e   :  { %v791_v23 = vrot.slane %v790_v21, 1  ;;  %v798_v24 = vld [vmem:[#allocation0 + $0x1e7] ss:$-1 sm:$0xff]  ;;  %v803_v25 = vld [vmem:[#allocation0 + $0x1ef] ss:$-1 sm:$0xff]  ;;  %767 = vst.msk [vmem:[#allocation1 + $0x130] sm:$0xff] %vm234_vm0, %v763_v15 }
  0x4f   :  { %772 = vst [vmem:[#allocation1 + $0x138] sm:$0xff] %v771_v18  ;;  %v799_v26 = vrot.slane %v798_v24, 1  ;;  %v804_v27 = vrot.slane %v803_v25, 1  ;;  %v813_v28 = vld [vmem:[#allocation0 + $0x207] ss:$-1 sm:$0xff]  ;;  %787 = vst [vmem:[#allocation1 + $0x140] sm:$0xff] %v786_v22 }
  0x50   :  { %v818_v29 = vld [vmem:[#allocation0 + $0x20f] ss:$-1 sm:$0xff]  ;;  %780 = vst.msk [vmem:[#allocation1 + $0x138] sm:$0xff] %vm234_vm0, %v776_v19  ;;  %v814_v30 = vrot.slane %v813_v28, 1  ;;  %v826_v32 = vld [vmem:[#allocation0 + $0x1ff] ss:$-1 sm:$0xff] }
  0x51   :  { %v819_v31 = vrot.slane %v818_v29, 1  ;;  %v831_v33 = vld [vmem:[#allocation0 + $0x207] ss:$-1 sm:$0xff]  ;;  %795 = vst.msk [vmem:[#allocation1 + $0x140] sm:$0xff] %vm234_vm0, %v791_v23  ;;  %800 = vst [vmem:[#allocation1 + $0x148] sm:$0xff] %v799_v26  ;;  %v827_v34 = vrot.slane %v826_v32, 1 }
  0x52   :  { %v832_v35 = vrot.slane %v831_v33, 1  ;;  %v841_v36 = vld [vmem:[#allocation0 + $0x21f] ss:$-1 sm:$0xff]  ;;  %v846_v37 = vld [vmem:[#allocation0 + $0x227] ss:$-1 sm:$0xff]  ;;  %808 = vst.msk [vmem:[#allocation1 + $0x148] sm:$0xff] %vm234_vm0, %v804_v27 }
  0x53   :  { %815 = vst [vmem:[#allocation1 + $0x150] sm:$0xff] %v814_v30  ;;  %v842_v38 = vrot.slane %v841_v36, 1  ;;  %v847_v39 = vrot.slane %v846_v37, 1  ;;  %v854_v40 = vld [vmem:[#allocation0 + $0x217] ss:$-1 sm:$0xff]  ;;  %828 = vst [vmem:[#allocation1 + $0x158] sm:$0xff] %v827_v34 }
  0x54   :  { %v859_v41 = vld [vmem:[#allocation0 + $0x21f] ss:$-1 sm:$0xff]  ;;  %823 = vst.msk [vmem:[#allocation1 + $0x150] sm:$0xff] %vm234_vm0, %v819_v31  ;;  %v855_v42 = vrot.slane %v854_v40, 1  ;;  %v869_v45 = vld [vmem:[#allocation0 + $0x237] ss:$-1 sm:$0xff] }
  0x55   :  { %v860_v44 = vrot.slane %v859_v41, 1  ;;  %v874_v46 = vld [vmem:[#allocation0 + $0x23f] ss:$-1 sm:$0xff]  ;;  %836 = vst.msk [vmem:[#allocation1 + $0x158] sm:$0xff] %vm234_vm0, %v832_v35  ;;  %843 = vst [vmem:[#allocation1 + $0x160] sm:$0xff] %v842_v38  ;;  %v870_v47 = vrot.slane %v869_v45, 1 }
  0x56   :  { %v875_v48 = vrot.slane %v874_v46, 1  ;;  %v882_v49 = vld [vmem:[#allocation0 + $0x22f] ss:$-1 sm:$0xff]  ;;  %v887_v50 = vld [vmem:[#allocation0 + $0x237] ss:$-1 sm:$0xff]  ;;  %851 = vst.msk [vmem:[#allocation1 + $0x160] sm:$0xff] %vm234_vm0, %v847_v39 }
  0x57   :  { %856 = vst [vmem:[#allocation1 + $0x168] sm:$0xff] %v855_v42  ;;  %v883_v51 = vrot.slane %v882_v49, 1  ;;  %v888_v52 = vrot.slane %v887_v50, 1  ;;  %v1014_v53 = vld [vmem:[#allocation1] sm:$0xff]  ;;  %v1016_v54 = vld [vmem:[#allocation1 + $0x8] sm:$0xff]  ;;  %v1018_v55 = vld [vmem:[#allocation1 + $0x10] sm:$0xff] }
  0x58   :  { %864 = vst.msk [vmem:[#allocation1 + $0x168] sm:$0xff] %vm234_vm0, %v860_v44  ;;  %871 = vst [vmem:[#allocation1 + $0x170] sm:$0xff] %v870_v47  ;;  %v1020_v56 = vld [vmem:[#allocation1 + $0x18] sm:$0xff]  ;;  %v1022_v57 = vld [vmem:[#allocation1 + $0x20] sm:$0xff] }
  0x59   :  { %1015 = vst [vmem:[%s1706_s1] sm:$0xff] %v1014_v53  ;;  %1017 = vst [vmem:[%s1706_s1 + $0x8] sm:$0xff] %v1016_v54  ;;  %v1024_v58 = vld [vmem:[#allocation1 + $0x28] sm:$0xff]  ;;  %v1026_v59 = vld [vmem:[#allocation1 + $0x30] sm:$0xff] }
  0x5a   :  { %1019 = vst [vmem:[%s1706_s1 + $0x10] sm:$0xff] %v1018_v55  ;;  %879 = vst.msk [vmem:[#allocation1 + $0x170] sm:$0xff] %vm234_vm0, %v875_v48  ;;  %v1028_v60 = vld [vmem:[#allocation1 + $0x38] sm:$0xff]  ;;  %v1030_v61 = vld [vmem:[#allocation1 + $0x40] sm:$0xff] }
  0x5b   :  { %884 = vst [vmem:[#allocation1 + $0x178] sm:$0xff] %v883_v51  ;;  %1021 = vst [vmem:[%s1706_s1 + $0x18] sm:$0xff] %v1020_v56  ;;  %v1032_v43 = vld [vmem:[#allocation1 + $0x48] sm:$0xff]  ;;  %v1034_v62 = vld [vmem:[#allocation1 + $0x50] sm:$0xff] }
  0x5c   :  { %1023 = vst [vmem:[%s1706_s1 + $0x20] sm:$0xff] %v1022_v57  ;;  %1025 = vst [vmem:[%s1706_s1 + $0x28] sm:$0xff] %v1024_v58  ;;  %v1036_v63 = vld [vmem:[#allocation1 + $0x58] sm:$0xff]  ;;  %v1038_v0 = vld [vmem:[#allocation1 + $0x60] sm:$0xff] }
  0x5d   :  { %892 = vst.msk [vmem:[#allocation1 + $0x178] sm:$0xff] %vm234_vm0, %v888_v52  ;;  %1027 = vst [vmem:[%s1706_s1 + $0x30] sm:$0xff] %v1026_v59  ;;  %v1040_v1 = vld [vmem:[#allocation1 + $0x68] sm:$0xff]  ;;  %v1042_v2 = vld [vmem:[#allocation1 + $0x70] sm:$0xff] }
  0x5e   :  { %1029 = vst [vmem:[%s1706_s1 + $0x38] sm:$0xff] %v1028_v60  ;;  %1031 = vst [vmem:[%s1706_s1 + $0x40] sm:$0xff] %v1030_v61  ;;  %v1044_v3 = vld [vmem:[#allocation1 + $0x78] sm:$0xff]  ;;  %v1046_v4 = vld [vmem:[#allocation1 + $0x80] sm:$0xff] }
  0x5f   :  { %1033 = vst [vmem:[%s1706_s1 + $0x48] sm:$0xff] %v1032_v43  ;;  %1035 = vst [vmem:[%s1706_s1 + $0x50] sm:$0xff] %v1034_v62  ;;  %v1048_v5 = vld [vmem:[#allocation1 + $0x88] sm:$0xff]  ;;  %v1050_v6 = vld [vmem:[#allocation1 + $0x90] sm:$0xff] }
  0x60   :  { %1037 = vst [vmem:[%s1706_s1 + $0x58] sm:$0xff] %v1036_v63  ;;  %1039 = vst [vmem:[%s1706_s1 + $0x60] sm:$0xff] %v1038_v0  ;;  %v1052_v7 = vld [vmem:[#allocation1 + $0x98] sm:$0xff]  ;;  %v1054_v8 = vld [vmem:[#allocation1 + $0xa0] sm:$0xff] }
  0x61   :  { %1041 = vst [vmem:[%s1706_s1 + $0x68] sm:$0xff] %v1040_v1  ;;  %1043 = vst [vmem:[%s1706_s1 + $0x70] sm:$0xff] %v1042_v2  ;;  %v1056_v9 = vld [vmem:[#allocation1 + $0xa8] sm:$0xff]  ;;  %v1058_v10 = vld [vmem:[#allocation1 + $0xb0] sm:$0xff] }
  0x62   :  { %1045 = vst [vmem:[%s1706_s1 + $0x78] sm:$0xff] %v1044_v3  ;;  %1047 = vst [vmem:[%s1706_s1 + $0x80] sm:$0xff] %v1046_v4  ;;  %v1060_v11 = vld [vmem:[#allocation1 + $0xb8] sm:$0xff]  ;;  %v1062_v12 = vld [vmem:[#allocation1 + $0xc0] sm:$0xff] }
  0x63   :  { %1049 = vst [vmem:[%s1706_s1 + $0x88] sm:$0xff] %v1048_v5  ;;  %1051 = vst [vmem:[%s1706_s1 + $0x90] sm:$0xff] %v1050_v6  ;;  %v1064_v13 = vld [vmem:[#allocation1 + $0xc8] sm:$0xff]  ;;  %v1066_v14 = vld [vmem:[#allocation1 + $0xd0] sm:$0xff] }
  0x64   :  { %1053 = vst [vmem:[%s1706_s1 + $0x98] sm:$0xff] %v1052_v7  ;;  %1055 = vst [vmem:[%s1706_s1 + $0xa0] sm:$0xff] %v1054_v8  ;;  %v1068_v15 = vld [vmem:[#allocation1 + $0xd8] sm:$0xff]  ;;  %v1070_v16 = vld [vmem:[#allocation1 + $0xe0] sm:$0xff] }
  0x65   :  { %1057 = vst [vmem:[%s1706_s1 + $0xa8] sm:$0xff] %v1056_v9  ;;  %1059 = vst [vmem:[%s1706_s1 + $0xb0] sm:$0xff] %v1058_v10  ;;  %v1072_v17 = vld [vmem:[#allocation1 + $0xe8] sm:$0xff]  ;;  %v1074_v18 = vld [vmem:[#allocation1 + $0xf0] sm:$0xff] }
  0x66   :  { %1061 = vst [vmem:[%s1706_s1 + $0xb8] sm:$0xff] %v1060_v11  ;;  %1063 = vst [vmem:[%s1706_s1 + $0xc0] sm:$0xff] %v1062_v12  ;;  %v1076_v19 = vld [vmem:[#allocation1 + $0xf8] sm:$0xff]  ;;  %v1078_v20 = vld [vmem:[#allocation1 + $0x100] sm:$0xff] }
  0x67   :  { %1065 = vst [vmem:[%s1706_s1 + $0xc8] sm:$0xff] %v1064_v13  ;;  %1067 = vst [vmem:[%s1706_s1 + $0xd0] sm:$0xff] %v1066_v14  ;;  %v1080_v21 = vld [vmem:[#allocation1 + $0x108] sm:$0xff]  ;;  %v1082_v22 = vld [vmem:[#allocation1 + $0x110] sm:$0xff] }
  0x68   :  { %1069 = vst [vmem:[%s1706_s1 + $0xd8] sm:$0xff] %v1068_v15  ;;  %1071 = vst [vmem:[%s1706_s1 + $0xe0] sm:$0xff] %v1070_v16  ;;  %v1084_v23 = vld [vmem:[#allocation1 + $0x118] sm:$0xff]  ;;  %v1086_v24 = vld [vmem:[#allocation1 + $0x120] sm:$0xff] }
  0x69   :  { %1073 = vst [vmem:[%s1706_s1 + $0xe8] sm:$0xff] %v1072_v17  ;;  %1075 = vst [vmem:[%s1706_s1 + $0xf0] sm:$0xff] %v1074_v18  ;;  %v1088_v25 = vld [vmem:[#allocation1 + $0x128] sm:$0xff]  ;;  %v1090_v26 = vld [vmem:[#allocation1 + $0x130] sm:$0xff] }
  0x6a   :  { %1077 = vst [vmem:[%s1706_s1 + $0xf8] sm:$0xff] %v1076_v19  ;;  %1079 = vst [vmem:[%s1706_s1 + $0x100] sm:$0xff] %v1078_v20  ;;  %v1092_v27 = vld [vmem:[#allocation1 + $0x138] sm:$0xff]  ;;  %v1094_v28 = vld [vmem:[#allocation1 + $0x140] sm:$0xff] }
  0x6b   :  { %1081 = vst [vmem:[%s1706_s1 + $0x108] sm:$0xff] %v1080_v21  ;;  %1083 = vst [vmem:[%s1706_s1 + $0x110] sm:$0xff] %v1082_v22  ;;  %v1096_v29 = vld [vmem:[#allocation1 + $0x148] sm:$0xff]  ;;  %v1098_v30 = vld [vmem:[#allocation1 + $0x150] sm:$0xff] }
  0x6c   :  { %1085 = vst [vmem:[%s1706_s1 + $0x118] sm:$0xff] %v1084_v23  ;;  %1087 = vst [vmem:[%s1706_s1 + $0x120] sm:$0xff] %v1086_v24  ;;  %v1100_v31 = vld [vmem:[#allocation1 + $0x158] sm:$0xff]  ;;  %v1102_v32 = vld [vmem:[#allocation1 + $0x160] sm:$0xff] }
  0x6d   :  { %1089 = vst [vmem:[%s1706_s1 + $0x128] sm:$0xff] %v1088_v25  ;;  %1091 = vst [vmem:[%s1706_s1 + $0x130] sm:$0xff] %v1090_v26  ;;  %v1104_v33 = vld [vmem:[#allocation1 + $0x168] sm:$0xff]  ;;  %v1106_v34 = vld [vmem:[#allocation1 + $0x170] sm:$0xff] }
  0x6e   :  { %1093 = vst [vmem:[%s1706_s1 + $0x138] sm:$0xff] %v1092_v27  ;;  %1095 = vst [vmem:[%s1706_s1 + $0x140] sm:$0xff] %v1094_v28  ;;  %v1108_v35 = vld [vmem:[#allocation1 + $0x178] sm:$0xff] }
  0x6f   :  { %1097 = vst [vmem:[%s1706_s1 + $0x148] sm:$0xff] %v1096_v29  ;;  %1099 = vst [vmem:[%s1706_s1 + $0x150] sm:$0xff] %v1098_v30 }
  0x70   :  { %1101 = vst [vmem:[%s1706_s1 + $0x158] sm:$0xff] %v1100_v31  ;;  %1103 = vst [vmem:[%s1706_s1 + $0x160] sm:$0xff] %v1102_v32 }
  0x71   :  { %1105 = vst [vmem:[%s1706_s1 + $0x168] sm:$0xff] %v1104_v33  ;;  %1107 = vst [vmem:[%s1706_s1 + $0x170] sm:$0xff] %v1106_v34 }
  0x72   :  { %1109 = vst [vmem:[%s1706_s1 + $0x178] sm:$0xff] %v1108_v35 }

// kernel: image_optimizer_forward.4
= control target key start
LH: loop header
LB: loop body
LE: loop exit
PB: predicated region body
PF: predicated region fallthrough
CT: control target
= control target key end

     0   :  { %s3379_s18 = smov 0   ;;  %s3381_s19 = smov 0   ;;  %s5051_s0 = inlined_call_operand.vmem [shape: f32[6,9,18,18], index: 0, kind: input, shape index: {}]   ;;  %s5052_s1 = inlined_call_operand.vmem [shape: bf16[24,81], index: 1, kind: input, shape index: {}]   ;;  %s5053_s2 = inlined_call_operand.vmem [shape: f32[24,1], index: 2, kind: input, shape index: {}]   ;;  %s5054_s3 = inlined_call_operand.vmem [shape: bf16[4,24], index: 3, kind: input, shape index: {}]   ;;  %s5055_s4 = inlined_call_operand.vmem [shape: f32[4,1], index: 4, kind: input, shape index: {}]   ;;  %s5056_s5 = inlined_call_operand.vmem [shape: f32[6,4,256], index: 5, kind: output, shape index: {}]  }
   0x1   :  { %s3383_s20 = smov 0  }
   0x2 LB: > { %s27_s21 = sadd.s32 1, %s3330_s19  ;;  %p3213_p0 = scmp.ge.s32.totalorder %s3334_s20, 1  ;;  %s3334_s20 = sphi %s3383_s20, %s15_s20   ;;  %s3330_s19 = sphi %s3381_s19, %s5131_s19   ;;  %s3326_s18 = sphi %s3379_s18, %s5130_s18  }
   0x3   : > { %p29_p1 = scmp.ge.s32.totalorder %s27_s21, 6  ;;  %p201_p2 = scmp.lt.s32.totalorder %s3334_s20, 7 }
   0x5   : > { %s5133_s21 = smov (%p29_p1, %s27_s21), 0  ;;  %p202_p3 = pnand %p3213_p0, %p201_p2 }
   0x7   : > { %205 = sbr.rel (%p202_p3) target bundleno = 913 (0x391), region = 40 }
   0xe   : > { %p233_p4 = scmp.lt.s32.totalorder %s3326_s18, 5  ;;  %v3336_v3 = vmov 1983009808   ;;  %v808_v5 = vlaneseq  ;;  %s3337_s26 = smov 127   ;;  %vm2513_vm0 = vcmask 130048   ;;  %vm2532_vm1 = vcmask 261120  }
   0xf   : > { %v806_v4 = vunpack.c.l.s4 %v3336_v3  ;;  %s3338_s27 = smov 126   ;;  %s3341_s28 = smov 32   ;;  %vm2545_vm2 = vcmask 392192   ;;  %vm2558_vm3 = vcmask 523264   ;;  %vm2571_vm4 = vcmask 654336  }
  0x10   : > { %s5135_s18 = smov (!%p233_p4, %s3326_s18), 5  ;;  %v3429_v23 = vshrl.u32 %v808_v5, 7  ;;  %s3342_s29 = smov 64   ;;  %vm2584_vm5 = vcmask 785408   ;;  %vm2597_vm6 = vcmask 916480   ;;  %vm2746_vm7 = vcmask 1040384  }
  0x11   : > { %s3262_s22 = smul.u32 216, %s5135_s18  ;;  %v807_v22 = vunpack.c.0.s8 %v806_v4  ;;  %s3343_s30 = smov 96   ;;  %vm2739_vm8 = vcmask 662528   ;;  %vm2819_vm9 = vcmask 1043456   ;;  %vm2815_vm10 = vcmask 195584  }
  0x12   : > { %s3344_s6 = smov 16   ;;  %s3345_s7 = smov 48  }
  0x13   : > { %s3403_s25 = scalar_lea.vmem %s5051_s0, %s3262_s22  ;;  %v3451_v34 = vsub.s32 %v807_v22, %v3429_v23  ;;  %s3346_s8 = smov 80  }
  0x14   : > { %v255_v0 = vld [vmem:[%s3403_s25 + $0x30] sm:$0xff]  ;;  %v256_v1 = vld [vmem:[%s3403_s25 + $0x38] sm:$0xff]  ;;  %v251_v2 = vld [vmem:[%s3403_s25] sm:$0xff]  ;;  %s3347_s9 = smov 112  }
  0x15   : > { %v3408_v6 = vpack.c.bf16 %v256_v1, %v255_v0  ;;  %v252_v7 = vld [vmem:[%s3403_s25 + $0x8] sm:$0xff]  ;;  %v258_v9 = vld [vmem:[%s3403_s25 + $0x50] sm:$0xff]  ;;  %v253_v11 = vld [vmem:[%s3403_s25 + $0x18] sm:$0xff] }
  0x16   : > { %v257_v8 = vld [vmem:[%s3403_s25 + $0x48] sm:$0xff]  ;;  %v269_v10 = vpack.c.bf16 %v252_v7, %v251_v2  ;;  %v254_v12 = vld [vmem:[%s3403_s25 + $0x20] sm:$0xff]  ;;  %v261_v13 = vld [vmem:[%s3403_s25 + $0x78] sm:$0xff] }
  0x17   : > { %349 = vrot.lane.b32.xlu1 %v3408_v6, %s3337_s26  ;;  %v3418_v14 = vpack.c.bf16 %v258_v9, %v257_v8  ;;  %v3420_v15 = vpack.c.bf16 %v254_v12, %v253_v11  ;;  %v262_v16 = vld [vmem:[%s3403_s25 + $0x80] sm:$0xff]  ;;  %v260_v18 = vld [vmem:[%s3403_s25 + $0x68] sm:$0xff]  ;;  %v266_v20 = vld [vmem:[%s3403_s25 + $0xb0] sm:$0xff]  ;;  %v483_v35 = vshrl.u32 %v3408_v6, 16 }
  0x18   : > { %v259_v17 = vld [vmem:[%s3403_s25 + $0x60] sm:$0xff]  ;;  %345 = vrot.lane.b32.xlu0 %v269_v10, %s3337_s26  ;;  %v265_v19 = vld [vmem:[%s3403_s25 + $0xa8] sm:$0xff]  ;;  %v263_v21 = vld [vmem:[%s3403_s25 + $0x90] sm:$0xff]  ;;  %v3431_v24 = vpack.c.bf16 %v262_v16, %v261_v13  ;;  %v475_v29 = vshrl.u32 %v269_v10, 16 }
  0x19   : > { %v3433_v25 = vpack.c.bf16 %v260_v18, %v259_v17  ;;  %v264_v26 = vld [vmem:[%s3403_s25 + $0x98] sm:$0xff]  ;;  %v473_v27 = vpack.i.b16 %v3420_v15, %v269_v10  ;;  %v481_v28 = vpack.i.b16 %v3418_v14, %v3408_v6  ;;  %v476_v30 = vshrl.u32 %v3420_v15, 16  ;;  %v267_v49 = vld [vmem:[%s3403_s25 + $0xc0] sm:$0xff]  ;;  %v268_v50 = vld [vmem:[%s3403_s25 + $0xc8] sm:$0xff] }
  0x1a   : > { %v3442_v31 = vpack.c.bf16 %v266_v20, %v265_v19  ;;  %v3444_v32 = vpack.c.bf16 %v264_v26, %v263_v21  ;;  %v484_v36 = vshrl.u32 %v3418_v14, 16  ;;  %v492_v39 = vshrl.u32 %v3431_v24, 16  ;;  %v3219_v0 = vld [vmem:[%s3403_s25 + $0x19] sm:$0xff]  ;;  %v3223_v1 = vld [vmem:[%s3403_s25 + $0x49] sm:$0xff]  ;;  %v3224_v3 = vld [vmem:[%s3403_s25 + $0x51] sm:$0xff] }
  0x1b   : > { %351 = vrot.lane.b32.xlu1 %v3418_v14, %s3337_s26  ;;  %v489_v33 = vpack.i.b16 %v3431_v24, %v3433_v25  ;;  %v491_v40 = vshrl.u32 %v3433_v25, 16  ;;  %v477_v42 = vpack.i.b16 %v476_v30, %v475_v29  ;;  %v3487_v58 = vpack.c.bf16 %v268_v50, %v267_v49  ;;  %v3225_v4 = vld [vmem:[%s3403_s25 + $0x61] sm:$0xff]  ;;  %v3226_v5 = vld [vmem:[%s3403_s25 + $0x69] sm:$0xff]  ;;  %v3221_v11 = vld [vmem:[%s3403_s25 + $0x31] sm:$0xff] }
  0x1c   : > { %347 = vrot.lane.b32.xlu0 %v3420_v15, %s3337_s26  ;;  %v497_v37 = vpack.i.b16 %v3442_v31, %v3444_v32  ;;  %v500_v43 = vshrl.u32 %v3442_v31, 16  ;;  %v499_v44 = vshrl.u32 %v3444_v32, 16  ;;  %v485_v52 = vpack.i.b16 %v484_v36, %v483_v35  ;;  %v3222_v12 = vld [vmem:[%s3403_s25 + $0x39] sm:$0xff]  ;;  %v3234_v49 = vld [vmem:[%s3403_s25 + $0xc9] sm:$0xff]  ;;  %v3217_v50 = vld [vmem:[%s3403_s25 + $0x1] sm:$0xff] }
  0x1d   : > { %v804_v38 = vcombine.high %v473_v27, %v489_v33  ;;  %v803_v41 = vcombine.low %v473_v27, %v489_v33  ;;  %v493_v54 = vpack.i.b16 %v492_v39, %v491_v40  ;;  %v3524_v18 = vpack.c.bf16 %v3224_v3, %v3223_v1  ;;  %v3227_v19 = vld [vmem:[%s3403_s25 + $0x79] sm:$0xff]  ;;  %v3228_v27 = vld [vmem:[%s3403_s25 + $0x81] sm:$0xff] }
  0x1e   : > { %v820_v46 = vcombine.high %v481_v28, %v497_v37  ;;  %v819_v48 = vcombine.low %v481_v28, %v497_v37  ;;  %v501_v57 = vpack.i.b16 %v500_v43, %v499_v44  ;;  %v3527_v20 = vpack.c.bf16 %v3226_v5, %v3225_v4  ;;  %v3229_v28 = vld [vmem:[%s3403_s25 + $0x91] sm:$0xff]  ;;  %v3230_v29 = vld [vmem:[%s3403_s25 + $0x99] sm:$0xff]  ;;  %v3243_v5 = vld [vmem:[%s3403_s25 + $0x62] sm:$0xff] }
  0x1f   : > { %355 = vrot.lane.b32.xlu1 %v3431_v24, %s3337_s26  ;;  %v3464_v45 = vrot.slane %v804_v38, %v3451_v34  ;;  %v3469_v47 = vrot.slane %v803_v41, %v3451_v34  ;;  %v939_v61 = vcombine.low %v477_v42, %v493_v54  ;;  %v940_v63 = vcombine.high %v477_v42, %v493_v54  ;;  %v3231_v42 = vld [vmem:[%s3403_s25 + $0xa9] sm:$0xff]  ;;  %v3237_v1 = vld [vmem:[%s3403_s25 + $0x1a] sm:$0xff] }
  0x20   : > { %353 = vrot.lane.b32.xlu0 %v3433_v25, %s3337_s26  ;;  %v3474_v51 = vrot.slane %v820_v46, %v3451_v34  ;;  %v3477_v53 = vrot.slane %v819_v48, %v3451_v34  ;;  %v955_v62 = vcombine.low %v485_v52, %v501_v57  ;;  %v956_v2 = vcombine.high %v485_v52, %v501_v57  ;;  %v3232_v46 = vld [vmem:[%s3403_s25 + $0xb1] sm:$0xff]  ;;  %v3233_v48 = vld [vmem:[%s3403_s25 + $0xc1] sm:$0xff]  ;;  %v3218_v52 = vld [vmem:[%s3403_s25 + $0x9] sm:$0xff] }
  0x21   : > { %v3502_v7 = vrot.slane %v939_v61, %v3451_v34  ;;  %v3508_v9 = vrot.slane %v940_v63, %v3451_v34  ;;  %v300_v26 = vpack.c.bf16 %v3222_v12, %v3221_v11  ;;  %v595_v30 = vshrl.u32 %v3524_v18, 16  ;;  %v3245_v11 = vld [vmem:[%s3403_s25 + $0x7a] sm:$0xff]  ;;  %v3246_v12 = vld [vmem:[%s3403_s25 + $0x82] sm:$0xff] }
  0x22   : > { %v883_v55 = vcombine.low %v3464_v45, %v3474_v51  ;;  %v884_v56 = vcombine.high %v3464_v45, %v3474_v51  ;;  %v867_v59 = vcombine.low %v3469_v47, %v3477_v53  ;;  %v868_v60 = vcombine.high %v3469_v47, %v3477_v53 }
  0x23   : > { %359 = vrot.lane.b32.xlu1 %v3442_v31, %s3337_s26  ;;  %v3505_v8 = vrot.slane %v955_v62, %v3451_v34  ;;  %v3514_v13 = vrot.slane %v956_v2, %v3451_v34  ;;  %v596_v33 = vshrl.u32 %v3527_v20, 16  ;;  %v588_v37 = vshrl.u32 %v300_v26, 16  ;;  %v3238_v2 = vld [vmem:[%s3403_s25 + $0x22] sm:$0xff] }
  0x24   : > { %357 = vrot.lane.b32.xlu0 %v3444_v32, %s3337_s26  ;;  %v303_v38 = vpack.c.bf16 %v3228_v27, %v3227_v19  ;;  %v304_v39 = vpack.c.bf16 %v3230_v29, %v3229_v28  ;;  %v305_v54 = vpack.c.bf16 %v3232_v46, %v3231_v42  ;;  %v306_v57 = vpack.c.bf16 %v3234_v49, %v3233_v48  ;;  %v3239_v42 = vld [vmem:[%s3403_s25 + $0x32] sm:$0xff]  ;;  %v3248_v49 = vld [vmem:[%s3403_s25 + $0x9a] sm:$0xff] }
  0x25   : > { %v1003_v16 = vcombine.low %v3502_v7, %v3505_v8  ;;  %v1004_v17 = vcombine.high %v3502_v7, %v3505_v8  ;;  %v3548_v40 = vpack.i.b16 %v596_v33, %v595_v30  ;;  %v328_v4 = vpack.c.bf16 %v3238_v2, %v3237_v1  ;;  %v3250_v46 = vld [vmem:[%s3403_s25 + $0xb2] sm:$0xff] }
  0x26   : > { %v3553_v43 = vpack.i.b16 %v304_v39, %v303_v38  ;;  %v604_v44 = vshrl.u32 %v304_v39, 16  ;;  %v3572_v61 = vpack.i.b16 %v306_v57, %v305_v54  ;;  %v612_v62 = vshrl.u32 %v306_v57, 16  ;;  %v3247_v48 = vld [vmem:[%s3403_s25 + $0x92] sm:$0xff] }
  0x27   : > { %363 = vrot.lane.b32.xlu1 %v269_v10, %s3338_s27  ;;  %v3220_v10 = vld [vmem:[%s3403_s25 + $0x21] sm:$0xff]  ;;  %v692_v28 = vshrl.u32 %v328_v4, 16  ;;  %v332_v29 = vpack.c.bf16 %v3246_v12, %v3245_v11  ;;  %v3339_v2 = vmov 1934713408   ;;  %v5085_v7 = vcombine.low %v3508_v9, %v3514_v13 }
  0x28   : > { %361 = vrot.lane.b32.xlu0 %v3487_v58, %s3337_s26  ;;  %v299_v22 = vpack.c.bf16 %v3220_v10, %v3219_v0  ;;  %v3236_v0 = vld [vmem:[%s3403_s25 + $0xa] sm:$0xff] }
  0x29   : > { %v3244_v10 = vld [vmem:[%s3403_s25 + $0x6a] sm:$0xff] }
  0x2a   : > { %v3544_v35 = vpack.i.b16 %v300_v26, %v299_v22  ;;  %v587_v36 = vshrl.u32 %v299_v22, 16 }
  0x2b   : > { %367 = vrot.lane.b32.xlu1 %v3408_v6, %s3338_s27 }
  0x2c   : > { %365 = vrot.lane.b32.xlu0 %v3420_v15, %s3338_s27  ;;  %v3538_v15 = vpack.i.b16 %v3527_v20, %v3524_v18  ;;  %v3550_v41 = vpack.i.b16 %v588_v37, %v587_v36  ;;  %v708_v36 = vshrl.u32 %v332_v29, 16  ;;  %v3242_v37 = vld [vmem:[%s3403_s25 + $0x52] sm:$0xff] }
  0x2f   : > { %371 = vrot.lane.b32.xlu1 %v3433_v25, %s3338_s27  ;;  %v603_v25 = vshrl.u32 %v303_v38, 16 }
  0x30   : > { %369 = vrot.lane.b32.xlu0 %v3418_v14, %s3338_s27 }
  0x31   : > { %v3562_v14 = vpack.i.b16 %v604_v44, %v603_v25  ;;  %v3240_v25 = vld [vmem:[%s3403_s25 + $0x3a] sm:$0xff]  ;;  %v3249_v44 = vld [vmem:[%s3403_s25 + $0xaa] sm:$0xff] }
  0x33   : > { %375 = vrot.lane.b32.xlu1 %v3444_v32, %s3338_s27  ;;  %v3570_v32 = vpack.c.bf16 %v3218_v52, %v3217_v50  ;;  %v3635_v50 = vpack.c.bf16 %v3250_v46, %v3249_v44  ;;  %v3638_v52 = vpack.c.bf16 %v3248_v49, %v3247_v48  ;;  %v507_v48 = vshrl.u32 %v3487_v58, 16 }
  0x34   : > { %373 = vrot.lane.b32.xlu0 %v3431_v24, %s3338_s27  ;;  %v611_v24 = vshrl.u32 %v305_v54, 16 }
  0x36   : > { %v3574_v63 = vpack.i.b16 %v612_v62, %v611_v24 }
  0x37   : > { %379 = vrot.lane.b32.xlu1 %v3487_v58, %s3338_s27 }
  0x38   : > { %377 = vrot.lane.b32.xlu0 %v3442_v31, %s3338_s27  ;;  %v3235_v31 = vld [vmem:[%s3403_s25 + $0x2] sm:$0xff] }
  0x39   : > { %v327_v3 = vpack.c.bf16 %v3236_v0, %v3235_v31 }
  0x3b   : > { %392 = vrot.lane.b32.xlu1 %v299_v22, %s3337_s26  ;;  %v3600_v19 = vpack.i.b16 %v328_v4, %v327_v3  ;;  %v691_v27 = vshrl.u32 %v327_v3, 16 }
  0x3c   : > { %390 = vrot.lane.b32.xlu0 %v3570_v32, %s3337_s26 }
  0x3f   : > { %396 = vrot.lane.b32.xlu1 %v3524_v18, %s3337_s26 }
  0x40   : > { %394 = vrot.lane.b32.xlu0 %v300_v26, %s3337_s26 }
  0x43   : > { %400 = vrot.lane.b32.xlu1 %v303_v38, %s3337_s26 }
  0x44   : > { %398 = vrot.lane.b32.xlu0 %v3527_v20, %s3337_s26 }
  0x47   : > { %404 = vrot.lane.b32.xlu1 %v305_v54, %s3337_s26 }
  0x48   : > { %402 = vrot.lane.b32.xlu0 %v304_v39, %s3337_s26 }
  0x4b   : > { %408 = vrot.lane.b32.xlu1 %v3570_v32, %s3338_s27 }
  0x4c   : > { %406 = vrot.lane.b32.xlu0 %v306_v57, %s3337_s26 }
  0x4f   : > { %412 = vrot.lane.b32.xlu1 %v300_v26, %s3338_s27  ;;  %v3604_v26 = vpack.i.b16 %v692_v28, %v691_v27 }
  0x50   : > { %410 = vrot.lane.b32.xlu0 %v299_v22, %s3338_s27  ;;  %v331_v22 = vpack.c.bf16 %v3244_v10, %v3243_v5 }
  0x52   : > { %v3608_v30 = vpack.i.b16 %v332_v29, %v331_v22  ;;  %v707_v33 = vshrl.u32 %v331_v22, 16 }
  0x53   : > { %416 = vrot.lane.b32.xlu1 %v3527_v20, %s3338_s27 }
  0x54   : > { %414 = vrot.lane.b32.xlu0 %v3524_v18, %s3338_s27  ;;  %5078 = vst [vmem:[#allocation2_spill] sm:$0xff] %v3608_v30  ;;  %v3612_v20 = vpack.i.b16 %v708_v36, %v707_v33  ;;  %v3241_v18 = vld [vmem:[%s3403_s25 + $0x4a] sm:$0xff] }
  0x56   : > { %5079 = vst [vmem:[#allocation3_spill] sm:$0xff] %v3612_v20 }
  0x57   : > { %420 = vrot.lane.b32.xlu1 %v304_v39, %s3338_s27  ;;  %v3621_v39 = vpack.c.bf16 %v3242_v37, %v3241_v18 }
  0x58   : > { %418 = vrot.lane.b32.xlu0 %v303_v38, %s3338_s27  ;;  %v3624_v38 = vpack.c.bf16 %v3240_v25, %v3239_v42 }
  0x5b   : > { %424 = vrot.lane.b32.xlu1 %v306_v57, %s3338_s27  ;;  %v3252_v57 = vld [vmem:[%s3403_s25 + $0xca] sm:$0xff] }
  0x5c   : > { %422 = vrot.lane.b32.xlu0 %v305_v54, %s3338_s27  ;;  %v3251_v54 = vld [vmem:[%s3403_s25 + $0xc2] sm:$0xff] }
  0x5d   : > { %v3646_v24 = vpack.c.bf16 %v3252_v57, %v3251_v54 }
  0x5f   : > { %437 = vrot.lane.b32.xlu1 %v328_v4, %s3337_s26 }
  0x60   : > { %435 = vrot.lane.b32.xlu0 %v327_v3, %s3337_s26 }
  0x63   : > { %441 = vrot.lane.b32.xlu1 %v3621_v39, %s3337_s26 }
  0x64   : > { %439 = vrot.lane.b32.xlu0 %v3624_v38, %s3337_s26 }
  0x67   : > { %445 = vrot.lane.b32.xlu1 %v332_v29, %s3337_s26 }
  0x68   : > { %443 = vrot.lane.b32.xlu0 %v331_v22, %s3337_s26 }
  0x6b   : > { %449 = vrot.lane.b32.xlu1 %v3635_v50, %s3337_s26 }
  0x6c   : > { %447 = vrot.lane.b32.xlu0 %v3638_v52, %s3337_s26 }
  0x6f   : > { %453 = vrot.lane.b32.xlu1 %v327_v3, %s3338_s27  ;;  %v870_v3 = vunpack.c.l.s4 %v3339_v2 }
  0x70   : > { %451 = vrot.lane.b32.xlu0 %v3646_v24, %s3337_s26 }
  0x71   : > { %v871_v11 = vunpack.c.0.s8 %v870_v3 }
  0x73   : > { %457 = vrot.lane.b32.xlu1 %v3624_v38, %s3338_s27  ;;  %v3671_v18 = vsub.s32 %v871_v11, %v3429_v23 }
  0x74   : > { %455 = vrot.lane.b32.xlu0 %v328_v4, %s3338_s27 }
  0x75   : > { %v3686_v23 = vrot.slane %v883_v55, %v3671_v18  ;;  %v3773_v8 = vrot.slane %v5085_v7, %v3671_v18 }
  0x77   : > { %461 = vrot.lane.b32.xlu1 %v331_v22, %s3338_s27  ;;  %v5057_v22 = vmov 0   ;;  %5080 = vst [vmem:[#allocation4_spill] sm:$0xff] %v3686_v23 }
  0x78   : > { %459 = vrot.lane.b32.xlu0 %v3621_v39, %s3338_s27  ;;  %3301 = vset.pattern.permute.xlu1 %v5057_v22 }
  0x79   : > { %3300 = vset.pattern.permute.xlu0 %v5057_v22  ;;  %2785 = vmatprep.mubr.bf16.mxu0 %v5057_v22 }
  0x7a   : > { %2858 = vmatprep.mubr.bf16.mxu1 %v5057_v22 }
  0x7b   : > { %465 = vrot.lane.b32.xlu1 %v3638_v52, %s3338_s27 }
  0x7c   : > { %463 = vrot.lane.b32.xlu0 %v332_v29, %s3338_s27 }
  0x7f   : > { %469 = vrot.lane.b32.xlu1 %v3646_v24, %s3338_s27 }
  0x80   : > { %467 = vrot.lane.b32.xlu0 %v3635_v50, %s3338_s27 }
  0x89   : > { %v350_v62 = vpop.permute.xlu1 %349 }
  0x8a   : > { %v346_v31 = vpop.permute.xlu0 %345 }
  0x8b   : > { %v505_v27 = vpack.i.b16 %v346_v31, %v3487_v58  ;;  %v516_v58 = vshrl.u32 %v350_v62, 16 }
  0x8d   : > { %v352_v0 = vpop.permute.xlu1 %351 }
  0x8e   : > { %v348_v1 = vpop.permute.xlu0 %347  ;;  %v523_v55 = vshrl.u32 %v352_v0, 16 }
  0x8f   : > { %v513_v29 = vpack.i.b16 %v350_v62, %v348_v1  ;;  %v515_v3 = vshrl.u32 %v348_v1, 16 }
  0x91   : > { %v356_v4 = vpop.permute.xlu1 %355  ;;  %v517_v62 = vpack.i.b16 %v516_v58, %v515_v3 }
  0x92   : > { %v354_v5 = vpop.permute.xlu0 %353 }
  0x93   : > { %v521_v10 = vpack.i.b16 %v354_v5, %v352_v0  ;;  %v524_v11 = vshrl.u32 %v354_v5, 16  ;;  %v898_v0 = vrot.slane %v884_v56, %v3671_v18 }
  0x95   : > { %v3664_v12 = vpop.permute.xlu1 %359  ;;  %v836_v33 = vcombine.high %v505_v27, %v521_v10  ;;  %v835_v37 = vcombine.low %v505_v27, %v521_v10  ;;  %v531_v10 = vshrl.u32 %v356_v4, 16 }
  0x96   : > { %v358_v28 = vpop.permute.xlu0 %357 }
  0x97   : > { %v529_v36 = vpack.i.b16 %v358_v28, %v356_v4  ;;  %v532_v49 = vshrl.u32 %v358_v28, 16  ;;  %v850_v54 = vrot.slane %v836_v33, %v3451_v34  ;;  %v843_v27 = vrot.slane %v835_v37, %v3451_v34 }
  0x98   : > { %v508_v28 = vshrl.u32 %v346_v31, 16  ;;  %v525_v31 = vpack.i.b16 %v524_v11, %v523_v55  ;;  %v3749_v55 = vrot.slane %v1003_v16, %v3671_v18  ;;  %v5084_v16 = vcombine.high %v3508_v9, %v3514_v13 }
  0x99   : > { %v3674_v42 = vpop.permute.xlu1 %363  ;;  %v851_v25 = vcombine.low %v513_v29, %v529_v36  ;;  %v852_v44 = vcombine.high %v513_v29, %v529_v36 }
  0x9a   : > { %v3676_v46 = vpop.permute.xlu0 %361 }
  0x9b   : > { %v859_v57 = vrot.slane %v851_v25, %v3451_v34  ;;  %v866_v2 = vrot.slane %v852_v44, %v3451_v34  ;;  %v3697_v25 = vrot.slane %v867_v59, %v3671_v18  ;;  %v3699_v44 = vpack.i.b16 %v532_v49, %v531_v10 }
  0x9c   : > { %v537_v7 = vpack.i.b16 %v3676_v46, %v3664_v12  ;;  %v540_v11 = vshrl.u32 %v3676_v46, 16 }
  0x9d   : > { %v3689_v29 = vpop.permute.xlu1 %367  ;;  %v915_v36 = vcombine.low %v850_v54, %v866_v2  ;;  %5081 = vst [vmem:[#allocation5_spill] sm:$0xff] %v3697_v25  ;;  %v899_v1 = vcombine.low %v843_v27, %v859_v57  ;;  %v916_v4 = vcombine.high %v850_v54, %v866_v2  ;;  %v900_v37 = vcombine.high %v843_v27, %v859_v57 }
  0x9e   : > { %v3691_v33 = vpop.permute.xlu0 %365  ;;  %v3722_v54 = vrot.slane %v868_v60, %v3671_v18  ;;  %v509_v57 = vpack.i.b16 %v508_v28, %v507_v48  ;;  %v987_v2 = vcombine.low %v517_v62, %v3699_v44 }
  0x9f   : > { %v3702_v5 = vrot.slane %v915_v36, %v3671_v18  ;;  %v3707_v6 = vrot.slane %v899_v1, %v3671_v18  ;;  %v930_v49 = vrot.slane %v916_v4, %v3671_v18  ;;  %v3728_v10 = vrot.slane %v900_v37, %v3671_v18 }
  0xa0   : > { %v971_v45 = vcombine.low %v509_v57, %v525_v31  ;;  %v3739_v27 = vrot.slane %v987_v2, %v3451_v34  ;;  %v972_v28 = vcombine.high %v509_v57, %v525_v31  ;;  %v580_v36 = vshrl.u32 %v3570_v32, 16 }
  0xa1   : > { %5082 = vst [vmem:[#allocation6_spill] sm:$0xff] %v3702_v5  ;;  %v3704_v22 = vpop.permute.xlu1 %371  ;;  %5083 = vst [vmem:[#allocation7_spill] sm:$0xff] %v3707_v6  ;;  %v936_v59 = vcombine.high %v3686_v23, %v3702_v5  ;;  %v932_v3 = vcombine.high %v3697_v25, %v3707_v6  ;;  %v937_v60 = vcombine.low %v898_v0, %v930_v49  ;;  %v555_v6 = vshrl.u32 %v3689_v29, 16 }
  0xa2   : > { %v3709_v21 = vpop.permute.xlu0 %369  ;;  %v933_v58 = vcombine.low %v3722_v54, %v3728_v10  ;;  %v3755_v1 = vrot.slane %v1004_v17, %v3671_v18  ;;  %v3758_v4 = vrot.slane %v971_v45, %v3451_v34  ;;  %v988_v17 = vcombine.high %v517_v62, %v3699_v44 }
  0xa3   : > { %2411 = vrot.lane.b32.xlu0 %v936_v59, %s3341_s28  ;;  %2285 = vrot.lane.b32.xlu1 %v932_v3, %s3341_s28  ;;  %v3767_v59 = vrot.slane %v5084_v16, %v3671_v18  ;;  %v545_v57 = vpack.i.b16 %v3691_v33, %v3674_v42  ;;  %v3781_v45 = vpack.i.b16 %v3621_v39, %v3624_v38  ;;  %v539_v44 = vshrl.u32 %v3664_v12, 16 }
  0xa4   : > { %v938_v16 = vcombine.high %v898_v0, %v930_v49  ;;  %v1035_v9 = vcombine.low %v3758_v4, %v3739_v27  ;;  %v3788_v13 = vrot.slane %v972_v28, %v3451_v34  ;;  %v3799_v49 = vrot.slane %v988_v17, %v3451_v34 }
  0xa5   : > { %v376_v51 = vpop.permute.xlu1 %375  ;;  %v548_v28 = vshrl.u32 %v3691_v33, 16  ;;  %v547_v12 = vshrl.u32 %v3674_v42, 16  ;;  %v934_v23 = vcombine.high %v3722_v54, %v3728_v10 }
  0xa6   : > { %v3734_v56 = vpop.permute.xlu0 %373 }
  0xa7   : > { %2447 = vrot.lane.b32.xlu0 %v937_v60, %s3342_s29  ;;  %v561_v37 = vpack.i.b16 %v3734_v56, %v3704_v22  ;;  %2321 = vrot.lane.b32.xlu1 %v933_v58, %s3342_s29  ;;  %v553_v60 = vpack.i.b16 %v3709_v21, %v3689_v29  ;;  %v3824_v10 = vpack.i.b16 %v548_v28, %v547_v12 }
  0xa9   : > { %v380_v31 = vpop.permute.xlu1 %379  ;;  %v1092_v48 = vcombine.high %v545_v57, %v561_v37  ;;  %v1076_v46 = vcombine.high %v537_v7, %v553_v60  ;;  %v1091_v30 = vcombine.low %v545_v57, %v561_v37  ;;  %v1075_v29 = vcombine.low %v537_v7, %v553_v60 }
  0xaa   : > { %v577_v2 = vpack.i.b16 %v3570_v32, %v380_v31  ;;  %v378_v3 = vpop.permute.xlu0 %377  ;;  %v579_v62 = vshrl.u32 %v380_v31, 16  ;;  %v571_v31 = vshrl.u32 %v376_v51, 16 }
  0xab   : > { %v569_v58 = vpack.i.b16 %v378_v3, %v376_v51  ;;  %v572_v32 = vshrl.u32 %v378_v3, 16  ;;  %2483 = vrot.lane.b32.xlu1 %v938_v16, %s3343_s30  ;;  %v1043_v16 = vrot.slane %v1035_v9, %v3671_v18  ;;  %v3815_v51 = vpack.i.b16 %v540_v11, %v539_v44 }
  0xac   : > { %v1124_v53 = vcombine.high %v577_v2, %v3538_v15  ;;  %v581_v5 = vpack.i.b16 %v580_v36, %v579_v62  ;;  %v3819_v42 = vrot.slane %v1092_v48, %v3451_v34  ;;  %v1052_v11 = vcombine.high %v3788_v13, %v3799_v49 }
  0xad   : > { %v3796_v0 = vpop.permute.xlu1 %392  ;;  %v1108_v3 = vcombine.high %v569_v58, %v3544_v35  ;;  %v573_v17 = vpack.i.b16 %v572_v32, %v571_v31  ;;  %v1107_v36 = vcombine.low %v569_v58, %v3544_v35  ;;  %v3833_v37 = vrot.slane %v1076_v46, %v3451_v34 }
  0xae   : > { %v3803_v47 = vpop.permute.xlu0 %390  ;;  %v3810_v25 = vrot.slane %v1124_v53, %v3451_v34  ;;  %v1123_v53 = vcombine.low %v577_v2, %v3538_v15  ;;  %v564_v48 = vshrl.u32 %v3734_v56, 16  ;;  %v1259_v57 = vcombine.low %v581_v5, %v3548_v40 }
  0xaf   : > { %v3813_v33 = vrot.slane %v1108_v3, %v3451_v34  ;;  %2357 = vrot.lane.b32.xlu1 %v934_v23, %s3343_s30  ;;  %v1067_v23 = vcombine.low %v3749_v55, %v1043_v16  ;;  %v1260_v44 = vcombine.high %v581_v5, %v3548_v40  ;;  %v1244_v15 = vcombine.high %v573_v17, %v3550_v41 }
  0xb0   : > { %v563_v2 = vshrl.u32 %v3704_v22, 16  ;;  %v3844_v60 = vrot.slane %v1091_v30, %v3451_v34  ;;  %v1243_v58 = vcombine.low %v573_v17, %v3550_v41  ;;  %v1155_v40 = vcombine.low %v3833_v37, %v3819_v42 }
  0xb1   : > { %v3822_v54 = vpop.permute.xlu1 %396  ;;  %v1187_v35 = vcombine.low %v3813_v33, %v3810_v25  ;;  %v556_v5 = vshrl.u32 %v3709_v21, 16  ;;  %v3854_v62 = vrot.slane %v1123_v53, %v3451_v34  ;;  %v3857_v22 = vrot.slane %v1107_v36, %v3451_v34 }
  0xb2   : > { %v3828_v9 = vpop.permute.xlu0 %394  ;;  %v1068_v41 = vcombine.high %v3749_v55, %v1043_v16  ;;  %v3863_v32 = vrot.slane %v1075_v29, %v3451_v34  ;;  %v565_v7 = vpack.i.b16 %v564_v48, %v563_v2  ;;  %v3866_v28 = vrot.slane %v1052_v11, %v3671_v18 }
  0xb3   : > { %2267 = vrot.lane.b32.xlu1 %v1067_v23, %s3344_s6  ;;  %v1036_v21 = vcombine.high %v3758_v4, %v3739_v27  ;;  %v3871_v31 = vrot.slane %v1259_v57, %v3451_v34  ;;  %v3874_v3 = vrot.slane %v1260_v44, %v3451_v34  ;;  %v3877_v12 = vrot.slane %v1244_v15, %v3451_v34 }
  0xb4   : > { %v1051_v55 = vcombine.low %v3788_v13, %v3799_v49  ;;  %v3882_v46 = vrot.slane %v1243_v58, %v3451_v34  ;;  %v3885_v16 = vrot.slane %v1155_v40, %v3671_v18  ;;  %v3888_v27 = vrot.slane %v1187_v35, %v3671_v18 }
  0xb5   : > { %v3848_v56 = vpop.permute.xlu1 %400  ;;  %v1139_v17 = vcombine.low %v3863_v32, %v3844_v60  ;;  %v557_v53 = vpack.i.b16 %v556_v5, %v555_v6  ;;  %v620_v13 = vshrl.u32 %v3796_v0, 16  ;;  %v619_v49 = vshrl.u32 %v3803_v47, 16 }
  0xb6   : > { %v3859_v30 = vpop.permute.xlu0 %398  ;;  %5086 = vst [vmem:[#allocation8_spill] sm:$0xff] %v3885_v16  ;;  %5087 = vst [vmem:[#allocation9_spill] sm:$0xff] %v3888_v27  ;;  %v1171_v11 = vcombine.low %v3857_v22, %v3854_v62  ;;  %v1228_v29 = vcombine.high %v3824_v10, %v565_v7  ;;  %v1208_v48 = vcombine.high %v3885_v16, %v3888_v27  ;;  %v628_v6 = vshrl.u32 %v3822_v54, 16 }
  0xb7   : > { %2303 = vrot.lane.b32.xlu1 %v1068_v41, %s3345_s7  ;;  %v1073_v23 = vcombine.low %v3767_v59, %v3866_v28  ;;  %v3907_v57 = vrot.slane %v1036_v21, %v3671_v18  ;;  %v627_v44 = vshrl.u32 %v3828_v9, 16  ;;  %v1323_v35 = vcombine.low %v3877_v12, %v3874_v3 }
  0xb8   : > { %v3912_v15 = vrot.slane %v1171_v11, %v3671_v18  ;;  %2413 = vrot.lane.b32.xlu0 %v1208_v48, %s3341_s28  ;;  %v3918_v2 = vrot.slane %v1139_v17, %v3671_v18  ;;  %v3927_v5 = vpack.i.b16 %v3635_v50, %v3638_v52  ;;  %v1212_v41 = vcombine.high %v3815_v51, %v557_v53 }
  0xb9   : > { %v3891_v4 = vpop.permute.xlu1 %404  ;;  %v3930_v21 = vpack.i.b16 %v620_v13, %v619_v49  ;;  %v5091_v17 = vshrl.u32 %v3624_v38, 16  ;;  %v5092_v48 = vshrl.u32 %v3621_v39, 16  ;;  %v5093_v16 = vshrl.u32 %v3638_v52, 16 }
  0xba   : > { %v3897_v36 = vpop.permute.xlu0 %402  ;;  %5088 = vst [vmem:[#allocation10_spill] sm:$0xff] %v3912_v15  ;;  %5089 = vst [vmem:[#allocation11_spill] sm:$0xff] %v3918_v2  ;;  %v5094_v40 = vshrl.u32 %v3635_v50, 16  ;;  %v1211_v20 = vcombine.low %v3815_v51, %v557_v53  ;;  %v1204_v13 = vcombine.high %v3918_v2, %v3912_v15  ;;  %v1059_v49 = vrot.slane %v1051_v55, %v3671_v18 }
  0xbb   : > { %2465 = vrot.lane.b32.xlu1 %v1073_v23, %s3346_s8  ;;  %5090 = vst [vmem:[#allocation12_spill] sm:$0xff] %v3927_v5  ;;  %v3938_v23 = vpack.i.b16 %v5092_v48, %v5091_v17  ;;  %v1069_v38 = vcombine.low %v3755_v1, %v3907_v57  ;;  %v1227_v39 = vcombine.low %v3824_v10, %v565_v7 }
  0xbc   : > { %v3944_v27 = vpack.i.b16 %v5094_v40, %v5093_v16  ;;  %v3954_v17 = vrot.slane %v1228_v29, %v3451_v34  ;;  %v3956_v52 = vpack.i.b16 %v628_v6, %v627_v44  ;;  %v1172_v50 = vcombine.high %v3857_v22, %v3854_v62  ;;  %2287 = vrot.lane.b32.xlu0 %v1204_v13, %s3341_s28 }
  0xbd   : > { %v3921_v58 = vpop.permute.xlu1 %408  ;;  %v1226_v55 = vrot.slane %v1212_v41, %v3451_v34  ;;  %v1484_v16 = vcombine.high %v3562_v14, %v3930_v21  ;;  %v1651_v7 = vcombine.low %v3781_v45, %v3927_v5  ;;  %v3974_v62 = vrot.slane %v1211_v20, %v3451_v34 }
  0xbe   : > { %v3932_v11 = vpop.permute.xlu0 %406  ;;  %v1071_v22 = vcombine.low %v3773_v8, %v1059_v49  ;;  %v1074_v29 = vcombine.high %v3767_v59, %v3866_v28  ;;  %v1788_v6 = vcombine.high %v3938_v23, %v3944_v27  ;;  %v3982_v44 = vrot.slane %v1227_v39, %v3451_v34 }
  0xbf   : > { %2339 = vrot.lane.b32.xlu1 %v1069_v38, %s3346_s8  ;;  %v1500_v40 = vcombine.high %v3574_v63, %v3956_v52  ;;  %v1072_v41 = vcombine.high %v3773_v8, %v1059_v49  ;;  %v1291_v48 = vcombine.low %v1226_v55, %v3954_v17  ;;  %v3990_v20 = vpack.i.b16 %v3796_v0, %v3803_v47 }
  0xc0   : > { %v636_v13 = vshrl.u32 %v3848_v56, 16  ;;  %2393 = vrot.lane.b32.xlu0 %v1071_v22, %s3344_s6  ;;  %v1140_v28 = vcombine.high %v3863_v32, %v3844_v60  ;;  %v1324_v8 = vcombine.high %v3877_v12, %v3874_v3  ;;  %v4002_v49 = vrot.slane %v1484_v16, %v3451_v34 }
  0xc1   : > { %v3962_v51 = vpop.permute.xlu1 %412  ;;  %v644_v47 = vshrl.u32 %v3891_v4, 16  ;;  %v643_v0 = vshrl.u32 %v3897_v36, 16  ;;  %v4009_v39 = vrot.slane %v1323_v35, %v3671_v18  ;;  %v1070_v60 = vcombine.high %v3755_v1, %v3907_v57 }
  0xc2   : > { %v3967_v10 = vpop.permute.xlu0 %410  ;;  %v660_v22 = vshrl.u32 %v3962_v51, 16  ;;  %v4016_v32 = vrot.slane %v1172_v50, %v3671_v18  ;;  %v4019_v3 = vrot.slane %v1500_v40, %v3451_v34  ;;  %v635_v12 = vshrl.u32 %v3859_v30, 16 }
  0xc3   : > { %2501 = vrot.lane.b32.xlu1 %v1074_v29, %s3347_s9  ;;  %v659_v29 = vshrl.u32 %v3967_v10, 16  ;;  %v4023_v16 = vrot.slane %v1291_v48, %v3671_v18  ;;  %v1275_v35 = vcombine.low %v3974_v62, %v3982_v44  ;;  %v652_v53 = vshrl.u32 %v3921_v58, 16 }
  0xc4   : > { %v651_v2 = vshrl.u32 %v3932_v11, 16  ;;  %2429 = vrot.lane.b32.xlu0 %v1072_v41, %s3345_s7  ;;  %v4032_v1 = vrot.slane %v1140_v28, %v3671_v18  ;;  %v1292_v50 = vcombine.high %v1226_v55, %v3954_v17  ;;  %v4039_v40 = vpack.i.b16 %v3822_v54, %v3828_v9 }
  0xc5   : > { %v3995_v59 = vpop.permute.xlu1 %416  ;;  %v4041_v48 = vpack.i.b16 %v644_v47, %v643_v0  ;;  %v1343_v15 = vcombine.low %v4023_v16, %v4009_v39  ;;  %v5095_v41 = vcombine.low %v3882_v46, %v3871_v31  ;;  %v4056_v54 = vrot.slane %v1324_v8, %v3671_v18 }
  0xc6   : > { %v4006_v38 = vpop.permute.xlu0 %414  ;;  %v1205_v17 = vcombine.low %v4032_v1, %v4016_v32  ;;  %v1308_v9 = vcombine.high %v3882_v46, %v3871_v31  ;;  %v4060_v55 = vpack.i.b16 %v636_v13, %v635_v12  ;;  %v4063_v47 = vrot.slane %v1275_v35, %v3671_v18 }
  0xc7   : > { %2375 = vrot.lane.b32.xlu1 %v1070_v60, %s3347_s9  ;;  %v4051_v28 = vrot.slane %v5095_v41, %v3671_v18  ;;  %v661_v60 = vpack.i.b16 %v660_v22, %v659_v29  ;;  %v1188_v0 = vcombine.high %v3813_v33, %v3810_v25  ;;  %v1563_v22 = vcombine.low %v4002_v49, %v4019_v3 }
  0xc8   : > { %v653_v29 = vpack.i.b16 %v652_v53, %v651_v2  ;;  %2395 = vrot.lane.b32.xlu0 %v1343_v15, %s3344_s6  ;;  %v4072_v8 = vrot.slane %v1292_v50, %v3671_v18  ;;  %v1276_v46 = vcombine.high %v3974_v62, %v3982_v44  ;;  %v1347_v13 = vcombine.low %v3553_v43, %v3990_v20 }
  0xc9   : > { %v4034_v57 = vpop.permute.xlu1 %420  ;;  %v4083_v33 = vrot.slane %v1651_v7, %v3451_v34  ;;  %v4086_v15 = vrot.slane %v1788_v6, %v3451_v34  ;;  %v1532_v53 = vcombine.high %v4041_v48, %v661_v60  ;;  %v1339_v12 = vcombine.low %v4063_v47, %v4051_v28 }
  0xca   : > { %v4045_v5 = vpop.permute.xlu0 %418  ;;  %v1345_v62 = vcombine.low %v4072_v8, %v4056_v54  ;;  %v4096_v44 = vrot.slane %v1308_v9, %v3671_v18  ;;  %v1348_v7 = vcombine.high %v3553_v43, %v3990_v20  ;;  %v1483_v6 = vcombine.low %v3562_v14, %v3930_v21 }
  0xcb   : > { %2323 = vrot.lane.b32.xlu1 %v1205_v17, %s3342_s29  ;;  %v1363_v35 = vcombine.low %v3572_v61, %v4039_v40  ;;  %v4106_v50 = vpack.i.b16 %v3848_v56, %v3859_v30  ;;  %v4110_v41 = vpack.i.b16 %v3921_v58, %v3932_v11  ;;  %v1516_v17 = vcombine.high %v4060_v55, %v653_v29 }
  0xcc   : > { %2269 = vrot.lane.b32.xlu0 %v1339_v12, %s3344_s6  ;;  %v4116_v43 = vrot.slane %v1276_v46, %v3671_v18  ;;  %v1499_v21 = vcombine.low %v3574_v63, %v3956_v52  ;;  %v641_v56 = vpack.i.b16 %v3891_v4, %v3897_v36  ;;  %v657_v30 = vpack.i.b16 %v3962_v51, %v3967_v10 }
  0xcd   : > { %v4074_v31 = vpop.permute.xlu1 %424  ;;  %v1156_v11 = vcombine.high %v3833_v37, %v3819_v42  ;;  %v1531_v20 = vcombine.low %v4041_v48, %v661_v60  ;;  %v4132_v9 = vrot.slane %v1532_v53, %v3451_v34  ;;  %v1344_v46 = vcombine.high %v4023_v16, %v4009_v39 }
  0xce   : > { %v4080_v25 = vpop.permute.xlu0 %422  ;;  %v1341_v63 = vcombine.low %v4116_v43, %v4096_v44  ;;  %v4139_v4 = vrot.slane %v1347_v13, %v3451_v34  ;;  %v4142_v36 = vrot.slane %v1348_v7, %v3451_v34  ;;  %v1364_v42 = vcombine.high %v3572_v61, %v4039_v40 }
  0xcf   : > { %2467 = vrot.lane.b32.xlu1 %v1345_v62, %s3346_s8  ;;  %v1202_v37 = vrot.slane %v1188_v0, %v3671_v18  ;;  %v1380_v52 = vcombine.high %v4106_v50, %v4110_v41  ;;  %v1515_v51 = vcombine.low %v4060_v55, %v653_v29  ;;  %v4151_v10 = vrot.slane %v1516_v17, %v3451_v34 }
  0xd0   : > { %2431 = vrot.lane.b32.xlu0 %v1344_v46, %s3345_s7  ;;  %v723_v39 = vshrl.u32 %v3646_v24, 16  ;;  %v4159_v61 = vrot.slane %v1483_v6, %v3451_v34  ;;  %v4162_v40 = vrot.slane %v1499_v21, %v3451_v34  ;;  %v1396_v48 = vcombine.high %v641_v56, %v657_v30 }
  0xd1   : > { %v4118_v14 = vpop.permute.xlu1 %437  ;;  %v1170_v55 = vrot.slane %v1156_v11, %v3671_v18  ;;  %v4168_v0 = vrot.slane %v1363_v35, %v3451_v34  ;;  %v4171_v29 = vrot.slane %v1531_v20, %v3451_v34  ;;  %v1340_v13 = vcombine.high %v4063_v47, %v4051_v28 }
  0xd2   : > { %v4126_v58 = vpop.permute.xlu0 %435  ;;  %v1595_v53 = vcombine.low %v4151_v10, %v4132_v9  ;;  %v4178_v12 = vrot.slane %v1364_v42, %v3451_v34  ;;  %v1379_v62 = vcombine.low %v4106_v50, %v4110_v41  ;;  %v1395_v7 = vcombine.low %v641_v56, %v657_v30 }
  0xd3   : > { %2341 = vrot.lane.b32.xlu1 %v1341_v63, %s3346_s8  ;;  %v1210_v6 = vcombine.high %v1170_v55, %v1202_v37  ;;  %v4183_v35 = vrot.slane %v1380_v52, %v3451_v34  ;;  %v4186_v17 = vrot.slane %v1515_v51, %v3451_v34  ;;  %v667_v21 = vshrl.u32 %v4006_v38, 16 }
  0xd4   : > { %v668_v28 = vshrl.u32 %v3995_v59, 16  ;;  %2305 = vrot.lane.b32.xlu0 %v1340_v13, %s3345_s7  ;;  %v4194_v11 = vrot.slane %v1396_v48, %v3451_v34  ;;  %v673_v50 = vpack.i.b16 %v4034_v57, %v4045_v5  ;;  %v676_v41 = vshrl.u32 %v4034_v57, 16 }
  0xd5   : > { %v4156_v16 = vpop.permute.xlu1 %441  ;;  %v1547_v30 = vcombine.low %v4159_v61, %v4162_v40  ;;  %v675_v20 = vshrl.u32 %v4045_v5, 16  ;;  %v1209_v46 = vcombine.low %v1170_v55, %v1202_v37  ;;  %v4206_v63 = vrot.slane %v1595_v53, %v3671_v18 }
  0xd6   : > { %v4164_v60 = vpop.permute.xlu0 %439  ;;  %v1579_v42 = vcombine.low %v4186_v17, %v4171_v29  ;;  %v1403_v52 = vrot.slane %v1395_v7, %v3451_v34  ;;  %v684_v57 = vshrl.u32 %v4074_v31, 16  ;;  %v1206_v51 = vcombine.high %v4032_v1, %v4016_v32 }
  0xd7   : > { %2485 = vrot.lane.b32.xlu1 %v1210_v6, %s3343_s30  ;;  %v1427_v48 = vcombine.low %v4142_v36, %v4178_v12  ;;  %v683_v13 = vshrl.u32 %v4080_v25, 16  ;;  %v724_v5 = vshrl.u32 %v4126_v58, 16  ;;  %v4223_v37 = vrot.slane %v1563_v22, %v3671_v18 }
  0xd8   : > { %2449 = vrot.lane.b32.xlu0 %v1209_v46, %s3342_s29  ;;  %v1411_v55 = vcombine.low %v4139_v4, %v4168_v0  ;;  %v1387_v32 = vrot.slane %v1379_v62, %v3451_v34  ;;  %v1635_v1 = vcombine.low %v673_v50, %v3600_v19  ;;  %v1636_v53 = vcombine.high %v673_v50, %v3600_v19 }
  0xd9   : > { %v4191_v47 = vpop.permute.xlu1 %445  ;;  %v1412_v6 = vcombine.high %v4139_v4, %v4168_v0  ;;  %v677_v46 = vpack.i.b16 %v676_v41, %v675_v20  ;;  %v1615_v22 = vcombine.low %v4223_v37, %v4206_v63  ;;  %v4238_v2 = vrot.slane %v1579_v42, %v3671_v18 }
  0xda   : > { %v4200_v56 = vpop.permute.xlu0 %443  ;;  %v1459_v62 = vcombine.low %v4183_v35, %v4194_v11  ;;  %v665_v19 = vpack.i.b16 %v3995_v59, %v4006_v38  ;;  %v681_v50 = vpack.i.b16 %v4074_v31, %v4080_v25  ;;  %v1346_v4 = vcombine.high %v4072_v8, %v4056_v54 }
  0xdb   : > { %5096 = vst [vmem:[#allocation13_spill] sm:$0xff] %v4200_v56  ;;  %2359 = vrot.lane.b32.xlu1 %v1206_v51, %s3343_s30  ;;  %v1444_v0 = vcombine.high %v1387_v32, %v1403_v52  ;;  %v669_v41 = vpack.i.b16 %v668_v28, %v667_v21  ;;  %v685_v20 = vpack.i.b16 %v684_v57, %v683_v13  ;;  %v5099_v57 = vld [vmem:[#allocation3_spill] sm:$0xff] }
  0xdc   : > { %v725_v51 = vpack.i.b16 %v724_v5, %v723_v39  ;;  %2397 = vrot.lane.b32.xlu0 %v1615_v22, %s3344_s6  ;;  %v4252_v42 = vrot.slane %v1547_v30, %v3671_v18  ;;  %v4258_v59 = vrot.slane %v1636_v53, %v3451_v34  ;;  %v1564_v38 = vcombine.high %v4002_v49, %v4019_v3 }
  0xdd   : > { %v4240_v56 = vpop.permute.xlu1 %449  ;;  %v5098_v54 = vcombine.low %v3938_v23, %v3944_v27  ;;  %v1771_v31 = vcombine.low %v677_v46, %v3604_v26  ;;  %v4275_v21 = vrot.slane %v1459_v62, %v3671_v18  ;;  %v1443_v28 = vcombine.low %v1387_v32, %v1403_v52 }
  0xde   : > { %v4231_v7 = vpop.permute.xlu0 %447  ;;  %5097 = vst [vmem:[#allocation14_spill] sm:$0xff] %v4240_v56  ;;  %v4255_v56 = vrot.slane %v1635_v1, %v3451_v34  ;;  %v1611_v25 = vcombine.low %v4252_v42, %v4238_v2  ;;  %v1772_v30 = vcombine.high %v677_v46, %v3604_v26  ;;  %v1619_v49 = vcombine.low %v665_v19, %v681_v50 }
  0xdf   : > { %2503 = vrot.lane.b32.xlu1 %v1346_v4, %s3347_s9  ;;  %v4267_v8 = vrot.slane %v5098_v54, %v3451_v34  ;;  %v1342_v3 = vcombine.high %v4116_v43, %v4096_v44  ;;  %v4281_v27 = vrot.slane %v1444_v0, %v3671_v18  ;;  %v1756_v23 = vcombine.high %v669_v41, %v685_v20  ;;  %v5103_v0 = vld [vmem:[#allocation2_spill] sm:$0xff] }
  0xe0   : > { %v1804_v13 = vcombine.high %v5099_v57, %v725_v51  ;;  %2271 = vrot.lane.b32.xlu0 %v1611_v25, %s3344_s6  ;;  %v4286_v5 = vrot.slane %v1427_v48, %v3671_v18  ;;  %v1596_v26 = vcombine.high %v4151_v10, %v4132_v9  ;;  %v1620_v52 = vcombine.high %v665_v19, %v681_v50 }
  0xe1   : > { %v4288_v1 = vpop.permute.xlu1 %453  ;;  %v1755_v32 = vcombine.low %v669_v41, %v685_v20  ;;  %v721_v44 = vpack.i.b16 %v4126_v58, %v3646_v24  ;;  %v4296_v43 = vrot.slane %v1412_v6, %v3671_v18  ;;  %v1803_v53 = vcombine.low %v5099_v57, %v725_v51 }
  0xe2   : > { %v4272_v39 = vpop.permute.xlu0 %451  ;;  %5100 = vst [vmem:[#allocation3_spill] sm:$0xff] %v4286_v5  ;;  %v1480_v48 = vcombine.high %v4286_v5, %v4275_v21  ;;  %v4302_v46 = vrot.slane %v1443_v28, %v3671_v18  ;;  %v1548_v9 = vcombine.high %v4159_v61, %v4162_v40  ;;  %v4307_v10 = vrot.slane %v1771_v31, %v3451_v34 }
  0xe3   : > { %2377 = vrot.lane.b32.xlu1 %v1342_v3, %s3347_s9  ;;  %v4310_v24 = vrot.slane %v1772_v30, %v3451_v34  ;;  %v1477_v58 = vcombine.low %v4296_v43, %v4281_v27  ;;  %v4315_v6 = vrot.slane %v1596_v26, %v3671_v18  ;;  %v4318_v22 = vrot.slane %v1756_v23, %v3451_v34  ;;  %v5104_v30 = vld [vmem:[#allocation12_spill] sm:$0xff] }
  0xe4   : > { %5101 = vst [vmem:[#allocation15_spill] sm:$0xff] %v4302_v46  ;;  %v4321_v62 = vrot.slane %v1804_v13, %v3451_v34  ;;  %2415 = vrot.lane.b32.xlu0 %v1480_v48, %s3341_s28  ;;  %v4327_v40 = vrot.slane %v1411_v55, %v3671_v18  ;;  %v1580_v19 = vcombine.high %v4186_v17, %v4171_v29 }
  0xe5   : > { %v4332_v50 = vrot.slane %v1619_v49, %v3451_v34  ;;  %v4335_v4 = vrot.slane %v1620_v52, %v3451_v34  ;;  %v1667_v41 = vcombine.low %v5103_v0, %v721_v44  ;;  %v4340_v20 = vrot.slane %v1564_v38, %v3671_v18  ;;  %v4351_v54 = vpop.permute.xlu1 %457 }
  0xe6   : > { %v4324_v61 = vpop.permute.xlu0 %455  ;;  %5102 = vst [vmem:[#allocation16_spill] sm:$0xff] %v4327_v40  ;;  %v4343_v51 = vrot.slane %v1755_v32, %v3451_v34  ;;  %v1668_v55 = vcombine.high %v5103_v0, %v721_v44  ;;  %v4347_v29 = vrot.slane %v1803_v53, %v3451_v34  ;;  %v1476_v17 = vcombine.high %v4327_v40, %v4302_v46 }
  0xe7   : > { %2325 = vrot.lane.b32.xlu1 %v1477_v58, %s3342_s29  ;;  %v1617_v31 = vcombine.low %v4340_v20, %v4315_v6  ;;  %v4356_v25 = vrot.slane %v1580_v19, %v3671_v18  ;;  %v1428_v38 = vcombine.high %v4142_v36, %v4178_v12  ;;  %v1460_v28 = vcombine.high %v4183_v35, %v4194_v11 }
  0xe8   : > { %v5105_v49 = vcombine.high %v3781_v45, %v5104_v30  ;;  %2289 = vrot.lane.b32.xlu0 %v1476_v17, %s3341_s28  ;;  %v1835_v57 = vcombine.low %v4318_v22, %v4310_v24  ;;  %v1867_v13 = vcombine.low %v4086_v15, %v4321_v62  ;;  %v1684_v36 = vcombine.high %v4332_v50, %v4255_v56 }
  0xe9   : > { %v1675_v45 = vrot.slane %v1667_v41, %v3451_v34  ;;  %v4381_v35 = vrot.slane %v1548_v9, %v3671_v18  ;;  %v4384_v11 = vrot.slane %v1668_v55, %v3451_v34  ;;  %v1616_v52 = vcombine.high %v4223_v37, %v4206_v63  ;;  %v4410_v0 = vpop.permute.xlu1 %461  ;;  %v5107_v37 = vld [vmem:[#allocation14_spill] sm:$0xff] }
  0xea   : > { %v4366_v3 = vrot.slane %v5105_v49, %v3451_v34  ;;  %v4386_v26 = vpop.permute.xlu0 %459  ;;  %v4391_v32 = vrot.slane %v1835_v57, %v3671_v18  ;;  %v4394_v44 = vrot.slane %v1867_v13, %v3671_v18  ;;  %v1474_v48 = vrot.slane %v1460_v28, %v3671_v18 }
  0xeb   : > { %2469 = vrot.lane.b32.xlu1 %v1617_v31, %s3346_s8  ;;  %v1613_v53 = vcombine.low %v4381_v35, %v4356_v25  ;;  %v1819_v9 = vcombine.low %v4343_v51, %v4307_v10  ;;  %v1851_v58 = vcombine.low %v4267_v8, %v4347_v29  ;;  %v4405_v63 = vpack.i.b16 %v4164_v60, %v4118_v14 }
  0xec   : > { %2433 = vrot.lane.b32.xlu0 %v1616_v52, %s3345_s7  ;;  %v1887_v41 = vcombine.low %v4391_v32, %v4394_v44  ;;  %v1442_v55 = vrot.slane %v1428_v38, %v3671_v18  ;;  %v1699_v28 = vcombine.low %v4335_v4, %v4258_v59  ;;  %v1716_v30 = vcombine.high %v4083_v33, %v1675_v45  ;;  %v5106_v38 = vld [vmem:[#allocation13_spill] sm:$0xff] }
  0xed   : > { %v4417_v17 = vrot.slane %v1819_v9, %v3671_v18  ;;  %v4420_v31 = vrot.slane %v1851_v58, %v3671_v18  ;;  %v1732_v49 = vcombine.high %v4366_v3, %v4384_v11  ;;  %v1612_v13 = vcombine.high %v4252_v42, %v4238_v2  ;;  %v466_v46 = vpop.permute.xlu1 %465 }
  0xee   : > { %v4432_v52 = vpack.i.b16 %v5106_v38, %v4156_v16  ;;  %v1482_v9 = vcombine.high %v1442_v55, %v1474_v48  ;;  %v4439_v19 = vpack.i.b16 %v4231_v7, %v4191_v47  ;;  %v4442_v57 = vpop.permute.xlu0 %463  ;;  %v4446_v2 = vrot.slane %v1699_v28, %v3671_v18 }
  0xef   : > { %2343 = vrot.lane.b32.xlu1 %v1613_v53, %s3346_s8  ;;  %v1883_v58 = vcombine.low %v4417_v17, %v4420_v31  ;;  %v1731_v42 = vcombine.low %v4366_v3, %v4384_v11  ;;  %v748_v53 = vshrl.u32 %v4231_v7, 16  ;;  %v763_v12 = vshrl.u32 %v4288_v1, 16 }
  0xf0   : > { %2307 = vrot.lane.b32.xlu0 %v1612_v13, %s3345_s7  ;;  %v1481_v40 = vcombine.low %v1442_v55, %v1474_v48  ;;  %v1683_v23 = vcombine.low %v4332_v50, %v4255_v56  ;;  %v1715_v28 = vcombine.low %v4083_v33, %v1675_v45  ;;  %v4460_v13 = vrot.slane %v1684_v36, %v3671_v18 }
  0xf1   : > { %v4456_v5 = vrot.slane %v1731_v42, %v3671_v18  ;;  %v4463_v3 = vrot.slane %v1716_v30, %v3671_v18  ;;  %v4467_v11 = vpack.i.b16 %v4324_v61, %v4288_v1  ;;  %v764_v48 = vshrl.u32 %v4324_v61, 16 }
  0xf2   : > { %v771_v56 = vshrl.u32 %v4351_v54, 16  ;;  %v1478_v50 = vcombine.high %v4296_v43, %v4281_v27  ;;  %v4477_v36 = vrot.slane %v1683_v23, %v3671_v18  ;;  %v4480_v45 = vrot.slane %v1715_v28, %v3671_v18  ;;  %v468_v23 = vpop.permute.xlu0 %467 }
  0xf3   : > { %2487 = vrot.lane.b32.xlu1 %v1482_v9, %s3343_s30  ;;  %v1752_v33 = vcombine.high %v4446_v2, %v4456_v5  ;;  %v1749_v1 = vcombine.low %v4460_v13, %v4463_v3  ;;  %v769_v61 = vpack.i.b16 %v4386_v26, %v4351_v54  ;;  %v772_v55 = vshrl.u32 %v4386_v26, 16 }
  0xf4   : > { %2451 = vrot.lane.b32.xlu0 %v1481_v40, %s3342_s29  ;;  %v779_v27 = vshrl.u32 %v4410_v0, 16  ;;  %v787_v43 = vshrl.u32 %v466_v46, 16  ;;  %v777_v40 = vpack.i.b16 %v4442_v57, %v4410_v0  ;;  %v1618_v30 = vcombine.high %v4340_v20, %v4315_v6 }
  0xf5   : > { %v1748_v9 = vcombine.high %v4477_v36, %v4480_v45  ;;  %v1888_v54 = vcombine.high %v4391_v32, %v4394_v44  ;;  %v1836_v26 = vcombine.high %v4318_v22, %v4310_v24  ;;  %v1868_v42 = vcombine.high %v4086_v15, %v4321_v62 }
  0xf6   : > { %v1820_v0 = vcombine.high %v4343_v51, %v4307_v10  ;;  %v780_v6 = vshrl.u32 %v4442_v57, 16  ;;  %v1852_v20 = vcombine.high %v4267_v8, %v4347_v29  ;;  %v5108_v24 = vcombine.high %v4335_v4, %v4258_v59 }
  0xf7   : > { %2361 = vrot.lane.b32.xlu1 %v1478_v50, %s3343_s30  ;;  %v4516_v15 = vrot.slane %v1732_v49, %v3671_v18  ;;  %v785_v62 = vpack.i.b16 %v468_v23, %v466_v46  ;;  %v4520_v10 = vrot.slane %v1836_v26, %v3671_v18  ;;  %v4523_v51 = vrot.slane %v1868_v42, %v3671_v18 }
  0xf8   : > { %2399 = vrot.lane.b32.xlu0 %v1887_v41, %s3344_s6  ;;  %v4513_v22 = vrot.slane %v5108_v24, %v3671_v18  ;;  %v4526_v8 = vrot.slane %v1820_v0, %v3671_v18  ;;  %v788_v29 = vshrl.u32 %v468_v23, 16  ;;  %v4529_v59 = vrot.slane %v1852_v20, %v3671_v18 }
  0xf9   : > { %v753_v41 = vpack.i.b16 %v4272_v39, %v5107_v37  ;;  %v756_v49 = vshrl.u32 %v4272_v39, 16  ;;  %v1614_v57 = vcombine.high %v4381_v35, %v4356_v25  ;;  %v1889_v50 = vcombine.low %v4520_v10, %v4523_v51 }
  0xfa   : > { %v5109_v23 = vshrl.u32 %v4118_v14, 16  ;;  %v1892_v42 = vcombine.high %v4405_v63, %v4439_v19  ;;  %v1885_v0 = vcombine.low %v4526_v8, %v4529_v59  ;;  %v1750_v39 = vcombine.high %v4460_v13, %v4463_v3 }
  0xfb   : > { %2505 = vrot.lane.b32.xlu1 %v1618_v30, %s3347_s9  ;;  %v5110_v30 = vshrl.u32 %v4164_v60, 16  ;;  %v765_v25 = vpack.i.b16 %v764_v48, %v763_v12  ;;  %v773_v35 = vpack.i.b16 %v772_v55, %v771_v56  ;;  %v1924_v20 = vcombine.high %v4467_v11, %v777_v40 }
  0xfc   : > { %2273 = vrot.lane.b32.xlu0 %v1883_v58, %s3344_s6  ;;  %v1940_v24 = vcombine.high %v769_v61, %v785_v62  ;;  %v781_v14 = vpack.i.b16 %v780_v6, %v779_v27  ;;  %v1923_v60 = vcombine.low %v4467_v11, %v777_v40  ;;  %v5111_v58 = vshrl.u32 %v4156_v16, 16 }
  0xfd   : > { %v733_v26 = vpack.i.b16 %v5110_v30, %v5109_v23  ;;  %v789_v23 = vpack.i.b16 %v788_v29, %v787_v43  ;;  %v1939_v30 = vcombine.low %v769_v61, %v785_v62  ;;  %v5112_v4 = vshrl.u32 %v5106_v38, 16 }
  0xfe   : > { %v5113_v28 = vshrl.u32 %v4191_v47, 16  ;;  %v5114_v48 = vshrl.u32 %v5107_v37, 16  ;;  %v1908_v55 = vcombine.high %v4432_v52, %v753_v41  ;;  %v1891_v11 = vcombine.low %v4405_v63, %v4439_v19 }
  0xff   : > { %2379 = vrot.lane.b32.xlu1 %v1614_v57, %s3347_s9  ;;  %v741_v46 = vpack.i.b16 %v5112_v4, %v5111_v58  ;;  %v1907_v61 = vcombine.low %v4432_v52, %v753_v41  ;;  %v4572_v16 = vrot.slane %v1892_v42, %v3451_v34  ;;  %v4575_v47 = vrot.slane %v1924_v20, %v3451_v34  ;;  %v470_v57 = vpop.permute.xlu1 %469 }
 0x100   : > { %v749_v12 = vpack.i.b16 %v748_v53, %v5113_v28  ;;  %v757_v56 = vpack.i.b16 %v756_v49, %v5114_v48  ;;  %2417 = vrot.lane.b32.xlu0 %v1752_v33, %s3341_s28  ;;  %v4578_v7 = vrot.slane %v1940_v24, %v3451_v34  ;;  %v1886_v37 = vcombine.high %v4526_v8, %v4529_v59  ;;  %v5117_v48 = vld [vmem:[#allocation15_spill] sm:$0xff] }
 0x101   : > { %v4584_v63 = vrot.slane %v1923_v60, %v3451_v34  ;;  %v2060_v19 = vcombine.high %v765_v25, %v781_v14  ;;  %v4587_v38 = vrot.slane %v1939_v30, %v3451_v34  ;;  %v2076_v52 = vcombine.high %v773_v35, %v789_v23 }
 0x102   : > { %v2028_v53 = vcombine.high %v733_v26, %v749_v12  ;;  %v4590_v33 = vrot.slane %v1908_v55, %v3451_v34  ;;  %v2044_v27 = vcombine.high %v741_v46, %v757_v56  ;;  %v1890_v43 = vcombine.high %v4520_v10, %v4523_v51 }
 0x103   : > { %2327 = vrot.lane.b32.xlu1 %v1749_v1, %s3342_s29  ;;  %v4595_v1 = vrot.slane %v1891_v11, %v3451_v34  ;;  %v4598_v40 = vrot.slane %v1907_v61, %v3451_v34  ;;  %v2027_v28 = vcombine.low %v733_v26, %v749_v12  ;;  %v2059_v6 = vcombine.low %v765_v25, %v781_v14 }
 0x104   : > { %2291 = vrot.lane.b32.xlu0 %v1748_v9, %s3341_s28  ;;  %v2003_v62 = vcombine.low %v4575_v47, %v4578_v7  ;;  %v4605_v29 = vrot.slane %v2060_v19, %v3451_v34  ;;  %v1987_v4 = vcombine.low %v4584_v63, %v4587_v38  ;;  %v2075_v41 = vcombine.low %v773_v35, %v789_v23  ;;  %v5115_v23 = vld [vmem:[#allocation3_spill] sm:$0xff] }
 0x105   : > { %v4610_v49 = vrot.slane %v2076_v52, %v3451_v34  ;;  %v4613_v9 = vrot.slane %v2028_v53, %v3451_v34  ;;  %v1971_v26 = vcombine.low %v4572_v16, %v4590_v33  ;;  %v2043_v42 = vcombine.low %v741_v46, %v757_v56  ;;  %v5118_v56 = vld [vmem:[#allocation16_spill] sm:$0xff] }
 0x106   : > { %v1955_v25 = vcombine.low %v4595_v1, %v4598_v40  ;;  %v4627_v35 = vrot.slane %v2027_v28, %v3451_v34  ;;  %v795_v20 = vshrl.u32 %v470_v57, 16  ;;  %v4631_v24 = vrot.slane %v2003_v62, %v3671_v18 }
 0x107   : > { %2471 = vrot.lane.b32.xlu1 %v1889_v50, %s3346_s8  ;;  %v4618_v50 = vrot.slane %v2044_v27, %v3451_v34  ;;  %v4634_v46 = vrot.slane %v2059_v6, %v3451_v34  ;;  %v4637_v14 = vrot.slane %v2075_v41, %v3451_v34  ;;  %v2139_v60 = vcombine.low %v4605_v29, %v4610_v49 }
 0x108   : > { %2435 = vrot.lane.b32.xlu0 %v1888_v54, %s3345_s7  ;;  %v4642_v32 = vrot.slane %v1987_v4, %v3671_v18  ;;  %v4645_v44 = vrot.slane %v2043_v42, %v3451_v34  ;;  %v1479_v30 = vcombine.low %v5115_v23, %v4275_v21  ;;  %v5116_v58 = vcombine.high %v4417_v17, %v4420_v31 }
 0x109   : > { %v2107_v54 = vcombine.low %v4613_v9, %v4618_v50  ;;  %v4659_v12 = vrot.slane %v1955_v25, %v3671_v18  ;;  %v1475_v55 = vcombine.low %v5118_v56, %v5117_v48  ;;  %v1751_v11 = vcombine.low %v4446_v2, %v4456_v5 }
 0x10a   : > { %v1747_v61 = vcombine.low %v4477_v36, %v4480_v45  ;;  %v5119_v19 = vcombine.high %v4513_v22, %v4516_v15  ;;  %v5120_v52 = vmov 0   ;;  %v2147_v53 = vrot.slane %v2139_v60, %v3671_v18 }
 0x10b   : > { %2345 = vrot.lane.b32.xlu1 %v1885_v0, %s3346_s8  ;;  %v4650_v0 = vrot.slane %v1971_v26, %v3671_v18  ;;  %v797_v17 = vpack.i.b16 %v5120_v52, %v795_v20  ;;  %v2123_v27 = vcombine.low %v4634_v46, %v4637_v14  ;;  %v2019_v28 = vcombine.low %v4659_v12, %v4642_v32 }
 0x10c   : > { %2309 = vrot.lane.b32.xlu0 %v5116_v58, %s3345_s7  ;;  %v5121_v6 = vcombine.low %v4513_v22, %v4516_v15  ;;  %v2115_v62 = vrot.slane %v2107_v54, %v3671_v18  ;;  %v2091_v4 = vcombine.low %v4627_v35, %v4645_v44  ;;  %v799_v13 = vpack.i.b16 %v5120_v52, %v5120_v52 }
 0x10d   : > { %v2023_v31 = vcombine.low %v4650_v0, %v4631_v24  ;;  %v4687_v41 = vrot.slane %v797_v17, %v3451_v34  ;;  %v2131_v25 = vrot.slane %v2123_v27, %v3671_v18  ;;  %v2004_v60 = vcombine.high %v4575_v47, %v4578_v7 }
 0x10e   : > { %v2159_v26 = vcombine.low %v2115_v62, %v2147_v53  ;;  %v2160_v22 = vcombine.high %v2115_v62, %v2147_v53  ;;  %v2099_v15 = vrot.slane %v2091_v4, %v3671_v18  ;;  %v2212_v54 = vcombine.high %v797_v17, %v799_v13 }
 0x10f   : > { %2489 = vrot.lane.b32.xlu1 %v5119_v19, %s3343_s30  ;;  %v4701_v20 = vrot.slane %v4687_v41, %v3671_v18  ;;  %v1972_v58 = vcombine.high %v4572_v16, %v4590_v33  ;;  %v2024_v19 = vcombine.high %v4650_v0, %v4631_v24  ;;  %v1988_v27 = vcombine.high %v4584_v63, %v4587_v38 }
 0x110   : > { %2453 = vrot.lane.b32.xlu0 %v5121_v6, %s3342_s29  ;;  %v2155_v3 = vcombine.low %v2099_v15, %v2131_v25  ;;  %v2018_v6 = vrot.slane %v2004_v60, %v3671_v18  ;;  %v4723_v47 = vrot.slane %v2212_v54, %v3451_v34  ;;  %v1956_v16 = vcombine.high %v4595_v1, %v4598_v40 }
 0x111   : > { %v1986_v7 = vrot.slane %v1972_v58, %v3671_v18  ;;  %v793_v33 = vpack.i.b16 %v5120_v52, %v470_v57  ;;  %v2020_v63 = vcombine.high %v4659_v12, %v4642_v32  ;;  %v2002_v62 = vrot.slane %v1988_v27, %v3671_v18 }
 0x112   : > { %v2140_v1 = vcombine.high %v4605_v29, %v4610_v49  ;;  %v2249_v8 = vrot.slane %v4723_v47, %v3671_v18  ;;  %v1970_v59 = vrot.slane %v1956_v16, %v3671_v18  ;;  %v2124_v29 = vcombine.high %v4634_v46, %v4637_v14  ;;  %v5122_v16 = vld [vmem:[#allocation7_spill] sm:$0xff] }
 0x113   : > { %2363 = vrot.lane.b32.xlu1 %v1750_v39, %s3343_s30  ;;  %v2025_v17 = vcombine.low %v1986_v7, %v2018_v6  ;;  %v2163_v57 = vcombine.high %v793_v33, %v799_v13  ;;  %v2170_v14 = vrot.slane %v793_v33, %v3451_v34 }
 0x114   : > { %2401 = vrot.lane.b32.xlu0 %v2159_v26, %s3344_s6  ;;  %v2021_v26 = vcombine.low %v1970_v59, %v2002_v62  ;;  %v4757_v54 = vrot.slane %v2124_v29, %v3671_v18 }
 0x115   : > { %v4693_v42 = vpop.permute.xlu1 %2285  ;;  %v2412_v40 = vpop.permute.xlu0 %2411  ;;  %v2177_v60 = vrot.slane %v2163_v57, %v3451_v34  ;;  %v4777_v51 = vrot.slane %v2170_v14, %v3671_v18  ;;  %v5125_v57 = vld [vmem:[#allocation4_spill] sm:$0xff] }
 0x117   : > { %2437 = vrot.lane.b32.xlu1 %v2160_v22, %s3345_s7  ;;  %v2154_v22 = vrot.slane %v2140_v1, %v3671_v18 }
 0x118   : > { %2275 = vrot.lane.b32.xlu0 %v2155_v3, %s3344_s6  ;;  %v2092_v3 = vcombine.high %v4627_v35, %v4645_v44  ;;  %v2156_v44 = vcombine.high %v2099_v15, %v2131_v25 }
 0x119   : > { %v4705_v39 = vpop.permute.xlu1 %2321 }
 0x11a   : > { %v2106_v46 = vrot.slane %v2092_v3, %v3671_v18  ;;  %v2208_v3 = vcombine.high %v4777_v51, %v5120_v52 }
 0x11b   : > { %2277 = vrot.lane.b32.xlu1 %v4701_v20, %s3344_s6 }
 0x11c   : > { %2419 = vrot.lane.b32.xlu0 %v2024_v19, %s3341_s28  ;;  %v4769_v19 = vrot.slane %v2177_v60, %v3671_v18  ;;  %v2157_v27 = vcombine.low %v2106_v46, %v4757_v54 }
 0x11d   : > { %v4716_v53 = vpop.permute.xlu1 %2483 }
 0x11e   : > { %v2210_v15 = vcombine.high %v4769_v19, %v5120_v52 }
 0x11f   : > { %2381 = vrot.lane.b32.xlu1 %v1886_v37, %s3347_s9  ;;  %v2108_v37 = vcombine.high %v4613_v9, %v4618_v50  ;;  %v2448_v9 = vpop.permute.xlu0 %2447 }
 0x120   : > { %2293 = vrot.lane.b32.xlu0 %v2020_v63, %s3341_s28  ;;  %v5123_v63 = vld [vmem:[#allocation5_spill] sm:$0xff] }
 0x121   : > { %v4735_v38 = vpop.permute.xlu1 %2357  ;;  %v2122_v49 = vrot.slane %v2108_v37, %v3671_v18  ;;  %v931_v10 = vcombine.low %v5123_v63, %v5122_v16  ;;  %v5124_v37 = vld [vmem:[#allocation6_spill] sm:$0xff]  ;;  %v2259_v16 = vcombine.high %v2249_v8, %v5120_v52 }
 0x123   : > { %2455 = vrot.lane.b32.xlu1 %v2025_v17, %s3342_s29  ;;  %v2161_v13 = vcombine.low %v2122_v49, %v2154_v22  ;;  %v2026_v17 = vcombine.high %v1986_v7, %v2018_v6  ;;  %v2022_v7 = vcombine.high %v1970_v59, %v2002_v62  ;;  %v2162_v59 = vcombine.high %v2122_v49, %v2154_v22 }
 0x124   : > { %2403 = vrot.lane.b32.xlu0 %v2249_v8, %s3344_s6 }
 0x125   : > { %v2268_v4 = vpop.permute.xlu1 %2267 }
 0x127   : > { %2329 = vrot.lane.b32.xlu1 %v2021_v26, %s3342_s29  ;;  %v935_v26 = vcombine.low %v5125_v57, %v5124_v37  ;;  %v2242_v37 = vcombine.high %v4723_v47, %v5120_v52  ;;  %v2714_v47 = vld [vmem:[%s5053_s2 + $0x8] sm:$0xff] }
 0x128   : > { %2507 = vrot.lane.b32.xlu0 %v1890_v43, %s3347_s9  ;;  %v2516_v43 = vsel %vm2513_vm0, %v931_v10, %v2268_v4  ;;  %v2178_v10 = vcombine.high %v2170_v14, %v5120_v52 }
 0x129   : > { %v2304_v50 = vpop.permute.xlu1 %2303  ;;  %v2534_v1 = vsel %vm2532_vm1, %v2516_v43, %v4693_v42 }
 0x12a   : > { %v4766_v35 = vpop.permute.xlu0 %2413  ;;  %v2547_v4 = vsel %vm2545_vm2, %v2534_v1, %v2304_v50 }
 0x12b   : > { %2473 = vrot.lane.b32.xlu1 %v2161_v13, %s3346_s8  ;;  %v2560_v42 = vsel %vm2558_vm3, %v2547_v4, %v4705_v39  ;;  %v5127_v4 = vld [vmem:[#allocation8_spill] sm:$0xff] }
 0x12c   : > { %2311 = vrot.lane.b32.xlu0 %v2156_v44, %s3345_s7 }
 0x12d   : > { %v2466_v58 = vpop.permute.xlu1 %2465 }
 0x12e   : > { %v4780_v25 = vpop.permute.xlu0 %2287 }
 0x12f   : > { %2347 = vrot.lane.b32.xlu1 %v2157_v27, %s3346_s8 }
 0x130   : > { %2421 = vrot.lane.b32.xlu0 %v2210_v15, %s3341_s28  ;;  %v2257_v15 = vcombine.high %v4701_v20, %v5120_v52 }
 0x131   : > { %v2340_v33 = vpop.permute.xlu1 %2339 }
 0x132   : > { %v2394_v29 = vpop.permute.xlu0 %2393  ;;  %v2573_v44 = vsel %vm2571_vm4, %v2560_v42, %v2340_v33  ;;  %v2227_v33 = vcombine.high %v4687_v41, %v5120_v52 }
 0x133   : > { %2491 = vrot.lane.b32.xlu1 %v2026_v17, %s3343_s30  ;;  %v2617_v6 = vsel %vm2513_vm0, %v935_v26, %v2394_v29  ;;  %v2158_v17 = vcombine.high %v2106_v46, %v4757_v54  ;;  %v5126_v26 = vld [vmem:[#allocation9_spill] sm:$0xff] }
 0x134   : > { %2295 = vrot.lane.b32.xlu0 %v2208_v3, %s3341_s28  ;;  %v2634_v27 = vsel %vm2532_vm1, %v2617_v6, %v2412_v40  ;;  %v2586_v40 = vsel %vm2584_vm5, %v2573_v44, %v4735_v38  ;;  %v2192_v38 = vrot.slane %v2178_v10, %v3671_v18  ;;  %v2241_v41 = vrot.slane %v2227_v33, %v3671_v18  ;;  %v5129_v6 = vld [vmem:[#allocation11_spill] sm:$0xff] }
 0x135   : > { %v2502_v13 = vpop.permute.xlu1 %2501  ;;  %v1207_v29 = vcombine.low %v5127_v4, %v5126_v26  ;;  %v2256_v44 = vrot.slane %v2242_v37, %v3671_v18  ;;  %v3304_v33 = vld [vmem:[%s3403_s25 + $0x69] sm:$0xff]  ;;  %v3307_v26 = vld [vmem:[%s3403_s25 + $0x61] sm:$0xff]  ;;  %v3308_v4 = vld [vmem:[%s3403_s25 + $0xb1] sm:$0xff] }
 0x136   : > { %v2430_v50 = vpop.permute.xlu0 %2429  ;;  %v2258_v57 = vcombine.high %v2241_v41, %v5120_v52 }
 0x137   : > { %2365 = vrot.lane.b32.xlu1 %v2022_v7, %s3343_s30  ;;  %v2646_v62 = vsel %vm2545_vm2, %v2634_v27, %v2430_v50 }
 0x138   : > { %v2658_v43 = vsel %vm2558_vm3, %v2646_v62, %v2448_v9  ;;  %2439 = vrot.lane.b32.xlu0 %v2259_v16, %s3345_s7  ;;  %v2193_v9 = vcombine.high %v2177_v60, %v5120_v52  ;;  %v2209_v60 = vcombine.high %v2192_v38, %v5120_v52  ;;  %v2715_v62 = vld [vmem:[%s5053_s2 + $0x10] sm:$0xff] }
 0x139   : > { %v2376_v63 = vpop.permute.xlu1 %2375  ;;  %v2670_v39 = vsel %vm2571_vm4, %v2658_v43, %v2466_v58 }
 0x13a   : > { %v2396_v8 = vpop.permute.xlu0 %2395  ;;  %v2682_v14 = vsel %vm2584_vm5, %v2670_v39, %v4716_v53  ;;  %v2599_v22 = vsel %vm2597_vm6, %v2586_v40, %v2376_v63  ;;  %v2207_v53 = vrot.slane %v2193_v9, %v3671_v18 }
 0x13b   : > { %2509 = vrot.lane.b32.xlu1 %v2162_v59, %s3347_s9  ;;  %v2694_v58 = vsel %vm2597_vm6, %v2682_v14, %v2502_v13  ;;  %v2620_v3 = vsel %vm2513_vm0, %v1207_v29, %v2396_v8  ;;  %v5128_v13 = vld [vmem:[#allocation10_spill] sm:$0xff] }
 0x13c   : > { %2313 = vrot.lane.b32.xlu0 %v2257_v15, %s3345_s7  ;;  %2753 = vmatprep.subr.bf16.mxu0 %v2694_v58  ;;  %v1203_v7 = vcombine.low %v5129_v6, %v5128_v13  ;;  %v2636_v16 = vsel %vm2532_vm1, %v2620_v3, %v4766_v35  ;;  %v2211_v15 = vcombine.high %v2207_v53, %v5120_v52  ;;  %v3309_v13 = vld [vmem:[%s3403_s25 + $0x79] sm:$0xff] }
 0x13d   : > { %v2324_v49 = vpop.permute.xlu1 %2323  ;;  %2754 = vmatpush1.bf16.msra.mxu0 %v2599_v22 }
 0x13e   : > { %v2270_v20 = vpop.permute.xlu0 %2269 }
 0x13f   : > { %2383 = vrot.lane.b32.xlu1 %v2158_v17, %s3347_s9  ;;  %v2519_v27 = vsel %vm2513_vm0, %v1203_v7, %v2270_v20 }
 0x140   : > { %2457 = vrot.lane.b32.xlu0 %v2207_v53, %s3342_s29  ;;  %v2536_v59 = vsel %vm2532_vm1, %v2519_v27, %v4780_v25 }
 0x141   : > { %v2468_v1 = vpop.permute.xlu1 %2467 }
 0x142   : > { %v2432_v54 = vpop.permute.xlu0 %2431 }
 0x143   : > { %2367 = vrot.lane.b32.xlu1 %v2209_v60, %s3343_s30  ;;  %v2648_v63 = vsel %vm2545_vm2, %v2636_v16, %v2432_v54  ;;  %v3305_v60 = vld [vmem:[%s3403_s25 + $0x81] sm:$0xff] }
 0x144   : > { %2331 = vrot.lane.b32.xlu0 %v2192_v38, %s3342_s29  ;;  %v2260_v38 = vcombine.high %v2256_v44, %v5120_v52 }
 0x145   : > { %v2342_v46 = vpop.permute.xlu1 %2341 }
 0x146   : > { %v2306_v42 = vpop.permute.xlu0 %2305 }
 0x147   : > { %2385 = vrot.lane.b32.xlu1 %v2258_v57, %s3347_s9  ;;  %v2549_v40 = vsel %vm2545_vm2, %v2536_v59, %v2306_v42 }
 0x148   : > { %2475 = vrot.lane.b32.xlu0 %v2256_v44, %s3346_s8  ;;  %v2562_v14 = vsel %vm2558_vm3, %v2549_v40, %v2324_v49  ;;  %v3310_v44 = vld [vmem:[%s3403_s25 + $0x91] sm:$0xff] }
 0x149   : > { %v2486_v50 = vpop.permute.xlu1 %2485  ;;  %v2575_v58 = vsel %vm2571_vm4, %v2562_v14, %v2342_v46  ;;  %v3306_v46 = vld [vmem:[%s3403_s25 + $0x99] sm:$0xff] }
 0x14a   : > { %v2450_v10 = vpop.permute.xlu0 %2449 }
 0x14b   : > { %2723 = vperm.xlu1 %3301, %v2714_v47   ;;  %v2660_v43 = vsel %vm2558_vm3, %v2648_v63, %v2450_v10 }
 0x14c   : > { %v2672_v8 = vsel %vm2571_vm4, %v2660_v43, %v2468_v1  ;;  %2349 = vrot.lane.b32.xlu0 %v2241_v41, %s3346_s8  ;;  %v2713_v1 = vld [vmem:[%s5053_s2] sm:$0xff] }
 0x14d   : > { %v2360_v39 = vpop.permute.xlu1 %2359  ;;  %v2684_v22 = vsel %vm2584_vm5, %v2672_v8, %v2486_v50 }
 0x14e   : > { %v2398_v35 = vpop.permute.xlu0 %2397  ;;  %v2588_v49 = vsel %vm2584_vm5, %v2575_v58, %v2360_v39 }
 0x14f   : > { %2728 = vperm.xlu1 %3301, %v2715_v62   ;;  %v2623_v42 = vsel %vm2513_vm0, %v1479_v30, %v2398_v35  ;;  %v3311_v62 = vld [vmem:[%s3403_s25 + $0xa9] sm:$0xff] }
 0x150   : > { %2493 = vrot.lane.b32.xlu0 %v2211_v15, %s3343_s30 }
 0x151   : > { %v2504_v9 = vpop.permute.xlu1 %2503 }
 0x152   : > { %v2697_v25 = vsel %vm2597_vm6, %v2684_v22, %v2504_v9  ;;  %v2272_v17 = vpop.permute.xlu0 %2271 }
 0x153   : > { %2755 = vmatprep.subr.bf16.mxu0 %v2697_v25  ;;  %2877 = vrot.lane.b32.xlu1 %v3304_v33, %s3337_s26  ;;  %v2522_v50 = vsel %vm2513_vm0, %v1475_v55, %v2272_v17 }
 0x154   : > { %2511 = vrot.lane.b32.xlu0 %v2260_v38, %s3347_s9 }
 0x155   : > { %v2378_v20 = vpop.permute.xlu1 %2377 }
 0x156   : > { %v2602_v53 = vsel %vm2597_vm6, %v2588_v49, %v2378_v20  ;;  %v2416_v41 = vpop.permute.xlu0 %2415 }
 0x157   : > { %2756 = vmatpush1.bf16.msra.mxu0 %v2602_v53  ;;  %2881 = vrot.lane.b32.xlu1 %v3305_v60, %s3337_s26  ;;  %v2638_v47 = vsel %vm2532_vm1, %v2623_v42, %v2416_v41 }
 0x158   : > { %2718 = vperm.xlu0 %3300, %v2713_v1  }
 0x159   : > { %v2326_v54 = vpop.permute.xlu1 %2325 }
 0x15a   : > { %v2290_v37 = vpop.permute.xlu0 %2289 }
 0x15b   : > { %2885 = vrot.lane.b32.xlu1 %v3306_v46, %s3337_s26  ;;  %v2538_v63 = vsel %vm2532_vm1, %v2522_v50, %v2290_v37 }
 0x15c   : > { %2875 = vrot.lane.b32.xlu0 %v3307_v26, %s3337_s26 }
 0x15d   : > { %v2470_v57 = vpop.permute.xlu1 %2469 }
 0x15e   : > { %v2434_v29 = vpop.permute.xlu0 %2433 }
 0x15f   : > { %2889 = vrot.lane.b32.xlu1 %v3308_v4, %s3337_s26  ;;  %v2650_v27 = vsel %vm2545_vm2, %v2638_v47, %v2434_v29 }
 0x160   : > { %2879 = vrot.lane.b32.xlu0 %v3309_v13, %s3337_s26 }
 0x161   : > { %v2344_v3 = vpop.permute.xlu1 %2343 }
 0x162   : > { %v2308_v6 = vpop.permute.xlu0 %2307 }
 0x163   : > { %v2551_v23 = vsel %vm2545_vm2, %v2538_v63, %v2308_v6 }
 0x164   : > { %2883 = vrot.lane.b32.xlu0 %v3310_v44, %s3337_s26  ;;  %v2564_v48 = vsel %vm2558_vm3, %v2551_v23, %v2326_v54 }
 0x165   : > { %v2488_v7 = vpop.permute.xlu1 %2487  ;;  %v2577_v39 = vsel %vm2571_vm4, %v2564_v48, %v2344_v3 }
 0x166   : > { %v2452_v16 = vpop.permute.xlu0 %2451 }
 0x167   : > { %v2662_v10 = vsel %vm2558_vm3, %v2650_v27, %v2452_v16 }
 0x168   : > { %v2674_v30 = vsel %vm2571_vm4, %v2662_v10, %v2470_v57  ;;  %2887 = vrot.lane.b32.xlu0 %v3311_v62, %s3337_s26 }
 0x169   : > { %v2362_v21 = vpop.permute.xlu1 %2361  ;;  %v2686_v56 = vsel %vm2584_vm5, %v2674_v30, %v2488_v7 }
 0x16a   : > { %v2400_v59 = vpop.permute.xlu0 %2399  ;;  %v2590_v8 = vsel %vm2584_vm5, %v2577_v39, %v2362_v21 }
 0x16b   : > { %v2626_v37 = vsel %vm2513_vm0, %v1751_v11, %v2400_v59 }
 0x16d   : > { %v2506_v55 = vpop.permute.xlu1 %2505 }
 0x16e   : > { %v2700_v43 = vsel %vm2597_vm6, %v2686_v56, %v2506_v55  ;;  %v2274_v40 = vpop.permute.xlu0 %2273 }
 0x16f   : > { %2757 = vmatprep.subr.bf16.mxu0 %v2700_v43  ;;  %v2525_v57 = vsel %vm2513_vm0, %v1747_v61, %v2274_v40 }
 0x171   : > { %v2380_v35 = vpop.permute.xlu1 %2379 }
 0x172   : > { %v2605_v15 = vsel %vm2597_vm6, %v2590_v8, %v2380_v35  ;;  %v2418_v14 = vpop.permute.xlu0 %2417 }
 0x173   : > { %2758 = vmatpush1.bf16.msra.mxu0 %v2605_v15  ;;  %v2640_v26 = vsel %vm2532_vm1, %v2626_v37, %v2418_v14 }
 0x175   : > { %v2328_v22 = vpop.permute.xlu1 %2327 }
 0x176   : > { %v2292_v9 = vpop.permute.xlu0 %2291 }
 0x177   : > { %v2540_v29 = vsel %vm2532_vm1, %v2525_v57, %v2292_v9 }
 0x179   : > { %v2472_v25 = vpop.permute.xlu1 %2471 }
 0x17a   : > { %v2436_v33 = vpop.permute.xlu0 %2435 }
 0x17b   : > { %v2652_v3 = vsel %vm2545_vm2, %v2640_v26, %v2436_v33 }
 0x17d   : > { %v2346_v58 = vpop.permute.xlu1 %2345 }
 0x17e   : > { %v2310_v17 = vpop.permute.xlu0 %2309 }
 0x17f   : > { %v2553_v6 = vsel %vm2545_vm2, %v2540_v29, %v2310_v17 }
 0x180   : > { %v2566_v2 = vsel %vm2558_vm3, %v2553_v6, %v2328_v22 }
 0x181   : > { %v2490_v38 = vpop.permute.xlu1 %2489  ;;  %v2579_v45 = vsel %vm2571_vm4, %v2566_v2, %v2346_v58 }
 0x182   : > { %v2454_v49 = vpop.permute.xlu0 %2453 }
 0x183   : > { %v2664_v7 = vsel %vm2558_vm3, %v2652_v3, %v2454_v49 }
 0x184   : > { %v2676_v11 = vsel %vm2571_vm4, %v2664_v7, %v2472_v25 }
 0x185   : > { %v2364_v20 = vpop.permute.xlu1 %2363  ;;  %v2688_v61 = vsel %vm2584_vm5, %v2676_v11, %v2490_v38 }
 0x186   : > { %v2402_v53 = vpop.permute.xlu0 %2401  ;;  %v2592_v44 = vsel %vm2584_vm5, %v2579_v45, %v2364_v20 }
 0x187   : > { %v2629_v23 = vsel %vm2513_vm0, %v2023_v31, %v2402_v53 }
 0x189   : > { %v2438_v1 = vpop.permute.xlu1 %2437 }
 0x18a   : > { %v2276_v60 = vpop.permute.xlu0 %2275 }
 0x18b   : > { %v2528_v48 = vsel %vm2513_vm0, %v2019_v28, %v2276_v60 }
 0x18d   : > { %v2278_v41 = vpop.permute.xlu1 %2277 }
 0x18e   : > { %v2420_v54 = vpop.permute.xlu0 %2419  ;;  %v2531_v33 = vsel %vm2513_vm0, %v4777_v51, %v2278_v41 }
 0x18f   : > { %v2642_v30 = vsel %vm2532_vm1, %v2629_v23, %v2420_v54 }
 0x190   : > { %v2654_v56 = vsel %vm2545_vm2, %v2642_v30, %v2438_v1 }
 0x191   : > { %v2382_v46 = vpop.permute.xlu1 %2381 }
 0x192   : > { %v2294_v4 = vpop.permute.xlu0 %2293  ;;  %v2608_v27 = vsel %vm2597_vm6, %v2592_v44, %v2382_v46 }
 0x193   : > { %v2542_v55 = vsel %vm2532_vm1, %v2528_v48, %v2294_v4  ;;  %v2748_v4 = vsel %vm2746_vm7, 65535, %v5120_v52  ;;  %v3348_v48 = vmov 0.0  }
 0x195   : > { %v2456_v13 = vpop.permute.xlu1 %2455 }
 0x196   : > { %v2404_v5 = vpop.permute.xlu0 %2403  ;;  %v2666_v43 = vsel %vm2558_vm3, %v2654_v56, %v2456_v13 }
 0x197   : > { %v2632_v1 = vsel %vm2513_vm0, %v4769_v19, %v2404_v5  ;;  %v3302_v5 = vld [vmem:[%s5052_s1] sm:$0xff]  }
 0x199   : > { %v2330_v36 = vpop.permute.xlu1 %2329 }
 0x19a   : > { %v2508_v42 = vpop.permute.xlu0 %2507 }
 0x19b   : > { %v2703_v47 = vsel %vm2597_vm6, %v2688_v61, %v2508_v42 }
 0x19c   : > { %2759 = vmatprep.subr.bf16.mxu0 %v2703_v47 }
 0x19d   : > { %v2474_v50 = vpop.permute.xlu1 %2473  ;;  %2760 = vmatpush1.bf16.msra.mxu0 %v2608_v27 }
 0x19e   : > { %v2312_v16 = vpop.permute.xlu0 %2311  ;;  %v2678_v24 = vsel %vm2571_vm4, %v2666_v43, %v2474_v50 }
 0x19f   : > { %v2555_v39 = vsel %vm2545_vm2, %v2542_v55, %v2312_v16 }
 0x1a0   : > { %v2568_v32 = vsel %vm2558_vm3, %v2555_v39, %v2330_v36  ;;  %v3303_v36 = vld [vmem:[%s5052_s1 + $0x8] ss:$0 sps:$4 sm:$0xff]  }
 0x1a1   : > { %v2348_v63 = vpop.permute.xlu1 %2347 }
 0x1a2   : > { %v2422_v10 = vpop.permute.xlu0 %2421  ;;  %v2581_v12 = vsel %vm2571_vm4, %v2568_v32, %v2348_v63 }
 0x1a3   : > { %v2644_v60 = vsel %vm2532_vm1, %v2632_v1, %v2422_v10 }
 0x1a5   : > { %v2492_v21 = vpop.permute.xlu1 %2491 }
 0x1a6   : > { %v2296_v62 = vpop.permute.xlu0 %2295  ;;  %v2690_v31 = vsel %vm2584_vm5, %v2678_v24, %v2492_v21 }
 0x1a7   : > { %v2544_v58 = vsel %vm2532_vm1, %v2531_v33, %v2296_v62 }
 0x1a9   : > { %v2366_v59 = vpop.permute.xlu1 %2365 }
 0x1aa   : > { %v2440_v0 = vpop.permute.xlu0 %2439  ;;  %v2594_v35 = vsel %vm2584_vm5, %v2581_v12, %v2366_v59 }
 0x1ab   : > { %v2656_v46 = vsel %vm2545_vm2, %v2644_v60, %v2440_v0  ;;  %v3107_v60 = vld [vmem:[%s5055_s4] sm:$0xf] }
 0x1ad   : > { %v2510_v40 = vpop.permute.xlu1 %2509 }
 0x1ae   : > { %v2706_v8 = vsel %vm2597_vm6, %v2690_v31, %v2510_v40  ;;  %v2314_v28 = vpop.permute.xlu0 %2313 }
 0x1af   : > { %2761 = vmatprep.subr.bf16.mxu0 %v2706_v8  ;;  %v2557_v17 = vsel %vm2545_vm2, %v2544_v58, %v2314_v28 }
 0x1b1   : > { %v2384_v15 = vpop.permute.xlu1 %2383 }
 0x1b2   : > { %v2611_v14 = vsel %vm2597_vm6, %v2594_v35, %v2384_v15  ;;  %v2458_v22 = vpop.permute.xlu0 %2457 }
 0x1b3   : > { %2762 = vmatpush1.bf16.msra.mxu0 %v2611_v14  ;;  %v2668_v41 = vsel %vm2558_vm3, %v2656_v46, %v2458_v22 }
 0x1b5   : > { %v2368_v38 = vpop.permute.xlu1 %2367 }
 0x1b6   : > { %v2332_v9 = vpop.permute.xlu0 %2331 }
 0x1b7   : > { %v2570_v20 = vsel %vm2558_vm3, %v2557_v17, %v2332_v9 }
 0x1b9   : > { %v2386_v37 = vpop.permute.xlu1 %2385 }
 0x1ba   : > { %v2476_v25 = vpop.permute.xlu0 %2475 }
 0x1bb   : > { %v2680_v57 = vsel %vm2571_vm4, %v2668_v41, %v2476_v25 }
 0x1be   : > { %v2350_v49 = vpop.permute.xlu0 %2349 }
 0x1bf   : > { %v2583_v53 = vsel %vm2571_vm4, %v2570_v20, %v2350_v49 }
 0x1c0   : > { %v2596_v51 = vsel %vm2584_vm5, %v2583_v53, %v2368_v38 }
 0x1c1   : > { %v2614_v19 = vsel %vm2597_vm6, %v2596_v51, %v2386_v37 }
 0x1c2   : > { %v2494_v54 = vpop.permute.xlu0 %2493  ;;  %v2749_v7 = vand.u32 %v2748_v4, %v2614_v19 }
 0x1c3   : > { %v2692_v26 = vsel %vm2584_vm5, %v2680_v57, %v2494_v54 }
 0x1c6   : > { %v2512_v29 = vpop.permute.xlu0 %2511 }
 0x1c7   : > { %v2709_v3 = vsel %vm2597_vm6, %v2692_v26, %v2512_v29 }
 0x1c8   : > { %v2751_v13 = vand.u32 %v2748_v4, %v2709_v3 }
 0x1ca   : > { %v4961_v6 = vpop.permute.xlu1 %2723  ;;  %2763 = vmatprep.subr.bf16.mxu0 %v2751_v13 }
 0x1cb   : > { %2764 = vmatpush1.bf16.msra.mxu0 %v2749_v7 }
 0x1ce   : > { %v4966_v2 = vpop.permute.xlu1 %2728  ;;  %3255 = vmatmul.mubr.msk.bf16.vlgmr.msra.gmra.mrb[0].mxu0 %vm2739_vm8, %v3302_v5 }
 0x1cf   : > { %2795 = vmatprep.mubr.bf16.mxu0 %v5120_v52 }
 0x1d2   : > { %v2878_v11 = vpop.permute.xlu1 %2877 }
 0x1d6   : > { %v2882_v45 = vpop.permute.xlu1 %2881  ;;  %3256 = vmatmul.mubr.msk.bf16.gmra.mrb[4].mxu0 %vm2739_vm8, %v3303_v36 }
 0x1d7   : > { %v4972_v61 = vpop.permute.xlu0 %2718 }
 0x1da   : > { %v2886_v42 = vpop.permute.xlu1 %2885 }
 0x1db   : > { %v2967_v44 = vcombine.low %v2878_v11, %v2886_v42  ;;  %v2876_v47 = vpop.permute.xlu0 %2875  ;;  %v2968_v25 = vcombine.high %v2878_v11, %v2886_v42 }
 0x1dd   : > { %v2975_v27 = vrot.slane %v2967_v44, %v3451_v34  ;;  %v2982_v49 = vrot.slane %v2968_v25, %v3451_v34 }
 0x1de   : > { %v2890_v50 = vpop.permute.xlu1 %2889 }
 0x1df   : > { %v2983_v16 = vcombine.low %v2882_v45, %v2890_v50  ;;  %v2880_v63 = vpop.permute.xlu0 %2879  ;;  %v2984_v33 = vcombine.high %v2882_v45, %v2890_v50 }
 0x1e1   : > { %v2991_v10 = vrot.slane %v2983_v16, %v3451_v34  ;;  %v2998_v20 = vrot.slane %v2984_v33, %v3451_v34 }
 0x1e3   : > { %v2999_v52 = vcombine.low %v2975_v27, %v2991_v10  ;;  %v2884_v21 = vpop.permute.xlu0 %2883  ;;  %v3000_v23 = vcombine.high %v2975_v27, %v2991_v10  ;;  %v3015_v1 = vcombine.low %v2982_v49, %v2998_v20 }
 0x1e4   : > { %v2899_v62 = vcombine.low %v2876_v47, %v2884_v21  ;;  %v2900_v59 = vcombine.high %v2876_v47, %v2884_v21 }
 0x1e5   : > { %v4977_v30 = vrot.slane %v2999_v52, %v3671_v18  ;;  %v3014_v43 = vrot.slane %v3000_v23, %v3671_v18  ;;  %v3023_v46 = vrot.slane %v3015_v1, %v3671_v18  ;;  %v2814_v23 = vld [vmem:[%s5054_s3] sm:$0x3] }
 0x1e6   : > { %v2907_v39 = vrot.slane %v2899_v62, %v3451_v34  ;;  %v2914_v24 = vrot.slane %v2900_v59, %v3451_v34 }
 0x1e7   : > { %v3031_v56 = vcombine.high %v4977_v30, %v3348_v48  ;;  %v2888_v55 = vpop.permute.xlu0 %2887  ;;  %v3032_v32 = vcombine.high %v3014_v43, %v3348_v48  ;;  %v3033_v51 = vcombine.high %v3023_v46, %v3348_v48 }
 0x1e8   : > { %v2915_v0 = vcombine.low %v2880_v63, %v2888_v55  ;;  %v2916_v31 = vcombine.high %v2880_v63, %v2888_v55 }
 0x1e9   : > { %3064 = vrot.lane.b32.xlu1 %v3031_v56, %s3344_s6 }
 0x1ea   : > { %v2923_v40 = vrot.slane %v2915_v0, %v3451_v34  ;;  %v2930_v8 = vrot.slane %v2916_v31, %v3451_v34  ;;  %v3016_v34 = vcombine.high %v2982_v49, %v2998_v20 }
 0x1ec   : > { %v2931_v12 = vcombine.low %v2907_v39, %v2923_v40  ;;  %v2947_v28 = vcombine.low %v2914_v24, %v2930_v8  ;;  %v2932_v35 = vcombine.high %v2907_v39, %v2923_v40  ;;  %v2948_v58 = vcombine.high %v2914_v24, %v2930_v8 }
 0x1ed   : > { %3068 = vrot.lane.b32.xlu1 %v3014_v43, %s3341_s28  ;;  %v3030_v41 = vrot.slane %v3016_v34, %v3671_v18 }
 0x1ee   : > { %v4988_v15 = vrot.slane %v2931_v12, %v3671_v18  ;;  %v2955_v14 = vrot.slane %v2947_v28, %v3671_v18  ;;  %v2946_v9 = vrot.slane %v2932_v35, %v3671_v18  ;;  %v2962_v53 = vrot.slane %v2948_v58, %v3671_v18 }
 0x1ef   : > { %v3034_v37 = vcombine.high %v3030_v41, %v3348_v48 }
 0x1f0   : > { %v2963_v22 = vcombine.high %v4988_v15, %v3348_v48  ;;  %v2965_v17 = vcombine.high %v2955_v14, %v3348_v48  ;;  %v2964_v38 = vcombine.high %v2946_v9, %v3348_v48  ;;  %v2966_v54 = vcombine.high %v2962_v53, %v3348_v48 }
 0x1f1   : > { %3072 = vrot.lane.b32.xlu1 %v3032_v32, %s3345_s7 }
 0x1f2   : > { %3036 = vrot.lane.b32.xlu0 %v2963_v22, %s3344_s6 }
 0x1f5   : > { %3048 = vrot.lane.b32.xlu1 %v2955_v14, %s3342_s29 }
 0x1f6   : > { %3040 = vrot.lane.b32.xlu0 %v2946_v9, %s3341_s28  ;;  %s3261_s28 = sshll.u32 %s5135_s18, 3 }
 0x1f7   : > { %s246_s6 = scalar_lea.vmem %s5056_s5, %s3261_s28 }
 0x1f9   : > { %3052 = vrot.lane.b32.xlu1 %v2965_v17, %s3346_s8 }
 0x1fa   : > { %3044 = vrot.lane.b32.xlu0 %v2964_v38, %s3345_s7 }
 0x1fd   : > { %3056 = vrot.lane.b32.xlu1 %v2962_v53, %s3343_s30 }
 0x1fe   : > { %3110 = vperm.xlu0 %3300, %v3107_v60  }
 0x201   : > { %3060 = vrot.lane.b32.xlu1 %v2966_v54, %s3347_s9 }
 0x202   : > { %3076 = vrot.lane.b32.xlu0 %v3023_v46, %s3342_s29 }
 0x206   : > { %3080 = vrot.lane.b32.xlu0 %v3033_v51, %s3346_s8 }
 0x20a   : > { %3084 = vrot.lane.b32.xlu0 %v3030_v41, %s3343_s30 }
 0x20e   : > { %3088 = vrot.lane.b32.xlu0 %v3034_v37, %s3347_s9 }
 0x264   : > { %v3037_v62 = vpop.permute.xlu0 %3036 }
 0x265   : > { %v3091_v0 = vsel %vm2513_vm0, %v4988_v15, %v3037_v62 }
 0x268   : > { %v3041_v59 = vpop.permute.xlu0 %3040 }
 0x269   : > { %v3092_v40 = vsel %vm2532_vm1, %v3091_v0, %v3041_v59 }
 0x26c   : > { %v3045_v56 = vpop.permute.xlu0 %3044 }
 0x26d   : > { %v3093_v28 = vsel %vm2545_vm2, %v3092_v40, %v3045_v56 }
 0x27d   : > { %v3111_v43 = vpop.permute.xlu0 %3110 }
 0x281   : > { %v3077_v24 = vpop.permute.xlu0 %3076 }
 0x285   : > { %v3081_v12 = vpop.permute.xlu0 %3080 }
 0x289   : > { %v3085_v15 = vpop.permute.xlu0 %3084 }
 0x28d   : > { %v3089_v38 = vpop.permute.xlu0 %3088 }
 0x2a1   : > { %v2787_v57 = vpop.f32.mrb[0].mxu0 }
 0x2a2   : > { %v2788_v26 = vadd.f32 %v2787_v57, %v4972_v61  ;;  %v2789_v4 = vpop.f32.mrb[1].mxu0 }
 0x2a3   : > { %v2790_v29 = vadd.f32 %v2789_v4, %v4972_v61  ;;  %v2791_v19 = vpop.f32.mrb[2].mxu0 }
 0x2a4   : > { %v2792_v3 = vadd.f32 %v2791_v19, %v4961_v6  ;;  %v2793_v13 = vpop.f32.mrb[3].mxu0  ;;  %v2804_v5 = vmax.f32 %v2788_v26, 0.0 }
 0x2a5   : > { %v2794_v7 = vadd.f32 %v2793_v13, %v4961_v6  ;;  %v2805_v18 = vmax.f32 %v2790_v29, 0.0 }
 0x2a6   : > { %v2806_v11 = vmax.f32 %v2792_v3, 0.0 }
 0x2a7   : > { %v2807_v36 = vmax.f32 %v2794_v7, 0.0 }
 0x2a8   : > { %v2810_v45 = vpack.c.bf16 %v2806_v11, %v2804_v5 }
 0x2a9   : > { %v2797_v42 = vpop.f32.mrb[4].mxu0  ;;  %v2811_v44 = vpack.c.bf16 %v2807_v36, %v2805_v18 }
 0x2aa   : > { %v2798_v47 = vadd.f32 %v2797_v42, %v4966_v2  ;;  %v2799_v50 = vpop.f32.mrb[5].mxu0 }
 0x2ab   : > { %v2800_v27 = vadd.f32 %v2799_v50, %v4966_v2  ;;  %v2801_v16 = vpop.f32.mrb[6].mxu0  ;;  %2826 = vmatprep.subr.bf16.mxu1 %v2811_v44  ;;  %v3065_v2 = vpop.permute.xlu1 %3064 }
 0x2ac   : > { %v2808_v61 = vmax.f32 %v2798_v47, 0.0  ;;  %v2802_v63 = vpop.f32.mrb[7].mxu0  ;;  %2827 = vmatpush1.bf16.msra.mxu1 %v2810_v45  ;;  %v3098_v31 = vsel %vm2513_vm0, %v4977_v30, %v3065_v2 }
 0x2ad   : > { %v2809_v10 = vmax.f32 %v2800_v27, 0.0 }
 0x2ae   : > { %v2812_v6 = vpack.c.bf16 %v2808_v61, %v2808_v61 }
 0x2af   : > { %v2813_v52 = vpack.c.bf16 %v2809_v10, %v2809_v10  ;;  %v3069_v48 = vpop.permute.xlu1 %3068 }
 0x2b0   : > { %v2821_v21 = vsel %vm2819_vm9, %v2812_v6, 0  ;;  %v3099_v32 = vsel %vm2532_vm1, %v3098_v31, %v3069_v48 }
 0x2b1   : > { %3257 = vmatprep.subr.msk.bf16.mxu1 %vm2819_vm9, %v2813_v52 }
 0x2b2   : > { %2829 = vmatpush1.bf16.msra.mxu1 %v2821_v21 }
 0x2b3   : > { %v3073_v55 = vpop.permute.xlu1 %3072 }
 0x2b4   : > { %v3100_v35 = vsel %vm2545_vm2, %v3099_v32, %v3073_v55 }
 0x2b5   : > { %3258 = vmatmul.mubr.msk.bf16.vlgmr.msra.gmra.mrb[0].mxu1 %vm2815_vm10, %v2814_v23  ;;  %v3101_v9 = vsel %vm2558_vm3, %v3100_v35, %v3077_v24 }
 0x2b6   : > { %v3102_v30 = vsel %vm2571_vm4, %v3101_v9, %v3081_v12 }
 0x2b7   : > { %v3049_v39 = vpop.permute.xlu1 %3048  ;;  %v3103_v17 = vsel %vm2584_vm5, %v3102_v30, %v3085_v15 }
 0x2b8   : > { %v3094_v14 = vsel %vm2558_vm3, %v3093_v28, %v3049_v39  ;;  %v3104_v60 = vsel %vm2597_vm6, %v3103_v17, %v3089_v38 }
 0x2bb   : > { %v3053_v8 = vpop.permute.xlu1 %3052 }
 0x2bc   : > { %v3095_v25 = vsel %vm2571_vm4, %v3094_v14, %v3053_v8 }
 0x2bf   : > { %v3057_v22 = vpop.permute.xlu1 %3056 }
 0x2c0   : > { %v3096_v33 = vsel %vm2584_vm5, %v3095_v25, %v3057_v22 }
 0x2c3   : > { %v3061_v58 = vpop.permute.xlu1 %3060 }
 0x2c4   : > { %v3097_v20 = vsel %vm2597_vm6, %v3096_v33, %v3061_v58 }
 0x388   : > { %v2860_v49 = vpop.f32.mrb[0].mxu1 }
 0x389   : > { %v3105_v53 = vadd.f32 %v3097_v20, %v2860_v49  ;;  %v2862_v1 = vpop.f32.mrb[1].mxu1 }
 0x38a   : > { %v3106_v54 = vadd.f32 %v3104_v60, %v2862_v1  ;;  %v2864_v46 = vpop.f32.mrb[2].mxu1 }
 0x38b   : > { %v3113_v34 = vadd.f32 %v3111_v43, %v3105_v53  ;;  %v2865_v51 = vpop.f32.mrb[3].mxu1 }
 0x38c   : > { %v3114_v41 = vadd.f32 %v3111_v43, %v3106_v54 }
 0x38e   : > { %v3117_v37 = vcombine.low %v3113_v34, %v3114_v41 }
 0x390   : > { %3119 = vst [vmem:[%s246_s6] sm:$0xff] %v3117_v37 }
 0x391 PF: > { %s15_s20 = sadd.s32 1, %s3334_s20   ;;  %s5130_s18 = smov %s3330_s19 }
 0x392   : > { %p12_p5 = scmp.ge.s32.totalorder %s15_s20, 8   ;;  %s5131_s19 = smov %s5133_s21 }
 0x394   :  { %14 = sbr.rel (!%p12_p5) target bundleno = 2 (0x2), region = 73 }

// kernel: image_optimizer_forward.5
= control target key start
LH: loop header
LB: loop body
LE: loop exit
PB: predicated region body
PF: predicated region fallthrough
CT: control target
= control target key end

     0   :  { %s5534_s18 = smov 0   ;;  %s5536_s19 = smov 0   ;;  %s8517_s0 = inlined_call_operand.vmem [shape: f32[6,8,34,34], index: 0, kind: input, shape index: {}]   ;;  %s8518_s1 = inlined_call_operand.vmem [shape: bf16[16,72], index: 1, kind: input, shape index: {}]   ;;  %s8519_s2 = inlined_call_operand.vmem [shape: f32[16,1], index: 2, kind: input, shape index: {}]   ;;  %s8520_s3 = inlined_call_operand.vmem [shape: bf16[4,16], index: 3, kind: input, shape index: {}]   ;;  %s8521_s4 = inlined_call_operand.vmem [shape: f32[4,1], index: 4, kind: input, shape index: {}]   ;;  %s8522_s5 = inlined_call_operand.vmem [shape: f32[6,4,1024], index: 5, kind: output, shape index: {}]  }
   0x1   :  { %s5538_s20 = smov 0  }
   0x2 LB: > { %s27_s21 = sadd.s32 1, %s5489_s19  ;;  %p5334_p0 = scmp.ge.s32.totalorder %s5493_s20, 1  ;;  %s5493_s20 = sphi %s5538_s20, %s15_s20   ;;  %s5489_s19 = sphi %s5536_s19, %s9213_s19   ;;  %s5485_s18 = sphi %s5534_s18, %s9212_s18  }
   0x3   : > { %p29_p1 = scmp.ge.s32.totalorder %s27_s21, 6  ;;  %p201_p2 = scmp.lt.s32.totalorder %s5493_s20, 7 }
   0x5   : > { %s9215_s21 = smov (%p29_p1, %s27_s21), 0  ;;  %p202_p3 = pnand %p5334_p0, %p201_p2 }
   0x7   : > { %205 = sbr.rel (%p202_p3) target bundleno = 1023 (0x3ff), region = 40 }
   0xe   : > { %p233_p4 = scmp.lt.s32.totalorder %s5485_s18, 5  ;;  %s5495_s26 = smov 127   ;;  %vm4023_vm0 = vcmask 261120   ;;  %vm4039_vm1 = vcmask 523264   ;;  %vm4050_vm2 = vcmask 785408   ;;  %vm4361_vm3 = vcmask 1043456  }
   0xf   : > { %s5496_s27 = smov 126   ;;  %s5500_s28 = smov 32   ;;  %vm4357_vm4 = vcmask 588800   ;;  %vm4575_vm5 = vcmask 130048  }
  0x10   : > { %s9217_s18 = smov (!%p233_p4, %s5485_s18), 5  ;;  %s5501_s29 = smov 64  }
  0x11   : > { %s5418_s22 = smul.u32 320, %s9217_s18  ;;  %s5502_s30 = smov 96  }
  0x12   : > { %s5417_s16 = sshll.u32 %s9217_s18, 5 }
  0x13   : > { %s5558_s25 = scalar_lea.vmem %s8517_s0, %s5418_s22  ;;  %s8487_s23 = scalar_lea.vmem %s8522_s5, %s5417_s16 }
  0x14   : > { %v259_v0 = vld [vmem:[%s5558_s25 + $0x50] sm:$0xff]  ;;  %v260_v1 = vld [vmem:[%s5558_s25 + $0x58] sm:$0xff]  ;;  %v251_v2 = vld [vmem:[%s5558_s25] sm:$0xff] }
  0x15   : > { %v5563_v3 = vpack.c.bf16 %v260_v1, %v259_v0  ;;  %v252_v4 = vld [vmem:[%s5558_s25 + $0x8] sm:$0xff]  ;;  %v263_v5 = vld [vmem:[%s5558_s25 + $0x78] sm:$0xff]  ;;  %v264_v6 = vld [vmem:[%s5558_s25 + $0x80] sm:$0xff] }
  0x16   : > { %v5568_v7 = vpack.c.bf16 %v252_v4, %v251_v2  ;;  %v5570_v8 = vpack.c.bf16 %v264_v6, %v263_v5  ;;  %v255_v9 = vld [vmem:[%s5558_s25 + $0x28] sm:$0xff]  ;;  %v256_v10 = vld [vmem:[%s5558_s25 + $0x30] sm:$0xff]  ;;  %v267_v14 = vld [vmem:[%s5558_s25 + $0xa0] sm:$0xff]  ;;  %v5497_v4 = vmov 1983009808   ;;  %v1220_v6 = vlaneseq }
  0x17   : > { %v271_v11 = vld [vmem:[%s5558_s25 + $0xc8] sm:$0xff]  ;;  %423 = vrot.lane.b32.xlu1 %v5563_v3, %s5495_s26  ;;  %v285_v12 = vpack.c.bf16 %v256_v10, %v255_v9  ;;  %v272_v13 = vld [vmem:[%s5558_s25 + $0xd0] sm:$0xff]  ;;  %v279_v17 = vld [vmem:[%s5558_s25 + $0x118] sm:$0xff]  ;;  %v651_v43 = vshrl.u32 %v5563_v3, 16  ;;  %v1218_v5 = vunpack.c.l.s4 %v5497_v4 }
  0x18   : > { %v268_v15 = vld [vmem:[%s5558_s25 + $0xa8] sm:$0xff]  ;;  %415 = vrot.lane.b32.xlu0 %v5568_v7, %s5495_s26  ;;  %v5584_v16 = vpack.i.b16 %v5570_v8, %v5563_v3  ;;  %v280_v18 = vld [vmem:[%s5558_s25 + $0x120] sm:$0xff]  ;;  %v275_v19 = vld [vmem:[%s5558_s25 + $0xf0] sm:$0xff]  ;;  %v293_v21 = vpack.c.bf16 %v272_v13, %v271_v11  ;;  %v643_v26 = vshrl.u32 %v5568_v7, 16  ;;  %v652_v50 = vshrl.u32 %v5570_v8, 16 }
  0x19   : > { %v5590_v20 = vpack.i.b16 %v285_v12, %v5568_v7  ;;  %v5592_v22 = vpack.c.bf16 %v268_v15, %v267_v14  ;;  %v276_v23 = vld [vmem:[%s5558_s25 + $0xf8] sm:$0xff]  ;;  %v5342_v24 = vld [vmem:[%s5558_s25 + $0x29] sm:$0xff]  ;;  %v644_v27 = vshrl.u32 %v285_v12, 16  ;;  %v5598_v28 = vpack.c.bf16 %v280_v18, %v279_v17  ;;  %v5338_v30 = vld [vmem:[%s5558_s25 + $0x1] sm:$0xff] }
  0x1a   : > { %v5343_v25 = vld [vmem:[%s5558_s25 + $0x31] sm:$0xff]  ;;  %v5600_v29 = vpack.c.bf16 %v276_v23, %v275_v19  ;;  %v5339_v31 = vld [vmem:[%s5558_s25 + $0x9] sm:$0xff]  ;;  %v5350_v32 = vld [vmem:[%s5558_s25 + $0x79] sm:$0xff]  ;;  %v660_v61 = vshrl.u32 %v293_v21, 16  ;;  %v653_v63 = vpack.i.b16 %v652_v50, %v651_v43  ;;  %v1219_v10 = vunpack.c.0.s8 %v1218_v5 }
  0x1b   : > { %427 = vrot.lane.b32.xlu1 %v5570_v8, %s5495_s26  ;;  %v5608_v33 = vpack.i.b16 %v293_v21, %v5592_v22  ;;  %v5610_v34 = vpack.c.bf16 %v5343_v25, %v5342_v24  ;;  %v5612_v35 = vpack.c.bf16 %v5339_v31, %v5338_v30  ;;  %v5351_v36 = vld [vmem:[%s5558_s25 + $0x81] sm:$0xff]  ;;  %v5346_v37 = vld [vmem:[%s5558_s25 + $0x51] sm:$0xff]  ;;  %v5347_v38 = vld [vmem:[%s5558_s25 + $0x59] sm:$0xff]  ;;  %v645_v55 = vpack.i.b16 %v644_v27, %v643_v26 }
  0x1c   : > { %419 = vrot.lane.b32.xlu0 %v285_v12, %s5495_s26  ;;  %v5620_v39 = vpack.i.b16 %v5598_v28, %v5600_v29  ;;  %v5358_v40 = vld [vmem:[%s5558_s25 + $0xc9] sm:$0xff]  ;;  %v5359_v41 = vld [vmem:[%s5558_s25 + $0xd1] sm:$0xff]  ;;  %v5354_v42 = vld [vmem:[%s5558_s25 + $0xa1] sm:$0xff]  ;;  %v5630_v45 = vpack.c.bf16 %v5351_v36, %v5350_v32  ;;  %v5632_v46 = vpack.c.bf16 %v5347_v38, %v5346_v37  ;;  %v659_v62 = vshrl.u32 %v5592_v22, 16 }
  0x1d   : > { %v5628_v44 = vpack.i.b16 %v5610_v34, %v5612_v35  ;;  %v5355_v47 = vld [vmem:[%s5558_s25 + $0xa9] sm:$0xff]  ;;  %v5366_v48 = vld [vmem:[%s5558_s25 + $0x119] sm:$0xff]  ;;  %v5367_v49 = vld [vmem:[%s5558_s25 + $0x121] sm:$0xff]  ;;  %v5638_v51 = vpack.c.bf16 %v5359_v41, %v5358_v40  ;;  %v668_v0 = vshrl.u32 %v5598_v28, 16  ;;  %v667_v1 = vshrl.u32 %v5600_v29, 16 }
  0x1e   : > { %v5640_v52 = vpack.c.bf16 %v5355_v47, %v5354_v42  ;;  %v5362_v53 = vld [vmem:[%s5558_s25 + $0xf1] sm:$0xff]  ;;  %v5363_v54 = vld [vmem:[%s5558_s25 + $0xf9] sm:$0xff]  ;;  %v5647_v56 = vpack.i.b16 %v5630_v45, %v5632_v46  ;;  %v5649_v57 = vpack.c.bf16 %v5367_v49, %v5366_v48  ;;  %v661_v2 = vpack.i.b16 %v660_v61, %v659_v62  ;;  %v5368_v42 = vld [vmem:[%s5558_s25 + $0x129] sm:$0xff] }
  0x1f   : > { %435 = vrot.lane.b32.xlu1 %v293_v21, %s5495_s26  ;;  %v5651_v58 = vpack.c.bf16 %v5363_v54, %v5362_v53  ;;  %v669_v9 = vpack.i.b16 %v668_v0, %v667_v1  ;;  %v5675_v11 = vshrl.u32 %v1220_v6, 7  ;;  %v747_v14 = vshrl.u32 %v5632_v46, 16  ;;  %v5357_v37 = vld [vmem:[%s5558_s25 + $0xb9] sm:$0xff]  ;;  %v5369_v43 = vld [vmem:[%s5558_s25 + $0x131] sm:$0xff] }
  0x20   : > { %431 = vrot.lane.b32.xlu0 %v5592_v22, %s5495_s26  ;;  %v5657_v59 = vpack.i.b16 %v5638_v51, %v5640_v52  ;;  %v756_v15 = vshrl.u32 %v5638_v51, 16  ;;  %v764_v17 = vshrl.u32 %v5649_v57, 16  ;;  %v1352_v18 = vcombine.high %v645_v55, %v661_v2 }
  0x21   : > { %v5661_v60 = vpack.i.b16 %v5649_v57, %v5651_v58  ;;  %v5682_v13 = vsub.s32 %v1219_v10, %v5675_v11  ;;  %v1368_v19 = vcombine.high %v653_v63, %v669_v9  ;;  %v1351_v23 = vcombine.low %v645_v55, %v661_v2 }
  0x22   : > { %v1367_v24 = vcombine.low %v653_v63, %v669_v9  ;;  %v1231_v27 = vcombine.low %v5584_v16, %v5620_v39  ;;  %v1216_v30 = vcombine.high %v5590_v20, %v5608_v33  ;;  %v1232_v36 = vcombine.high %v5584_v16, %v5620_v39 }
  0x23   : > { %443 = vrot.lane.b32.xlu1 %v5598_v28, %s5495_s26  ;;  %v5698_v25 = vrot.slane %v1352_v18, %v5682_v13  ;;  %v5701_v26 = vrot.slane %v1368_v19, %v5682_v13  ;;  %v5710_v31 = vrot.slane %v1351_v23, %v5682_v13  ;;  %v1519_v53 = vcombine.low %v5628_v44, %v5657_v59  ;;  %v5370_v18 = vld [vmem:[%s5558_s25 + $0x2] sm:$0xff]  ;;  %v5378_v19 = vld [vmem:[%s5558_s25 + $0x52] sm:$0xff] }
  0x24   : > { %439 = vrot.lane.b32.xlu0 %v5600_v29, %s5495_s26  ;;  %v5735_v16 = vrot.slane %v1232_v36, %v5682_v13  ;;  %v1535_v54 = vcombine.low %v5647_v56, %v5661_v60  ;;  %v1520_v55 = vcombine.high %v5628_v44, %v5657_v59  ;;  %v1536_v10 = vcombine.high %v5647_v56, %v5661_v60 }
  0x25   : > { %8736 = vst [vmem:[#allocation2_spill] sm:$0xff] %v5710_v31  ;;  %v5760_v1 = vrot.slane %v1519_v53, %v5682_v13  ;;  %v5499_v9 = vmov 1934713408  }
  0x26   : > { %v5763_v2 = vrot.slane %v1535_v54, %v5682_v13  ;;  %v5803_v60 = vrot.slane %v1536_v10, %v5682_v13 }
  0x27   : > { %451 = vrot.lane.b32.xlu1 %v285_v12, %s5496_s27  ;;  %v740_v12 = vshrl.u32 %v5610_v34, 16 }
  0x28   : > { %447 = vrot.lane.b32.xlu0 %v5568_v7, %s5496_s27  ;;  %v739_v7 = vshrl.u32 %v5612_v35, 16 }
  0x2a   : > { %v741_v39 = vpack.i.b16 %v740_v12, %v739_v7  ;;  %v5788_v12 = vrot.slane %v1520_v55, %v5682_v13  ;;  %v257_v55 = vld [vmem:[%s5558_s25 + $0x38] sm:$0xff]  ;;  %v5349_v7 = vld [vmem:[%s5558_s25 + $0x69] sm:$0xff] }
  0x2b   : > { %459 = vrot.lane.b32.xlu1 %v5570_v8, %s5496_s27  ;;  %v748_v8 = vshrl.u32 %v5630_v45, 16 }
  0x2c   : > { %455 = vrot.lane.b32.xlu0 %v5563_v3, %s5496_s27  ;;  %v755_v3 = vshrl.u32 %v5640_v52, 16 }
  0x2d   : > { %v749_v48 = vpack.i.b16 %v748_v8, %v747_v14  ;;  %v5348_v14 = vld [vmem:[%s5558_s25 + $0x61] sm:$0xff] }
  0x2e   : > { %v757_v49 = vpack.i.b16 %v756_v15, %v755_v3  ;;  %v1282_v15 = vunpack.c.l.s4 %v5499_v9  ;;  %v6028_v9 = vpack.c.bf16 %v5369_v43, %v5368_v42 }
  0x2f   : > { %467 = vrot.lane.b32.xlu1 %v293_v21, %s5496_s27  ;;  %v763_v21 = vshrl.u32 %v5651_v58, 16 }
  0x30   : > { %463 = vrot.lane.b32.xlu0 %v5592_v22, %s5496_s27  ;;  %v1215_v22 = vcombine.low %v5590_v20, %v5608_v33  ;;  %v5723_v20 = vrot.slane %v1231_v27, %v5682_v13  ;;  %v5728_v33 = vrot.slane %v1216_v30, %v5682_v13  ;;  %v1656_v61 = vcombine.high %v741_v39, %v757_v49  ;;  %v5387_v27 = vld [vmem:[%s5558_s25 + $0xaa] sm:$0xff] }
  0x31   : > { %v765_v50 = vpack.i.b16 %v764_v17, %v763_v21  ;;  %v1655_v63 = vcombine.low %v741_v39, %v757_v49  ;;  %v5374_v17 = vld [vmem:[%s5558_s25 + $0x2a] sm:$0xff]  ;;  %v5379_v21 = vld [vmem:[%s5558_s25 + $0x5a] sm:$0xff]  ;;  %v5394_v49 = vld [vmem:[%s5558_s25 + $0xf2] sm:$0xff]  ;;  %8754 = vst [vmem:[#allocation20_spill] sm:$0xff] %v6028_v9 }
  0x32   : > { %v5716_v32 = vrot.slane %v1215_v22, %v5682_v13  ;;  %v5766_v4 = vrot.slane %v1656_v61, %v5682_v13  ;;  %v5386_v22 = vld [vmem:[%s5558_s25 + $0xa2] sm:$0xff]  ;;  %v5398_v39 = vld [vmem:[%s5558_s25 + $0x11a] sm:$0xff] }
  0x33   : > { %475 = vrot.lane.b32.xlu1 %v5598_v28, %s5496_s27  ;;  %v5713_v28 = vrot.slane %v1367_v24, %v5682_v13  ;;  %v1672_v62 = vcombine.high %v749_v48, %v765_v50  ;;  %v1671_v0 = vcombine.low %v749_v48, %v765_v50  ;;  %v5774_v44 = vrot.slane %v1655_v63, %v5682_v13  ;;  %v5391_v24 = vld [vmem:[%s5558_s25 + $0xd2] sm:$0xff]  ;;  %v5399_v48 = vld [vmem:[%s5558_s25 + $0x122] sm:$0xff]  ;;  %v5395_v50 = vld [vmem:[%s5558_s25 + $0xfa] sm:$0xff] }
  0x34   : > { %471 = vrot.lane.b32.xlu0 %v5600_v29, %s5496_s27  ;;  %8738 = vst [vmem:[#allocation4_spill] sm:$0xff] %v5766_v4  ;;  %v5855_v36 = vpack.c.bf16 %v5387_v27, %v5386_v22  ;;  %v5863_v53 = vpack.c.bf16 %v5399_v48, %v5398_v39  ;;  %v5867_v54 = vpack.c.bf16 %v5395_v50, %v5394_v49  ;;  %v258_v61 = vld [vmem:[%s5558_s25 + $0x40] sm:$0xff]  ;;  %v254_v63 = vld [vmem:[%s5558_s25 + $0x18] sm:$0xff]  ;;  %v8523_v22 = vmov 0   ;;  %v281_v48 = vld [vmem:[%s5558_s25 + $0x128] sm:$0xff] }
  0x35   : > { %8737 = vst [vmem:[#allocation3_spill] sm:$0xff] %v5713_v28  ;;  %v5769_v5 = vrot.slane %v1672_v62, %v5682_v13  ;;  %8740 = vst [vmem:[#allocation6_spill] sm:$0xff] %v5774_v44  ;;  %v5781_v6 = vrot.slane %v1671_v0, %v5682_v13  ;;  %v253_v62 = vld [vmem:[%s5558_s25 + $0x10] sm:$0xff]  ;;  %v5891_v0 = vpack.c.bf16 %v258_v61, %v257_v55  ;;  %4410 = vmatprep.mubr.bf16.mxu0 %v8523_v22  ;;  %v277_v50 = vld [vmem:[%s5558_s25 + $0x100] sm:$0xff] }
  0x36   : > { %v5895_v10 = vpack.c.bf16 %v254_v63, %v253_v62  ;;  %4453 = vmatprep.mubr.bf16.mxu1 %v8523_v22  ;;  %5453 = vset.pattern.permute.xlu1 %v8523_v22  ;;  %v282_v49 = vld [vmem:[%s5558_s25 + $0x130] sm:$0xff]  ;;  %v278_v55 = vld [vmem:[%s5558_s25 + $0x108] sm:$0xff] }
  0x37   : > { %499 = vrot.lane.b32.xlu1 %v5610_v34, %s5495_s26  ;;  %8739 = vst [vmem:[#allocation5_spill] sm:$0xff] %v5769_v5  ;;  %8741 = vst [vmem:[#allocation7_spill] sm:$0xff] %v5781_v6  ;;  %5452 = vset.pattern.permute.xlu0 %v8523_v22  ;;  %v5931_v61 = vpack.c.bf16 %v282_v49, %v281_v48  ;;  %v5935_v62 = vpack.c.bf16 %v278_v55, %v277_v50  ;;  %v5352_v55 = vld [vmem:[%s5558_s25 + $0x89] sm:$0xff]  ;;  %v5353_v22 = vld [vmem:[%s5558_s25 + $0x91] sm:$0xff] }
  0x38   : > { %495 = vrot.lane.b32.xlu0 %v5612_v35, %s5495_s26  ;;  %v5361_v29 = vld [vmem:[%s5558_s25 + $0xe1] sm:$0xff]  ;;  %v5365_v4 = vld [vmem:[%s5558_s25 + $0x109] sm:$0xff] }
  0x39   : > { %8742 = vst [vmem:[#allocation8_spill] sm:$0xff] %v5931_v61  ;;  %8743 = vst [vmem:[#allocation9_spill] sm:$0xff] %v5935_v62  ;;  %v5364_v5 = vld [vmem:[%s5558_s25 + $0x101] sm:$0xff] }
  0x3b   : > { %507 = vrot.lane.b32.xlu1 %v5630_v45, %s5495_s26 }
  0x3c   : > { %503 = vrot.lane.b32.xlu0 %v5632_v46, %s5495_s26 }
  0x3f   : > { %515 = vrot.lane.b32.xlu1 %v5638_v51, %s5495_s26 }
  0x40   : > { %511 = vrot.lane.b32.xlu0 %v5640_v52, %s5495_s26 }
  0x43   : > { %523 = vrot.lane.b32.xlu1 %v5649_v57, %s5495_s26 }
  0x44   : > { %519 = vrot.lane.b32.xlu0 %v5651_v58, %s5495_s26 }
  0x47   : > { %531 = vrot.lane.b32.xlu1 %v5610_v34, %s5496_s27  ;;  %v5375_v34 = vld [vmem:[%s5558_s25 + $0x32] sm:$0xff] }
  0x48   : > { %527 = vrot.lane.b32.xlu0 %v5612_v35, %s5496_s27  ;;  %v5371_v35 = vld [vmem:[%s5558_s25 + $0xa] sm:$0xff] }
  0x4b   : > { %539 = vrot.lane.b32.xlu1 %v5630_v45, %s5496_s27  ;;  %v5827_v45 = vpack.c.bf16 %v5375_v34, %v5374_v17  ;;  %v265_v17 = vld [vmem:[%s5558_s25 + $0x88] sm:$0xff]  ;;  %v266_v34 = vld [vmem:[%s5558_s25 + $0x90] sm:$0xff] }
  0x4c   : > { %535 = vrot.lane.b32.xlu0 %v5632_v46, %s5496_s27  ;;  %v5831_v46 = vpack.c.bf16 %v5371_v35, %v5370_v18  ;;  %v261_v18 = vld [vmem:[%s5558_s25 + $0x60] sm:$0xff]  ;;  %v262_v35 = vld [vmem:[%s5558_s25 + $0x68] sm:$0xff] }
  0x4f   : > { %547 = vrot.lane.b32.xlu1 %v5638_v51, %s5496_s27  ;;  %v5382_v51 = vld [vmem:[%s5558_s25 + $0x7a] sm:$0xff] }
  0x50   : > { %543 = vrot.lane.b32.xlu0 %v5640_v52, %s5496_s27  ;;  %v5383_v52 = vld [vmem:[%s5558_s25 + $0x82] sm:$0xff] }
  0x51   : > { %v5839_v23 = vpack.c.bf16 %v5383_v52, %v5382_v51  ;;  %v5903_v51 = vpack.c.bf16 %v266_v34, %v265_v17  ;;  %v5907_v52 = vpack.c.bf16 %v262_v35, %v261_v18  ;;  %v5344_v35 = vld [vmem:[%s5558_s25 + $0x39] sm:$0xff] }
  0x53   : > { %555 = vrot.lane.b32.xlu1 %v5649_v57, %s5496_s27  ;;  %v5843_v57 = vpack.c.bf16 %v5379_v21, %v5378_v19  ;;  %v273_v19 = vld [vmem:[%s5558_s25 + $0xd8] sm:$0xff]  ;;  %v274_v21 = vld [vmem:[%s5558_s25 + $0xe0] sm:$0xff] }
  0x54   : > { %551 = vrot.lane.b32.xlu0 %v5651_v58, %s5496_s27  ;;  %v5390_v58 = vld [vmem:[%s5558_s25 + $0xca] sm:$0xff]  ;;  %v5919_v27 = vpack.c.bf16 %v274_v21, %v273_v19  ;;  %v5345_v19 = vld [vmem:[%s5558_s25 + $0x41] sm:$0xff] }
  0x55   : > { %v5851_v30 = vpack.c.bf16 %v5391_v24, %v5390_v58  ;;  %v269_v58 = vld [vmem:[%s5558_s25 + $0xb0] sm:$0xff]  ;;  %v270_v24 = vld [vmem:[%s5558_s25 + $0xb8] sm:$0xff]  ;;  %v5971_v49 = vpack.c.bf16 %v5345_v19, %v5344_v35  ;;  %v5987_v35 = vpack.c.bf16 %v5353_v22, %v5352_v55 }
  0x56   : > { %v5923_v39 = vpack.c.bf16 %v270_v24, %v269_v58  ;;  %v5340_v58 = vld [vmem:[%s5558_s25 + $0x11] sm:$0xff]  ;;  %v5341_v24 = vld [vmem:[%s5558_s25 + $0x19] sm:$0xff] }
  0x57   : > { %579 = vrot.lane.b32.xlu1 %v5827_v45, %s5495_s26  ;;  %8744 = vst [vmem:[#allocation10_spill] sm:$0xff] %v5971_v49  ;;  %v5975_v50 = vpack.c.bf16 %v5341_v24, %v5340_v58  ;;  %8746 = vst [vmem:[#allocation12_spill] sm:$0xff] %v5987_v35  ;;  %v5993_v58 = vpack.c.bf16 %v5349_v7, %v5348_v14  ;;  %v5360_v24 = vld [vmem:[%s5558_s25 + $0xd9] sm:$0xff]  ;;  %v5356_v55 = vld [vmem:[%s5558_s25 + $0xb1] sm:$0xff] }
  0x58   : > { %575 = vrot.lane.b32.xlu0 %v5831_v46, %s5495_s26  ;;  %v6011_v8 = vpack.c.bf16 %v5361_v29, %v5360_v24  ;;  %v6015_v47 = vpack.c.bf16 %v5357_v37, %v5356_v55  ;;  %v1283_v37 = vunpack.c.0.s8 %v1282_v15  ;;  %v6032_v24 = vpack.c.bf16 %v5365_v4, %v5364_v5 }
  0x59   : > { %8745 = vst [vmem:[#allocation11_spill] sm:$0xff] %v5975_v50  ;;  %8747 = vst [vmem:[#allocation13_spill] sm:$0xff] %v5993_v58 }
  0x5a   : > { %8750 = vst [vmem:[#allocation16_spill] sm:$0xff] %v6011_v8  ;;  %8751 = vst [vmem:[#allocation17_spill] sm:$0xff] %v6015_v47  ;;  %v6044_v42 = vsub.s32 %v1283_v37, %v5675_v11  ;;  %v8762_v11 = vcombine.high %v5728_v33, %v5735_v16 }
  0x5b   : > { %587 = vrot.lane.b32.xlu1 %v5839_v23, %s5495_s26  ;;  %8755 = vst [vmem:[#allocation21_spill] sm:$0xff] %v6032_v24 }
  0x5c   : > { %583 = vrot.lane.b32.xlu0 %v5843_v57, %s5495_s26  ;;  %v6064_v37 = vrot.slane %v8762_v11, %v6044_v42 }
  0x5e   : > { %8763 = vst [vmem:[#allocation27_spill] sm:$0xff] %v6064_v37 }
  0x5f   : > { %595 = vrot.lane.b32.xlu1 %v5851_v30, %s5495_s26 }
  0x60   : > { %591 = vrot.lane.b32.xlu0 %v5855_v36, %s5495_s26 }
  0x63   : > { %603 = vrot.lane.b32.xlu1 %v5863_v53, %s5495_s26 }
  0x64   : > { %599 = vrot.lane.b32.xlu0 %v5867_v54, %s5495_s26 }
  0x67   : > { %611 = vrot.lane.b32.xlu1 %v5827_v45, %s5496_s27 }
  0x68   : > { %607 = vrot.lane.b32.xlu0 %v5831_v46, %s5496_s27 }
  0x6b   : > { %619 = vrot.lane.b32.xlu1 %v5839_v23, %s5496_s27 }
  0x6c   : > { %615 = vrot.lane.b32.xlu0 %v5843_v57, %s5496_s27 }
  0x6f   : > { %627 = vrot.lane.b32.xlu1 %v5851_v30, %s5496_s27 }
  0x70   : > { %623 = vrot.lane.b32.xlu0 %v5855_v36, %s5496_s27 }
  0x73   : > { %635 = vrot.lane.b32.xlu1 %v5863_v53, %s5496_s27 }
  0x74   : > { %631 = vrot.lane.b32.xlu0 %v5867_v54, %s5496_s27 }
  0x77   : > { %421 = vrot.lane.b32.xlu1 %v5891_v0, %s5495_s26 }
  0x78   : > { %417 = vrot.lane.b32.xlu0 %v5895_v10, %s5495_s26 }
  0x7b   : > { %429 = vrot.lane.b32.xlu1 %v5903_v51, %s5495_s26 }
  0x7c   : > { %425 = vrot.lane.b32.xlu0 %v5907_v52, %s5495_s26 }
  0x7f   : > { %437 = vrot.lane.b32.xlu1 %v5919_v27, %s5495_s26 }
  0x80   : > { %433 = vrot.lane.b32.xlu0 %v5923_v39, %s5495_s26 }
  0x83   : > { %445 = vrot.lane.b32.xlu1 %v5931_v61, %s5495_s26 }
  0x84   : > { %441 = vrot.lane.b32.xlu0 %v5935_v62, %s5495_s26 }
  0x87   : > { %453 = vrot.lane.b32.xlu1 %v5891_v0, %s5496_s27 }
  0x88   : > { %449 = vrot.lane.b32.xlu0 %v5895_v10, %s5496_s27 }
  0x89   : > { %v5945_v63 = vpop.permute.xlu1 %423 }
  0x8a   : > { %v5947_v17 = vpop.permute.xlu0 %415 }
  0x8b   : > { %461 = vrot.lane.b32.xlu1 %v5903_v51, %s5496_s27 }
  0x8c   : > { %457 = vrot.lane.b32.xlu0 %v5907_v52, %s5496_s27 }
  0x8d   : > { %v5953_v34 = vpop.permute.xlu1 %427 }
  0x8e   : > { %v5955_v18 = vpop.permute.xlu0 %419  ;;  %v681_v40 = vpack.i.b16 %v5953_v34, %v5945_v63 }
  0x8f   : > { %469 = vrot.lane.b32.xlu1 %v5919_v27, %s5496_s27  ;;  %v673_v7 = vpack.i.b16 %v5955_v18, %v5947_v17 }
  0x90   : > { %465 = vrot.lane.b32.xlu0 %v5923_v39, %s5496_s27 }
  0x91   : > { %v5963_v21 = vpop.permute.xlu1 %435 }
  0x92   : > { %v5967_v48 = vpop.permute.xlu0 %431 }
  0x93   : > { %477 = vrot.lane.b32.xlu1 %v5931_v61, %s5496_s27  ;;  %v689_v38 = vpack.i.b16 %v5963_v21, %v5967_v48 }
  0x94   : > { %473 = vrot.lane.b32.xlu0 %v5935_v62, %s5496_s27 }
  0x95   : > { %v5979_v56 = vpop.permute.xlu1 %443  ;;  %v1248_v41 = vcombine.high %v673_v7, %v689_v38  ;;  %v1247_v31 = vcombine.low %v673_v7, %v689_v38 }
  0x96   : > { %v5983_v59 = vpop.permute.xlu0 %439 }
  0x97   : > { %501 = vrot.lane.b32.xlu1 %v5971_v49, %s5495_s26  ;;  %v697_v19 = vpack.i.b16 %v5979_v56, %v5983_v59  ;;  %v1255_v7 = vrot.slane %v1247_v31, %v5682_v13  ;;  %v8760_v31 = vcombine.high %v5716_v32, %v5723_v20 }
  0x98   : > { %497 = vrot.lane.b32.xlu0 %v5975_v50, %s5495_s26 }
  0x99   : > { %v6001_v22 = vpop.permute.xlu1 %451  ;;  %v1264_v14 = vcombine.high %v681_v40, %v697_v19  ;;  %v1263_v6 = vcombine.low %v681_v40, %v697_v19  ;;  %v1262_v40 = vrot.slane %v1248_v41, %v5682_v13  ;;  %v6058_v15 = vrot.slane %v8760_v31, %v6044_v42 }
  0x9a   : > { %8748 = vst [vmem:[#allocation14_spill] sm:$0xff] %v6001_v22  ;;  %v6005_v3 = vpop.permute.xlu0 %447 }
  0x9b   : > { %8749 = vst [vmem:[#allocation15_spill] sm:$0xff] %v6005_v3  ;;  %509 = vrot.lane.b32.xlu1 %v5987_v35, %s5495_s26  ;;  %v1278_v29 = vrot.slane %v1264_v14, %v5682_v13  ;;  %v1271_v19 = vrot.slane %v1263_v6, %v5682_v13  ;;  %8761 = vst [vmem:[#allocation26_spill] sm:$0xff] %v6058_v15 }
  0x9c   : > { %505 = vrot.lane.b32.xlu0 %v5993_v58, %s5495_s26 }
  0x9d   : > { %v6019_v44 = vpop.permute.xlu1 %459  ;;  %v1328_v14 = vcombine.high %v1262_v40, %v1278_v29  ;;  %v1311_v43 = vcombine.low %v1255_v7, %v1271_v19  ;;  %v1312_v41 = vcombine.high %v1255_v7, %v1271_v19  ;;  %v1327_v4 = vcombine.low %v1262_v40, %v1278_v29 }
  0x9e   : > { %8752 = vst [vmem:[#allocation18_spill] sm:$0xff] %v6019_v44  ;;  %v6023_v28 = vpop.permute.xlu0 %455  ;;  %v8765_v7 = vcombine.low %v5716_v32, %v5723_v20  ;;  %v705_v20 = vpack.i.b16 %v6001_v22, %v6005_v3 }
  0x9f   : > { %8753 = vst [vmem:[#allocation19_spill] sm:$0xff] %v6023_v28  ;;  %517 = vrot.lane.b32.xlu1 %v6011_v8, %s5495_s26  ;;  %v6067_v29 = vrot.slane %v1328_v14, %v6044_v42  ;;  %v8767_v14 = vcombine.low %v5728_v33, %v5735_v16  ;;  %v6098_v32 = vrot.slane %v1327_v4, %v6044_v42 }
  0xa0   : > { %513 = vrot.lane.b32.xlu0 %v6015_v47, %s5495_s26  ;;  %v6079_v31 = vrot.slane %v8765_v7, %v6044_v42 }
  0xa1   : > { %v6036_v55 = vpop.permute.xlu1 %467  ;;  %8764 = vst [vmem:[#allocation28_spill] sm:$0xff] %v6067_v29  ;;  %v6085_v11 = vrot.slane %v8767_v14, %v6044_v42  ;;  %8772 = vst [vmem:[#allocation34_spill] sm:$0xff] %v6098_v32 }
  0xa2   : > { %8756 = vst [vmem:[#allocation22_spill] sm:$0xff] %v6036_v55  ;;  %v6038_v38 = vpop.permute.xlu0 %463  ;;  %8766 = vst [vmem:[#allocation29_spill] sm:$0xff] %v6079_v31  ;;  %v5380_v31 = vld [vmem:[%s5558_s25 + $0x62] sm:$0xff] }
  0xa3   : > { %8757 = vst [vmem:[#allocation23_spill] sm:$0xff] %v6038_v38  ;;  %525 = vrot.lane.b32.xlu1 %v6028_v9, %s5495_s26  ;;  %v721_v40 = vpack.i.b16 %v6036_v55, %v6038_v38  ;;  %8768 = vst [vmem:[#allocation30_spill] sm:$0xff] %v6085_v11  ;;  %v713_v38 = vpack.i.b16 %v6019_v44, %v6023_v28  ;;  %v5400_v28 = vld [vmem:[%s5558_s25 + $0x12a] sm:$0xff] }
  0xa4   : > { %521 = vrot.lane.b32.xlu0 %v6032_v24, %s5495_s26  ;;  %v5397_v44 = vld [vmem:[%s5558_s25 + $0x10a] sm:$0xff] }
  0xa5   : > { %v6048_v5 = vpop.permute.xlu1 %475  ;;  %v1488_v7 = vcombine.high %v705_v20, %v721_v40 }
  0xa6   : > { %8758 = vst [vmem:[#allocation24_spill] sm:$0xff] %v6048_v5  ;;  %v6050_v6 = vpop.permute.xlu0 %471 }
  0xa7   : > { %8759 = vst [vmem:[#allocation25_spill] sm:$0xff] %v6050_v6  ;;  %533 = vrot.lane.b32.xlu1 %v5971_v49, %s5496_s27  ;;  %v729_v19 = vpack.i.b16 %v6048_v5, %v6050_v6  ;;  %v6092_v6 = vrot.slane %v1312_v41, %v6044_v42  ;;  %v6095_v5 = vrot.slane %v1311_v43, %v6044_v42 }
  0xa8   : > { %529 = vrot.lane.b32.xlu0 %v5975_v50, %s5496_s27  ;;  %v1487_v41 = vcombine.low %v705_v20, %v721_v40  ;;  %v5372_v20 = vld [vmem:[%s5558_s25 + $0x12] sm:$0xff] }
  0xa9   : > { %v6089_v55 = vpop.permute.xlu1 %499  ;;  %8770 = vst [vmem:[#allocation32_spill] sm:$0xff] %v6092_v6  ;;  %8771 = vst [vmem:[#allocation33_spill] sm:$0xff] %v6095_v5  ;;  %v1504_v16 = vcombine.high %v713_v38, %v729_v19  ;;  %v1503_v43 = vcombine.low %v713_v38, %v729_v19  ;;  %v5376_v38 = vld [vmem:[%s5558_s25 + $0x3a] sm:$0xff]  ;;  %v5377_v19 = vld [vmem:[%s5558_s25 + $0x42] sm:$0xff] }
  0xaa   : > { %8769 = vst [vmem:[#allocation31_spill] sm:$0xff] %v6089_v55  ;;  %v6102_v33 = vpop.permute.xlu0 %495  ;;  %v1495_v11 = vrot.slane %v1487_v41, %v5682_v13  ;;  %v5381_v5 = vld [vmem:[%s5558_s25 + $0x6a] sm:$0xff] }
  0xab   : > { %8773 = vst [vmem:[#allocation35_spill] sm:$0xff] %v6102_v33  ;;  %541 = vrot.lane.b32.xlu1 %v5987_v35, %s5496_s27  ;;  %v6121_v37 = vrot.slane %v1504_v16, %v5682_v13  ;;  %v6130_v33 = vrot.slane %v1488_v7, %v5682_v13  ;;  %v1511_v55 = vrot.slane %v1503_v43, %v5682_v13  ;;  %v5373_v16 = vld [vmem:[%s5558_s25 + $0x1a] sm:$0xff] }
  0xac   : > { %537 = vrot.lane.b32.xlu0 %v5993_v58, %s5496_s27  ;;  %v6144_v7 = vpack.c.bf16 %v5377_v19, %v5376_v38  ;;  %v6148_v43 = vpack.c.bf16 %v5373_v16, %v5372_v20  ;;  %v8784_v20 = vcombine.high %v5788_v12, %v5803_v60  ;;  %v6174_v16 = vpack.c.bf16 %v5381_v5, %v5380_v31 }
  0xad   : > { %v6110_v4 = vpop.permute.xlu1 %507  ;;  %v1568_v32 = vcombine.high %v6130_v33, %v6121_v37  ;;  %v1552_v41 = vcombine.high %v1495_v11, %v1511_v55  ;;  %v8792_v5 = vcombine.low %v5760_v1, %v5763_v2 }
  0xae   : > { %8774 = vst [vmem:[#allocation36_spill] sm:$0xff] %v6110_v4  ;;  %v6118_v3 = vpop.permute.xlu0 %503  ;;  %8778 = vst [vmem:[#allocation40_spill] sm:$0xff] %v6144_v7  ;;  %v5385_v4 = vld [vmem:[%s5558_s25 + $0x92] sm:$0xff] }
  0xaf   : > { %8775 = vst [vmem:[#allocation37_spill] sm:$0xff] %v6118_v3  ;;  %549 = vrot.lane.b32.xlu1 %v6011_v8, %s5496_s27  ;;  %8779 = vst [vmem:[#allocation41_spill] sm:$0xff] %v6148_v43  ;;  %v5384_v3 = vld [vmem:[%s5558_s25 + $0x8a] sm:$0xff]  ;;  %v6163_v19 = vrot.slane %v1568_v32, %v6044_v42  ;;  %v5389_v32 = vld [vmem:[%s5558_s25 + $0xba] sm:$0xff]  ;;  %v6183_v15 = vrot.slane %v1552_v41, %v6044_v42  ;;  %v6198_v31 = vrot.slane %v8792_v5, %v6044_v42 }
  0xb0   : > { %545 = vrot.lane.b32.xlu0 %v6015_v47, %s5496_s27  ;;  %v6160_v38 = vpack.c.bf16 %v5385_v4, %v5384_v3  ;;  %8786 = vst [vmem:[#allocation47_spill] sm:$0xff] %v6174_v16  ;;  %v5388_v4 = vld [vmem:[%s5558_s25 + $0xb2] sm:$0xff]  ;;  %v6202_v41 = vpack.i.b16 %v5827_v45, %v5831_v46 }
  0xb1   : > { %v6133_v40 = vpop.permute.xlu1 %515  ;;  %8783 = vst [vmem:[#allocation45_spill] sm:$0xff] %v6163_v19  ;;  %8788 = vst [vmem:[#allocation49_spill] sm:$0xff] %v6183_v15 }
  0xb2   : > { %8776 = vst [vmem:[#allocation38_spill] sm:$0xff] %v6133_v40  ;;  %v6137_v14 = vpop.permute.xlu0 %511  ;;  %v1551_v40 = vcombine.low %v1495_v11, %v1511_v55  ;;  %8782 = vst [vmem:[#allocation44_spill] sm:$0xff] %v6160_v38  ;;  %v6169_v55 = vrot.slane %v8784_v20, %v6044_v42  ;;  %v8789_v20 = vcombine.high %v5760_v1, %v5763_v2 }
  0xb3   : > { %8777 = vst [vmem:[#allocation39_spill] sm:$0xff] %v6137_v14  ;;  %557 = vrot.lane.b32.xlu1 %v6028_v9, %s5496_s27  ;;  %8793 = vst [vmem:[#allocation52_spill] sm:$0xff] %v6198_v31  ;;  %v1567_v1 = vcombine.low %v6130_v33, %v6121_v37  ;;  %v6229_v2 = vpack.c.bf16 %v5389_v32, %v5388_v4  ;;  %v6246_v4 = vpack.i.b16 %v5863_v53, %v5867_v54 }
  0xb4   : > { %553 = vrot.lane.b32.xlu0 %v6032_v24, %s5496_s27  ;;  %8785 = vst [vmem:[#allocation46_spill] sm:$0xff] %v6169_v55  ;;  %v6189_v6 = vrot.slane %v8789_v20, %v6044_v42  ;;  %v6192_v11 = vrot.slane %v1551_v40, %v6044_v42  ;;  %v6208_v40 = vpack.i.b16 %v5839_v23, %v5843_v57  ;;  %v699_v20 = vshrl.u32 %v5983_v59, 16  ;;  %v5396_v55 = vld [vmem:[%s5558_s25 + $0x102] sm:$0xff] }
  0xb5   : > { %v6152_v14 = vpop.permute.xlu1 %523  ;;  %8797 = vst [vmem:[#allocation56_spill] sm:$0xff] %v6229_v2  ;;  %v6261_v33 = vpack.i.b16 %v5891_v0, %v5895_v10  ;;  %v6265_v59 = vpack.c.bf16 %v5397_v44, %v5396_v55  ;;  %v6284_v55 = vpack.i.b16 %v5903_v51, %v5907_v52  ;;  %v6313_v44 = vpack.i.b16 %v5971_v49, %v5975_v50  ;;  %v8840_v49 = vld [vmem:[#allocation23_spill] sm:$0xff] }
  0xb6   : > { %8780 = vst [vmem:[#allocation42_spill] sm:$0xff] %v6152_v14  ;;  %v6156_v29 = vpop.permute.xlu0 %519  ;;  %v5392_v14 = vld [vmem:[%s5558_s25 + $0xda] sm:$0xff]  ;;  %8790 = vst [vmem:[#allocation50_spill] sm:$0xff] %v6189_v6  ;;  %v723_v50 = vshrl.u32 %v8840_v49, 16 }
  0xb7   : > { %8781 = vst [vmem:[#allocation43_spill] sm:$0xff] %v6156_v29  ;;  %581 = vrot.lane.b32.xlu1 %v6144_v7, %s5495_s26  ;;  %v5393_v29 = vld [vmem:[%s5558_s25 + $0xe2] sm:$0xff]  ;;  %8791 = vst [vmem:[#allocation51_spill] sm:$0xff] %v6192_v11 }
  0xb8   : > { %577 = vrot.lane.b32.xlu0 %v6148_v43, %s5495_s26  ;;  %8794 = vst [vmem:[#allocation53_spill] sm:$0xff] %v6208_v40  ;;  %v6216_v5 = vpack.c.bf16 %v5393_v29, %v5392_v14  ;;  %v5401_v29 = vld [vmem:[%s5558_s25 + $0x132] sm:$0xff]  ;;  %v700_v14 = vshrl.u32 %v5979_v56, 16  ;;  %v692_v40 = vshrl.u32 %v5963_v21, 16  ;;  %8800 = vst [vmem:[#allocation59_spill] sm:$0xff] %v6261_v33  ;;  %v8803_v21 = vcombine.low %v5788_v12, %v5803_v60 }
  0xb9   : > { %v6178_v3 = vpop.permute.xlu1 %531  ;;  %v6257_v37 = vpack.c.bf16 %v5401_v29, %v5400_v28  ;;  %8801 = vst [vmem:[#allocation60_spill] sm:$0xff] %v6265_v59  ;;  %v683_v29 = vshrl.u32 %v5945_v63, 16  ;;  %v676_v56 = vshrl.u32 %v5955_v18, 16  ;;  %8805 = vst [vmem:[#allocation63_spill] sm:$0xff] %v6284_v55  ;;  %v6292_v63 = vpack.i.b16 %v5919_v27, %v5923_v39 }
  0xba   : > { %8787 = vst [vmem:[#allocation48_spill] sm:$0xff] %v6178_v3  ;;  %v6210_v22 = vpop.permute.xlu0 %527  ;;  %8796 = vst [vmem:[#allocation55_spill] sm:$0xff] %v6216_v5  ;;  %v6222_v3 = vpack.i.b16 %v5851_v30, %v5855_v36  ;;  %v701_v33 = vpack.i.b16 %v700_v14, %v699_v20  ;;  %v675_v18 = vshrl.u32 %v5947_v17, 16  ;;  %v6301_v12 = vpack.i.b16 %v5931_v61, %v5935_v62  ;;  %v8842_v61 = vld [vmem:[#allocation15_spill] sm:$0xff] }
  0xbb   : > { %8795 = vst [vmem:[#allocation54_spill] sm:$0xff] %v6210_v22  ;;  %589 = vrot.lane.b32.xlu1 %v6160_v38, %s5495_s26  ;;  %v691_v22 = vshrl.u32 %v5967_v48, 16  ;;  %8799 = vst [vmem:[#allocation58_spill] sm:$0xff] %v6257_v37  ;;  %v6274_v48 = vrot.slane %v8803_v21, %v6044_v42  ;;  %v707_v62 = vshrl.u32 %v8842_v61, 16 }
  0xbc   : > { %585 = vrot.lane.b32.xlu0 %v6174_v16, %s5495_s26  ;;  %8806 = vst [vmem:[#allocation64_spill] sm:$0xff] %v6292_v63  ;;  %8807 = vst [vmem:[#allocation65_spill] sm:$0xff] %v6301_v12 }
  0xbd   : > { %v6235_v19 = vpop.permute.xlu1 %539  ;;  %8804 = vst [vmem:[#allocation62_spill] sm:$0xff] %v6274_v48  ;;  %v693_v14 = vpack.i.b16 %v692_v40, %v691_v22  ;;  %v677_v22 = vpack.i.b16 %v676_v56, %v675_v18  ;;  %8808 = vst [vmem:[#allocation66_spill] sm:$0xff] %v6313_v44  ;;  %v6321_v56 = vpack.i.b16 %v5987_v35, %v5993_v58  ;;  %v8815_v44 = vld [vmem:[#allocation3_spill] sm:$0xff]  ;;  %v8835_v58 = vld [vmem:[#allocation25_spill] sm:$0xff] }
  0xbe   : > { %8798 = vst [vmem:[#allocation57_spill] sm:$0xff] %v6235_v19  ;;  %v6250_v32 = vpop.permute.xlu0 %535  ;;  %v684_v19 = vshrl.u32 %v5953_v34, 16  ;;  %v6268_v34 = vrot.slane %v1567_v1, %v6044_v42  ;;  %v6340_v18 = vpack.i.b16 %v6028_v9, %v6032_v24  ;;  %v8812_v40 = vcombine.high %v5698_v25, %v5701_v26 }
  0xbf   : > { %597 = vrot.lane.b32.xlu1 %v6216_v5, %s5495_s26  ;;  %v1384_v1 = vcombine.high %v677_v22, %v693_v14  ;;  %8809 = vst [vmem:[#allocation67_spill] sm:$0xff] %v6321_v56  ;;  %v6379_v35 = vpack.i.b16 %v6144_v7, %v6148_v43 }
  0xc0   : > { %593 = vrot.lane.b32.xlu0 %v6229_v2, %s5495_s26  ;;  %8802 = vst [vmem:[#allocation61_spill] sm:$0xff] %v6268_v34  ;;  %v685_v20 = vpack.i.b16 %v684_v19, %v683_v29  ;;  %8811 = vst [vmem:[#allocation69_spill] sm:$0xff] %v6340_v18  ;;  %v6349_v55 = vrot.slane %v8812_v40, %v6044_v42  ;;  %v8818_v40 = vcombine.low %v5698_v25, %v5701_v26 }
  0xc1   : > { %v6279_v11 = vpop.permute.xlu1 %547  ;;  %v6375_v24 = vrot.slane %v1384_v1, %v5682_v13  ;;  %v8823_v25 = vshrl.u32 %v5851_v30, 16 }
  0xc2   : > { %v6288_v60 = vpop.permute.xlu0 %543  ;;  %v1400_v19 = vcombine.high %v685_v20, %v701_v33  ;;  %v1399_v21 = vcombine.low %v685_v20, %v701_v33  ;;  %v1383_v33 = vcombine.low %v677_v22, %v693_v14  ;;  %v6329_v20 = vpack.i.b16 %v6011_v8, %v6015_v47 }
  0xc3   : > { %605 = vrot.lane.b32.xlu1 %v6257_v37, %s5495_s26  ;;  %v731_v8 = vshrl.u32 %v8835_v58, 16  ;;  %v8837_v58 = vld [vmem:[#allocation18_spill] sm:$0xff] }
  0xc4   : > { %601 = vrot.lane.b32.xlu0 %v6265_v59, %s5495_s26  ;;  %8810 = vst [vmem:[#allocation68_spill] sm:$0xff] %v6329_v20  ;;  %v6336_v17 = vrot.slane %v1400_v19, %v5682_v13  ;;  %v6352_v28 = vrot.slane %v1399_v21, %v5682_v13  ;;  %v8814_v19 = vld [vmem:[#allocation2_spill] sm:$0xff]  ;;  %v6372_v21 = vrot.slane %v8818_v40, %v6044_v42 }
  0xc5   : > { %v6309_v29 = vpop.permute.xlu1 %555  ;;  %v8816_v20 = vcombine.high %v8814_v19, %v8815_v44  ;;  %v8817_v14 = vcombine.low %v8814_v19, %v8815_v44  ;;  %8819 = vst [vmem:[#allocation2_spill] sm:$0xff] %v6379_v35  ;;  %v8820_v44 = vshrl.u32 %v5831_v46, 16  ;;  %v8822_v19 = vshrl.u32 %v5855_v36, 16  ;;  %v8827_v46 = vld [vmem:[#allocation5_spill] sm:$0xff]  ;;  %v8834_v35 = vld [vmem:[#allocation24_spill] sm:$0xff] }
  0xc6   : > { %v6317_v12 = vpop.permute.xlu0 %551  ;;  %v1391_v1 = vrot.slane %v1383_v33, %v5682_v13  ;;  %v6394_v40 = vpack.i.b16 %v6160_v38, %v6174_v16  ;;  %v1464_v33 = vcombine.high %v6375_v24, %v6336_v17 }
  0xc7   : > { %613 = vrot.lane.b32.xlu1 %v6144_v7, %s5496_s27  ;;  %v6360_v18 = vrot.slane %v8816_v20, %v6044_v42  ;;  %v6366_v9 = vrot.slane %v8817_v14, %v6044_v42  ;;  %v8821_v20 = vshrl.u32 %v5827_v45, 16  ;;  %v853_v26 = vpack.i.b16 %v8823_v25, %v8822_v19  ;;  %v8826_v45 = vld [vmem:[#allocation4_spill] sm:$0xff] }
  0xc8   : > { %609 = vrot.lane.b32.xlu0 %v6148_v43, %s5496_s27  ;;  %8824 = vst [vmem:[#allocation3_spill] sm:$0xff] %v6394_v40  ;;  %v6398_v43 = vpack.i.b16 %v6216_v5, %v6229_v2  ;;  %v8828_v36 = vcombine.high %v8826_v45, %v8827_v46  ;;  %v8830_v25 = vshrl.u32 %v5843_v57, 16  ;;  %v8832_v7 = vshrl.u32 %v5867_v54, 16  ;;  %v8836_v57 = vld [vmem:[#allocation53_spill] sm:$0xff] }
  0xc9   : > { %v6343_v22 = vpop.permute.xlu1 %579  ;;  %v837_v14 = vpack.i.b16 %v8821_v20, %v8820_v44  ;;  %v8829_v20 = vcombine.low %v8826_v45, %v8827_v46  ;;  %v1448_v45 = vcombine.high %v1391_v1, %v6352_v28  ;;  %v2031_v46 = vcombine.low %v6202_v41, %v6222_v3 }
  0xca   : > { %v6354_v56 = vpop.permute.xlu0 %575  ;;  %8825 = vst [vmem:[#allocation71_spill] sm:$0xff] %v6398_v43  ;;  %v6406_v44 = vrot.slane %v8828_v36, %v6044_v42  ;;  %v8833_v36 = vshrl.u32 %v5863_v53, 16  ;;  %v732_v43 = vshrl.u32 %v8834_v35, 16  ;;  %v2047_v54 = vcombine.low %v8836_v57, %v6246_v4 }
  0xcb   : > { %8813 = vst [vmem:[#allocation70_spill] sm:$0xff] %v6354_v56  ;;  %621 = vrot.lane.b32.xlu1 %v6160_v38, %s5496_s27  ;;  %v6416_v19 = vrot.slane %v8829_v20, %v6044_v42  ;;  %v2032_v53 = vcombine.high %v6202_v41, %v6222_v3  ;;  %v2048_v35 = vcombine.high %v8836_v57, %v6246_v4 }
  0xcc   : > { %617 = vrot.lane.b32.xlu0 %v6174_v16, %s5496_s27  ;;  %v8831_v16 = vshrl.u32 %v5839_v23, 16  ;;  %v861_v40 = vpack.i.b16 %v8833_v36, %v8832_v7  ;;  %v2168_v23 = vcombine.high %v837_v14, %v853_v26  ;;  %v716_v7 = vshrl.u32 %v8837_v58, 16 }
  0xcd   : > { %v6408_v30 = vpop.permute.xlu1 %587  ;;  %v6452_v3 = vrot.slane %v1464_v33, %v6044_v42  ;;  %v733_v4 = vpack.i.b16 %v732_v43, %v731_v8  ;;  %v6457_v58 = vrot.slane %v1448_v45, %v6044_v42  ;;  %v1447_v49 = vcombine.low %v1391_v1, %v6352_v28 }
  0xce   : > { %v845_v38 = vpack.i.b16 %v8831_v16, %v8830_v25  ;;  %v6428_v47 = vpop.permute.xlu0 %583  ;;  %v8838_v16 = vld [vmem:[#allocation19_spill] sm:$0xff]  ;;  %v8839_v25 = vld [vmem:[#allocation22_spill] sm:$0xff]  ;;  %v2167_v61 = vcombine.low %v837_v14, %v853_v26  ;;  %v2039_v8 = vrot.slane %v2031_v46, %v5682_v13  ;;  %v2055_v43 = vrot.slane %v2047_v54, %v5682_v13 }
  0xcf   : > { %629 = vrot.lane.b32.xlu1 %v6216_v5, %s5496_s27  ;;  %v715_v20 = vshrl.u32 %v8838_v16, 16  ;;  %v724_v36 = vshrl.u32 %v8839_v25, 16  ;;  %v8841_v5 = vld [vmem:[#allocation14_spill] sm:$0xff]  ;;  %v8844_v25 = vld [vmem:[#allocation7_spill] sm:$0xff]  ;;  %v2046_v28 = vrot.slane %v2032_v53, %v5682_v13  ;;  %v2062_v1 = vrot.slane %v2048_v35, %v5682_v13 }
  0xd0   : > { %625 = vrot.lane.b32.xlu0 %v6229_v2, %s5496_s27  ;;  %v708_v63 = vshrl.u32 %v8841_v5, 16  ;;  %v2184_v41 = vcombine.high %v845_v38, %v861_v40  ;;  %v8843_v16 = vld [vmem:[#allocation6_spill] sm:$0xff]  ;;  %v2183_v33 = vcombine.low %v845_v38, %v861_v40  ;;  %v1485_v14 = vcombine.low %v6349_v55, %v6452_v3 }
  0xd1   : > { %v6449_v34 = vpop.permute.xlu1 %595  ;;  %v8845_v5 = vcombine.high %v8843_v16, %v8844_v25  ;;  %v717_v48 = vpack.i.b16 %v716_v7, %v715_v20  ;;  %v725_v45 = vpack.i.b16 %v724_v36, %v723_v50  ;;  %v6479_v38 = vrot.slane %v2168_v23, %v5682_v13 }
  0xd2   : > { %v6454_v57 = vpop.permute.xlu0 %591  ;;  %v6482_v26 = vrot.slane %v2184_v41, %v5682_v13  ;;  %v1481_v46 = vcombine.low %v6360_v18, %v6457_v58  ;;  %v6489_v54 = vrot.slane %v1447_v49, %v6044_v42  ;;  %v8847_v23 = vcombine.low %v8843_v16, %v8844_v25  ;;  %v8851_v49 = vld [vmem:[#allocation32_spill] sm:$0xff]  ;;  %v8852_v16 = vld [vmem:[#allocation26_spill] sm:$0xff] }
  0xd3   : > { %v6464_v2 = vrot.slane %v8845_v5, %v6044_v42  ;;  %637 = vrot.lane.b32.xlu1 %v6257_v37, %s5496_s27  ;;  %v709_v5 = vpack.i.b16 %v708_v63, %v707_v62  ;;  %v1640_v50 = vcombine.high %v717_v48, %v733_v4  ;;  %v1463_v62 = vcombine.low %v6375_v24, %v6336_v17 }
  0xd4   : > { %633 = vrot.lane.b32.xlu0 %v6265_v59, %s5496_s27  ;;  %v1639_v63 = vcombine.low %v717_v48, %v733_v4  ;;  %v6498_v53 = vrot.slane %v8847_v23, %v6044_v42  ;;  %v6501_v35 = vrot.slane %v2167_v61, %v5682_v13  ;;  %v6504_v7 = vrot.slane %v2183_v33, %v5682_v13 }
  0xd5   : > { %v6474_v31 = vpop.permute.xlu1 %603  ;;  %v1624_v20 = vcombine.high %v709_v5, %v725_v45  ;;  %v2096_v24 = vcombine.high %v2039_v8, %v2055_v43  ;;  %v2112_v48 = vcombine.high %v2046_v28, %v2062_v1  ;;  %v2095_v17 = vcombine.low %v2039_v8, %v2055_v43  ;;  %v8859_v43 = vld [vmem:[#allocation27_spill] sm:$0xff] }
  0xd6   : > { %v6484_v40 = vpop.permute.xlu0 %599  ;;  %8848 = vst [vmem:[#allocation5_spill] sm:$0xff] %v6498_v53  ;;  %v1623_v36 = vcombine.low %v709_v5, %v725_v45  ;;  %v6509_v41 = vpack.i.b16 %v6257_v37, %v6265_v59  ;;  %v1346_v25 = vcombine.high %v8852_v16, %v8851_v49  ;;  %v2111_v61 = vcombine.low %v2046_v28, %v2062_v1  ;;  %v8858_v1 = vld [vmem:[#allocation28_spill] sm:$0xff] }
  0xd7   : > { %8846 = vst [vmem:[#allocation4_spill] sm:$0xff] %v6484_v40  ;;  %3803 = vrot.lane.b32.xlu1 %v1485_v14, %s5500_s28  ;;  %v1654_v33 = vrot.slane %v1640_v50, %v5682_v13  ;;  %v6521_v8 = vrot.slane %v1463_v62, %v6044_v42  ;;  %v1647_v45 = vrot.slane %v1639_v63, %v5682_v13  ;;  %v8865_v37 = vshrl.u32 %v5907_v52, 16 }
  0xd8   : > { %3713 = vrot.lane.b32.xlu0 %v1481_v46, %s5500_s28  ;;  %8849 = vst [vmem:[#allocation24_spill] sm:$0xff] %v6509_v41  ;;  %v1479_v46 = vcombine.low %v6366_v9, %v6489_v54  ;;  %v1638_v50 = vrot.slane %v1624_v20, %v5682_v13  ;;  %v6536_v62 = vrot.slane %v2096_v24, %v6044_v42  ;;  %v8862_v24 = vshrl.u32 %v5891_v0, 16  ;;  %v8871_v0 = vld [vmem:[#allocation31_spill] sm:$0xff]  ;;  %v8873_v41 = vld [vmem:[#allocation33_spill] sm:$0xff] }
  0xd9   : > { %v6511_v4 = vpop.permute.xlu1 %611  ;;  %v6539_v63 = vrot.slane %v2112_v48, %v6044_v42  ;;  %v6542_v23 = vrot.slane %v2095_v17, %v6044_v42  ;;  %v1350_v5 = vcombine.high %v8859_v43, %v8858_v1  ;;  %v6550_v20 = vrot.slane %v2111_v61, %v6044_v42 }
  0xda   : > { %8850 = vst [vmem:[#allocation25_spill] sm:$0xff] %v6511_v4  ;;  %v6516_v14 = vpop.permute.xlu0 %607  ;;  %8854 = vst [vmem:[#allocation18_spill] sm:$0xff] %v6536_v62  ;;  %v1483_v17 = vcombine.low %v6372_v21, %v6521_v8  ;;  %v8866_v49 = vshrl.u32 %v5903_v51, 16  ;;  %v8868_v61 = vshrl.u32 %v5923_v39, 16  ;;  %v8876_v51 = vld [vmem:[#allocation38_spill] sm:$0xff] }
  0xdb   : > { %8853 = vst [vmem:[#allocation53_spill] sm:$0xff] %v6516_v14  ;;  %3728 = vrot.lane.b32.xlu1 %v1346_v25, %s5501_s29  ;;  %8855 = vst [vmem:[#allocation19_spill] sm:$0xff] %v6539_v63  ;;  %v1631_v25 = vrot.slane %v1623_v36, %v5682_v13  ;;  %v1704_v36 = vcombine.high %v1638_v50, %v1654_v33  ;;  %v8878_v14 = vld [vmem:[#allocation37_spill] sm:$0xff] }
  0xdc   : > { %3668 = vrot.lane.b32.xlu0 %v1479_v46, %s5500_s28  ;;  %8856 = vst [vmem:[#allocation22_spill] sm:$0xff] %v6542_v23  ;;  %8860 = vst [vmem:[#allocation14_spill] sm:$0xff] %v6550_v20  ;;  %v8861_v46 = vshrl.u32 %v5895_v10, 16  ;;  %v6566_v1 = vpack.i.b16 %v8866_v49, %v8865_v37  ;;  %v8869_v10 = vshrl.u32 %v5919_v27, 16  ;;  %v8874_v20 = vld [vmem:[#allocation29_spill] sm:$0xff]  ;;  %v1482_v27 = vcombine.high %v6360_v18, %v6457_v58 }
  0xdd   : > { %v6545_v28 = vpop.permute.xlu1 %619  ;;  %v1688_v52 = vcombine.high %v1631_v25, %v1647_v45  ;;  %v1687_v39 = vcombine.low %v1631_v25, %v1647_v45  ;;  %v1703_v49 = vcombine.low %v1638_v50, %v1654_v33  ;;  %v779_v4 = vshrl.u32 %v8878_v14, 16  ;;  %v8883_v25 = vld [vmem:[#allocation43_spill] sm:$0xff] }
  0xde   : > { %8857 = vst [vmem:[#allocation23_spill] sm:$0xff] %v6545_v28  ;;  %v6556_v59 = vpack.i.b16 %v8862_v24, %v8861_v46  ;;  %v6558_v48 = vpop.permute.xlu0 %615  ;;  %8867 = vst [vmem:[#allocation7_spill] sm:$0xff] %v6566_v1  ;;  %v6572_v43 = vpack.i.b16 %v8869_v10, %v8868_v61  ;;  %v772_v46 = vshrl.u32 %v8871_v0, 16  ;;  %v8872_v24 = vld [vmem:[#allocation35_spill] sm:$0xff]  ;;  %v8877_v61 = vld [vmem:[#allocation36_spill] sm:$0xff]  ;;  %v6599_v33 = vrot.slane %v1704_v36, %v6044_v42 }
  0xdf   : > { %8864 = vst [vmem:[#allocation6_spill] sm:$0xff] %v6558_v48  ;;  %v771_v16 = vshrl.u32 %v8872_v24, 16  ;;  %3818 = vrot.lane.b32.xlu1 %v1350_v5, %s5501_s29  ;;  %v1344_v48 = vcombine.high %v8874_v20, %v8873_v41  ;;  %v8875_v28 = vld [vmem:[#allocation39_spill] sm:$0xff]  ;;  %v780_v10 = vshrl.u32 %v8877_v61, 16  ;;  %v1486_v5 = vcombine.high %v6349_v55, %v6452_v3  ;;  %v8880_v41 = vld [vmem:[#allocation34_spill] sm:$0xff] }
  0xe0   : > { %8863 = vst [vmem:[#allocation15_spill] sm:$0xff] %v6556_v59  ;;  %8870 = vst [vmem:[#allocation72_spill] sm:$0xff] %v6572_v43  ;;  %v785_v37 = vpack.i.b16 %v8876_v51, %v8875_v28  ;;  %3758 = vrot.lane.b32.xlu0 %v1483_v17, %s5500_s28  ;;  %v8881_v20 = vld [vmem:[#allocation30_spill] sm:$0xff]  ;;  %v769_v17 = vpack.i.b16 %v8871_v0, %v8872_v24  ;;  %v788_v59 = vshrl.u32 %v8876_v51, 16  ;;  %v787_v18 = vshrl.u32 %v8875_v28, 16 }
  0xe1   : > { %v6586_v23 = vpop.permute.xlu1 %627  ;;  %v1348_v1 = vcombine.high %v8881_v20, %v8880_v41  ;;  %v6601_v45 = vpack.i.b16 %v772_v46, %v771_v16  ;;  %v1484_v55 = vcombine.high %v6372_v21, %v6521_v8  ;;  %v1480_v3 = vcombine.high %v6366_v9, %v6489_v54  ;;  %v8884_v0 = vld [vmem:[#allocation42_spill] sm:$0xff] }
  0xe2   : > { %8879 = vst [vmem:[#allocation31_spill] sm:$0xff] %v6586_v23  ;;  %v6596_v58 = vpop.permute.xlu0 %623  ;;  %v6609_v50 = vrot.slane %v1688_v52, %v6044_v42  ;;  %v1759_v28 = vcombine.low %v769_v17, %v785_v37  ;;  %v793_v24 = vpack.i.b16 %v8884_v0, %v8883_v25  ;;  %v6615_v16 = vrot.slane %v1687_v39, %v6044_v42  ;;  %v8888_v39 = vld [vmem:[#allocation46_spill] sm:$0xff] }
  0xe3   : > { %8882 = vst [vmem:[#allocation35_spill] sm:$0xff] %v6596_v58  ;;  %3743 = vrot.lane.b32.xlu1 %v1482_v27, %s5502_s30  ;;  %v6618_v36 = vrot.slane %v1703_v49, %v6044_v42  ;;  %v777_v21 = vpack.i.b16 %v8877_v61, %v8878_v14  ;;  %v6622_v8 = vpack.i.b16 %v780_v10, %v779_v4  ;;  %v8889_v14 = vld [vmem:[#allocation45_spill] sm:$0xff]  ;;  %v8891_v41 = vld [vmem:[#allocation54_spill] sm:$0xff]  ;;  %v795_v58 = vshrl.u32 %v8883_v25, 16 }
  0xe4   : > { %3683 = vrot.lane.b32.xlu0 %v1344_v48, %s5501_s29  ;;  %8885 = vst [vmem:[#allocation39_spill] sm:$0xff] %v6615_v16  ;;  %v1760_v9 = vcombine.high %v769_v17, %v785_v37  ;;  %v825_v54 = vpack.i.b16 %v6309_v29, %v6317_v12  ;;  %v6628_v52 = vpack.i.b16 %v788_v59, %v787_v18  ;;  %v796_v37 = vshrl.u32 %v8884_v0, 16  ;;  %v8890_v49 = vld [vmem:[#allocation57_spill] sm:$0xff] }
  0xe5   : > { %v6626_v46 = vpop.permute.xlu1 %635  ;;  %v1757_v51 = vcombine.low %v6599_v33, %v6406_v44  ;;  %v809_v61 = vpack.i.b16 %v8890_v49, %v6250_v32  ;;  %v817_v59 = vpack.i.b16 %v6279_v11, %v6288_v60  ;;  %v1753_v10 = vcombine.low %v6609_v50, %v6464_v2 }
  0xe6   : > { %8886 = vst [vmem:[#allocation38_spill] sm:$0xff] %v6626_v46  ;;  %v6630_v48 = vpop.permute.xlu0 %631  ;;  %v6647_v17 = vrot.slane %v1759_v28, %v5682_v13  ;;  %v1776_v18 = vcombine.high %v777_v21, %v793_v24  ;;  %v1751_v0 = vcombine.low %v6615_v16, %v6498_v53  ;;  %v6655_v27 = vrot.slane %v1760_v9, %v5682_v13 }
  0xe7   : > { %8887 = vst [vmem:[#allocation36_spill] sm:$0xff] %v6630_v48  ;;  %3833 = vrot.lane.b32.xlu1 %v1486_v5, %s5502_s30  ;;  %v8892_v5 = vld [vmem:[#allocation48_spill] sm:$0xff]  ;;  %v1808_v48 = vcombine.high %v809_v61, %v825_v54  ;;  %v889_v28 = vpack.i.b16 %v6474_v31, %v6484_v40  ;;  %v1775_v23 = vcombine.low %v777_v21, %v793_v24  ;;  %v828_v24 = vshrl.u32 %v6309_v29, 16 }
  0xe8   : > { %3773 = vrot.lane.b32.xlu0 %v1348_v1, %s5501_s29  ;;  %v801_v20 = vpack.i.b16 %v8892_v5, %v8891_v41  ;;  %v1807_v53 = vcombine.low %v809_v61, %v825_v54  ;;  %v873_v43 = vpack.i.b16 %v6408_v30, %v6428_v47  ;;  %v881_v40 = vpack.i.b16 %v6449_v34, %v6454_v57 }
  0xe9   : > { %v6661_v46 = vpop.permute.xlu1 %421  ;;  %v6676_v1 = vrot.slane %v1776_v18, %v5682_v13  ;;  %v827_v21 = vshrl.u32 %v6317_v12, 16  ;;  %v1822_v54 = vrot.slane %v1808_v48, %v5682_v13  ;;  %v865_v61 = vpack.i.b16 %v6343_v22, %v6354_v56 }
  0xea   : > { %8893 = vst [vmem:[#allocation37_spill] sm:$0xff] %v6661_v46  ;;  %v6666_v16 = vpop.permute.xlu0 %417  ;;  %v1792_v4 = vcombine.high %v801_v20, %v817_v59  ;;  %v1791_v25 = vcombine.low %v801_v20, %v817_v59  ;;  %v2079_v9 = vcombine.low %v873_v43, %v889_v28  ;;  %v811_v18 = vshrl.u32 %v6250_v32, 16 }
  0xeb   : > { %8894 = vst [vmem:[#allocation43_spill] sm:$0xff] %v6666_v16  ;;  %3788 = vrot.lane.b32.xlu1 %v1484_v55, %s5502_s30  ;;  %v2080_v16 = vcombine.high %v873_v43, %v889_v28  ;;  %v812_v55 = vshrl.u32 %v8890_v49, 16  ;;  %v820_v20 = vshrl.u32 %v6279_v11, 16  ;;  %v819_v29 = vshrl.u32 %v6288_v60, 16 }
  0xec   : > { %3698 = vrot.lane.b32.xlu0 %v1480_v3, %s5502_s30  ;;  %v1806_v3 = vrot.slane %v1792_v4, %v5682_v13  ;;  %v1815_v48 = vrot.slane %v1807_v53, %v5682_v13  ;;  %v2063_v59 = vcombine.low %v865_v61, %v881_v40  ;;  %v2064_v56 = vcombine.high %v865_v61, %v881_v40 }
  0xed   : > { %v6684_v46 = vpop.permute.xlu1 %429  ;;  %v1783_v43 = vrot.slane %v1775_v23, %v5682_v13  ;;  %v804_v49 = vshrl.u32 %v8892_v5, 16  ;;  %v803_v32 = vshrl.u32 %v8891_v41, 16  ;;  %v829_v28 = vpack.i.b16 %v828_v24, %v827_v21 }
  0xee   : > { %8895 = vst [vmem:[#allocation42_spill] sm:$0xff] %v6684_v46  ;;  %v6690_v12 = vpop.permute.xlu0 %425  ;;  %v1799_v11 = vrot.slane %v1791_v25, %v5682_v13  ;;  %v1872_v60 = vcombine.high %v1806_v3, %v1822_v54  ;;  %v6701_v4 = vrot.slane %v2079_v9, %v5682_v13  ;;  %v6704_v53 = vrot.slane %v2080_v16, %v5682_v13  ;;  %v8936_v46 = vld [vmem:[#allocation5_spill] sm:$0xff] }
  0xef   : > { %8896 = vst [vmem:[#allocation57_spill] sm:$0xff] %v6690_v12  ;;  %3805 = vrot.lane.b32.xlu1 %v1757_v51, %s5500_s28  ;;  %v797_v51 = vpack.i.b16 %v796_v37, %v795_v58  ;;  %v1840_v23 = vcombine.high %v6655_v27, %v6676_v1  ;;  %v813_v5 = vpack.i.b16 %v812_v55, %v811_v18 }
  0xf0   : > { %3715 = vrot.lane.b32.xlu0 %v1753_v10, %s5500_s28  ;;  %v821_v41 = vpack.i.b16 %v820_v20, %v819_v29  ;;  %v1855_v10 = vcombine.low %v1799_v11, %v1815_v48  ;;  %v1856_v21 = vcombine.high %v1799_v11, %v1815_v48  ;;  %v6713_v25 = vrot.slane %v2063_v59, %v5682_v13 }
  0xf1   : > { %v6706_v40 = vpop.permute.xlu1 %437  ;;  %v6716_v9 = vrot.slane %v2064_v56, %v5682_v13  ;;  %v8899_v16 = vcombine.high %v6183_v15, %v6189_v6  ;;  %v1823_v58 = vcombine.low %v6647_v17, %v1783_v43  ;;  %v1824_v37 = vcombine.high %v6647_v17, %v1783_v43  ;;  %v8932_v15 = vld [vmem:[#allocation63_spill] sm:$0xff] }
  0xf2   : > { %8897 = vst [vmem:[#allocation54_spill] sm:$0xff] %v6706_v40  ;;  %v6710_v24 = vpop.permute.xlu0 %433  ;;  %v805_v61 = vpack.i.b16 %v804_v49, %v803_v32  ;;  %v1944_v55 = vcombine.high %v813_v5, %v829_v28  ;;  %v1871_v18 = vcombine.low %v1806_v3, %v1822_v54  ;;  %v2128_v20 = vcombine.high %v6713_v25, %v6701_v4 }
  0xf3   : > { %8898 = vst [vmem:[#allocation48_spill] sm:$0xff] %v6710_v24  ;;  %3730 = vrot.lane.b32.xlu1 %v8899_v16, %s5501_s29  ;;  %v2144_v56 = vcombine.high %v6716_v9, %v6704_v53  ;;  %v6732_v48 = vrot.slane %v1872_v60, %v6044_v42  ;;  %v1839_v59 = vcombine.low %v6655_v27, %v6676_v1  ;;  %v8937_v24 = vld [vmem:[#allocation39_spill] sm:$0xff] }
  0xf4   : > { %3670 = vrot.lane.b32.xlu0 %v1751_v0, %s5500_s28  ;;  %v1911_v17 = vcombine.low %v6622_v8, %v797_v51  ;;  %v1912_v43 = vcombine.high %v6622_v8, %v797_v51  ;;  %v1943_v0 = vcombine.low %v813_v5, %v829_v28  ;;  %v1928_v3 = vcombine.high %v805_v61, %v821_v41 }
  0xf5   : > { %v6729_v29 = vpop.permute.xlu1 %445  ;;  %8900 = vst [vmem:[#allocation73_spill] sm:$0xff] %v6732_v48  ;;  %v8901_v49 = vcombine.high %v8889_v14, %v8888_v39  ;;  %v6745_v32 = vrot.slane %v1856_v21, %v6044_v42  ;;  %v6748_v11 = vrot.slane %v1840_v23, %v6044_v42  ;;  %v6751_v27 = vrot.slane %v1855_v10, %v6044_v42  ;;  %v8924_v39 = vld [vmem:[#allocation8_spill] sm:$0xff] }
  0xf6   : > { %v6738_v54 = vpop.permute.xlu0 %441  ;;  %v1927_v1 = vcombine.low %v805_v61, %v821_v41  ;;  %v6754_v8 = vrot.slane %v1944_v55, %v5682_v13  ;;  %v8905_v28 = vcombine.low %v6618_v36, %v6416_v19  ;;  %v6761_v60 = vrot.slane %v1824_v37, %v6044_v42  ;;  %v8913_v55 = vld [vmem:[#allocation52_spill] sm:$0xff] }
  0xf7   : > { %3820 = vrot.lane.b32.xlu1 %v8901_v49, %s5501_s29  ;;  %8902 = vst [vmem:[#allocation74_spill] sm:$0xff] %v6745_v32  ;;  %8903 = vst [vmem:[#allocation75_spill] sm:$0xff] %v6748_v11  ;;  %v6764_v51 = vrot.slane %v1823_v58, %v6044_v42  ;;  %v6769_v5 = vrot.slane %v1871_v18, %v6044_v42  ;;  %v6772_v41 = vrot.slane %v2128_v20, %v6044_v42  ;;  %v8914_v18 = vld [vmem:[#allocation51_spill] sm:$0xff] }
  0xf8   : > { %8904 = vst [vmem:[#allocation76_spill] sm:$0xff] %v6751_v27  ;;  %3760 = vrot.lane.b32.xlu0 %v8905_v28, %s5500_s28  ;;  %8906 = vst [vmem:[#allocation77_spill] sm:$0xff] %v6761_v60  ;;  %v6775_v10 = vrot.slane %v2144_v56, %v6044_v42  ;;  %v1895_v16 = vcombine.low %v6601_v45, %v6628_v52  ;;  %v6782_v58 = vrot.slane %v1912_v43, %v5682_v13  ;;  %v8922_v43 = vld [vmem:[#allocation9_spill] sm:$0xff] }
  0xf9   : > { %8907 = vst [vmem:[#allocation78_spill] sm:$0xff] %v6764_v51  ;;  %v6766_v23 = vpop.permute.xlu1 %453  ;;  %8909 = vst [vmem:[#allocation80_spill] sm:$0xff] %v6769_v5  ;;  %v1951_v37 = vrot.slane %v1943_v0, %v5682_v13  ;;  %v1616_v20 = vcombine.high %v8914_v18, %v8913_v55  ;;  %v6790_v49 = vrot.slane %v1928_v3, %v5682_v13  ;;  %v8923_v18 = vshrl.u32 %v8922_v43, 16 }
  0xfa   : > { %8908 = vst [vmem:[#allocation79_spill] sm:$0xff] %v6766_v23  ;;  %8910 = vst [vmem:[#allocation81_spill] sm:$0xff] %v6772_v41  ;;  %v6785_v61 = vpop.permute.xlu0 %449  ;;  %v8915_v56 = vcombine.high %v6609_v50, %v6464_v2  ;;  %v6797_v28 = vrot.slane %v1839_v59, %v6044_v42  ;;  %v8917_v21 = vcombine.high %v6601_v45, %v6628_v52  ;;  %v8925_v14 = vshrl.u32 %v8924_v39, 16 }
  0xfb   : > { %8911 = vst [vmem:[#allocation82_spill] sm:$0xff] %v6775_v10  ;;  %8912 = vst [vmem:[#allocation83_spill] sm:$0xff] %v6785_v61  ;;  %v1919_v55 = vrot.slane %v1911_v17, %v5682_v13  ;;  %v1935_v2 = vrot.slane %v1927_v1, %v5682_v13  ;;  %v1758_v50 = vcombine.high %v6599_v33, %v6406_v44  ;;  %v8921_v44 = vld [vmem:[#allocation61_spill] sm:$0xff] }
  0xfc   : > { %3745 = vrot.lane.b32.xlu1 %v8915_v56, %s5502_s30  ;;  %8916 = vst [vmem:[#allocation84_spill] sm:$0xff] %v6797_v28  ;;  %v6807_v3 = vrot.slane %v8917_v21, %v5682_v13  ;;  %3685 = vrot.lane.b32.xlu0 %v1616_v20, %s5501_s29  ;;  %v2008_v56 = vcombine.high %v6790_v49, %v6754_v8  ;;  %v8920_v21 = vld [vmem:[#allocation62_spill] sm:$0xff] }
  0xfd   : > { %v6814_v59 = vpop.permute.xlu1 %461  ;;  %v1903_v17 = vrot.slane %v1895_v16, %v5682_v13  ;;  %v1620_v33 = vcombine.high %v8921_v44, %v8920_v21  ;;  %v1992_v20 = vcombine.high %v1935_v2, %v1951_v37  ;;  %v6833_v6 = vpack.i.b16 %v8925_v14, %v8923_v18  ;;  %v8930_v21 = vld [vmem:[#allocation59_spill] sm:$0xff] }
  0xfe   : > { %8918 = vst [vmem:[#allocation85_spill] sm:$0xff] %v6814_v59  ;;  %v6825_v1 = vpop.permute.xlu0 %457  ;;  %v1976_v45 = vcombine.high %v6807_v3, %v6782_v58  ;;  %v8926_v16 = vcombine.high %v6479_v38, %v6482_v26  ;;  %v8927_v0 = vcombine.high %v6501_v35, %v6504_v7  ;;  %v8928_v39 = vcombine.low %v6501_v35, %v6504_v7  ;;  %v8934_v7 = vld [vmem:[#allocation72_spill] sm:$0xff] }
  0xff   : > { %8919 = vst [vmem:[#allocation86_spill] sm:$0xff] %v6825_v1  ;;  %v1960_v18 = vcombine.high %v1903_v17, %v1919_v55  ;;  %v1756_v61 = vcombine.high %v6618_v36, %v6416_v19  ;;  %v6868_v35 = vrot.slane %v2008_v56, %v6044_v42  ;;  %v1752_v40 = vcombine.high %v8937_v24, %v8936_v46  ;;  %v8938_v19 = vld [vmem:[#allocation7_spill] sm:$0xff] }
 0x100   : > { %3835 = vrot.lane.b32.xlu1 %v1758_v50, %s5502_s30  ;;  %v6842_v52 = vrot.slane %v8926_v16, %v6044_v42  ;;  %v6848_v43 = vrot.slane %v8927_v0, %v6044_v42  ;;  %v6854_v14 = vrot.slane %v8928_v39, %v6044_v42  ;;  %3775 = vrot.lane.b32.xlu0 %v1620_v33, %s5501_s29  ;;  %v8929_v50 = vld [vmem:[#allocation64_spill] sm:$0xff]  ;;  %v8931_v16 = vld [vmem:[#allocation65_spill] sm:$0xff]  ;;  %v8935_v33 = vld [vmem:[#allocation15_spill] sm:$0xff] }
 0x101   : > { %v2439_v44 = vcombine.low %v8930_v21, %v8929_v50  ;;  %v2455_v1 = vcombine.low %v8932_v15, %v8931_v16  ;;  %v2440_v59 = vcombine.high %v8930_v21, %v8929_v50  ;;  %v6863_v0 = vpop.permute.xlu1 %469  ;;  %v2576_v39 = vcombine.high %v8935_v33, %v8934_v7 }
 0x102   : > { %8933 = vst [vmem:[#allocation9_spill] sm:$0xff] %v6863_v0  ;;  %v2456_v23 = vcombine.high %v8932_v15, %v8931_v16  ;;  %v6874_v12 = vpop.permute.xlu0 %465  ;;  %v6879_v21 = vrot.slane %v1992_v20, %v6044_v42  ;;  %v1991_v50 = vcombine.low %v1935_v2, %v1951_v37  ;;  %v2592_v36 = vcombine.high %v8938_v19, %v6833_v6 }
 0x103   : > { %v2127_v56 = vcombine.low %v6713_v25, %v6701_v4  ;;  %v6887_v0 = vrot.slane %v1976_v45, %v6044_v42  ;;  %v2575_v15 = vcombine.low %v8935_v33, %v8934_v7  ;;  %v2591_v46 = vcombine.low %v8938_v19, %v6833_v6 }
 0x104   : > { %3790 = vrot.lane.b32.xlu1 %v1756_v61, %s5502_s30  ;;  %3700 = vrot.lane.b32.xlu0 %v1752_v40, %s5502_s30  ;;  %v6895_v24 = vrot.slane %v1960_v18, %v6044_v42  ;;  %v1959_v37 = vcombine.low %v1903_v17, %v1919_v55  ;;  %v6898_v2 = vrot.slane %v2439_v44, %v5682_v13  ;;  %v892_v25 = vshrl.u32 %v6474_v31, 16  ;;  %v8939_v61 = vld [vmem:[#allocation4_spill] sm:$0xff] }
 0x105   : > { %v6901_v4 = vrot.slane %v2455_v1, %v5682_v13  ;;  %v891_v45 = vshrl.u32 %v8939_v61, 16  ;;  %v6905_v20 = vpop.permute.xlu1 %477  ;;  %v2029_v6 = vcombine.low %v6887_v0, %v6868_v35  ;;  %v6910_v40 = vrot.slane %v2440_v59, %v5682_v13  ;;  %v8948_v61 = vld [vmem:[#allocation10_spill] sm:$0xff] }
 0x106   : > { %8940 = vst [vmem:[#allocation8_spill] sm:$0xff] %v6905_v20  ;;  %v876_v55 = vshrl.u32 %v6408_v30, 16  ;;  %v6913_v17 = vpop.permute.xlu0 %473  ;;  %v2025_v1 = vcombine.low %v6895_v24, %v6879_v21  ;;  %v6918_v44 = vrot.slane %v1991_v50, %v6044_v42  ;;  %v2007_v31 = vcombine.low %v6790_v49, %v6754_v8 }
 0x107   : > { %8941 = vst [vmem:[#allocation64_spill] sm:$0xff] %v6913_v17  ;;  %v875_v18 = vshrl.u32 %v6428_v47, 16  ;;  %v884_v16 = vshrl.u32 %v6449_v34, 16  ;;  %v883_v59 = vshrl.u32 %v6454_v57, 16  ;;  %v6927_v30 = vrot.slane %v2127_v56, %v6044_v42  ;;  %v8943_v57 = vld [vmem:[#allocation70_spill] sm:$0xff] }
 0x108   : > { %3807 = vrot.lane.b32.xlu1 %v2029_v6, %s5500_s28  ;;  %3717 = vrot.lane.b32.xlu0 %v2025_v1, %s5500_s28  ;;  %v6931_v7 = vrot.slane %v1959_v37, %v6044_v42  ;;  %v1975_v33 = vcombine.low %v6807_v3, %v6782_v58  ;;  %v6936_v8 = vrot.slane %v2576_v39, %v5682_v13  ;;  %v868_v34 = vshrl.u32 %v6343_v22, 16  ;;  %v8946_v22 = vld [vmem:[#allocation11_spill] sm:$0xff] }
 0x109   : > { %8942 = vst [vmem:[#allocation59_spill] sm:$0xff] %v6927_v30  ;;  %v6939_v47 = vrot.slane %v2456_v23, %v5682_v13  ;;  %v867_v49 = vshrl.u32 %v8943_v57, 16  ;;  %v893_v50 = vpack.i.b16 %v892_v25, %v891_v45  ;;  %v6943_v19 = vpop.permute.xlu1 %501  ;;  %v1890_v56 = vcombine.high %v6761_v60, %v6745_v32  ;;  %v8950_v57 = vld [vmem:[#allocation17_spill] sm:$0xff]  ;;  %v8952_v60 = vld [vmem:[#allocation16_spill] sm:$0xff] }
 0x10a   : > { %8944 = vst [vmem:[#allocation65_spill] sm:$0xff] %v6943_v19  ;;  %v6947_v37 = vpop.permute.xlu0 %497  ;;  %v2023_v58 = vcombine.low %v6931_v7, %v6918_v44  ;;  %v6952_v3 = vrot.slane %v2007_v31, %v6044_v42  ;;  %v6955_v23 = vrot.slane %v2592_v36, %v5682_v13  ;;  %v8947_v39 = vshrl.u32 %v8946_v22, 16  ;;  %v8954_v31 = vld [vmem:[#allocation22_spill] sm:$0xff] }
 0x10b   : > { %8945 = vst [vmem:[#allocation63_spill] sm:$0xff] %v6947_v37  ;;  %v8949_v25 = vshrl.u32 %v8948_v61, 16  ;;  %v877_v6 = vpack.i.b16 %v876_v55, %v875_v18  ;;  %v885_v1 = vpack.i.b16 %v884_v16, %v883_v59  ;;  %v8951_v32 = vshrl.u32 %v8950_v57, 16  ;;  %v8957_v18 = vld [vmem:[#allocation12_spill] sm:$0xff] }
 0x10c   : > { %3732 = vrot.lane.b32.xlu1 %v1890_v56, %s5501_s29  ;;  %v8953_v19 = vshrl.u32 %v8952_v60, 16  ;;  %3672 = vrot.lane.b32.xlu0 %v2023_v58, %s5500_s28  ;;  %v6970_v36 = vrot.slane %v1975_v33, %v6044_v42  ;;  %v2583_v22 = vrot.slane %v2575_v15, %v5682_v13  ;;  %v8958_v16 = vshrl.u32 %v8957_v18, 16  ;;  %v8959_v56 = vld [vmem:[#allocation21_spill] sm:$0xff] }
 0x10d   : > { %v1029_v45 = vpack.i.b16 %v8949_v25, %v8947_v39  ;;  %v8955_v39 = vld [vmem:[#allocation13_spill] sm:$0xff]  ;;  %v8960_v61 = vshrl.u32 %v8959_v56, 16  ;;  %v8961_v25 = vld [vmem:[#allocation20_spill] sm:$0xff]  ;;  %v2216_v57 = vcombine.high %v877_v6, %v893_v50  ;;  %v6981_v20 = vpop.permute.xlu1 %509  ;;  %v1894_v33 = vcombine.high %v6748_v11, %v6732_v48 }
 0x10e   : > { %v1045_v37 = vpack.i.b16 %v8953_v19, %v8951_v32  ;;  %v8956_v55 = vshrl.u32 %v8955_v39, 16  ;;  %v8962_v60 = vshrl.u32 %v8961_v25, 16  ;;  %v869_v19 = vpack.i.b16 %v868_v34, %v867_v49  ;;  %8963 = vst [vmem:[#allocation72_spill] sm:$0xff] %v6981_v20  ;;  %v6986_v17 = vpop.permute.xlu0 %505 }
 0x10f   : > { %v2599_v58 = vrot.slane %v2591_v46, %v5682_v13  ;;  %v2215_v15 = vcombine.low %v877_v6, %v893_v50  ;;  %8964 = vst [vmem:[#allocation15_spill] sm:$0xff] %v6986_v17  ;;  %v2027_v39 = vcombine.low %v6970_v36, %v6952_v3  ;;  %v2504_v34 = vcombine.high %v6898_v2, %v6901_v4 }
 0x110   : > { %v1037_v59 = vpack.i.b16 %v8958_v16, %v8956_v55  ;;  %v1053_v32 = vpack.i.b16 %v8962_v60, %v8960_v61  ;;  %v8965_v55 = vcombine.low %v6479_v38, %v6482_v26  ;;  %v2200_v49 = vcombine.high %v869_v19, %v885_v1  ;;  %3822 = vrot.lane.b32.xlu1 %v1894_v33, %s5501_s29 }
 0x111   : > { %v2520_v46 = vcombine.high %v6910_v40, %v6939_v47  ;;  %v2503_v50 = vcombine.low %v6898_v2, %v6901_v4  ;;  %v2880_v6 = vcombine.high %v1029_v45, %v1045_v37  ;;  %v2199_v16 = vcombine.low %v869_v19, %v885_v1  ;;  %3762 = vrot.lane.b32.xlu0 %v2027_v39, %s5500_s28  ;;  %v7007_v25 = vpop.permute.xlu1 %517 }
 0x112   : > { %v6994_v18 = vrot.slane %v8965_v55, %v6044_v42  ;;  %v2896_v56 = vcombine.high %v1037_v59, %v1053_v32  ;;  %v2879_v38 = vcombine.low %v1029_v45, %v1045_v37  ;;  %v2895_v26 = vcombine.low %v1037_v59, %v1053_v32  ;;  %8966 = vst [vmem:[#allocation5_spill] sm:$0xff] %v7007_v25  ;;  %v7016_v4 = vpop.permute.xlu0 %513 }
 0x113   : > { %v7005_v61 = vrot.slane %v2216_v57, %v5682_v13  ;;  %v2026_v60 = vcombine.high %v6895_v24, %v6879_v21  ;;  %v2656_v33 = vcombine.high %v6936_v8, %v6955_v23  ;;  %v2640_v55 = vcombine.high %v2583_v22, %v2599_v58  ;;  %8967 = vst [vmem:[#allocation39_spill] sm:$0xff] %v7016_v4 }
 0x114   : > { %v7014_v2 = vrot.slane %v2215_v15, %v5682_v13  ;;  %v1888_v37 = vcombine.high %v6764_v51, %v6751_v27  ;;  %v7021_v45 = vrot.slane %v2504_v34, %v6044_v42  ;;  %v2639_v1 = vcombine.low %v2583_v22, %v2599_v58  ;;  %v8984_v51 = vld [vmem:[#allocation35_spill] sm:$0xff] }
 0x115   : > { %v7024_v59 = vrot.slane %v2200_v49, %v5682_v13  ;;  %3747 = vrot.lane.b32.xlu1 %v2026_v60, %s5502_s30  ;;  %v2655_v21 = vcombine.low %v6936_v8, %v6955_v23  ;;  %v2519_v24 = vcombine.low %v6910_v40, %v6939_v47  ;;  %v7032_v32 = vrot.slane %v2880_v6, %v5682_v13  ;;  %v7045_v8 = vpop.permute.xlu1 %525 }
 0x116   : > { %8968 = vst [vmem:[#allocation7_spill] sm:$0xff] %v7021_v45  ;;  %v2207_v19 = vrot.slane %v2199_v16, %v5682_v13  ;;  %3687 = vrot.lane.b32.xlu0 %v1888_v37, %s5501_s29  ;;  %v7037_v22 = vrot.slane %v2896_v56, %v5682_v13  ;;  %v7040_v57 = vrot.slane %v2879_v38, %v5682_v13  ;;  %8973 = vst [vmem:[#allocation17_spill] sm:$0xff] %v7045_v8  ;;  %v7057_v39 = vpop.permute.xlu0 %521  ;;  %v8978_v16 = vld [vmem:[#allocation68_spill] sm:$0xff]  ;;  %v8979_v56 = vld [vmem:[#allocation66_spill] sm:$0xff] }
 0x117   : > { %8969 = vst [vmem:[#allocation4_spill] sm:$0xff] %v7032_v32  ;;  %v7043_v58 = vrot.slane %v2895_v26, %v5682_v13  ;;  %v2030_v40 = vcombine.high %v6887_v0, %v6868_v35  ;;  %v2280_v47 = vcombine.high %v7024_v59, %v7005_v61  ;;  %v7052_v23 = vrot.slane %v2520_v46, %v6044_v42  ;;  %v8983_v26 = vld [vmem:[#allocation31_spill] sm:$0xff]  ;;  %v8992_v32 = vld [vmem:[#allocation6_spill] sm:$0xff] }
 0x118   : > { %8970 = vst [vmem:[#allocation70_spill] sm:$0xff] %v7037_v22  ;;  %8971 = vst [vmem:[#allocation11_spill] sm:$0xff] %v7040_v57  ;;  %v7055_v15 = vrot.slane %v2503_v50, %v6044_v42  ;;  %v1892_v34 = vcombine.high %v6797_v28, %v6769_v5  ;;  %v2264_v49 = vcombine.high %v2207_v19, %v7014_v2  ;;  %v916_v27 = vshrl.u32 %v8983_v26, 16 }
 0x119   : > { %8972 = vst [vmem:[#allocation10_spill] sm:$0xff] %v7043_v58  ;;  %8974 = vst [vmem:[#allocation16_spill] sm:$0xff] %v7052_v23  ;;  %v7063_v6 = vrot.slane %v2656_v33, %v6044_v42  ;;  %v7066_v0 = vrot.slane %v2640_v55, %v6044_v42  ;;  %3837 = vrot.lane.b32.xlu1 %v2030_v40, %s5502_s30  ;;  %v7070_v35 = vrot.slane %v2639_v1, %v6044_v42  ;;  %v8980_v33 = vld [vmem:[#allocation69_spill] sm:$0xff]  ;;  %v8981_v55 = vld [vmem:[#allocation67_spill] sm:$0xff] }
 0x11a   : > { %8975 = vst [vmem:[#allocation13_spill] sm:$0xff] %v7055_v15  ;;  %8976 = vst [vmem:[#allocation12_spill] sm:$0xff] %v7057_v39  ;;  %v7073_v46 = vrot.slane %v2655_v21, %v6044_v42  ;;  %v7076_v50 = vrot.slane %v2519_v24, %v6044_v42  ;;  %v2743_v38 = vcombine.low %v8979_v56, %v8978_v16  ;;  %3777 = vrot.lane.b32.xlu0 %v1892_v34, %s5501_s29  ;;  %v7089_v21 = vpop.permute.xlu1 %533  ;;  %v7102_v28 = vpop.permute.xlu0 %529 }
 0x11b   : > { %v2759_v37 = vcombine.low %v8981_v55, %v8980_v33  ;;  %8982 = vst [vmem:[#allocation20_spill] sm:$0xff] %v7089_v21  ;;  %v2028_v24 = vcombine.high %v6970_v36, %v6952_v3  ;;  %v2024_v40 = vcombine.high %v6931_v7, %v6918_v44  ;;  %v7096_v34 = vrot.slane %v2280_v47, %v6044_v42  ;;  %v8986_v36 = vld [vmem:[#allocation25_spill] sm:$0xff]  ;;  %v8987_v44 = vld [vmem:[#allocation38_spill] sm:$0xff]  ;;  %v8988_v47 = vld [vmem:[#allocation36_spill] sm:$0xff] }
 0x11c   : > { %8977 = vst [vmem:[#allocation21_spill] sm:$0xff] %v7076_v50  ;;  %v2744_v60 = vcombine.high %v8979_v56, %v8978_v16  ;;  %v915_v5 = vshrl.u32 %v8984_v51, 16  ;;  %8985 = vst [vmem:[#allocation68_spill] sm:$0xff] %v7102_v28  ;;  %v7105_v1 = vrot.slane %v2264_v49, %v6044_v42  ;;  %v2263_v3 = vcombine.low %v2207_v19, %v7014_v2  ;;  %v8990_v56 = vld [vmem:[#allocation53_spill] sm:$0xff]  ;;  %v8991_v19 = vld [vmem:[#allocation23_spill] sm:$0xff] }
 0x11d   : > { %v900_v48 = vshrl.u32 %v8986_v36, 16  ;;  %v924_v7 = vshrl.u32 %v8987_v44, 16  ;;  %v923_v11 = vshrl.u32 %v8988_v47, 16  ;;  %3792 = vrot.lane.b32.xlu1 %v2028_v24, %s5502_s30  ;;  %v7113_v16 = vrot.slane %v2743_v38, %v5682_v13 }
 0x11e   : > { %v897_v58 = vpack.i.b16 %v8986_v36, %v8990_v56  ;;  %v899_v57 = vshrl.u32 %v8990_v56, 16  ;;  %v913_v49 = vpack.i.b16 %v8983_v26, %v8984_v51  ;;  %3702 = vrot.lane.b32.xlu0 %v2024_v40, %s5502_s30  ;;  %v2279_v2 = vcombine.low %v7024_v59, %v7005_v61  ;;  %v7127_v50 = vpop.permute.xlu1 %541  ;;  %v7133_v40 = vpop.permute.xlu0 %537 }
 0x11f   : > { %8989 = vst [vmem:[#allocation66_spill] sm:$0xff] %v7113_v16  ;;  %v908_v22 = vshrl.u32 %v8991_v19, 16  ;;  %v907_v24 = vshrl.u32 %v8992_v32, 16  ;;  %v921_v38 = vpack.i.b16 %v8987_v44, %v8988_v47  ;;  %8993 = vst [vmem:[#allocation69_spill] sm:$0xff] %v7127_v50  ;;  %v2301_v36 = vcombine.low %v6842_v52, %v7096_v34 }
 0x120   : > { %v2143_v51 = vcombine.low %v6716_v9, %v6704_v53  ;;  %v917_v26 = vpack.i.b16 %v916_v27, %v915_v5  ;;  %8994 = vst [vmem:[#allocation67_spill] sm:$0xff] %v7133_v40  ;;  %v2297_v61 = vcombine.low %v6848_v43, %v7105_v1  ;;  %v7138_v59 = vrot.slane %v2263_v3, %v6044_v42 }
 0x121   : > { %v905_v44 = vpack.i.b16 %v8991_v19, %v8992_v32  ;;  %v925_v47 = vpack.i.b16 %v924_v7, %v923_v11  ;;  %3809 = vrot.lane.b32.xlu1 %v2301_v36, %s5500_s28  ;;  %v7144_v56 = vrot.slane %v2759_v37, %v5682_v13  ;;  %v2760_v53 = vcombine.high %v8981_v55, %v8980_v33 }
 0x122   : > { %v901_v9 = vpack.i.b16 %v900_v48, %v899_v57  ;;  %v2303_v27 = vcombine.low %v897_v58, %v913_v49  ;;  %3719 = vrot.lane.b32.xlu0 %v2297_v61, %s5500_s28  ;;  %v7150_v5 = vrot.slane %v2279_v2, %v6044_v42  ;;  %v7153_v3 = vrot.slane %v2744_v60, %v5682_v13  ;;  %v7155_v19 = vpop.permute.xlu1 %549  ;;  %v7159_v48 = vpop.permute.xlu0 %545 }
 0x123   : > { %8995 = vst [vmem:[#allocation31_spill] sm:$0xff] %v7144_v56  ;;  %v909_v32 = vpack.i.b16 %v908_v22, %v907_v24  ;;  %v2304_v11 = vcombine.high %v897_v58, %v913_v49  ;;  %v2319_v7 = vcombine.low %v905_v44, %v921_v38  ;;  %8997 = vst [vmem:[#allocation25_spill] sm:$0xff] %v7155_v19 }
 0x124   : > { %8996 = vst [vmem:[#allocation35_spill] sm:$0xff] %v7153_v3  ;;  %v2162_v37 = vcombine.high %v6536_v62, %v6772_v41  ;;  %v2371_v36 = vcombine.low %v901_v9, %v917_v26  ;;  %v2372_v33 = vcombine.high %v901_v9, %v917_v26  ;;  %8998 = vst [vmem:[#allocation38_spill] sm:$0xff] %v7159_v48 }
 0x125   : > { %v2295_v57 = vcombine.low %v6854_v14, %v7138_v59  ;;  %v7164_v55 = vrot.slane %v2143_v51, %v6044_v42  ;;  %v2320_v60 = vcombine.high %v905_v44, %v921_v38  ;;  %v2387_v2 = vcombine.low %v909_v32, %v925_v47 }
 0x126   : > { %3734 = vrot.lane.b32.xlu1 %v2162_v37, %s5501_s29  ;;  %v7170_v58 = vrot.slane %v2760_v53, %v5682_v13  ;;  %v2311_v49 = vrot.slane %v2303_v27, %v5682_v13  ;;  %v2166_v24 = vcombine.high %v6539_v63, %v6775_v10  ;;  %v2299_v51 = vcombine.low %v6994_v18, %v7150_v5  ;;  %v7182_v53 = vpop.permute.xlu1 %557 }
 0x127   : > { %8999 = vst [vmem:[#allocation36_spill] sm:$0xff] %v7164_v55  ;;  %3674 = vrot.lane.b32.xlu0 %v2295_v57, %s5500_s28  ;;  %v2160_v38 = vcombine.high %v8954_v31, %v6927_v30  ;;  %v2318_v26 = vrot.slane %v2304_v11, %v5682_v13  ;;  %v2327_v61 = vrot.slane %v2319_v7, %v5682_v13  ;;  %9001 = vst [vmem:[#allocation23_spill] sm:$0xff] %v7182_v53  ;;  %v7190_v57 = vpop.permute.xlu0 %553  ;;  %v9003_v11 = vld [vmem:[#allocation14_spill] sm:$0xff]  ;;  %v9004_v7 = vld [vmem:[#allocation37_spill] sm:$0xff] }
 0x128   : > { %9000 = vst [vmem:[#allocation53_spill] sm:$0xff] %v7170_v58  ;;  %v2388_v44 = vcombine.high %v909_v32, %v925_v47  ;;  %v2298_v9 = vcombine.high %v6848_v43, %v7105_v1  ;;  %v2379_v27 = vrot.slane %v2371_v36, %v5682_v13  ;;  %v7188_v37 = vrot.slane %v2372_v33, %v5682_v13  ;;  %v9005_v33 = vld [vmem:[#allocation43_spill] sm:$0xff] }
 0x129   : > { %9002 = vst [vmem:[#allocation6_spill] sm:$0xff] %v7190_v57  ;;  %v2302_v22 = vcombine.high %v6842_v52, %v7096_v34  ;;  %v2334_v47 = vrot.slane %v2320_v60, %v5682_v13  ;;  %v2395_v32 = vrot.slane %v2387_v2, %v5682_v13  ;;  %v2164_v43 = vcombine.high %v9003_v11, %v7164_v55  ;;  %v9007_v55 = vld [vmem:[#allocation54_spill] sm:$0xff]  ;;  %v9008_v11 = vld [vmem:[#allocation48_spill] sm:$0xff] }
 0x12a   : > { %3824 = vrot.lane.b32.xlu1 %v2166_v24, %s5501_s29  ;;  %v2300_v1 = vcombine.high %v6994_v18, %v7150_v5  ;;  %v964_v36 = vshrl.u32 %v9004_v7, 16  ;;  %v7206_v52 = vpack.i.b16 %v9004_v7, %v9005_v33  ;;  %v963_v34 = vshrl.u32 %v9005_v33, 16  ;;  %v7215_v5 = vpop.permute.xlu1 %581 }
 0x12b   : > { %3764 = vrot.lane.b32.xlu0 %v2299_v51, %s5500_s28  ;;  %v2296_v60 = vcombine.high %v6854_v14, %v7138_v59  ;;  %v2335_v2 = vcombine.low %v2311_v49, %v2327_v61  ;;  %v2402_v24 = vrot.slane %v2388_v44, %v5682_v13  ;;  %v988_v30 = vshrl.u32 %v6729_v29, 16  ;;  %9006 = vst [vmem:[#allocation37_spill] sm:$0xff] %v7215_v5  ;;  %v7221_v33 = vpop.permute.xlu0 %577  ;;  %v9010_v59 = vld [vmem:[#allocation42_spill] sm:$0xff]  ;;  %v9011_v44 = vld [vmem:[#allocation57_spill] sm:$0xff] }
 0x12c   : > { %v987_v18 = vshrl.u32 %v6738_v54, 16  ;;  %v2336_v31 = vcombine.high %v2311_v49, %v2327_v61  ;;  %v980_v7 = vshrl.u32 %v9007_v55, 16  ;;  %v979_v10 = vshrl.u32 %v9008_v11, 16  ;;  %9009 = vst [vmem:[#allocation43_spill] sm:$0xff] %v7221_v33 }
 0x12d   : > { %v985_v51 = vpack.i.b16 %v6729_v29, %v6738_v54  ;;  %v2352_v14 = vcombine.high %v2318_v26, %v2334_v47  ;;  %v972_v63 = vshrl.u32 %v9010_v59, 16  ;;  %v971_v41 = vshrl.u32 %v9011_v44, 16 }
 0x12e   : > { %3749 = vrot.lane.b32.xlu1 %v2298_v9, %s5502_s30  ;;  %v2404_v62 = vcombine.high %v2379_v27, %v2395_v32  ;;  %v2351_v56 = vcombine.low %v2318_v26, %v2334_v47  ;;  %v969_v49 = vpack.i.b16 %v9010_v59, %v9011_v44  ;;  %v977_v61 = vpack.i.b16 %v9007_v55, %v9008_v11  ;;  %v7231_v5 = vpop.permute.xlu1 %589 }
 0x12f   : > { %3689 = vrot.lane.b32.xlu0 %v2160_v38, %s5501_s29  ;;  %v2403_v29 = vcombine.low %v2379_v27, %v2395_v32  ;;  %v965_v54 = vpack.i.b16 %v964_v36, %v963_v34  ;;  %v989_v16 = vpack.i.b16 %v988_v30, %v987_v18  ;;  %9012 = vst [vmem:[#allocation54_spill] sm:$0xff] %v7231_v5  ;;  %v7236_v47 = vpop.permute.xlu0 %585 }
 0x130   : > { %v2420_v33 = vcombine.high %v7188_v37, %v2402_v24  ;;  %v2823_v9 = vcombine.low %v7153_v3, %v7170_v58  ;;  %v981_v50 = vpack.i.b16 %v980_v7, %v979_v10  ;;  %v2487_v26 = vcombine.low %v969_v49, %v985_v51  ;;  %9013 = vst [vmem:[#allocation48_spill] sm:$0xff] %v7236_v47  ;;  %v9031_v3 = vld [vmem:[#allocation86_spill] sm:$0xff]  ;;  %v9032_v58 = vld [vmem:[#allocation9_spill] sm:$0xff] }
 0x131   : > { %v2419_v59 = vcombine.low %v7188_v37, %v2402_v24  ;;  %v7240_v55 = vrot.slane %v2336_v31, %v6044_v42  ;;  %v973_v38 = vpack.i.b16 %v972_v63, %v971_v41  ;;  %v2418_v30 = vrot.slane %v2404_v62, %v6044_v42 }
 0x132   : > { %3839 = vrot.lane.b32.xlu1 %v2302_v22, %s5502_s30  ;;  %v7245_v27 = vrot.slane %v2335_v2, %v6044_v42  ;;  %v7248_v11 = vrot.slane %v2352_v14, %v6044_v42  ;;  %v2471_v10 = vcombine.low %v7206_v52, %v977_v61  ;;  %v2488_v32 = vcombine.high %v969_v49, %v985_v51  ;;  %v7257_v22 = vpop.permute.xlu1 %597 }
 0x133   : > { %9014 = vst [vmem:[#allocation42_spill] sm:$0xff] %v7240_v55  ;;  %3779 = vrot.lane.b32.xlu0 %v2164_v43, %s5501_s29  ;;  %v2411_v37 = vrot.slane %v2403_v29, %v6044_v42  ;;  %v7254_v31 = vrot.slane %v2351_v56, %v6044_v42  ;;  %v2472_v63 = vcombine.high %v7206_v52, %v977_v61  ;;  %9018 = vst [vmem:[#allocation89_spill] sm:$0xff] %v7257_v22  ;;  %v7261_v18 = vpop.permute.xlu0 %593  ;;  %v9020_v56 = vmov 0  }
 0x134   : > { %9015 = vst [vmem:[#allocation57_spill] sm:$0xff] %v7245_v27  ;;  %9016 = vst [vmem:[#allocation87_spill] sm:$0xff] %v7248_v11  ;;  %v2623_v41 = vcombine.low %v973_v38, %v989_v16  ;;  %v2624_v62 = vcombine.high %v973_v38, %v989_v16  ;;  %v2434_v36 = vrot.slane %v2420_v33, %v6044_v42 }
 0x135   : > { %9017 = vst [vmem:[#allocation88_spill] sm:$0xff] %v7254_v31  ;;  %v2607_v34 = vcombine.low %v965_v54, %v981_v50  ;;  %v2608_v2 = vcombine.high %v965_v54, %v981_v50  ;;  %v2495_v24 = vrot.slane %v2487_v26, %v5682_v13  ;;  %9019 = vst [vmem:[#allocation90_spill] sm:$0xff] %v7261_v18 }
 0x136   : > { %v2427_v43 = vrot.slane %v2419_v59, %v6044_v42  ;;  %3794 = vrot.lane.b32.xlu1 %v2300_v1, %s5502_s30  ;;  %v7267_v7 = vcombine.high %v7240_v55, %v9020_v56  ;;  %v7271_v16 = vcombine.high %v7245_v27, %v9020_v56  ;;  %v7275_v52 = vcombine.high %v7248_v11, %v9020_v56  ;;  %v7295_v29 = vpop.permute.xlu1 %605  ;;  %v9030_v27 = vld [vmem:[#allocation85_spill] sm:$0xff] }
 0x137   : > { %v7278_v50 = vcombine.high %v2418_v30, %v9020_v56  ;;  %v2479_v51 = vrot.slane %v2471_v10, %v5682_v13  ;;  %v7282_v33 = vrot.slane %v2488_v32, %v5682_v13  ;;  %3704 = vrot.lane.b32.xlu0 %v2296_v60, %s5502_s30  ;;  %v7287_v1 = vcombine.high %v7254_v31, %v9020_v56  ;;  %v7302_v38 = vpop.permute.xlu0 %601  ;;  %v9027_v32 = vld [vmem:[#allocation79_spill] sm:$0xff] }
 0x138   : > { %v7290_v14 = vcombine.high %v2411_v37, %v9020_v56  ;;  %v2486_v44 = vrot.slane %v2472_v63, %v5682_v13  ;;  %v2631_v49 = vrot.slane %v2623_v41, %v5682_v13  ;;  %v2638_v61 = vrot.slane %v2624_v62, %v5682_v13  ;;  %9023 = vst [vmem:[#allocation93_spill] sm:$0xff] %v7295_v29  ;;  %v9028_v41 = vld [vmem:[#allocation83_spill] sm:$0xff] }
 0x139   : > { %9021 = vst [vmem:[#allocation91_spill] sm:$0xff] %v7278_v50  ;;  %v7298_v54 = vcombine.high %v2434_v36, %v9020_v56  ;;  %v2615_v60 = vrot.slane %v2607_v34, %v5682_v13  ;;  %v2622_v26 = vrot.slane %v2608_v2, %v5682_v13  ;;  %v2536_v59 = vcombine.high %v2479_v51, %v2495_v24 }
 0x13a   : > { %9022 = vst [vmem:[#allocation92_spill] sm:$0xff] %v7290_v14  ;;  %9025 = vst [vmem:[#allocation95_spill] sm:$0xff] %v7302_v38  ;;  %v7305_v10 = vcombine.high %v2427_v43, %v9020_v56  ;;  %v996_v63 = vshrl.u32 %v9027_v32, 16  ;;  %v993_v62 = vpack.i.b16 %v9027_v32, %v9028_v41  ;;  %v995_v31 = vshrl.u32 %v9028_v41, 16  ;;  %3721 = vrot.lane.b32.xlu1 %v2418_v30, %s5500_s28  ;;  %v9034_v14 = vld [vmem:[#allocation64_spill] sm:$0xff] }
 0x13b   : > { %9024 = vst [vmem:[#allocation94_spill] sm:$0xff] %v7298_v54  ;;  %v7313_v11 = vrot.slane %v2823_v9, %v6044_v42  ;;  %v2535_v34 = vcombine.low %v2479_v51, %v2495_v24  ;;  %v2552_v2 = vcombine.high %v2486_v44, %v7282_v33  ;;  %v1004_v55 = vshrl.u32 %v9030_v27, 16  ;;  %3676 = vrot.lane.b32.xlu0 %v2411_v37, %s5500_s28  ;;  %v7321_v54 = vpop.permute.xlu1 %613  ;;  %v9035_v9 = vld [vmem:[#allocation8_spill] sm:$0xff]  ;;  %v7327_v24 = vpop.permute.xlu0 %609 }
 0x13c   : > { %9026 = vst [vmem:[#allocation96_spill] sm:$0xff] %v7305_v10  ;;  %v1003_v56 = vshrl.u32 %v9031_v3, 16  ;;  %v1012_v10 = vshrl.u32 %v9032_v58, 16  ;;  %v1011_v32 = vshrl.u32 %v6874_v12, 16  ;;  %9033 = vst [vmem:[#allocation83_spill] sm:$0xff] %v7321_v54  ;;  %v2688_v41 = vcombine.high %v2622_v26, %v2638_v61 }
 0x13d   : > { %9029 = vst [vmem:[#allocation79_spill] sm:$0xff] %v7313_v11  ;;  %v2672_v30 = vcombine.high %v2615_v60, %v2631_v49  ;;  %v7325_v11 = vpack.i.b16 %v9035_v9, %v9034_v14  ;;  %9036 = vst [vmem:[#allocation85_spill] sm:$0xff] %v7327_v24  ;;  %v7330_v51 = vrot.slane %v2536_v59, %v6044_v42  ;;  %v1020_v54 = vshrl.u32 %v9035_v9, 16 }
 0x13e   : > { %v2671_v22 = vcombine.low %v2615_v60, %v2631_v49  ;;  %v2687_v18 = vcombine.low %v2622_v26, %v2638_v61  ;;  %v7332_v37 = vpack.i.b16 %v996_v63, %v995_v31  ;;  %v1009_v5 = vpack.i.b16 %v9032_v58, %v6874_v12  ;;  %3811 = vrot.lane.b32.xlu1 %v2434_v36, %s5500_s28 }
 0x13f   : > { %9037 = vst [vmem:[#allocation86_spill] sm:$0xff] %v7330_v51  ;;  %v1019_v47 = vshrl.u32 %v9034_v14, 16  ;;  %v2551_v50 = vcombine.low %v2486_v44, %v7282_v33  ;;  %v7342_v24 = vpack.i.b16 %v9030_v27, %v9031_v3  ;;  %3766 = vrot.lane.b32.xlu0 %v2427_v43, %s5500_s28  ;;  %v7346_v31 = vrot.slane %v2552_v2, %v6044_v42  ;;  %v7355_v14 = vpop.permute.xlu1 %621  ;;  %v7365_v43 = vpop.permute.xlu0 %617 }
 0x140   : > { %v7349_v49 = vrot.slane %v2535_v34, %v6044_v42  ;;  %v7351_v12 = vpack.i.b16 %v1004_v55, %v1003_v56  ;;  %v7353_v58 = vpack.i.b16 %v1012_v10, %v1011_v32  ;;  %9040 = vst [vmem:[#allocation8_spill] sm:$0xff] %v7355_v14  ;;  %v7358_v36 = vrot.slane %v2688_v41, %v6044_v42  ;;  %v9052_v14 = vld [vmem:[#allocation48_spill] sm:$0xff] }
 0x141   : > { %9038 = vst [vmem:[#allocation9_spill] sm:$0xff] %v7346_v31  ;;  %v7361_v3 = vrot.slane %v2672_v30, %v6044_v42  ;;  %v2728_v27 = vcombine.high %v7342_v24, %v7325_v11  ;;  %9041 = vst [vmem:[#allocation97_spill] sm:$0xff] %v7365_v43  ;;  %v7370_v55 = vrot.slane %v2671_v22, %v6044_v42 }
 0x142   : > { %9039 = vst [vmem:[#allocation64_spill] sm:$0xff] %v7349_v49  ;;  %v7373_v56 = vrot.slane %v2687_v18, %v6044_v42  ;;  %v2711_v44 = vcombine.low %v993_v62, %v1009_v5  ;;  %v2712_v61 = vcombine.high %v993_v62, %v1009_v5  ;;  %v7375_v60 = vpack.i.b16 %v1020_v54, %v1019_v47  ;;  %v9043_v54 = vld [vmem:[#allocation63_spill] sm:$0xff] }
 0x143   : > { %v1073_v26 = vpack.i.b16 %v7007_v25, %v7016_v4  ;;  %3736 = vrot.lane.b32.xlu1 %v7267_v7, %s5501_s29  ;;  %v1081_v59 = vpack.i.b16 %v7045_v8, %v7057_v39  ;;  %3691 = vrot.lane.b32.xlu0 %v7271_v16, %s5501_s29  ;;  %v7390_v47 = vrot.slane %v2551_v50, %v6044_v42  ;;  %v9044_v7 = vld [vmem:[#allocation65_spill] sm:$0xff]  ;;  %v7396_v63 = vpop.permute.xlu1 %629  ;;  %v7407_v2 = vpop.permute.xlu0 %625  ;;  %v9063_v39 = vld [vmem:[#allocation94_spill] sm:$0xff] }
 0x144   : > { %v2847_v18 = vcombine.low %v7332_v37, %v7353_v58  ;;  %v1057_v10 = vpack.i.b16 %v9044_v7, %v9043_v54  ;;  %9045 = vst [vmem:[#allocation65_spill] sm:$0xff] %v7396_v63  ;;  %v7403_v34 = vrot.slane %v2728_v27, %v5682_v13  ;;  %v1065_v50 = vpack.i.b16 %v6981_v20, %v6986_v17  ;;  %v9051_v63 = vld [vmem:[#allocation91_spill] sm:$0xff]  ;;  %v9058_v17 = vld [vmem:[#allocation37_spill] sm:$0xff] }
 0x145   : > { %9042 = vst [vmem:[#allocation98_spill] sm:$0xff] %v7390_v47  ;;  %9046 = vst [vmem:[#allocation99_spill] sm:$0xff] %v7407_v2  ;;  %v7414_v30 = vrot.slane %v2711_v44, %v5682_v13  ;;  %v7417_v9 = vrot.slane %v2712_v61, %v5682_v13  ;;  %v2863_v27 = vcombine.low %v7351_v12, %v7375_v60 }
 0x146   : > { %v2983_v5 = vcombine.low %v1057_v10, %v1073_v26  ;;  %v2999_v32 = vcombine.low %v1065_v50, %v1081_v59  ;;  %v3000_v33 = vcombine.high %v1065_v50, %v1081_v59  ;;  %v7430_v61 = vrot.slane %v2847_v18, %v5682_v13  ;;  %v9050_v59 = vld [vmem:[#allocation69_spill] sm:$0xff] }
 0x147   : > { %9047 = vst [vmem:[#allocation100_spill] sm:$0xff] %v7417_v9  ;;  %3826 = vrot.lane.b32.xlu1 %v7275_v52, %s5501_s29  ;;  %3781 = vrot.lane.b32.xlu0 %v7287_v1, %s5501_s29  ;;  %v2984_v41 = vcombine.high %v1057_v10, %v1073_v26  ;;  %v1105_v62 = vpack.i.b16 %v7155_v19, %v7159_v48  ;;  %v7436_v16 = vpop.permute.xlu1 %637  ;;  %v7446_v18 = vpop.permute.xlu0 %633 }
 0x148   : > { %v1113_v52 = vpack.i.b16 %v7182_v53, %v7190_v57  ;;  %9048 = vst [vmem:[#allocation101_spill] sm:$0xff] %v7436_v16  ;;  %v2791_v1 = vcombine.low %v7417_v9, %v7403_v34  ;;  %v1177_v26 = vpack.i.b16 %v7295_v29, %v7302_v38  ;;  %9049 = vst [vmem:[#allocation102_spill] sm:$0xff] %v7446_v18  ;;  %v9053_v18 = vld [vmem:[#allocation54_spill] sm:$0xff]  ;;  %v9055_v38 = vld [vmem:[#allocation89_spill] sm:$0xff] }
 0x149   : > { %v7449_v10 = vrot.slane %v2863_v27, %v5682_v13  ;;  %v2991_v44 = vrot.slane %v2983_v5, %v5682_v13  ;;  %v1089_v22 = vpack.i.b16 %v7089_v21, %v7102_v28  ;;  %v1097_v2 = vpack.i.b16 %v9050_v59, %v7133_v40  ;;  %v9054_v27 = vld [vmem:[#allocation90_spill] sm:$0xff]  ;;  %v9056_v5 = vld [vmem:[#allocation92_spill] sm:$0xff]  ;;  %v9062_v40 = vld [vmem:[#allocation3_spill] sm:$0xff] }
 0x14a   : > { %v3007_v50 = vrot.slane %v2999_v32, %v5682_v13  ;;  %v3014_v43 = vrot.slane %v3000_v33, %v5682_v13  ;;  %v1161_v16 = vpack.i.b16 %v9053_v18, %v9052_v14  ;;  %v1169_v29 = vpack.i.b16 %v9055_v38, %v9054_v27  ;;  %v9057_v32 = vld [vmem:[#allocation43_spill] sm:$0xff]  ;;  %v9060_v18 = vld [vmem:[#allocation2_spill] sm:$0xff]  ;;  %v9061_v38 = vld [vmem:[#allocation24_spill] sm:$0xff] }
 0x14b   : > { %3751 = vrot.lane.b32.xlu1 %v9051_v63, %s5502_s30  ;;  %3706 = vrot.lane.b32.xlu0 %v9056_v5, %s5502_s30  ;;  %v2998_v28 = vrot.slane %v2984_v41, %v5682_v13  ;;  %v3015_v21 = vcombine.low %v1089_v22, %v1105_v62  ;;  %v3031_v4 = vcombine.low %v1097_v2, %v1113_v52  ;;  %v7467_v63 = vpop.permute.xlu1 %3803  ;;  %v3714_v19 = vpop.permute.xlu0 %3713  ;;  %v9059_v14 = vld [vmem:[#allocation71_spill] sm:$0xff]  ;;  %v9064_v53 = vld [vmem:[#allocation96_spill] sm:$0xff] }
 0x14c   : > { %v3032_v25 = vcombine.high %v1097_v2, %v1113_v52  ;;  %v1153_v33 = vpack.i.b16 %v9058_v17, %v9057_v32  ;;  %v3303_v48 = vcombine.low %v1161_v16, %v1177_v26  ;;  %v3255_v27 = vcombine.low %v9060_v18, %v9059_v14 }
 0x14d   : > { %v3271_v5 = vcombine.low %v9062_v40, %v9061_v38  ;;  %v3016_v59 = vcombine.high %v1089_v22, %v1105_v62  ;;  %v3304_v41 = vcombine.high %v1161_v16, %v1177_v26  ;;  %v3256_v2 = vcombine.high %v9060_v18, %v9059_v14 }
 0x14e   : > { %v3272_v52 = vcombine.high %v9062_v40, %v9061_v38  ;;  %v3047_v32 = vcombine.low %v2991_v44, %v3007_v50  ;;  %v3048_v17 = vcombine.high %v2991_v44, %v3007_v50  ;;  %v3064_v8 = vcombine.high %v2998_v28, %v3014_v43 }
 0x14f   : > { %3841 = vrot.lane.b32.xlu1 %v9063_v39, %s5502_s30  ;;  %v3287_v57 = vcombine.low %v1153_v33, %v1169_v29  ;;  %3796 = vrot.lane.b32.xlu0 %v9064_v53, %s5502_s30  ;;  %v3063_v20 = vcombine.low %v2998_v28, %v3014_v43  ;;  %v3039_v22 = vrot.slane %v3031_v4, %v5682_v13  ;;  %v3729_v62 = vpop.permute.xlu1 %3728  ;;  %v7487_v18 = vpop.permute.xlu0 %3668 }
 0x150   : > { %v3046_v16 = vrot.slane %v3032_v25, %v5682_v13  ;;  %v3288_v39 = vcombine.high %v1153_v33, %v1169_v29  ;;  %v3023_v26 = vrot.slane %v3015_v21, %v5682_v13  ;;  %v3311_v14 = vrot.slane %v3303_v48, %v5682_v13 }
 0x151   : > { %v3263_v40 = vrot.slane %v3255_v27, %v5682_v13  ;;  %v3279_v38 = vrot.slane %v3271_v5, %v5682_v13  ;;  %v3030_v44 = vrot.slane %v3016_v59, %v5682_v13  ;;  %v3318_v28 = vrot.slane %v3304_v41, %v5682_v13 }
 0x152   : > { %v9065_v25 = vcombine.low %v7063_v6, %v7358_v36  ;;  %v3270_v4 = vrot.slane %v3256_v2, %v5682_v13  ;;  %v3286_v21 = vrot.slane %v3272_v52, %v5682_v13  ;;  %v3295_v48 = vrot.slane %v3287_v57, %v5682_v13 }
 0x153   : > { %v9066_v53 = vcombine.low %v7066_v0, %v7361_v3  ;;  %v7505_v29 = vrot.slane %v2791_v1, %v6044_v42  ;;  %v7508_v43 = vrot.slane %v3048_v17, %v6044_v42  ;;  %v7511_v59 = vrot.slane %v3064_v8, %v6044_v42  ;;  %v3819_v57 = vpop.permute.xlu1 %3818  ;;  %v3759_v52 = vpop.permute.xlu0 %3758 }
 0x154   : > { %3983 = vrot.lane.b32.xlu1 %v9065_v25, %s5500_s28  ;;  %v3079_v50 = vcombine.low %v3023_v26, %v3039_v22  ;;  %v3080_v27 = vcombine.high %v3023_v26, %v3039_v22  ;;  %v3096_v33 = vcombine.high %v3030_v44, %v3046_v16  ;;  %v3302_v5 = vrot.slane %v3288_v39, %v5682_v13  ;;  %v9068_v26 = vld [vmem:[#allocation26_spill] sm:$0xff] }
 0x155   : > { %3893 = vrot.lane.b32.xlu0 %v9066_v53, %s5500_s28  ;;  %v3095_v41 = vcombine.low %v3030_v44, %v3046_v16  ;;  %v3352_v2 = vcombine.high %v3295_v48, %v3311_v14  ;;  %v7515_v25 = vrot.slane %v3047_v32, %v6044_v42  ;;  %v3320_v1 = vcombine.high %v3263_v40, %v3279_v38  ;;  %v9069_v16 = vld [vmem:[#allocation32_spill] sm:$0xff] }
 0x156   : > { %v3351_v53 = vcombine.low %v3295_v48, %v3311_v14  ;;  %v3368_v54 = vcombine.high %v3302_v5, %v3318_v28  ;;  %v9067_v17 = vcombine.high %v7021_v45, %v7330_v51  ;;  %v7522_v8 = vrot.slane %v3063_v20, %v6044_v42 }
 0x157   : > { %v3336_v22 = vcombine.high %v3270_v4, %v3286_v21  ;;  %v3367_v39 = vcombine.low %v3302_v5, %v3318_v28  ;;  %v9070_v44 = vcombine.low %v9068_v26, %v9069_v16  ;;  %v9071_v32 = vcombine.low %v7070_v35, %v7370_v55 }
 0x158   : > { %3908 = vrot.lane.b32.xlu1 %v9067_v17, %s5501_s29  ;;  %v3319_v14 = vcombine.low %v3263_v40, %v3279_v38  ;;  %v3335_v48 = vcombine.low %v3270_v4, %v3286_v21  ;;  %v3744_v17 = vpop.permute.xlu1 %3743  ;;  %v7534_v20 = vrot.slane %v3080_v27, %v6044_v42  ;;  %v7537_v28 = vrot.slane %v3096_v33, %v6044_v42  ;;  %v9073_v38 = vld [vmem:[#allocation28_spill] sm:$0xff] }
 0x159   : > { %v4067_v9 = vsel %vm4023_vm0, %v9070_v44, %v3714_v19  ;;  %3848 = vrot.lane.b32.xlu0 %v9071_v32, %s5500_s28  ;;  %v7540_v5 = vrot.slane %v3079_v50, %v6044_v42  ;;  %v3684_v19 = vpop.permute.xlu0 %3683  ;;  %v7544_v16 = vrot.slane %v3095_v41, %v6044_v42  ;;  %v7547_v40 = vrot.slane %v3320_v1, %v6044_v42 }
 0x15a   : > { %v4081_v45 = vsel %vm4039_vm1, %v4067_v9, %v3729_v62  ;;  %v7550_v9 = vrot.slane %v3352_v2, %v6044_v42  ;;  %v9072_v62 = vld [vmem:[#allocation27_spill] sm:$0xff]  ;;  %v9075_v50 = vcombine.high %v7052_v23, %v7346_v31  ;;  %v7565_v27 = vrot.slane %v3368_v54, %v6044_v42 }
 0x15b   : > { %v4091_v26 = vsel %vm4050_vm2, %v4081_v45, %v3744_v17  ;;  %v9074_v4 = vcombine.low %v9072_v62, %v9073_v38  ;;  %v7562_v45 = vrot.slane %v3336_v22, %v6044_v42  ;;  %v9076_v33 = vcombine.low %v7073_v46, %v7373_v56  ;;  %v9121_v23 = vld [vmem:[#allocation39_spill] sm:$0xff] }
 0x15c   : > { %3998 = vrot.lane.b32.xlu1 %v9075_v50, %s5501_s29  ;;  %4378 = vmatprep.subr.bf16.mxu0 %v4091_v26  ;;  %v7572_v41 = vrot.slane %v3319_v14, %v6044_v42  ;;  %v7578_v2 = vrot.slane %v3335_v48, %v6044_v42  ;;  %v7581_v1 = vrot.slane %v3367_v39, %v6044_v42  ;;  %v3834_v32 = vpop.permute.xlu1 %3833  ;;  %v9082_v14 = vld [vmem:[#allocation79_spill] sm:$0xff]  ;;  %v1075_v31 = vshrl.u32 %v9121_v23, 16 }
 0x15d   : > { %v4145_v21 = vsel %vm4023_vm0, %v9074_v4, %v7467_v63  ;;  %3938 = vrot.lane.b32.xlu0 %v9076_v33, %s5500_s28  ;;  %v7575_v63 = vrot.slane %v3351_v53, %v6044_v42  ;;  %v9081_v54 = vcombine.high %v7351_v12, %v7375_v60  ;;  %v3774_v48 = vpop.permute.xlu0 %3773  ;;  %v9084_v38 = vcombine.high %v7066_v0, %v7361_v3  ;;  %v9109_v60 = vld [vmem:[#allocation72_spill] sm:$0xff]  ;;  %v9116_v39 = vld [vmem:[#allocation67_spill] sm:$0xff] }
 0x15e   : > { %9077 = vst [vmem:[#allocation91_spill] sm:$0xff] %v7572_v41  ;;  %9079 = vst [vmem:[#allocation71_spill] sm:$0xff] %v7578_v2  ;;  %v4159_v44 = vsel %vm4039_vm1, %v4145_v21, %v3819_v57  ;;  %v9083_v57 = vcombine.high %v7332_v37, %v7353_v58  ;;  %v9085_v50 = vcombine.low %v7342_v24, %v7325_v11  ;;  %v9086_v37 = vld [vmem:[#allocation30_spill] sm:$0xff]  ;;  %v9090_v11 = vld [vmem:[#allocation29_spill] sm:$0xff]  ;;  %v1099_v17 = vshrl.u32 %v9116_v39, 16 }
 0x15f   : > { %9078 = vst [vmem:[#allocation92_spill] sm:$0xff] %v7575_v63  ;;  %9080 = vst [vmem:[#allocation2_spill] sm:$0xff] %v7581_v1  ;;  %v7587_v22 = vrot.slane %v9081_v54, %v5682_v13  ;;  %v4169_v26 = vsel %vm4050_vm2, %v4159_v44, %v3834_v32  ;;  %v9087_v58 = vld [vmem:[#allocation34_spill] sm:$0xff]  ;;  %v9089_v0 = vcombine.high %v7055_v15, %v7349_v49  ;;  %v9091_v24 = vld [vmem:[#allocation33_spill] sm:$0xff] }
 0x160   : > { %v7605_v62 = vrot.slane %v9083_v57, %v5682_v13  ;;  %3923 = vrot.lane.b32.xlu1 %v9084_v38, %s5502_s30  ;;  %4421 = vmatprep.subr.bf16.mxu1 %v4169_v26  ;;  %v7619_v33 = vrot.slane %v9085_v50, %v5682_v13  ;;  %v9088_v54 = vcombine.low %v9086_v37, %v9087_v58  ;;  %v9117_v15 = vld [vmem:[#allocation25_spill] sm:$0xff]  ;;  %v9123_v39 = vld [vmem:[#allocation68_spill] sm:$0xff] }
 0x161   : > { %3863 = vrot.lane.b32.xlu0 %v9089_v0, %s5501_s29  ;;  %v9092_v26 = vcombine.low %v9090_v11, %v9091_v24  ;;  %v2710_v50 = vcombine.high %v7063_v6, %v7358_v36  ;;  %v9093_v0 = vld [vmem:[#allocation21_spill] sm:$0xff]  ;;  %v9095_v36 = vld [vmem:[#allocation35_spill] sm:$0xff]  ;;  %v9096_v11 = vld [vmem:[#allocation4_spill] sm:$0xff]  ;;  %v1108_v49 = vshrl.u32 %v9117_v15, 16  ;;  %v1091_v2 = vshrl.u32 %v9123_v39, 16 }
 0x162   : > { %v4106_v44 = vsel %vm4023_vm0, %v9088_v54, %v3759_v52  ;;  %v3789_v52 = vpop.permute.xlu1 %3788  ;;  %v2928_v37 = vcombine.high %v7605_v62, %v7587_v22  ;;  %v3699_v54 = vpop.permute.xlu0 %3698  ;;  %v2572_v3 = vcombine.high %v9093_v0, %v7390_v47  ;;  %v9094_v6 = vld [vmem:[#allocation53_spill] sm:$0xff]  ;;  %v9097_v24 = vld [vmem:[#allocation70_spill] sm:$0xff] }
 0x163   : > { %v4026_v57 = vsel %vm4023_vm0, %v9092_v26, %v7487_v18  ;;  %v4120_v38 = vsel %vm4039_vm1, %v4106_v44, %v3774_v48  ;;  %v2912_v18 = vcombine.high %v7430_v61, %v7449_v10  ;;  %v2824_v44 = vcombine.high %v9095_v36, %v9094_v6  ;;  %v9118_v0 = vld [vmem:[#allocation38_spill] sm:$0xff] }
 0x164   : > { %v4041_v58 = vsel %vm4039_vm1, %v4026_v57, %v3684_v19  ;;  %v4130_v32 = vsel %vm4050_vm2, %v4120_v38, %v3789_v52  ;;  %4013 = vrot.lane.b32.xlu1 %v2710_v50, %s5502_s30  ;;  %v2776_v19 = vcombine.high %v7414_v30, %v7619_v33  ;;  %v9098_v26 = vcombine.high %v9096_v11, %v9097_v24  ;;  %v9099_v50 = vld [vmem:[#allocation11_spill] sm:$0xff] }
 0x165   : > { %v4052_v48 = vsel %vm4050_vm2, %v4041_v58, %v3699_v54  ;;  %4422 = vmatpush1.bf16.msra.mxu1 %v4130_v32  ;;  %3953 = vrot.lane.b32.xlu0 %v2572_v3, %s5501_s29  ;;  %v2708_v32 = vcombine.high %v7073_v46, %v7373_v56  ;;  %v7667_v52 = vrot.slane %v2928_v37, %v6044_v42  ;;  %v9100_v58 = vld [vmem:[#allocation10_spill] sm:$0xff]  ;;  %v9104_v37 = vld [vmem:[#allocation31_spill] sm:$0xff] }
 0x166   : > { %4379 = vmatpush1.bf16.msra.mxu0 %v4052_v48  ;;  %v7660_v57 = vrot.slane %v9098_v26, %v6044_v42  ;;  %v7662_v38 = vpop.permute.xlu1 %3805  ;;  %v9101_v54 = vcombine.high %v9099_v50, %v9100_v58  ;;  %v9102_v48 = vcombine.low %v9099_v50, %v9100_v58  ;;  %v3716_v36 = vpop.permute.xlu0 %3715  ;;  %v2704_v26 = vcombine.high %v7070_v35, %v7370_v55  ;;  %v9103_v56 = vld [vmem:[#allocation66_spill] sm:$0xff] }
 0x167   : > { %v7684_v46 = vrot.slane %v2912_v18, %v6044_v42  ;;  %v9105_v4 = vcombine.high %v9103_v56, %v9104_v37  ;;  %v1060_v50 = vshrl.u32 %v9044_v7, 16  ;;  %v7697_v58 = vrot.slane %v2824_v44, %v6044_v42  ;;  %v9107_v18 = vld [vmem:[#allocation100_spill] sm:$0xff] }
 0x168   : > { %v7673_v3 = vrot.slane %v9101_v54, %v6044_v42  ;;  %v7679_v6 = vrot.slane %v9102_v48, %v6044_v42  ;;  %v2911_v54 = vcombine.low %v7430_v61, %v7449_v10  ;;  %3968 = vrot.lane.b32.xlu1 %v2708_v32, %s5502_s30  ;;  %v2959_v35 = vcombine.low %v9096_v11, %v9097_v24  ;;  %v9108_v48 = vld [vmem:[#allocation63_spill] sm:$0xff]  ;;  %v9112_v32 = vld [vmem:[#allocation6_spill] sm:$0xff] }
 0x169   : > { %v7690_v21 = vrot.slane %v9105_v4, %v6044_v42  ;;  %v2807_v55 = vcombine.low %v9103_v56, %v9104_v37  ;;  %v2792_v4 = vcombine.high %v9107_v18, %v7403_v34  ;;  %v1059_v12 = vshrl.u32 %v9108_v48, 16  ;;  %3878 = vrot.lane.b32.xlu0 %v2704_v26, %s5502_s30  ;;  %v9111_v10 = vld [vmem:[#allocation23_spill] sm:$0xff]  ;;  %v9113_v56 = vld [vmem:[#allocation17_spill] sm:$0xff]  ;;  %v9114_v18 = vld [vmem:[#allocation12_spill] sm:$0xff] }
 0x16a   : > { %v1068_v61 = vshrl.u32 %v9109_v60, 16  ;;  %v7709_v7 = vrot.slane %v2776_v19, %v6044_v42  ;;  %v1116_v44 = vshrl.u32 %v9111_v10, 16  ;;  %v1115_v53 = vshrl.u32 %v9112_v32, 16  ;;  %v3731_v11 = vpop.permute.xlu1 %3730  ;;  %v7719_v48 = vpop.permute.xlu0 %3670  ;;  %v9115_v10 = vld [vmem:[#allocation69_spill] sm:$0xff] }
 0x16b   : > { %9106 = vst [vmem:[#allocation24_spill] sm:$0xff] %v7690_v21  ;;  %v2981_v24 = vcombine.low %v7667_v52, %v7660_v57  ;;  %v2927_v34 = vcombine.low %v7605_v62, %v7587_v22  ;;  %v1084_v37 = vshrl.u32 %v9113_v56, 16  ;;  %v1083_v60 = vshrl.u32 %v9114_v18, 16  ;;  %v9119_v62 = vld [vmem:[#allocation15_spill] sm:$0xff]  ;;  %v9120_v18 = vld [vmem:[#allocation5_spill] sm:$0xff] }
 0x16c   : > { %9110 = vst [vmem:[#allocation3_spill] sm:$0xff] %v7709_v7  ;;  %v2977_v19 = vcombine.low %v7684_v46, %v7673_v3  ;;  %v7724_v26 = vrot.slane %v2911_v54, %v6044_v42  ;;  %v1100_v32 = vshrl.u32 %v9115_v10, 16  ;;  %v1107_v22 = vshrl.u32 %v9118_v0, 16  ;;  %v9122_v10 = vld [vmem:[#allocation20_spill] sm:$0xff] }
 0x16d   : > { %3985 = vrot.lane.b32.xlu1 %v2981_v24, %s5500_s28  ;;  %v1067_v56 = vshrl.u32 %v9119_v62, 16  ;;  %v1076_v47 = vshrl.u32 %v9120_v18, 16  ;;  %v7736_v54 = vrot.slane %v2792_v4, %v6044_v42  ;;  %v1092_v51 = vshrl.u32 %v9122_v10, 16 }
 0x16e   : > { %3895 = vrot.lane.b32.xlu0 %v2977_v19, %s5500_s28  ;;  %v1117_v15 = vpack.i.b16 %v1116_v44, %v1115_v53  ;;  %v3821_v1 = vpop.permute.xlu1 %3820  ;;  %v2842_v0 = vcombine.high %v7709_v7, %v7690_v21  ;;  %v2775_v24 = vcombine.low %v7414_v30, %v7619_v33  ;;  %v3761_v62 = vpop.permute.xlu0 %3760  ;;  %v2975_v23 = vcombine.low %v7724_v26, %v7679_v6  ;;  %v9124_v7 = vld [vmem:[#allocation49_spill] sm:$0xff]  ;;  %v9125_v21 = vld [vmem:[#allocation50_spill] sm:$0xff] }
 0x16f   : > { %v7747_v19 = vrot.slane %v2927_v34, %v6044_v42  ;;  %v7750_v4 = vrot.slane %v2959_v35, %v6044_v42  ;;  %v1085_v18 = vpack.i.b16 %v1084_v37, %v1083_v60  ;;  %v1101_v10 = vpack.i.b16 %v1100_v32, %v1099_v17 }
 0x170   : > { %v1109_v53 = vpack.i.b16 %v1108_v49, %v1107_v22  ;;  %v7754_v44 = vrot.slane %v2807_v55, %v6044_v42  ;;  %v1061_v39 = vpack.i.b16 %v1060_v50, %v1059_v12  ;;  %v1069_v30 = vpack.i.b16 %v1068_v61, %v1067_v56  ;;  %v9127_v50 = vld [vmem:[#allocation45_spill] sm:$0xff]  ;;  %v9128_v61 = vld [vmem:[#allocation46_spill] sm:$0xff] }
 0x171   : > { %3910 = vrot.lane.b32.xlu1 %v2842_v0, %s5501_s29  ;;  %v1077_v33 = vpack.i.b16 %v1076_v47, %v1075_v31  ;;  %v9126_v41 = vcombine.low %v9124_v7, %v9125_v21  ;;  %v1093_v35 = vpack.i.b16 %v1092_v51, %v1091_v2  ;;  %v3168_v63 = vcombine.high %v1101_v10, %v1117_v15 }
 0x172   : > { %3850 = vrot.lane.b32.xlu0 %v2975_v23, %s5500_s28  ;;  %v3746_v49 = vpop.permute.xlu1 %3745  ;;  %v2846_v37 = vcombine.high %v7736_v54, %v7697_v58  ;;  %v3167_v55 = vcombine.low %v1101_v10, %v1117_v15  ;;  %v3686_v60 = vpop.permute.xlu0 %3685  ;;  %v2979_v31 = vcombine.low %v7747_v19, %v7750_v4  ;;  %v7768_v12 = vrot.slane %v2775_v24, %v6044_v42 }
 0x173   : > { %v4070_v34 = vsel %vm4023_vm0, %v9126_v41, %v3716_v36  ;;  %v3136_v41 = vcombine.high %v1069_v30, %v1085_v18  ;;  %v3152_v21 = vcombine.high %v1093_v35, %v1109_v53  ;;  %v3119_v51 = vcombine.low %v1061_v39, %v1077_v33 }
 0x174   : > { %v4083_v17 = vsel %vm4039_vm1, %v4070_v34, %v3731_v11  ;;  %v3135_v2 = vcombine.low %v1069_v30, %v1085_v18  ;;  %v3151_v36 = vcombine.low %v1093_v35, %v1109_v53  ;;  %v9129_v7 = vcombine.low %v9127_v50, %v9128_v61  ;;  %v9131_v30 = vld [vmem:[#allocation62_spill] sm:$0xff]  ;;  %v9137_v50 = vld [vmem:[#allocation41_spill] sm:$0xff] }
 0x175   : > { %v4094_v47 = vsel %vm4050_vm2, %v4083_v17, %v3746_v49  ;;  %4000 = vrot.lane.b32.xlu1 %v2846_v37, %s5501_s29  ;;  %v3120_v32 = vcombine.high %v1061_v39, %v1077_v33  ;;  %v7778_v22 = vrot.slane %v3168_v63, %v5682_v13  ;;  %v2978_v0 = vcombine.high %v7684_v46, %v7673_v3  ;;  %v9130_v39 = vld [vmem:[#allocation61_spill] sm:$0xff]  ;;  %v9133_v17 = vld [vmem:[#allocation51_spill] sm:$0xff]  ;;  %v9134_v49 = vld [vmem:[#allocation52_spill] sm:$0xff] }
 0x176   : > { %4380 = vmatprep.subr.bf16.mxu0 %v4094_v47  ;;  %v4148_v11 = vsel %vm4023_vm0, %v9129_v7, %v7662_v38  ;;  %3940 = vrot.lane.b32.xlu0 %v2979_v31, %s5500_s28  ;;  %v3836_v15 = vpop.permute.xlu1 %3835  ;;  %v3175_v24 = vrot.slane %v3167_v55, %v5682_v13  ;;  %v3776_v23 = vpop.permute.xlu0 %3775  ;;  %v2840_v18 = vcombine.high %v7768_v12, %v7754_v44  ;;  %v1123_v61 = vshrl.u32 %v9137_v50, 16 }
 0x177   : > { %v4161_v56 = vsel %vm4039_vm1, %v4148_v11, %v3821_v1  ;;  %v7788_v10 = vrot.slane %v3136_v41, %v5682_v13  ;;  %v7791_v63 = vrot.slane %v3152_v21, %v5682_v13  ;;  %v2982_v1 = vcombine.high %v7667_v52, %v7660_v57 }
 0x178   : > { %v4172_v38 = vsel %vm4050_vm2, %v4161_v56, %v3836_v15  ;;  %v3127_v3 = vrot.slane %v3119_v51, %v5682_v13  ;;  %v3143_v46 = vrot.slane %v3135_v2, %v5682_v13  ;;  %v3159_v53 = vrot.slane %v3151_v36, %v5682_v13  ;;  %v9136_v2 = vld [vmem:[#allocation40_spill] sm:$0xff]  ;;  %v9140_v15 = vld [vmem:[#allocation55_spill] sm:$0xff] }
 0x179   : > { %3925 = vrot.lane.b32.xlu1 %v2978_v0, %s5502_s30  ;;  %4423 = vmatprep.subr.bf16.mxu1 %v4172_v38  ;;  %v9132_v33 = vcombine.low %v9130_v39, %v9131_v30  ;;  %v7805_v35 = vrot.slane %v3120_v32, %v5682_v13  ;;  %v9135_v57 = vcombine.low %v9133_v17, %v9134_v49  ;;  %v1124_v36 = vshrl.u32 %v9136_v2, 16  ;;  %v9139_v32 = vld [vmem:[#allocation47_spill] sm:$0xff]  ;;  %v9142_v39 = vld [vmem:[#allocation58_spill] sm:$0xff]  ;;  %v9143_v17 = vld [vmem:[#allocation60_spill] sm:$0xff] }
 0x17a   : > { %3865 = vrot.lane.b32.xlu0 %v2840_v18, %s5501_s29  ;;  %v3791_v55 = vpop.permute.xlu1 %3790  ;;  %v3232_v31 = vcombine.high %v7791_v63, %v7778_v22  ;;  %v2844_v41 = vcombine.high %v7505_v29, %v9082_v14  ;;  %v3216_v51 = vcombine.high %v3159_v53, %v3175_v24  ;;  %v1131_v56 = vshrl.u32 %v9139_v32, 16  ;;  %v9141_v18 = vld [vmem:[#allocation56_spill] sm:$0xff] }
 0x17b   : > { %v4109_v34 = vsel %vm4023_vm0, %v9132_v33, %v3761_v62  ;;  %v4029_v52 = vsel %vm4023_vm0, %v9135_v57, %v7719_v48  ;;  %v3701_v62 = vpop.permute.xlu0 %3700  ;;  %v3200_v7 = vcombine.high %v7805_v35, %v7788_v10  ;;  %v1140_v0 = vshrl.u32 %v9140_v15, 16 }
 0x17c   : > { %v4122_v37 = vsel %vm4039_vm1, %v4109_v34, %v3776_v23  ;;  %v4043_v47 = vsel %vm4039_vm1, %v4029_v52, %v3686_v60  ;;  %v9138_v60 = vld [vmem:[#allocation44_spill] sm:$0xff]  ;;  %v3184_v23 = vcombine.high %v3127_v3, %v3143_v46  ;;  %v1139_v38 = vshrl.u32 %v9141_v18, 16  ;;  %v9151_v18 = vld [vmem:[#allocation43_spill] sm:$0xff] }
 0x17d   : > { %v4133_v21 = vsel %vm4050_vm2, %v4122_v37, %v3791_v55  ;;  %4015 = vrot.lane.b32.xlu1 %v2982_v1, %s5502_s30  ;;  %v4055_v48 = vsel %vm4050_vm2, %v4043_v47, %v3701_v62  ;;  %v1132_v11 = vshrl.u32 %v9138_v60, 16  ;;  %v1148_v1 = vshrl.u32 %v9142_v39, 16 }
 0x17e   : > { %4424 = vmatpush1.bf16.msra.mxu1 %v4133_v21  ;;  %3955 = vrot.lane.b32.xlu0 %v2844_v41, %s5501_s29  ;;  %v7831_v30 = vpop.permute.xlu1 %3807  ;;  %v2980_v33 = vcombine.high %v7747_v19, %v7750_v4  ;;  %v7836_v34 = vrot.slane %v3232_v31, %v6044_v42  ;;  %v1147_v49 = vshrl.u32 %v9143_v17, 16  ;;  %v2976_v52 = vcombine.high %v7724_v26, %v7679_v6  ;;  %v9144_v41 = vld [vmem:[#allocation93_spill] sm:$0xff]  ;;  %v9145_v6 = vld [vmem:[#allocation95_spill] sm:$0xff] }
 0x17f   : > { %4381 = vmatpush1.bf16.msra.mxu0 %v4055_v48  ;;  %v3718_v57 = vpop.permute.xlu0 %3717  ;;  %v7842_v37 = vrot.slane %v3216_v51, %v6044_v42  ;;  %v3215_v55 = vcombine.low %v3159_v53, %v3175_v24  ;;  %v7846_v47 = vrot.slane %v3200_v7, %v6044_v42  ;;  %v7850_v19 = vrot.slane %v3184_v23, %v6044_v42  ;;  %v9147_v7 = vld [vmem:[#allocation48_spill] sm:$0xff] }
 0x180   : > { %v3183_v4 = vcombine.low %v3127_v3, %v3143_v46  ;;  %v1125_v31 = vpack.i.b16 %v1124_v36, %v1123_v61  ;;  %v1133_v62 = vpack.i.b16 %v1132_v11, %v1131_v56  ;;  %v1180_v21 = vshrl.u32 %v9144_v41, 16  ;;  %v9146_v36 = vld [vmem:[#allocation54_spill] sm:$0xff]  ;;  %v9148_v11 = vld [vmem:[#allocation89_spill] sm:$0xff] }
 0x181   : > { %3970 = vrot.lane.b32.xlu1 %v2980_v33, %s5502_s30  ;;  %v1179_v26 = vshrl.u32 %v9145_v6, 16  ;;  %v3253_v24 = vcombine.low %v7846_v47, %v7836_v34  ;;  %v1141_v53 = vpack.i.b16 %v1140_v0, %v1139_v38  ;;  %v3249_v50 = vcombine.low %v7850_v19, %v7842_v37  ;;  %v9149_v56 = vld [vmem:[#allocation90_spill] sm:$0xff]  ;;  %v9152_v41 = vld [vmem:[#allocation77_spill] sm:$0xff] }
 0x182   : > { %3880 = vrot.lane.b32.xlu0 %v2976_v52, %s5502_s30  ;;  %v3733_v51 = vpop.permute.xlu1 %3732  ;;  %v7861_v48 = vrot.slane %v3215_v55, %v6044_v42  ;;  %v3231_v3 = vcombine.low %v7791_v63, %v7778_v22  ;;  %v1149_v46 = vpack.i.b16 %v1148_v1, %v1147_v49  ;;  %v1164_v61 = vshrl.u32 %v9146_v36, 16  ;;  %v9150_v22 = vld [vmem:[#allocation37_spill] sm:$0xff]  ;;  %v9153_v6 = vld [vmem:[#allocation74_spill] sm:$0xff] }
 0x183   : > { %v7856_v2 = vpop.permute.xlu0 %3672  ;;  %v1163_v60 = vshrl.u32 %v9147_v7, 16  ;;  %v1172_v32 = vshrl.u32 %v9148_v11, 16  ;;  %v1171_v15 = vshrl.u32 %v9149_v56, 16  ;;  %v7872_v0 = vrot.slane %v3183_v4, %v6044_v42 }
 0x184   : > { %v3199_v23 = vcombine.low %v7805_v35, %v7788_v10  ;;  %v1156_v63 = vshrl.u32 %v9150_v22, 16  ;;  %v1155_v38 = vshrl.u32 %v9151_v18, 16  ;;  %v1181_v39 = vpack.i.b16 %v1180_v21, %v1179_v26 }
 0x185   : > { %3987 = vrot.lane.b32.xlu1 %v3253_v24, %s5500_s28  ;;  %v3114_v33 = vcombine.high %v7508_v43, %v7534_v20  ;;  %v3247_v49 = vcombine.low %v7872_v0, %v7861_v48  ;;  %v7883_v52 = vrot.slane %v3231_v3, %v6044_v42  ;;  %v1165_v55 = vpack.i.b16 %v1164_v61, %v1163_v60 }
 0x186   : > { %3897 = vrot.lane.b32.xlu0 %v3249_v50, %s5500_s28  ;;  %v3823_v1 = vpop.permute.xlu1 %3822  ;;  %v1173_v4 = vpack.i.b16 %v1172_v32, %v1171_v15  ;;  %v3392_v10 = vcombine.high %v1125_v31, %v1141_v53  ;;  %v3408_v35 = vcombine.high %v1133_v62, %v1149_v46  ;;  %v9154_v21 = vcombine.low %v9152_v41, %v9153_v6 }
 0x187   : > { %v3763_v17 = vpop.permute.xlu0 %3762  ;;  %v7892_v24 = vrot.slane %v3199_v23, %v6044_v42  ;;  %v3391_v50 = vcombine.low %v1125_v31, %v1141_v53  ;;  %v3407_v36 = vcombine.low %v1133_v62, %v1149_v46  ;;  %v1157_v3 = vpack.i.b16 %v1156_v63, %v1155_v38  ;;  %v9155_v53 = vld [vmem:[#allocation75_spill] sm:$0xff]  ;;  %v9156_v46 = vld [vmem:[#allocation73_spill] sm:$0xff] }
 0x188   : > { %v4073_v26 = vsel %vm4023_vm0, %v9154_v21, %v3718_v57  ;;  %v3440_v7 = vcombine.high %v1165_v55, %v1181_v39  ;;  %v3118_v11 = vcombine.high %v7511_v59, %v7537_v28  ;;  %v3439_v32 = vcombine.low %v1165_v55, %v1181_v39  ;;  %v9159_v21 = vld [vmem:[#allocation80_spill] sm:$0xff] }
 0x189   : > { %3912 = vrot.lane.b32.xlu1 %v3114_v33, %s5501_s29  ;;  %v4085_v61 = vsel %vm4039_vm1, %v4073_v26, %v3733_v51  ;;  %v3251_v57 = vcombine.low %v7892_v24, %v7883_v52  ;;  %v3424_v22 = vcombine.high %v1157_v3, %v1173_v4  ;;  %v7902_v31 = vrot.slane %v3392_v10, %v5682_v13 }
 0x18a   : > { %3852 = vrot.lane.b32.xlu0 %v3247_v49, %s5500_s28  ;;  %v3748_v60 = vpop.permute.xlu1 %3747  ;;  %v7905_v62 = vrot.slane %v3408_v35, %v5682_v13  ;;  %v3423_v51 = vcombine.low %v1157_v3, %v1173_v4  ;;  %v9157_v23 = vcombine.low %v9155_v53, %v9156_v46  ;;  %v3399_v18 = vrot.slane %v3391_v50, %v5682_v13  ;;  %v9162_v3 = vld [vmem:[#allocation76_spill] sm:$0xff] }
 0x18b   : > { %v3688_v56 = vpop.permute.xlu0 %3687  ;;  %v4097_v15 = vsel %vm4050_vm2, %v4085_v61, %v3748_v60  ;;  %v3415_v38 = vrot.slane %v3407_v36, %v5682_v13  ;;  %v3454_v39 = vrot.slane %v3440_v7, %v5682_v13  ;;  %v3250_v55 = vcombine.high %v7850_v19, %v7842_v37  ;;  %v9161_v36 = vld [vmem:[#allocation78_spill] sm:$0xff] }
 0x18c   : > { %4382 = vmatprep.subr.bf16.mxu0 %v4097_v15  ;;  %v4151_v63 = vsel %vm4023_vm0, %v9157_v23, %v7831_v30  ;;  %v3447_v4 = vrot.slane %v3439_v32, %v5682_v13  ;;  %v3112_v30 = vcombine.high %v7515_v25, %v7540_v5  ;;  %v3438_v41 = vrot.slane %v3424_v22, %v5682_v13 }
 0x18d   : > { %4002 = vrot.lane.b32.xlu1 %v3118_v11, %s5501_s29  ;;  %v4163_v33 = vsel %vm4039_vm1, %v4151_v63, %v3823_v1  ;;  %v3431_v6 = vrot.slane %v3423_v51, %v5682_v13  ;;  %v9158_v1 = vld [vmem:[#allocation84_spill] sm:$0xff]  ;;  %v3472_v19 = vcombine.high %v7902_v31, %v7905_v62  ;;  %v3456_v50 = vcombine.high %v3399_v18, %v3415_v38 }
 0x18e   : > { %3942 = vrot.lane.b32.xlu0 %v3251_v57, %s5500_s28  ;;  %v3838_v49 = vpop.permute.xlu1 %3837  ;;  %v9160_v26 = vcombine.low %v9158_v1, %v9159_v21  ;;  %v9163_v7 = vcombine.low %v9161_v36, %v9162_v3  ;;  %v3254_v32 = vcombine.high %v7846_v47, %v7836_v34  ;;  %v3504_v57 = vcombine.high %v3438_v41, %v3454_v39  ;;  %v9165_v1 = vld [vmem:[#allocation102_spill] sm:$0xff] }
 0x18f   : > { %v3778_v10 = vpop.permute.xlu0 %3777  ;;  %v4175_v35 = vsel %vm4050_vm2, %v4163_v33, %v3838_v49  ;;  %v3116_v22 = vcombine.high %v7522_v8, %v7544_v16  ;;  %v3488_v53 = vcombine.high %v3431_v6, %v3447_v4  ;;  %v3252_v34 = vcombine.high %v7892_v24, %v7883_v52 }
 0x190   : > { %4425 = vmatprep.subr.bf16.mxu1 %v4175_v35  ;;  %v4112_v37 = vsel %vm4023_vm0, %v9160_v26, %v3763_v17  ;;  %v4032_v61 = vsel %vm4023_vm0, %v9163_v7, %v7856_v2  ;;  %v7951_v47 = vrot.slane %v3472_v19, %v6044_v42  ;;  %v3455_v23 = vcombine.low %v3399_v18, %v3415_v38  ;;  %v9164_v35 = vld [vmem:[#allocation101_spill] sm:$0xff] }
 0x191   : > { %3927 = vrot.lane.b32.xlu1 %v3250_v55, %s5502_s30  ;;  %v4124_v60 = vsel %vm4039_vm1, %v4112_v37, %v3778_v10  ;;  %v4045_v17 = vsel %vm4039_vm1, %v4032_v61, %v3688_v56  ;;  %v7954_v56 = vrot.slane %v3504_v57, %v6044_v42  ;;  %v3248_v33 = vcombine.high %v7872_v0, %v7861_v48  ;;  %v9168_v7 = vld [vmem:[#allocation65_spill] sm:$0xff] }
 0x192   : > { %3867 = vrot.lane.b32.xlu0 %v3112_v30, %s5501_s29  ;;  %v3793_v11 = vpop.permute.xlu1 %3792  ;;  %v3470_v49 = vrot.slane %v3456_v50, %v6044_v42  ;;  %v3502_v55 = vrot.slane %v3488_v53, %v6044_v42  ;;  %v3487_v10 = vcombine.low %v3431_v6, %v3447_v4  ;;  %v7965_v30 = vrot.slane %v3455_v23, %v6044_v42  ;;  %v9174_v53 = vld [vmem:[#allocation85_spill] sm:$0xff] }
 0x193   : > { %v3703_v15 = vpop.permute.xlu0 %3702  ;;  %v4136_v51 = vsel %vm4050_vm2, %v4124_v60, %v3793_v11  ;;  %v3525_v24 = vcombine.low %v7951_v47, %v7954_v56  ;;  %v3471_v0 = vcombine.low %v7902_v31, %v7905_v62  ;;  %v3503_v4 = vcombine.low %v3438_v41, %v3454_v39  ;;  %v9166_v62 = vld [vmem:[#allocation8_spill] sm:$0xff]  ;;  %v9167_v41 = vld [vmem:[#allocation97_spill] sm:$0xff]  ;;  %v9169_v60 = vld [vmem:[#allocation99_spill] sm:$0xff] }
 0x194   : > { %v4058_v2 = vsel %vm4050_vm2, %v4045_v17, %v3703_v15  ;;  %4426 = vmatpush1.bf16.msra.mxu1 %v4136_v51  ;;  %v3521_v38 = vcombine.low %v3470_v49, %v3502_v55  ;;  %v7968_v48 = vrot.slane %v3487_v10, %v6044_v42  ;;  %v1212_v6 = vshrl.u32 %v9164_v35, 16  ;;  %v9171_v17 = vld [vmem:[#allocation18_spill] sm:$0xff]  ;;  %v9172_v15 = vld [vmem:[#allocation81_spill] sm:$0xff] }
 0x195   : > { %4017 = vrot.lane.b32.xlu1 %v3254_v32, %s5502_s30  ;;  %4383 = vmatpush1.bf16.msra.mxu0 %v4058_v2  ;;  %v1211_v21 = vshrl.u32 %v9165_v1, 16  ;;  %v3386_v37 = vcombine.high %v7547_v40, %v7550_v9  ;;  %v7981_v36 = vrot.slane %v3471_v0, %v6044_v42  ;;  %v7984_v31 = vrot.slane %v3503_v4, %v6044_v42  ;;  %v9170_v32 = vld [vmem:[#allocation83_spill] sm:$0xff] }
 0x196   : > { %3957 = vrot.lane.b32.xlu0 %v3116_v22, %s5501_s29  ;;  %v3810_v46 = vpop.permute.xlu1 %3809  ;;  %v3519_v50 = vcombine.low %v7965_v30, %v7968_v48  ;;  %v1196_v39 = vshrl.u32 %v9166_v62, 16  ;;  %v1195_v3 = vshrl.u32 %v9167_v41, 16  ;;  %v1204_v61 = vshrl.u32 %v9168_v7, 16 }
 0x197   : > { %v3720_v63 = vpop.permute.xlu0 %3719  ;;  %v1203_v11 = vshrl.u32 %v9169_v60, 16  ;;  %v1188_v57 = vshrl.u32 %v9170_v32, 16  ;;  %v9173_v22 = vcombine.low %v9171_v17, %v9172_v15  ;;  %v1187_v2 = vshrl.u32 %v9174_v53, 16 }
 0x198   : > { %v3390_v10 = vcombine.high %v7562_v45, %v7565_v27  ;;  %v1197_v4 = vpack.i.b16 %v1196_v39, %v1195_v3  ;;  %v3522_v39 = vcombine.high %v3470_v49, %v3502_v55  ;;  %v1193_v3 = vpack.i.b16 %v9166_v62, %v9167_v41  ;;  %v9181_v62 = vld [vmem:[#allocation36_spill] sm:$0xff] }
 0x199   : > { %3972 = vrot.lane.b32.xlu1 %v3252_v34, %s5502_s30  ;;  %v4076_v51 = vsel %vm4023_vm0, %v9173_v22, %v3720_v63  ;;  %v1213_v34 = vpack.i.b16 %v1212_v6, %v1211_v21  ;;  %v1209_v63 = vpack.i.b16 %v9164_v35, %v9165_v1  ;;  %v9175_v6 = vld [vmem:[#allocation19_spill] sm:$0xff]  ;;  %v1189_v17 = vpack.i.b16 %v1188_v57, %v1187_v2  ;;  %v9178_v1 = vld [vmem:[#allocation92_spill] sm:$0xff]  ;;  %v9180_v57 = vld [vmem:[#allocation14_spill] sm:$0xff] }
 0x19a   : > { %3882 = vrot.lane.b32.xlu0 %v3248_v33, %s5502_s30  ;;  %v3735_v52 = vpop.permute.xlu1 %3734  ;;  %v9182_v41 = vcombine.low %v9180_v57, %v9181_v62  ;;  %v9183_v2 = vld [vmem:[#allocation22_spill] sm:$0xff] }
 0x19b   : > { %v3675_v18 = vpop.permute.xlu0 %3674  ;;  %v4087_v23 = vsel %vm4039_vm1, %v4076_v51, %v3735_v52  ;;  %v9176_v52 = vld [vmem:[#allocation82_spill] sm:$0xff]  ;;  %v3611_v15 = vcombine.low %v1197_v4, %v1213_v34  ;;  %v3543_v49 = vcombine.low %v1193_v3, %v1209_v63  ;;  %v3612_v55 = vcombine.high %v1197_v4, %v1213_v34 }
 0x19c   : > { %v9177_v21 = vcombine.low %v9175_v6, %v9176_v52 }
 0x19d   : > { %3989 = vrot.lane.b32.xlu1 %v3525_v24, %s5500_s28 }
 0x19e   : > { %3899 = vrot.lane.b32.xlu0 %v3521_v38, %s5500_s28  ;;  %v3825_v26 = vpop.permute.xlu1 %3824  ;;  %v3523_v38 = vcombine.low %v7981_v36, %v7984_v31 }
 0x19f   : > { %v3765_v19 = vpop.permute.xlu0 %3764 }
 0x1a1   : > { %3914 = vrot.lane.b32.xlu1 %v3386_v37, %s5501_s29  ;;  %v1205_v37 = vpack.i.b16 %v1204_v61, %v1203_v11  ;;  %v1201_v61 = vpack.i.b16 %v9168_v7, %v9169_v60  ;;  %v9179_v11 = vld [vmem:[#allocation91_spill] sm:$0xff]  ;;  %v4115_v7 = vsel %vm4023_vm0, %v9182_v41, %v3765_v19  ;;  %v3619_v60 = vrot.slane %v3611_v15, %v5682_v13  ;;  %v9186_v19 = vld [vmem:[#allocation2_spill] sm:$0xff] }
 0x1a2   : > { %3854 = vrot.lane.b32.xlu0 %v3519_v50, %s5500_s28  ;;  %v3750_v33 = vpop.permute.xlu1 %3749  ;;  %v4154_v50 = vsel %vm4023_vm0, %v9177_v21, %v3810_v46  ;;  %v9187_v21 = vld [vmem:[#allocation71_spill] sm:$0xff] }
 0x1a3   : > { %v3690_v24 = vpop.permute.xlu0 %3689  ;;  %v4100_v0 = vsel %vm4050_vm2, %v4087_v23, %v3750_v33  ;;  %v4165_v22 = vsel %vm4039_vm1, %v4154_v50, %v3825_v26  ;;  %v3384_v23 = vcombine.high %v9179_v11, %v9178_v1  ;;  %v3595_v33 = vcombine.low %v1189_v17, %v1205_v37 }
 0x1a4   : > { %4384 = vmatprep.subr.bf16.mxu0 %v4100_v0  ;;  %v1185_v26 = vpack.i.b16 %v9170_v32, %v9174_v53  ;;  %v3526_v32 = vcombine.high %v7951_v47, %v7954_v56  ;;  %v3388_v50 = vcombine.high %v9187_v21, %v9186_v19  ;;  %v3551_v47 = vrot.slane %v3543_v49, %v5682_v13 }
 0x1a5   : > { %4004 = vrot.lane.b32.xlu1 %v3390_v10, %s5501_s29  ;;  %v9184_v10 = vld [vmem:[#allocation59_spill] sm:$0xff]  ;;  %v3626_v56 = vrot.slane %v3612_v55, %v5682_v13 }
 0x1a6   : > { %3944 = vrot.lane.b32.xlu0 %v3523_v38, %s5500_s28  ;;  %v3840_v51 = vpop.permute.xlu1 %3839  ;;  %v9185_v38 = vcombine.low %v9183_v2, %v9184_v10  ;;  %v3527_v53 = vcombine.low %v1185_v26, %v1201_v61 }
 0x1a7   : > { %v3780_v35 = vpop.permute.xlu0 %3779  ;;  %v4178_v46 = vsel %vm4050_vm2, %v4165_v22, %v3840_v51  ;;  %v3596_v22 = vcombine.high %v1189_v17, %v1205_v37  ;;  %v3603_v51 = vrot.slane %v3595_v33, %v5682_v13  ;;  %v3528_v33 = vcombine.high %v1185_v26, %v1201_v61 }
 0x1a8   : > { %4427 = vmatprep.subr.bf16.mxu1 %v4178_v46  ;;  %v4035_v0 = vsel %vm4023_vm0, %v9185_v38, %v3675_v18  ;;  %v4126_v6 = vsel %vm4039_vm1, %v4115_v7, %v3780_v35  ;;  %v3524_v35 = vcombine.high %v7981_v36, %v7984_v31 }
 0x1a9   : > { %3929 = vrot.lane.b32.xlu1 %v3522_v39, %s5502_s30  ;;  %v4047_v34 = vsel %vm4039_vm1, %v4035_v0, %v3690_v24  ;;  %v3544_v39 = vcombine.high %v1193_v3, %v1209_v63  ;;  %v3628_v37 = vcombine.high %v3603_v51, %v3619_v60  ;;  %v3627_v46 = vcombine.low %v3603_v51, %v3619_v60 }
 0x1aa   : > { %3869 = vrot.lane.b32.xlu0 %v3384_v23, %s5501_s29  ;;  %v3795_v52 = vpop.permute.xlu1 %3794  ;;  %v3520_v23 = vcombine.high %v7965_v30, %v7968_v48  ;;  %v3535_v63 = vrot.slane %v3527_v53, %v5682_v13  ;;  %v3610_v3 = vrot.slane %v3596_v22, %v5682_v13  ;;  %v3542_v61 = vrot.slane %v3528_v33, %v5682_v13  ;;  %v9189_v22 = vld [vmem:[#allocation42_spill] sm:$0xff] }
 0x1ab   : > { %v3705_v4 = vpop.permute.xlu0 %3704  ;;  %v4139_v15 = vsel %vm4050_vm2, %v4126_v6, %v3795_v52  ;;  %v3558_v49 = vrot.slane %v3544_v39, %v5682_v13  ;;  %v3642_v36 = vrot.slane %v3628_v37, %v6044_v42  ;;  %v3635_v30 = vrot.slane %v3627_v46, %v6044_v42 }
 0x1ac   : > { %v4061_v18 = vsel %vm4050_vm2, %v4047_v34, %v3705_v4  ;;  %4428 = vmatpush1.bf16.msra.mxu1 %v4139_v15  ;;  %v3560_v55 = vcombine.high %v3535_v63, %v3551_v47  ;;  %v3644_v31 = vcombine.high %v3610_v3, %v3626_v56  ;;  %v3559_v62 = vcombine.low %v3535_v63, %v3551_v47 }
 0x1ad   : > { %4019 = vrot.lane.b32.xlu1 %v3526_v32, %s5502_s30  ;;  %4385 = vmatpush1.bf16.msra.mxu0 %v4061_v18  ;;  %v3643_v48 = vcombine.low %v3610_v3, %v3626_v56  ;;  %v3576_v26 = vcombine.high %v3542_v61, %v3558_v49  ;;  %v3575_v10 = vcombine.low %v3542_v61, %v3558_v49  ;;  %v9188_v32 = vmov 0   ;;  %v9190_v18 = vld [vmem:[#allocation57_spill] sm:$0xff]  ;;  %v8103_v49 = vld [vmem:[%s8518_s1] sm:$0xff]  }
 0x1ae   : > { %3959 = vrot.lane.b32.xlu0 %v3388_v50, %s5501_s29  ;;  %v3722_v24 = vpop.permute.xlu1 %3721  ;;  %v3658_v60 = vrot.slane %v3644_v31, %v6044_v42  ;;  %v8062_v2 = vrot.slane %v3560_v55, %v6044_v42  ;;  %v8066_v6 = vrot.slane %v3559_v62, %v6044_v42  ;;  %v9192_v55 = vld [vmem:[#allocation88_spill] sm:$0xff]  ;;  %v3660_v61 = vcombine.high %v3642_v36, %v9188_v32 }
 0x1af   : > { %v3677_v17 = vpop.permute.xlu0 %3676  ;;  %v3651_v0 = vrot.slane %v3643_v48, %v6044_v42  ;;  %v8073_v34 = vrot.slane %v3576_v26, %v6044_v42  ;;  %v8078_v15 = vrot.slane %v3575_v10, %v6044_v42  ;;  %v4079_v51 = vsel %vm4023_vm0, %v9189_v22, %v3722_v24 }
 0x1b0   : > { %v3592_v53 = vcombine.high %v8062_v2, %v9188_v32  ;;  %v3591_v50 = vcombine.high %v8066_v6, %v9188_v32  ;;  %v4038_v39 = vsel %vm4023_vm0, %v9190_v18, %v3677_v17  ;;  %v9191_v17 = vld [vmem:[#allocation87_spill] sm:$0xff]  ;;  %v3659_v10 = vcombine.high %v3635_v30, %v9188_v32 }
 0x1b1   : > { %3974 = vrot.lane.b32.xlu1 %v3524_v35, %s5502_s30  ;;  %v3594_v35 = vcombine.high %v8073_v34, %v9188_v32  ;;  %v3593_v24 = vcombine.high %v8078_v15, %v9188_v32  ;;  %v9194_v18 = vld [vmem:[#allocation7_spill] sm:$0xff] }
 0x1b2   : > { %3884 = vrot.lane.b32.xlu0 %v3520_v23, %s5502_s30  ;;  %v3812_v57 = vpop.permute.xlu1 %3811 }
 0x1b3   : > { %v3767_v41 = vpop.permute.xlu0 %3766  ;;  %v4157_v63 = vsel %vm4023_vm0, %v9191_v17, %v3812_v57 }
 0x1b4   : > { %v4118_v31 = vsel %vm4023_vm0, %v9192_v55, %v3767_v41  ;;  %v5457_v55 = vld [vmem:[%s5558_s25 + $0xb1] sm:$0xff] }
 0x1b5   : > { %3901 = vrot.lane.b32.xlu1 %v3642_v36, %s5500_s28 }
 0x1b6   : > { %3856 = vrot.lane.b32.xlu0 %v3635_v30, %s5500_s28  ;;  %v3737_v7 = vpop.permute.xlu1 %3736 }
 0x1b7   : > { %v3692_v38 = vpop.permute.xlu0 %3691  ;;  %v4089_v47 = vsel %vm4039_vm1, %v4079_v51, %v3737_v7  ;;  %v9193_v51 = vld [vmem:[#allocation86_spill] sm:$0xff] }
 0x1b8   : > { %v4049_v37 = vsel %vm4039_vm1, %v4038_v39, %v3692_v38  ;;  %v2569_v39 = vcombine.low %v9194_v18, %v9193_v51 }
 0x1b9   : > { %3991 = vrot.lane.b32.xlu1 %v3658_v60, %s5500_s28 }
 0x1ba   : > { %3946 = vrot.lane.b32.xlu0 %v3651_v0, %s5500_s28  ;;  %v3827_v52 = vpop.permute.xlu1 %3826 }
 0x1bb   : > { %v3782_v4 = vpop.permute.xlu0 %3781  ;;  %v4167_v62 = vsel %vm4039_vm1, %v4157_v63, %v3827_v52  ;;  %v3662_v52 = vcombine.high %v3658_v60, %v9188_v32  ;;  %v4340_v60 = vld [vmem:[%s8519_s2] sm:$0xff] }
 0x1bc   : > { %v4128_v57 = vsel %vm4039_vm1, %v4118_v31, %v3782_v4  ;;  %v4341_v4 = vld [vmem:[%s8519_s2 + $0x8] sm:$0xff] }
 0x1bd   : > { %3916 = vrot.lane.b32.xlu1 %v3592_v53, %s5501_s29  ;;  %v3661_v53 = vcombine.high %v3651_v0, %v9188_v32 }
 0x1be   : > { %3871 = vrot.lane.b32.xlu0 %v3591_v50, %s5501_s29  ;;  %v3752_v56 = vpop.permute.xlu1 %3751 }
 0x1bf   : > { %v4103_v23 = vsel %vm4050_vm2, %v4089_v47, %v3752_v56  ;;  %v3707_v46 = vpop.permute.xlu0 %3706  ;;  %v5455_v56 = vld [vmem:[%s5558_s25 + $0xa1] sm:$0xff] }
 0x1c0   : > { %v4064_v33 = vsel %vm4050_vm2, %v4049_v37, %v3707_v46  ;;  %5403 = vmatprep.subr.msk.bf16.mxu0 %vm4361_vm3, %v4103_v23  ;;  %v5456_v37 = vld [vmem:[%s5558_s25 + $0xa9] sm:$0xff] }
 0x1c1   : > { %4006 = vrot.lane.b32.xlu1 %v3594_v35, %s5501_s29  ;;  %v4362_v3 = vsel %vm4361_vm3, %v4064_v33, 0  ;;  %v9196_v33 = vld [vmem:[#allocation16_spill] sm:$0xff] }
 0x1c2   : > { %3961 = vrot.lane.b32.xlu0 %v3593_v24, %s5501_s29  ;;  %4387 = vmatpush1.bf16.msra.mxu0 %v4362_v3  ;;  %v3842_v48 = vpop.permute.xlu1 %3841  ;;  %v9195_v24 = vld [vmem:[#allocation9_spill] sm:$0xff] }
 0x1c3   : > { %v4181_v26 = vsel %vm4050_vm2, %v4167_v62, %v3842_v48  ;;  %v3797_v7 = vpop.permute.xlu0 %3796  ;;  %v2573_v17 = vcombine.low %v9196_v33, %v9195_v24  ;;  %v5458_v62 = vld [vmem:[%s5558_s25 + $0xb9] sm:$0xff] }
 0x1c4   : > { %v4142_v38 = vsel %vm4050_vm2, %v4128_v57, %v3797_v7  ;;  %5405 = vmatprep.subr.msk.bf16.mxu1 %vm4361_vm3, %v4181_v26  ;;  %v9197_v57 = vld [vmem:[#allocation98_spill] sm:$0xff]  ;;  %v9198_v26 = vld [vmem:[#allocation21_spill] sm:$0xff] }
 0x1c5   : > { %3931 = vrot.lane.b32.xlu1 %v3660_v61, %s5502_s30  ;;  %5404 = vmatmul.mubr.msk.bf16.vlgmr.msra.gmra.mrb[0].mxu0 %vm4357_vm4, %v8103_v49  ;;  %v4366_v36 = vsel %vm4361_vm3, %v4142_v38, 0  ;;  %v2571_v7 = vcombine.low %v9198_v26, %v9197_v57  ;;  %v5468_v26 = vld [vmem:[%s5558_s25 + $0x121] sm:$0xff] }
 0x1c6   : > { %3886 = vrot.lane.b32.xlu0 %v3659_v10, %s5502_s30  ;;  %4430 = vmatpush1.bf16.msra.mxu1 %v4366_v36  ;;  %v3984_v41 = vpop.permute.xlu1 %3983  ;;  %v9199_v36 = vld [vmem:[#allocation64_spill] sm:$0xff] }
 0x1c7   : > { %4496 = vmatprep.mubr.bf16.mxu0 %v9188_v32  ;;  %v3894_v30 = vpop.permute.xlu0 %3893  ;;  %v4301_v31 = vsel %vm4023_vm0, %v2573_v17, %v3984_v41  ;;  %v5465_v17 = vld [vmem:[%s5558_s25 + $0x101] sm:$0xff] }
 0x1c8   : > { %v4223_v35 = vsel %vm4023_vm0, %v2569_v39, %v3894_v30 }
 0x1c9   : > { %4021 = vrot.lane.b32.xlu1 %v3662_v52, %s5502_s30  ;;  %5406 = vmatmul.mubr.msk.bf16.vlgmr.msra.gmra.mrb[0].mxu1 %vm4357_vm4, %v8103_v49  ;;  %v9200_v52 = vld [vmem:[#allocation13_spill] sm:$0xff] }
 0x1ca   : > { %3976 = vrot.lane.b32.xlu0 %v3661_v53, %s5502_s30  ;;  %v3909_v50 = vpop.permute.xlu1 %3908  ;;  %4539 = vmatprep.mubr.bf16.mxu1 %v9188_v32  ;;  %v2567_v30 = vcombine.low %v9200_v52, %v9199_v36  ;;  %v5459_v53 = vld [vmem:[%s5558_s25 + $0xc9] sm:$0xff] }
 0x1cb   : > { %v3849_v0 = vpop.permute.xlu0 %3848  ;;  %v4237_v23 = vsel %vm4039_vm1, %v4223_v35, %v3909_v50  ;;  %v5462_v35 = vld [vmem:[%s5558_s25 + $0xe1] sm:$0xff] }
 0x1cc   : > { %v4184_v50 = vsel %vm4023_vm0, %v2567_v30, %v3849_v0  ;;  %v5469_v30 = vld [vmem:[%s5558_s25 + $0x129] sm:$0xff] }
 0x1cd   : > { %4349 = vperm.xlu1 %5453, %v4341_v4   ;;  %v5460_v4 = vld [vmem:[%s5558_s25 + $0xd1] sm:$0xff] }
 0x1ce   : > { %4344 = vperm.xlu0 %5452, %v4340_v60   ;;  %v3999_v22 = vpop.permute.xlu1 %3998 }
 0x1cf   : > { %v3939_v47 = vpop.permute.xlu0 %3938  ;;  %v4315_v48 = vsel %vm4039_vm1, %v4301_v31, %v3999_v22  ;;  %v9202_v31 = vld [vmem:[#allocation3_spill] sm:$0xff] }
 0x1d0   : > { %v4262_v41 = vsel %vm4023_vm0, %v2571_v7, %v3939_v47  ;;  %v5461_v47 = vld [vmem:[%s5558_s25 + $0xd9] sm:$0xff] }
 0x1d1   : > { %4759 = vrot.lane.b32.xlu1 %v5455_v56, %s5495_s26 }
 0x1d2   : > { %4761 = vrot.lane.b32.xlu0 %v5456_v37, %s5495_s26  ;;  %v3924_v46 = vpop.permute.xlu1 %3923 }
 0x1d3   : > { %v3864_v63 = vpop.permute.xlu0 %3863  ;;  %v4247_v3 = vsel %vm4050_vm2, %v4237_v23, %v3924_v46  ;;  %v5463_v23 = vld [vmem:[%s5558_s25 + $0xf1] sm:$0xff]  ;;  %v5464_v46 = vld [vmem:[%s5558_s25 + $0xf9] sm:$0xff] }
 0x1d4   : > { %4464 = vmatprep.subr.bf16.mxu0 %v4247_v3  ;;  %v4198_v51 = vsel %vm4039_vm1, %v4184_v50, %v3864_v63  ;;  %v5466_v63 = vld [vmem:[%s5558_s25 + $0x109] sm:$0xff] }
 0x1d5   : > { %4763 = vrot.lane.b32.xlu1 %v5457_v55, %s5495_s26  ;;  %v9201_v55 = vld [vmem:[#allocation24_spill] sm:$0xff] }
 0x1d6   : > { %4765 = vrot.lane.b32.xlu0 %v5458_v62, %s5495_s26  ;;  %v4014_v61 = vpop.permute.xlu1 %4013  ;;  %v2841_v62 = vcombine.low %v9202_v31, %v9201_v55 }
 0x1d7   : > { %v3954_v10 = vpop.permute.xlu0 %3953  ;;  %v4325_v38 = vsel %vm4050_vm2, %v4315_v48, %v4014_v61  ;;  %v5467_v61 = vld [vmem:[%s5558_s25 + $0x119] sm:$0xff] }
 0x1d8   : > { %4507 = vmatprep.subr.bf16.mxu1 %v4325_v38  ;;  %v4276_v60 = vsel %vm4039_vm1, %v4262_v41, %v3954_v10  ;;  %v2845_v38 = vcombine.low %v7736_v54, %v7697_v58  ;;  %v5470_v41 = vld [vmem:[%s5558_s25 + $0x131] sm:$0xff] }
 0x1d9   : > { %4767 = vrot.lane.b32.xlu1 %v5459_v53, %s5495_s26 }
 0x1da   : > { %4769 = vrot.lane.b32.xlu0 %v5460_v4, %s5495_s26  ;;  %v3969_v22 = vpop.permute.xlu1 %3968  ;;  %v5207_v4 = vld [vmem:[%s8521_s4] sm:$0xf] }
 0x1db   : > { %v4286_v18 = vsel %vm4050_vm2, %v4276_v60, %v3969_v22  ;;  %v3879_v39 = vpop.permute.xlu0 %3878  ;;  %v2839_v22 = vcombine.low %v7768_v12, %v7754_v44 }
 0x1dc   : > { %v4208_v56 = vsel %vm4050_vm2, %v4198_v51, %v3879_v39  ;;  %4508 = vmatpush1.bf16.msra.mxu1 %v4286_v18  ;;  %v9203_v51 = vcombine.low %v7505_v29, %v9082_v14 }
 0x1dd   : > { %4771 = vrot.lane.b32.xlu1 %v5461_v47, %s5495_s26  ;;  %4465 = vmatpush1.bf16.msra.mxu0 %v4208_v56 }
 0x1de   : > { %4773 = vrot.lane.b32.xlu0 %v5462_v35, %s5495_s26 }
 0x1df   : > { %v3986_v0 = vpop.permute.xlu1 %3985 }
 0x1e0   : > { %v3896_v37 = vpop.permute.xlu0 %3895  ;;  %v4304_v53 = vsel %vm4023_vm0, %v2845_v38, %v3986_v0 }
 0x1e1   : > { %4775 = vrot.lane.b32.xlu1 %v5463_v23, %s5495_s26  ;;  %v4226_v57 = vsel %vm4023_vm0, %v2841_v62, %v3896_v37  ;;  %v9205_v62 = vcombine.low %v7511_v59, %v7537_v28 }
 0x1e2   : > { %4777 = vrot.lane.b32.xlu0 %v5464_v46, %s5495_s26 }
 0x1e3   : > { %v3911_v24 = vpop.permute.xlu1 %3910 }
 0x1e4   : > { %v3851_v33 = vpop.permute.xlu0 %3850  ;;  %v4239_v7 = vsel %vm4039_vm1, %v4226_v57, %v3911_v24 }
 0x1e5   : > { %4779 = vrot.lane.b32.xlu1 %v5465_v17, %s5495_s26  ;;  %v4187_v39 = vsel %vm4023_vm0, %v2839_v22, %v3851_v33  ;;  %v9204_v33 = vcombine.low %v7508_v43, %v7534_v20  ;;  %v9206_v20 = vcombine.low %v7522_v8, %v7544_v16 }
 0x1e6   : > { %4781 = vrot.lane.b32.xlu0 %v5466_v63, %s5495_s26 }
 0x1e7   : > { %v4001_v3 = vpop.permute.xlu1 %4000 }
 0x1e8   : > { %v3941_v48 = vpop.permute.xlu0 %3940  ;;  %v4317_v50 = vsel %vm4039_vm1, %v4304_v53, %v4001_v3 }
 0x1e9   : > { %4783 = vrot.lane.b32.xlu1 %v5467_v61, %s5495_s26  ;;  %v4265_v18 = vsel %vm4023_vm0, %v9203_v51, %v3941_v48 }
 0x1ea   : > { %4785 = vrot.lane.b32.xlu0 %v5468_v26, %s5495_s26 }
 0x1eb   : > { %v3926_v10 = vpop.permute.xlu1 %3925 }
 0x1ec   : > { %v3866_v36 = vpop.permute.xlu0 %3865  ;;  %v4250_v52 = vsel %vm4050_vm2, %v4239_v7, %v3926_v10  ;;  %v9207_v10 = vcombine.low %v7515_v25, %v7540_v5  ;;  %v9208_v5 = vcombine.low %v7547_v40, %v7550_v9  ;;  %v9210_v9 = vcombine.low %v9187_v21, %v9186_v19 }
 0x1ed   : > { %4466 = vmatprep.subr.bf16.mxu0 %v4250_v52  ;;  %4787 = vrot.lane.b32.xlu1 %v5469_v30, %s5495_s26  ;;  %v4200_v35 = vsel %vm4039_vm1, %v4187_v39, %v3866_v36 }
 0x1ee   : > { %4789 = vrot.lane.b32.xlu0 %v5470_v41, %s5495_s26 }
 0x1ef   : > { %v4016_v60 = vpop.permute.xlu1 %4015 }
 0x1f0   : > { %v3956_v58 = vpop.permute.xlu0 %3955  ;;  %v4328_v54 = vsel %vm4050_vm2, %v4317_v50, %v4016_v60 }
 0x1f1   : > { %4509 = vmatprep.subr.bf16.mxu1 %v4328_v54  ;;  %5210 = vperm.xlu1 %5453, %v5207_v4   ;;  %v4278_v56 = vsel %vm4039_vm1, %v4265_v18, %v3956_v58  ;;  %v9209_v18 = vcombine.low %v7562_v45, %v7565_v27 }
 0x1f3   : > { %v3971_v47 = vpop.permute.xlu1 %3970 }
 0x1f4   : > { %v4289_v0 = vsel %vm4050_vm2, %v4278_v56, %v3971_v47  ;;  %v3881_v37 = vpop.permute.xlu0 %3880 }
 0x1f5   : > { %v4211_v23 = vsel %vm4050_vm2, %v4200_v35, %v3881_v37  ;;  %4510 = vmatpush1.bf16.msra.mxu1 %v4289_v0  ;;  %v9211_v37 = vcombine.low %v9179_v11, %v9178_v1 }
 0x1f6   : > { %4467 = vmatpush1.bf16.msra.mxu0 %v4211_v23 }
 0x1f7   : > { %v3988_v44 = vpop.permute.xlu1 %3987 }
 0x1f8   : > { %v3898_v12 = vpop.permute.xlu0 %3897  ;;  %v4307_v48 = vsel %vm4023_vm0, %v9205_v62, %v3988_v44 }
 0x1f9   : > { %v4229_v17 = vsel %vm4023_vm0, %v9204_v33, %v3898_v12 }
 0x1fb   : > { %v3913_v46 = vpop.permute.xlu1 %3912 }
 0x1fc   : > { %v3853_v29 = vpop.permute.xlu0 %3852  ;;  %v4241_v63 = vsel %vm4039_vm1, %v4229_v17, %v3913_v46 }
 0x1fd   : > { %v4190_v38 = vsel %vm4023_vm0, %v9207_v10, %v3853_v29 }
 0x1ff   : > { %v4003_v14 = vpop.permute.xlu1 %4002 }
 0x200   : > { %v3943_v24 = vpop.permute.xlu0 %3942  ;;  %v4319_v61 = vsel %vm4039_vm1, %v4307_v48, %v4003_v14 }
 0x201   : > { %v4268_v7 = vsel %vm4023_vm0, %v9206_v20, %v3943_v24 }
 0x203   : > { %v3928_v3 = vpop.permute.xlu1 %3927 }
 0x204   : > { %v3868_v55 = vpop.permute.xlu0 %3867  ;;  %v4253_v31 = vsel %vm4050_vm2, %v4241_v63, %v3928_v3 }
 0x205   : > { %4468 = vmatprep.subr.bf16.mxu0 %v4253_v31  ;;  %v4202_v36 = vsel %vm4039_vm1, %v4190_v38, %v3868_v55 }
 0x207   : > { %v4018_v57 = vpop.permute.xlu1 %4017 }
 0x208   : > { %v3958_v26 = vpop.permute.xlu0 %3957  ;;  %v4331_v43 = vsel %vm4050_vm2, %v4319_v61, %v4018_v57 }
 0x209   : > { %4511 = vmatprep.subr.bf16.mxu1 %v4331_v43  ;;  %v4280_v59 = vsel %vm4039_vm1, %v4268_v7, %v3958_v26 }
 0x20b   : > { %v3973_v28 = vpop.permute.xlu1 %3972 }
 0x20c   : > { %v4292_v52 = vsel %vm4050_vm2, %v4280_v59, %v3973_v28  ;;  %v3883_v30 = vpop.permute.xlu0 %3882 }
 0x20d   : > { %v4214_v53 = vsel %vm4050_vm2, %v4202_v36, %v3883_v30  ;;  %4512 = vmatpush1.bf16.msra.mxu1 %v4292_v52 }
 0x20e   : > { %4469 = vmatpush1.bf16.msra.mxu0 %v4214_v53 }
 0x20f   : > { %v3990_v8 = vpop.permute.xlu1 %3989 }
 0x210   : > { %v3900_v16 = vpop.permute.xlu0 %3899  ;;  %v4310_v39 = vsel %vm4023_vm0, %v9209_v18, %v3990_v8 }
 0x211   : > { %v4232_v60 = vsel %vm4023_vm0, %v9208_v5, %v3900_v16 }
 0x213   : > { %v3915_v41 = vpop.permute.xlu1 %3914 }
 0x214   : > { %v3855_v4 = vpop.permute.xlu0 %3854  ;;  %v4243_v58 = vsel %vm4039_vm1, %v4232_v60, %v3915_v41 }
 0x215   : > { %v4193_v23 = vsel %vm4023_vm0, %v9211_v37, %v3855_v4 }
 0x217   : > { %v4005_v50 = vpop.permute.xlu1 %4004 }
 0x218   : > { %v3945_v25 = vpop.permute.xlu0 %3944  ;;  %v4321_v56 = vsel %vm4039_vm1, %v4310_v39, %v4005_v50 }
 0x219   : > { %v4271_v0 = vsel %vm4023_vm0, %v9210_v9, %v3945_v25 }
 0x21b   : > { %v3930_v54 = vpop.permute.xlu1 %3929 }
 0x21c   : > { %v3870_v22 = vpop.permute.xlu0 %3869  ;;  %v4256_v51 = vsel %vm4050_vm2, %v4243_v58, %v3930_v54 }
 0x21d   : > { %4470 = vmatprep.subr.bf16.mxu0 %v4256_v51  ;;  %v4204_v44 = vsel %vm4039_vm1, %v4193_v23, %v3870_v22 }
 0x21f   : > { %v4020_v47 = vpop.permute.xlu1 %4019 }
 0x220   : > { %v3960_v35 = vpop.permute.xlu0 %3959  ;;  %v4334_v40 = vsel %vm4050_vm2, %v4321_v56, %v4020_v47 }
 0x221   : > { %4513 = vmatprep.subr.bf16.mxu1 %v4334_v40  ;;  %v4282_v45 = vsel %vm4039_vm1, %v4271_v0, %v3960_v35 }
 0x223   : > { %v3975_v27 = vpop.permute.xlu1 %3974 }
 0x224   : > { %v4295_v12 = vsel %vm4050_vm2, %v4282_v45, %v3975_v27  ;;  %v3885_v46 = vpop.permute.xlu0 %3884 }
 0x225   : > { %v4217_v29 = vsel %vm4050_vm2, %v4204_v44, %v3885_v46  ;;  %4514 = vmatpush1.bf16.msra.mxu1 %v4295_v12 }
 0x226   : > { %4471 = vmatpush1.bf16.msra.mxu0 %v4217_v29 }
 0x227   : > { %v3902_v19 = vpop.permute.xlu1 %3901 }
 0x228   : > { %v3857_v21 = vpop.permute.xlu0 %3856  ;;  %v4235_v63 = vsel %vm4023_vm0, %v8062_v2, %v3902_v19 }
 0x229   : > { %v4196_v3 = vsel %vm4023_vm0, %v8066_v6, %v3857_v21 }
 0x22b   : > { %v3992_v14 = vpop.permute.xlu1 %3991 }
 0x22c   : > { %v3947_v24 = vpop.permute.xlu0 %3946  ;;  %v4313_v26 = vsel %vm4023_vm0, %v8073_v34, %v3992_v14 }
 0x22d   : > { %v4274_v6 = vsel %vm4023_vm0, %v8078_v15, %v3947_v24 }
 0x22f   : > { %v3917_v33 = vpop.permute.xlu1 %3916 }
 0x230   : > { %v3872_v1 = vpop.permute.xlu0 %3871  ;;  %v4245_v55 = vsel %vm4039_vm1, %v4235_v63, %v3917_v33 }
 0x231   : > { %v4206_v62 = vsel %vm4039_vm1, %v4196_v3, %v3872_v1 }
 0x233   : > { %v4007_v11 = vpop.permute.xlu1 %4006 }
 0x234   : > { %v3962_v17 = vpop.permute.xlu0 %3961  ;;  %v4323_v43 = vsel %vm4039_vm1, %v4313_v26, %v4007_v11 }
 0x235   : > { %v4284_v7 = vsel %vm4039_vm1, %v4274_v6, %v3962_v17 }
 0x237   : > { %v3932_v31 = vpop.permute.xlu1 %3931 }
 0x238   : > { %v4259_v48 = vsel %vm4050_vm2, %v4245_v55, %v3932_v31  ;;  %v3887_v61 = vpop.permute.xlu0 %3886 }
 0x239   : > { %v4220_v57 = vsel %vm4050_vm2, %v4206_v62, %v3887_v61  ;;  %5407 = vmatprep.subr.msk.bf16.mxu0 %vm4361_vm3, %v4259_v48 }
 0x23a   : > { %v4370_v2 = vsel %vm4361_vm3, %v4220_v57, 0 }
 0x23b   : > { %4473 = vmatpush1.bf16.msra.mxu0 %v4370_v2  ;;  %v4022_v20 = vpop.permute.xlu1 %4021 }
 0x23c   : > { %v4337_v10 = vsel %vm4050_vm2, %v4323_v43, %v4022_v20  ;;  %v3977_v38 = vpop.permute.xlu0 %3976 }
 0x23d   : > { %v4298_v59 = vsel %vm4050_vm2, %v4284_v7, %v3977_v38  ;;  %5409 = vmatprep.subr.msk.bf16.mxu1 %vm4361_vm3, %v4337_v10  ;;  %v5503_v7 = vmov 0.0  }
 0x23e   : > { %v4374_v34 = vsel %vm4361_vm3, %v4298_v59, 0  ;;  %5408 = vmatmul.mubr.msk.bf16.vlgmr.msra.gmra.mrb[4].mxu0 %vm4357_vm4, %v8103_v49 }
 0x23f   : > { %4516 = vmatpush1.bf16.msra.mxu1 %v4374_v34  ;;  %4611 = vmatprep.mubr.bf16.mxu0 %v9188_v32 }
 0x242   : > { %5410 = vmatmul.mubr.msk.bf16.vlgmr.msra.gmra.mrb[4].mxu1 %vm4357_vm4, %v8103_v49 }
 0x243   : > { %4652 = vmatprep.mubr.bf16.mxu1 %v9188_v32 }
 0x24c   : > { %v8283_v15 = vpop.permute.xlu1 %4349 }
 0x24d   : > { %v8285_v28 = vpop.permute.xlu0 %4344 }
 0x250   : > { %v4760_v36 = vpop.permute.xlu1 %4759 }
 0x251   : > { %v4762_v52 = vpop.permute.xlu0 %4761 }
 0x254   : > { %v4764_v30 = vpop.permute.xlu1 %4763 }
 0x255   : > { %v4766_v53 = vpop.permute.xlu0 %4765 }
 0x258   : > { %v4768_v8 = vpop.permute.xlu1 %4767 }
 0x259   : > { %v4770_v16 = vpop.permute.xlu0 %4769 }
 0x25c   : > { %v4772_v41 = vpop.permute.xlu1 %4771 }
 0x25d   : > { %v4774_v4 = vpop.permute.xlu0 %4773 }
 0x260   : > { %v4776_v50 = vpop.permute.xlu1 %4775 }
 0x261   : > { %v4778_v25 = vpop.permute.xlu0 %4777  ;;  %v4807_v5 = vcombine.low %v4760_v36, %v4776_v50  ;;  %v4808_v60 = vcombine.high %v4760_v36, %v4776_v50 }
 0x262   : > { %v4875_v49 = vcombine.low %v4762_v52, %v4778_v25  ;;  %v4876_v54 = vcombine.high %v4762_v52, %v4778_v25 }
 0x263   : > { %v8288_v51 = vrot.slane %v4807_v5, %v5682_v13  ;;  %v8291_v18 = vrot.slane %v4808_v60, %v5682_v13 }
 0x264   : > { %v4780_v58 = vpop.permute.xlu1 %4779  ;;  %v8294_v39 = vrot.slane %v4875_v49, %v5682_v13  ;;  %v8297_v56 = vrot.slane %v4876_v54, %v5682_v13 }
 0x265   : > { %v4782_v22 = vpop.permute.xlu0 %4781  ;;  %v4943_v35 = vcombine.low %v4764_v30, %v4780_v58  ;;  %v4944_v40 = vcombine.high %v4764_v30, %v4780_v58 }
 0x266   : > { %v5011_v23 = vcombine.low %v4766_v53, %v4782_v22  ;;  %v5012_v45 = vcombine.high %v4766_v53, %v4782_v22 }
 0x267   : > { %v8304_v14 = vrot.slane %v4943_v35, %v5682_v13  ;;  %v4958_v24 = vrot.slane %v4944_v40, %v5682_v13 }
 0x268   : > { %v4784_v47 = vpop.permute.xlu1 %4783  ;;  %v8310_v17 = vrot.slane %v5011_v23, %v5682_v13  ;;  %v5026_v63 = vrot.slane %v5012_v45, %v5682_v13 }
 0x269   : > { %v4823_v9 = vcombine.low %v4768_v8, %v4784_v47  ;;  %v4824_v0 = vcombine.high %v4768_v8, %v4784_v47  ;;  %v4786_v37 = vpop.permute.xlu0 %4785 }
 0x26a   : > { %v4891_v27 = vcombine.low %v4770_v16, %v4786_v37  ;;  %v4892_v44 = vcombine.high %v4770_v16, %v4786_v37 }
 0x26b   : > { %v4831_v12 = vrot.slane %v4823_v9, %v5682_v13  ;;  %v4838_v46 = vrot.slane %v4824_v0, %v5682_v13 }
 0x26c   : > { %v4899_v29 = vrot.slane %v4891_v27, %v5682_v13  ;;  %v4906_v19 = vrot.slane %v4892_v44, %v5682_v13  ;;  %v4788_v21 = vpop.permute.xlu1 %4787 }
 0x26d   : > { %v4839_v33 = vcombine.low %v8288_v51, %v4831_v12  ;;  %v4855_v1 = vcombine.low %v8291_v18, %v4838_v46  ;;  %v4790_v11 = vpop.permute.xlu0 %4789  ;;  %v4959_v48 = vcombine.low %v4772_v41, %v4788_v21  ;;  %v4960_v61 = vcombine.high %v4772_v41, %v4788_v21 }
 0x26e   : > { %v4907_v3 = vcombine.low %v8294_v39, %v4899_v29  ;;  %v4923_v55 = vcombine.low %v8297_v56, %v4906_v19  ;;  %v5027_v2 = vcombine.low %v4774_v4, %v4790_v11  ;;  %v5028_v6 = vcombine.high %v4774_v4, %v4790_v11 }
 0x26f   : > { %v8316_v31 = vrot.slane %v4839_v33, %v6044_v42  ;;  %v8319_v62 = vrot.slane %v4855_v1, %v6044_v42  ;;  %v4967_v43 = vrot.slane %v4959_v48, %v5682_v13  ;;  %v4974_v20 = vrot.slane %v4960_v61, %v5682_v13 }
 0x270   : > { %v8322_v57 = vrot.slane %v4907_v3, %v6044_v42  ;;  %v8325_v26 = vrot.slane %v4923_v55, %v6044_v42  ;;  %v5035_v59 = vrot.slane %v5027_v2, %v5682_v13  ;;  %v5042_v34 = vrot.slane %v5028_v6, %v5682_v13 }
 0x271   : > { %v4873_v10 = vcombine.high %v8319_v62, %v5503_v7  ;;  %v4871_v38 = vcombine.high %v8316_v31, %v5503_v7  ;;  %v4975_v36 = vcombine.low %v8304_v14, %v4967_v43  ;;  %v4991_v52 = vcombine.low %v4958_v24, %v4974_v20 }
 0x272   : > { %v4941_v30 = vcombine.high %v8325_v26, %v5503_v7  ;;  %v5043_v53 = vcombine.low %v8310_v17, %v5035_v59  ;;  %v5059_v8 = vcombine.low %v5026_v63, %v5042_v34  ;;  %v4939_v16 = vcombine.high %v8322_v57, %v5503_v7 }
 0x273   : > { %5092 = vrot.lane.b32.xlu1 %v4873_v10, %s5500_s28  ;;  %5080 = vrot.lane.b32.xlu0 %v4871_v38, %s5500_s28  ;;  %v8344_v41 = vrot.slane %v4975_v36, %v6044_v42  ;;  %v8347_v13 = vrot.slane %v4991_v52, %v6044_v42  ;;  %v4856_v60 = vcombine.high %v8291_v18, %v4838_v46 }
 0x274   : > { %v8350_v4 = vrot.slane %v5059_v8, %v6044_v42  ;;  %v8356_v25 = vrot.slane %v5043_v53, %v6044_v42  ;;  %v4840_v49 = vcombine.high %v8288_v51, %v4831_v12  ;;  %v4924_v22 = vcombine.high %v8297_v56, %v4906_v19 }
 0x275   : > { %v5009_v50 = vcombine.high %v8347_v13, %v5503_v7  ;;  %v5007_v5 = vcombine.high %v8344_v41, %v5503_v7  ;;  %v4870_v47 = vrot.slane %v4856_v60, %v6044_v42  ;;  %v4908_v18 = vcombine.high %v8294_v39, %v4899_v29  ;;  %v8418_v60 = vld [vmem:[%s8520_s3] sm:$0x3] }
 0x276   : > { %v5077_v58 = vcombine.high %v8350_v4, %v5503_v7  ;;  %v5075_v54 = vcombine.high %v8356_v25, %v5503_v7  ;;  %v4854_v35 = vrot.slane %v4840_v49, %v6044_v42  ;;  %v4992_v40 = vcombine.high %v4958_v24, %v4974_v20  ;;  %v8426_v49 = vpop.permute.xlu1 %5210 }
 0x277   : > { %5116 = vrot.lane.b32.xlu1 %v4941_v30, %s5500_s28  ;;  %5104 = vrot.lane.b32.xlu0 %v4939_v16, %s5500_s28  ;;  %v4938_v51 = vrot.slane %v4924_v22, %v6044_v42  ;;  %v4976_v9 = vcombine.high %v8304_v14, %v4967_v43  ;;  %v4922_v56 = vrot.slane %v4908_v18, %v6044_v42 }
 0x278   : > { %v5060_v0 = vcombine.high %v5026_v63, %v5042_v34  ;;  %v5006_v39 = vrot.slane %v4992_v40, %v6044_v42  ;;  %v5044_v37 = vcombine.high %v8310_v17, %v5035_v59  ;;  %v4874_v44 = vcombine.high %v4870_v47, %v5503_v7 }
 0x279   : > { %v4990_v23 = vrot.slane %v4976_v9, %v6044_v42  ;;  %v4872_v12 = vcombine.high %v4854_v35, %v5503_v7  ;;  %v4942_v46 = vcombine.high %v4938_v51, %v5503_v7  ;;  %v4940_v29 = vcombine.high %v4922_v56, %v5503_v7 }
 0x27a   : > { %v5074_v45 = vrot.slane %v5060_v0, %v6044_v42  ;;  %v5058_v27 = vrot.slane %v5044_v37, %v6044_v42  ;;  %v5010_v42 = vcombine.high %v5006_v39, %v5503_v7 }
 0x27b   : > { %5140 = vrot.lane.b32.xlu1 %v5009_v50, %s5500_s28  ;;  %5128 = vrot.lane.b32.xlu0 %v5007_v5, %s5500_s28  ;;  %v5008_v19 = vcombine.high %v4990_v23, %v5503_v7 }
 0x27c   : > { %v5078_v11 = vcombine.high %v5074_v45, %v5503_v7  ;;  %v5076_v55 = vcombine.high %v5058_v27, %v5503_v7 }
 0x27f   : > { %5164 = vrot.lane.b32.xlu1 %v5077_v58, %s5500_s28  ;;  %5152 = vrot.lane.b32.xlu0 %v5075_v54, %s5500_s28 }
 0x283   : > { %5096 = vrot.lane.b32.xlu1 %v4870_v47, %s5501_s29  ;;  %5084 = vrot.lane.b32.xlu0 %v4854_v35, %s5501_s29 }
 0x287   : > { %5120 = vrot.lane.b32.xlu1 %v4938_v51, %s5501_s29  ;;  %5108 = vrot.lane.b32.xlu0 %v4922_v56, %s5501_s29 }
 0x28b   : > { %5144 = vrot.lane.b32.xlu1 %v5006_v39, %s5501_s29  ;;  %5132 = vrot.lane.b32.xlu0 %v4990_v23, %s5501_s29 }
 0x28f   : > { %5168 = vrot.lane.b32.xlu1 %v5074_v45, %s5501_s29  ;;  %5156 = vrot.lane.b32.xlu0 %v5058_v27, %s5501_s29 }
 0x293   : > { %5100 = vrot.lane.b32.xlu1 %v4874_v44, %s5502_s30  ;;  %5088 = vrot.lane.b32.xlu0 %v4872_v12, %s5502_s30 }
 0x297   : > { %5124 = vrot.lane.b32.xlu1 %v4942_v46, %s5502_s30  ;;  %5112 = vrot.lane.b32.xlu0 %v4940_v29, %s5502_s30 }
 0x298   : > { %v4412_v21 = vpop.f32.mrb[0].mxu0 }
 0x299   : > { %v4413_v14 = vadd.f32 %v4412_v21, %v8285_v28  ;;  %v4414_v24 = vpop.f32.mrb[1].mxu0 }
 0x29a   : > { %v4415_v33 = vadd.f32 %v4414_v24, %v8285_v28  ;;  %v4416_v1 = vpop.f32.mrb[2].mxu0 }
 0x29b   : > { %5148 = vrot.lane.b32.xlu1 %v5010_v42, %s5502_s30  ;;  %v4550_v17 = vmax.f32 %v4413_v14, 0.0  ;;  %v4417_v63 = vadd.f32 %v4416_v1, %v8283_v15  ;;  %v4418_v3 = vpop.f32.mrb[3].mxu0  ;;  %5136 = vrot.lane.b32.xlu0 %v5008_v19, %s5502_s30 }
 0x29c   : > { %v4551_v48 = vmax.f32 %v4415_v33, 0.0  ;;  %v4419_v61 = vadd.f32 %v4418_v3, %v8283_v15  ;;  %v4455_v2 = vpop.f32.mrb[0].mxu1 }
 0x29d   : > { %v4558_v6 = vmax.f32 %v4417_v63, 0.0  ;;  %v4456_v43 = vadd.f32 %v4455_v2, %v8285_v28  ;;  %v4457_v20 = vpop.f32.mrb[1].mxu1 }
 0x29e   : > { %v4559_v10 = vmax.f32 %v4419_v61, 0.0  ;;  %v4458_v38 = vadd.f32 %v4457_v20, %v8285_v28  ;;  %v4459_v59 = vpop.f32.mrb[2].mxu1 }
 0x29f   : > { %5172 = vrot.lane.b32.xlu1 %v5078_v11, %s5502_s30  ;;  %v4566_v34 = vpack.c.bf16 %v4558_v6, %v4550_v17  ;;  %v4552_v36 = vmax.f32 %v4456_v43, 0.0  ;;  %v4460_v52 = vadd.f32 %v4459_v59, %v8283_v15  ;;  %v4461_v30 = vpop.f32.mrb[3].mxu1  ;;  %5160 = vrot.lane.b32.xlu0 %v5076_v55, %s5502_s30 }
 0x2a0   : > { %v4567_v7 = vpack.c.bf16 %v4559_v10, %v4551_v48  ;;  %v4553_v53 = vmax.f32 %v4458_v38, 0.0  ;;  %v4462_v8 = vadd.f32 %v4461_v30, %v8283_v15 }
 0x2a1   : > { %v4560_v16 = vmax.f32 %v4460_v52, 0.0 }
 0x2a2   : > { %v4561_v50 = vmax.f32 %v4462_v8, 0.0  ;;  %4579 = vmatprep.subr.bf16.mxu0 %v4567_v7 }
 0x2a3   : > { %v4568_v5 = vpack.c.bf16 %v4560_v16, %v4552_v36  ;;  %4580 = vmatpush1.bf16.msra.mxu0 %v4566_v34 }
 0x2a4   : > { %v4569_v58 = vpack.c.bf16 %v4561_v50, %v4553_v53 }
 0x2a6   : > { %4620 = vmatprep.subr.bf16.mxu1 %v4569_v58  ;;  %5411 = vmatmul.mubr.msk.bf16.vlgmr.msra.gmra.mrb[8].mxu0 %vm4575_vm5, %v8418_v60 }
 0x2a7   : > { %4621 = vmatpush1.bf16.msra.mxu1 %v4568_v5  ;;  %4693 = vmatprep.mubr.bf16.mxu0 %v9188_v32 }
 0x2aa   : > { %5412 = vmatmul.mubr.msk.bf16.vlgmr.msra.gmra.mrb[8].mxu1 %vm4575_vm5, %v8418_v60 }
 0x2ab   : > { %4734 = vmatprep.mubr.bf16.mxu1 %v9188_v32 }
 0x2e5   : > { %v5093_v54 = vpop.permute.xlu1 %5092  ;;  %v5081_v22 = vpop.permute.xlu0 %5080 }
 0x2e9   : > { %v8428_v47 = vpop.permute.xlu1 %5116  ;;  %v5105_v18 = vpop.permute.xlu0 %5104 }
 0x2ea   : > { %v5181_v5 = vsel %vm4023_vm0, %v8322_v57, %v5105_v18 }
 0x2ed   : > { %v5141_v35 = vpop.permute.xlu1 %5140  ;;  %v5129_v40 = vpop.permute.xlu0 %5128 }
 0x2ee   : > { %v5190_v23 = vsel %vm4023_vm0, %v8347_v13, %v5141_v35  ;;  %v5187_v32 = vsel %vm4023_vm0, %v8344_v41, %v5129_v40 }
 0x2f1   : > { %v5165_v51 = vpop.permute.xlu1 %5164  ;;  %v5153_v9 = vpop.permute.xlu0 %5152 }
 0x2f2   : > { %v5196_v12 = vsel %vm4023_vm0, %v8350_v4, %v5165_v51  ;;  %v5193_v29 = vsel %vm4023_vm0, %v8356_v25, %v5153_v9 }
 0x2f5   : > { %v5097_v56 = vpop.permute.xlu1 %5096  ;;  %v5085_v0 = vpop.permute.xlu0 %5084 }
 0x2f9   : > { %v8430_v39 = vpop.permute.xlu1 %5120  ;;  %v5109_v37 = vpop.permute.xlu0 %5108 }
 0x2fd   : > { %v5145_v45 = vpop.permute.xlu1 %5144  ;;  %v5133_v44 = vpop.permute.xlu0 %5132 }
 0x2fe   : > { %v8437_v27 = vsel %vm4039_vm1, %v5190_v23, %v5145_v45  ;;  %v8442_v46 = vsel %vm4039_vm1, %v5187_v32, %v5133_v44 }
 0x301   : > { %v5169_v42 = vpop.permute.xlu1 %5168  ;;  %v5157_v19 = vpop.permute.xlu0 %5156 }
 0x302   : > { %v8447_v13 = vsel %vm4039_vm1, %v5196_v12, %v5169_v42  ;;  %v8450_v41 = vsel %vm4039_vm1, %v5193_v29, %v5157_v19 }
 0x305   : > { %v5089_v50 = vpop.permute.xlu0 %5088  ;;  %v5101_v35 = vpop.permute.xlu1 %5100 }
 0x311   : > { %v4498_v21 = vpop.f32.mrb[4].mxu0 }
 0x312   : > { %v4499_v14 = vadd.f32 %v4498_v21, %v8285_v28  ;;  %v4500_v24 = vpop.f32.mrb[5].mxu0 }
 0x313   : > { %v4501_v4 = vadd.f32 %v4500_v24, %v8285_v28  ;;  %v4502_v33 = vpop.f32.mrb[6].mxu0 }
 0x314   : > { %v4503_v1 = vadd.f32 %v4502_v33, %v8283_v15  ;;  %v4504_v11 = vpop.f32.mrb[7].mxu0  ;;  %v4554_v63 = vmax.f32 %v4499_v14, 0.0 }
 0x315   : > { %v4505_v25 = vadd.f32 %v4504_v11, %v8283_v15  ;;  %v4541_v17 = vpop.f32.mrb[4].mxu1  ;;  %v4555_v61 = vmax.f32 %v4501_v4, 0.0 }
 0x316   : > { %v4562_v3 = vmax.f32 %v4503_v1, 0.0  ;;  %v4542_v55 = vadd.f32 %v4541_v17, %v8285_v28  ;;  %v4543_v48 = vpop.f32.mrb[5].mxu1 }
 0x317   : > { %v4563_v2 = vmax.f32 %v4505_v25, 0.0  ;;  %v4544_v6 = vadd.f32 %v4543_v48, %v8285_v28  ;;  %v4545_v43 = vpop.f32.mrb[6].mxu1  ;;  %v5178_v28 = vsel %vm4023_vm0, %v8319_v62, %v5093_v54 }
 0x318   : > { %v4570_v20 = vpack.c.bf16 %v4562_v3, %v4554_v63  ;;  %v4546_v10 = vadd.f32 %v4545_v43, %v8283_v15  ;;  %v4547_v38 = vpop.f32.mrb[7].mxu1  ;;  %v4556_v36 = vmax.f32 %v4542_v55, 0.0  ;;  %v5179_v58 = vsel %vm4039_vm1, %v5178_v28, %v5097_v56  ;;  %v5113_v56 = vpop.permute.xlu0 %5112 }
 0x319   : > { %v4571_v59 = vpack.c.bf16 %v4563_v2, %v4555_v61  ;;  %v4548_v34 = vadd.f32 %v4547_v38, %v8283_v15  ;;  %v4557_v30 = vmax.f32 %v4544_v6, 0.0  ;;  %v5175_v15 = vsel %vm4023_vm0, %v8316_v31, %v5081_v22 }
 0x31a   : > { %v4564_v52 = vmax.f32 %v4546_v10, 0.0  ;;  %v5176_v16 = vsel %vm4039_vm1, %v5175_v15, %v5085_v0  ;;  %v5182_v31 = vsel %vm4039_vm1, %v5181_v5, %v5109_v37  ;;  %v5180_v54 = vsel %vm4050_vm2, %v5179_v58, %v5101_v35 }
 0x31b   : > { %v4565_v7 = vmax.f32 %v4548_v34, 0.0  ;;  %4661 = vmatprep.subr.bf16.mxu0 %v4571_v59  ;;  %v5177_v51 = vsel %vm4050_vm2, %v5176_v16, %v5089_v50  ;;  %v5183_v37 = vsel %vm4050_vm2, %v5182_v31, %v5113_v56 }
 0x31c   : > { %v4572_v53 = vpack.c.bf16 %v4564_v52, %v4556_v36  ;;  %4662 = vmatpush1.bf16.msra.mxu0 %v4570_v20  ;;  %v5137_v4 = vpop.permute.xlu0 %5136 }
 0x31d   : > { %v4573_v8 = vpack.c.bf16 %v4565_v7, %v4557_v30  ;;  %v5189_v11 = vsel %vm4050_vm2, %v8442_v46, %v5137_v4 }
 0x31f   : > { %5413 = vmatmul.mubr.msk.bf16.vlgmr.msra.gmra.mrb[12].mxu0 %vm4575_vm5, %v8418_v60  ;;  %4702 = vmatprep.subr.bf16.mxu1 %v4573_v8 }
 0x320   : > { %4703 = vmatpush1.bf16.msra.mxu1 %v4572_v53  ;;  %v5161_v25 = vpop.permute.xlu0 %5160 }
 0x321   : > { %v5195_v46 = vsel %vm4050_vm2, %v8450_v41, %v5161_v25 }
 0x323   : > { %5414 = vmatmul.mubr.msk.bf16.vlgmr.msra.gmra.mrb[12].mxu1 %vm4575_vm5, %v8418_v60  ;;  %v5184_v60 = vsel %vm4023_vm0, %v8325_v26, %v8428_v47  ;;  %v5125_v26 = vpop.permute.xlu1 %5124 }
 0x324   : > { %v5185_v9 = vsel %vm4039_vm1, %v5184_v60, %v8430_v39 }
 0x325   : > { %v5186_v44 = vsel %vm4050_vm2, %v5185_v9, %v5125_v26 }
 0x327   : > { %v5149_v33 = vpop.permute.xlu1 %5148 }
 0x328   : > { %v5192_v3 = vsel %vm4050_vm2, %v8437_v27, %v5149_v33 }
 0x32b   : > { %v5173_v55 = vpop.permute.xlu1 %5172 }
 0x32c   : > { %v5198_v59 = vsel %vm4050_vm2, %v8447_v13, %v5173_v55 }
 0x379   : > { %v4613_v40 = vpop.f32.mrb[8].mxu0 }
 0x37a   : > { %v5199_v22 = vadd.f32 %v5177_v51, %v4613_v40  ;;  %v4615_v62 = vpop.f32.mrb[9].mxu0 }
 0x37b   : > { %v5200_v57 = vadd.f32 %v5180_v54, %v4615_v62  ;;  %v4617_v18 = vpop.f32.mrb[10].mxu0 }
 0x37c   : > { %v5213_v0 = vadd.f32 %v8426_v49, %v5199_v22  ;;  %v4618_v23 = vpop.f32.mrb[11].mxu0 }
 0x37d   : > { %v5214_v47 = vadd.f32 %v8426_v49, %v5200_v57  ;;  %v4654_v32 = vpop.f32.mrb[8].mxu1 }
 0x37e   : > { %v5201_v39 = vadd.f32 %v5183_v37, %v4654_v32  ;;  %v4656_v45 = vpop.f32.mrb[9].mxu1 }
 0x37f   : > { %v5229_v12 = vcombine.low %v5213_v0, %v5214_v47  ;;  %v5202_v29 = vadd.f32 %v5186_v44, %v4656_v45  ;;  %v4658_v42 = vpop.f32.mrb[10].mxu1 }
 0x380   : > { %v5215_v19 = vadd.f32 %v8426_v49, %v5201_v39  ;;  %v4659_v21 = vpop.f32.mrb[11].mxu1 }
 0x381   : > { %5237 = vst [vmem:[%s8487_s23] sm:$0xff] %v5229_v12  ;;  %v5216_v14 = vadd.f32 %v8426_v49, %v5202_v29 }
 0x383   : > { %v5230_v24 = vcombine.low %v5215_v19, %v5216_v14 }
 0x385   : > { %5238 = vst [vmem:[%s8487_s23 + $0x8] sm:$0xff] %v5230_v24 }
 0x3f2   : > { %v4695_v1 = vpop.f32.mrb[12].mxu0 }
 0x3f3   : > { %v5203_v17 = vadd.f32 %v5189_v11, %v4695_v1  ;;  %v4697_v63 = vpop.f32.mrb[13].mxu0 }
 0x3f4   : > { %v5204_v48 = vadd.f32 %v5192_v3, %v4697_v63  ;;  %v4699_v61 = vpop.f32.mrb[14].mxu0 }
 0x3f5   : > { %v5217_v2 = vadd.f32 %v8426_v49, %v5203_v17  ;;  %v4700_v6 = vpop.f32.mrb[15].mxu0 }
 0x3f6   : > { %v5218_v43 = vadd.f32 %v8426_v49, %v5204_v48  ;;  %v4736_v20 = vpop.f32.mrb[12].mxu1 }
 0x3f7   : > { %v5205_v10 = vadd.f32 %v5195_v46, %v4736_v20  ;;  %v4738_v38 = vpop.f32.mrb[13].mxu1 }
 0x3f8   : > { %v5231_v27 = vcombine.low %v5217_v2, %v5218_v43  ;;  %v5206_v34 = vadd.f32 %v5198_v59, %v4738_v38  ;;  %v4740_v36 = vpop.f32.mrb[14].mxu1 }
 0x3f9   : > { %v5219_v52 = vadd.f32 %v8426_v49, %v5205_v10  ;;  %v4741_v30 = vpop.f32.mrb[15].mxu1 }
 0x3fa   : > { %5239 = vst [vmem:[%s8487_s23 + $0x10] sm:$0xff] %v5231_v27  ;;  %v5220_v7 = vadd.f32 %v8426_v49, %v5206_v34 }
 0x3fc   : > { %v5232_v53 = vcombine.low %v5219_v52, %v5220_v7 }
 0x3fe   : > { %5240 = vst [vmem:[%s8487_s23 + $0x18] sm:$0xff] %v5232_v53 }
 0x3ff PF: > { %s15_s20 = sadd.s32 1, %s5493_s20   ;;  %s9212_s18 = smov %s5489_s19 }
 0x400   : > { %p12_p5 = scmp.ge.s32.totalorder %s15_s20, 8   ;;  %s9213_s19 = smov %s9215_s21 }
 0x402   :  { %14 = sbr.rel (!%p12_p5) target bundleno = 2 (0x2), region = 73 }

</bundles_post_ra>
